<compile_context>
chip_gen: v7x
topology: tpu7x:2x2x1
jax: 0.10.0
libtpu: 0.0.40
codegen_flags: <defaults>
</compile_context>

<pallas_src>
import jax
import jax.numpy as jnp
import numpy as np
from jax.experimental import pallas as pl
from jax.experimental.pallas import tpu as pltpu

N_ACTION = 3
_VMEM_LIMIT = 32 * 1024 * 1024     # fused working set < 8 MB; safe on v5e/v6e/v7x

# Architectural constants (the 7*7*64 fc layer pins the spatial input to 84x84).
_OH1 = 20                 # conv1 out spatial: (84 - 8)/4 + 1
_OH2 = 9                  # conv2 out spatial: (20 - 4)/2 + 1
_OH3 = 7                  # conv3 out spatial: (9 - 3)/1 + 1
_C1, _C2, _C3 = 32, 64, 64
_K2 = 4 * 4 * _C1         # 512
_K3 = 3 * 3 * _C2         # 576


# ----------------------------------------------------------------------------
# Pallas kernel 1: fused conv tower (conv1 -> conv2 -> conv3), one image/step.
# All inter-layer activations and the conv2/conv3 im2col patch matrices live
# only in VMEM scratch; im2col uses static strided pl.ds reads (no reshapes).
# ----------------------------------------------------------------------------
def _conv_tower_kernel(p1_ref, w1_ref, b1_ref, w2_ref, b2_ref, w3_ref, b3_ref,
                       o_ref, y1_scr, p2_scr, y2_scr, p3_scr):
    # ---- conv1: (400, KH*KW*Cin) @ (KH*KW*Cin, 32), bias + ReLU in f32 ----
    a1 = jnp.dot(p1_ref[0], w1_ref[...], preferred_element_type=jnp.float32)
    y1_scr[...] = jnp.maximum(a1 + b1_ref[...], 0.0)          # (400, 32) f32

    # ---- conv2 im2col (4x4 kernel, stride 2), entirely in VMEM ----
    # p2[9*oh + ow, (i*4 + j)*32 + c] = y1[(2*oh + i)*20 + (2*ow + j), c]
    for oh in range(_OH2):
        for i in range(4):
            src = 2 * _OH1 * oh + _OH1 * i
            for j in range(4):
                p2_scr[pl.ds(_OH2 * oh, _OH2), pl.ds((i * 4 + j) * _C1, _C1)] = (
                    y1_scr[pl.ds(src + j, _OH2, 2), :])        # strided row read

    a2 = jnp.dot(p2_scr[...].astype(jnp.bfloat16), w2_ref[...],
                 preferred_element_type=jnp.float32)
    y2_scr[...] = jnp.maximum(a2 + b2_ref[...], 0.0)           # (81, 64) f32

    # ---- conv3 im2col (3x3 kernel, stride 1) ----
    # p3[7*oh + ow, (i*3 + j)*64 + c] = y2[(oh + i)*9 + (ow + j), c]
    for oh in range(_OH3):
        for i in range(3):
            src = _OH2 * (oh + i)
            for j in range(3):
                p3_scr[pl.ds(_OH3 * oh, _OH3), pl.ds((i * 3 + j) * _C2, _C2)] = (
                    y2_scr[pl.ds(src + j, _OH3), :])

    a3 = jnp.dot(p3_scr[...].astype(jnp.bfloat16), w3_ref[...],
                 preferred_element_type=jnp.float32)
    o_ref[0] = jnp.maximum(a3 + b3_ref[...], 0.0).astype(o_ref.dtype)


def conv_tower(p1, w1, b1, w2, b2, w3, b3):
    """p1: (B, 400, KH*KW*Cin) bf16 conv1 patches -> (B, 49, 64) bf16."""
    B, m1, k1 = p1.shape
    assert m1 == _OH1 * _OH1, m1
    assert w1.shape == (k1, _C1) and w2.shape == (_K2, _C2) and w3.shape == (_K3, _C3)
    cost = pl.CostEstimate(
        flops=2 * B * (m1 * k1 * _C1
                       + _OH2 * _OH2 * _K2 * _C2
                       + _OH3 * _OH3 * _K3 * _C3),
        transcendentals=0,
        bytes_accessed=(B * m1 * k1 + k1 * _C1 + _K2 * _C2 + _K3 * _C3
                        + B * _OH3 * _OH3 * _C3) * 2
                       + (_C1 + _C2 + _C3) * 4,
    )
    return pl.pallas_call(
        _conv_tower_kernel,
        out_shape=jax.ShapeDtypeStruct((B, _OH3 * _OH3, _C3), jnp.bfloat16),
        grid=(B,),
        in_specs=[
            pl.BlockSpec((1, m1, k1), lambda b: (b, 0, 0)),      # per-image patches
            pl.BlockSpec((k1, _C1), lambda b: (0, 0)),           # weights: constant
            pl.BlockSpec((1, _C1), lambda b: (0, 0)),            # index -> fetched once
            pl.BlockSpec((_K2, _C2), lambda b: (0, 0)),
            pl.BlockSpec((1, _C2), lambda b: (0, 0)),
            pl.BlockSpec((_K3, _C3), lambda b: (0, 0)),
            pl.BlockSpec((1, _C3), lambda b: (0, 0)),
        ],
        out_specs=pl.BlockSpec((1, _OH3 * _OH3, _C3), lambda b: (b, 0, 0)),
        scratch_shapes=[
            pltpu.VMEM((_OH1 * _OH1, _C1), jnp.float32),         # y1  (400, 32)
            pltpu.VMEM((_OH2 * _OH2, _K2), jnp.float32),         # p2  ( 81, 512)
            pltpu.VMEM((_OH2 * _OH2, _C2), jnp.float32),         # y2  ( 81, 64)
            pltpu.VMEM((_OH3 * _OH3, _K3), jnp.float32),         # p3  ( 49, 576)
        ],
        compiler_params=pltpu.CompilerParams(
            dimension_semantics=("parallel",),                   # shard images on v7x
            vmem_limit_bytes=_VMEM_LIMIT),
        cost_estimate=cost,
    )(p1, w1, b1, w2, b2, w3, b3)


# ----------------------------------------------------------------------------
# Pallas kernel 2: fused fc + out head over the whole batch (M = B):
#   (relu(x @ w1 + b1)) @ w2 + b2.  The 3.2 MB fc weight streams through the
#   MXU once per forward; the (B, 512) hidden never touches HBM.
# ----------------------------------------------------------------------------
def _fc_head_kernel(x_ref, w1_ref, b1_ref, w2_ref, b2_ref, o_ref):
    h = jnp.dot(x_ref[...], w1_ref[...], preferred_element_type=jnp.float32)
    h = jnp.maximum(h + b1_ref[...], 0.0)
    out = jnp.dot(h.astype(w2_ref.dtype), w2_ref[...],
                  preferred_element_type=jnp.float32)
    o_ref[...] = (out + b2_ref[...]).astype(o_ref.dtype)


def fc_head(x, w1, b1, w2, b2, *, tm=512):
    """x: (B, 3136) bf16 -> (B, n_action) f32."""
    B, K = x.shape
    _, N1 = w1.shape
    _, N2 = w2.shape
    tm = B if B <= tm else tm
    grid_m = pl.cdiv(B, tm)
    cost = pl.CostEstimate(
        flops=2 * B * K * N1 + 2 * B * N1 * N2,
        transcendentals=0,
        bytes_accessed=(B * K + K * N1 + N1 * N2) * 2 + (N1 + N2) * 4 + B * N2 * 4,
    )
    # Note: if B % tm != 0 the last step computes on padded rows; the blocked
    # out_spec masks the out-of-range store, so results stay correct.
    return pl.pallas_call(
        _fc_head_kernel,
        out_shape=jax.ShapeDtypeStruct((B, N2), jnp.float32),
        grid=(grid_m,),
        in_specs=[
            pl.BlockSpec((tm, K), lambda i: (i, 0)),
            pl.BlockSpec((K, N1), lambda i: (0, 0)),
            pl.BlockSpec((1, N1), lambda i: (0, 0)),
            pl.BlockSpec((N1, N2), lambda i: (0, 0)),
            pl.BlockSpec((1, N2), lambda i: (0, 0)),
        ],
        out_specs=pl.BlockSpec((tm, N2), lambda i: (i, 0)),
        compiler_params=pltpu.CompilerParams(
            dimension_semantics=("parallel",),
            vmem_limit_bytes=_VMEM_LIMIT),
        cost_estimate=cost,
    )(x, w1, b1, w2, b2)


# ----------------------------------------------------------------------------
# XLA-side glue for conv1 only: channel-last im2col (strided slices + stack +
# contiguous reshape, feature order (kh, kw, c) matching the pre-laid weights).
# ----------------------------------------------------------------------------
def _im2col_nhwc(x, kh, kw, stride):
    """x: (B, H, W, C) -> (B, OH*OW, KH*KW*C)."""
    B, H, W, C = x.shape
    oh = (H - kh) // stride + 1
    ow = (W - kw) // stride + 1
    cols = []
    for i in range(kh):
        for j in range(kw):
            cols.append(x[:, i:i + stride * oh:stride, j:j + stride * ow:stride, :])
    p = jnp.stack(cols, axis=3)                     # (B, OH, OW, KH*KW, C)
    return p.reshape(B, oh * ow, kh * kw * C)


# ----------------------------------------------------------------------------
# Parameters: torch-layout init + one-time pre-layout for the kernels.
# ----------------------------------------------------------------------------
def init_params(key, n_channel, n_action):
    """PyTorch-layout params, init mimicking torch's default uniform(-1/sqrt(fan_in))."""
    def u(key, shape, fan_in):
        bound = 1.0 / jnp.sqrt(jnp.float32(fan_in))
        return jax.random.uniform(key, shape, jnp.float32, -bound, bound)

    keys = jax.random.split(key, 10)
    return {
        "conv1_w": u(keys[0], (32, n_channel, 8, 8), n_channel * 8 * 8),
        "conv1_b": u(keys[1], (32,), n_channel * 8 * 8),
        "conv2_w": u(keys[2], (64, 32, 4, 4), 32 * 4 * 4),
        "conv2_b": u(keys[3], (64,), 32 * 4 * 4),
        "conv3_w": u(keys[4], (64, 64, 3, 3), 64 * 3 * 3),
        "conv3_b": u(keys[5], (64,), 64 * 3 * 3),
        "fc_w": u(keys[6], (512, 7 * 7 * 64), 7 * 7 * 64),   # torch: (out, in)
        "fc_b": u(keys[7], (512,), 7 * 7 * 64),
        "out_w": u(keys[8], (n_action, 512), 512),
        "out_b": u(keys[9], (n_action,), 512),
    }


def prepare_params(params):
    """One-time layout + dtype conversion: no per-forward weight transposes."""
    def conv_w(w):  # (Cout, Cin, KH, KW) -> (KH*KW*Cin, Cout) bf16, (kh,kw,c) rows
        c_out, c_in, kh, kw = w.shape
        return (jnp.transpose(w, (2, 3, 1, 0))
                .reshape(kh * kw * c_in, c_out).astype(jnp.bfloat16))

    # torch flatten of conv3 output is (C,H,W)-ordered; ours is (H,W,C)-ordered.
    fc_w = params["fc_w"].reshape(512, 64, 7, 7)
    fc_w = jnp.transpose(fc_w, (2, 3, 1, 0)).reshape(7 * 7 * 64, 512)
    return {
        "conv1_w": conv_w(params["conv1_w"]), "conv1_b": params["conv1_b"].reshape(1, -1),
        "conv2_w": conv_w(params["conv2_w"]), "conv2_b": params["conv2_b"].reshape(1, -1),
        "conv3_w": conv_w(params["conv3_w"]), "conv3_b": params["conv3_b"].reshape(1, -1),
        "fc_w": fc_w.astype(jnp.bfloat16), "fc_b": params["fc_b"].reshape(1, -1),
        "out_w": params["out_w"].T.astype(jnp.bfloat16), "out_b": params["out_b"].reshape(1, -1),
    }


# ----------------------------------------------------------------------------
# Forward
# ----------------------------------------------------------------------------
@jax.jit
def cnn_model_forward(prep, x):
    """x: (B, n_channel, 84, 84) f32 (NCHW, like torch) -> (B, n_action) f32."""
    B = x.shape[0]
    # Single XLA-side layout op chain: NCHW -> NHWC + bf16 cast + conv1 im2col.
    xh = jnp.transpose(x, (0, 2, 3, 1)).astype(jnp.bfloat16)
    p1 = _im2col_nhwc(xh, 8, 8, 4)                             # (B, 400, 8*8*C)
    y3 = conv_tower(p1,
                    prep["conv1_w"], prep["conv1_b"],
                    prep["conv2_w"], prep["conv2_b"],
                    prep["conv3_w"], prep["conv3_b"])          # (B, 49, 64) bf16
    y3 = y3.reshape(B, 7 * 7 * 64)     # contiguous minor-dim merge: free bitcast
    return fc_head(y3, prep["fc_w"], prep["fc_b"], prep["out_w"], prep["out_b"])


@jax.jit
def _reference_forward(params, x):
    """Pure-JAX f32 reference (lax.conv) with torch semantics."""
    dn = ("NCHW", "OIHW", "NCHW")
    y = jax.lax.conv_general_dilated(x, params["conv1_w"], (4, 4), "VALID", dimension_numbers=dn)
    y = jax.nn.relu(y + params["conv1_b"][None, :, None, None])
    y = jax.lax.conv_general_dilated(y, params["conv2_w"], (2, 2), "VALID", dimension_numbers=dn)
    y = jax.nn.relu(y + params["conv2_b"][None, :, None, None])
    y = jax.lax.conv_general_dilated(y, params["conv3_w"], (1, 1), "VALID", dimension_numbers=dn)
    y = jax.nn.relu(y + params["conv3_b"][None, :, None, None])
    y = y.reshape(y.shape[0], -1)
    y = jax.nn.relu(y @ params["fc_w"].T + params["fc_b"])
    return y @ params["out_w"].T + params["out_b"]


if __name__ == "__main__":
    # The fc layer (7*7*64) pins the spatial input to 84x84 (standard DQN Atari).
    batch = 2
    n_channel = 4
    key = jax.random.PRNGKey(0)
    pkey, xkey = jax.random.split(key)

    params = init_params(pkey, n_channel, N_ACTION)
    prep = prepare_params(params)          # one-time weight pre-layout (bf16)
    x = jax.random.normal(xkey, (batch, n_channel, 84, 84), jnp.float32)

    out = jax.block_until_ready(cnn_model_forward(prep, x))
    assert out.shape == (batch, N_ACTION), out.shape
    assert out.dtype == jnp.float32
    assert bool(jnp.all(jnp.isfinite(out)))

    # Numerics: bf16 MXU path vs f32 reference (loose tolerance by design).
    ref = jax.block_until_ready(_reference_forward(params, x))
    np.testing.assert_allclose(np.asarray(out), np.asarray(ref), rtol=0.05, atol=0.05)
    print("KERNEL_OK")
</pallas_src>

<mosaic_0001>
module attributes {stable_mosaic.version = 11 : i64} {
  func.func @_conv_tower_kernel(%arg0: i32, %arg1: memref<1x400x256xbf16, #tpu.memory_space<vmem>>, %arg2: memref<256x32xbf16, #tpu.memory_space<vmem>>, %arg3: memref<1x32xf32, #tpu.memory_space<vmem>>, %arg4: memref<512x64xbf16, #tpu.memory_space<vmem>>, %arg5: memref<1x64xf32, #tpu.memory_space<vmem>>, %arg6: memref<576x64xbf16, #tpu.memory_space<vmem>>, %arg7: memref<1x64xf32, #tpu.memory_space<vmem>>, %arg8: memref<1x49x64xbf16, #tpu.memory_space<vmem>>, %arg9: memref<400x32xf32, #tpu.memory_space<vmem>>, %arg10: memref<81x512xf32, #tpu.memory_space<vmem>>, %arg11: memref<81x64xf32, #tpu.memory_space<vmem>>, %arg12: memref<49x576xf32, #tpu.memory_space<vmem>>) attributes {dimension_semantics = [#tpu.dimension_semantics<parallel>], iteration_bounds = array<i64: 2>, scalar_prefetch = 0 : i64, scratch_operands = 4 : i64, tpu.core_type = #tpu.core_type<tc>, window_params = [{transform_indices = @transform_0, window_bounds = array<i64: 1, 400, 256>}, {pipeline_mode = #tpu.pipeline_mode<synchronous>, transform_indices = @transform_1, window_bounds = array<i64: 256, 32>}, {pipeline_mode = #tpu.pipeline_mode<synchronous>, transform_indices = @transform_2, window_bounds = array<i64: 1, 32>}, {pipeline_mode = #tpu.pipeline_mode<synchronous>, transform_indices = @transform_3, window_bounds = array<i64: 512, 64>}, {pipeline_mode = #tpu.pipeline_mode<synchronous>, transform_indices = @transform_4, window_bounds = array<i64: 1, 64>}, {pipeline_mode = #tpu.pipeline_mode<synchronous>, transform_indices = @transform_5, window_bounds = array<i64: 576, 64>}, {pipeline_mode = #tpu.pipeline_mode<synchronous>, transform_indices = @transform_6, window_bounds = array<i64: 1, 64>}, {transform_indices = @transform_7, window_bounds = array<i64: 1, 49, 64>}]} {
    %c0 = arith.constant 0 : index
    %c0_0 = arith.constant 0 : index
    %c0_1 = arith.constant 0 : index
    %0 = vector.load %arg1[%c0, %c0_0, %c0_1] : memref<1x400x256xbf16, #tpu.memory_space<vmem>>, vector<1x400x256xbf16>
    %1 = vector.shape_cast %0 : vector<1x400x256xbf16> to vector<400x256xbf16>
    %c0_2 = arith.constant 0 : index
    %c0_3 = arith.constant 0 : index
    %2 = vector.load %arg2[%c0_2, %c0_3] : memref<256x32xbf16, #tpu.memory_space<vmem>>, vector<256x32xbf16>
    %cst = arith.constant dense<0.000000e+00> : vector<400x32xf32>
    %3 = tpu.matmul %1, %2, %cst {dimension_numbers = #tpu.dot_dimension_numbers<[1], [0], [0], [1], [0, 0, 1, 1], [], []>} : vector<400x256xbf16>, vector<256x32xbf16>, vector<400x32xf32> -> vector<400x32xf32>
    %c0_4 = arith.constant 0 : index
    %c0_5 = arith.constant 0 : index
    %4 = vector.load %arg3[%c0_4, %c0_5] : memref<1x32xf32, #tpu.memory_space<vmem>>, vector<1x32xf32>
    %5 = vector.broadcast %4 : vector<1x32xf32> to vector<400x32xf32>
    %6 = arith.addf %3, %5 : vector<400x32xf32>
    %cst_6 = arith.constant 0.000000e+00 : f32
    %7 = vector.broadcast %cst_6 : f32 to vector<400x32xf32>
    %8 = arith.maximumf %6, %7 : vector<400x32xf32>
    %c0_7 = arith.constant 0 : index
    %c0_8 = arith.constant 0 : index
    %9 = vector.load %arg9[%c0_7, %c0_8] : memref<400x32xf32, #tpu.memory_space<vmem>>, vector<400x32xf32>
    tpu.vector_store %arg9[%c0_7, %c0_8], %8 {strides = array<i32>} : memref<400x32xf32, #tpu.memory_space<vmem>>, vector<400x32xf32>,
    %c0_9 = arith.constant 0 : index
    %c0_10 = arith.constant 0 : index
    %10 = tpu.strided_load %arg9[%c0_9, %c0_10] {strides = array<i32: 2, 1>} : memref<400x32xf32, #tpu.memory_space<vmem>>, vector<9x32xf32>
    %c0_11 = arith.constant 0 : index
    %c0_12 = arith.constant 0 : index
    %11 = vector.load %arg10[%c0_11, %c0_12] : memref<81x512xf32, #tpu.memory_space<vmem>>, vector<9x32xf32>
    tpu.vector_store %arg10[%c0_11, %c0_12], %10 {strides = array<i32>} : memref<81x512xf32, #tpu.memory_space<vmem>>, vector<9x32xf32>,
    %c1 = arith.constant 1 : index
    %c0_13 = arith.constant 0 : index
    %12 = tpu.strided_load %arg9[%c1, %c0_13] {strides = array<i32: 2, 1>} : memref<400x32xf32, #tpu.memory_space<vmem>>, vector<9x32xf32>
    %c0_14 = arith.constant 0 : index
    %c32 = arith.constant 32 : index
    %13 = vector.load %arg10[%c0_14, %c32] : memref<81x512xf32, #tpu.memory_space<vmem>>, vector<9x32xf32>
    tpu.vector_store %arg10[%c0_14, %c32], %12 {strides = array<i32>} : memref<81x512xf32, #tpu.memory_space<vmem>>, vector<9x32xf32>,
    %c2 = arith.constant 2 : index
    %c0_15 = arith.constant 0 : index
    %14 = tpu.strided_load %arg9[%c2, %c0_15] {strides = array<i32: 2, 1>} : memref<400x32xf32, #tpu.memory_space<vmem>>, vector<9x32xf32>
    %c0_16 = arith.constant 0 : index
    %c64 = arith.constant 64 : index
    %15 = vector.load %arg10[%c0_16, %c64] : memref<81x512xf32, #tpu.memory_space<vmem>>, vector<9x32xf32>
    tpu.vector_store %arg10[%c0_16, %c64], %14 {strides = array<i32>} : memref<81x512xf32, #tpu.memory_space<vmem>>, vector<9x32xf32>,
    %c3 = arith.constant 3 : index
    %c0_17 = arith.constant 0 : index
    %16 = tpu.strided_load %arg9[%c3, %c0_17] {strides = array<i32: 2, 1>} : memref<400x32xf32, #tpu.memory_space<vmem>>, vector<9x32xf32>
    %c0_18 = arith.constant 0 : index
    %c96 = arith.constant 96 : index
    %17 = vector.load %arg10[%c0_18, %c96] : memref<81x512xf32, #tpu.memory_space<vmem>>, vector<9x32xf32>
    tpu.vector_store %arg10[%c0_18, %c96], %16 {strides = array<i32>} : memref<81x512xf32, #tpu.memory_space<vmem>>, vector<9x32xf32>,
    %c20 = arith.constant 20 : index
    %c0_19 = arith.constant 0 : index
    %18 = tpu.strided_load %arg9[%c20, %c0_19] {strides = array<i32: 2, 1>} : memref<400x32xf32, #tpu.memory_space<vmem>>, vector<9x32xf32>
    %c0_20 = arith.constant 0 : index
    %c128 = arith.constant 128 : index
    %19 = vector.load %arg10[%c0_20, %c128] : memref<81x512xf32, #tpu.memory_space<vmem>>, vector<9x32xf32>
    tpu.vector_store %arg10[%c0_20, %c128], %18 {strides = array<i32>} : memref<81x512xf32, #tpu.memory_space<vmem>>, vector<9x32xf32>,
    %c21 = arith.constant 21 : index
    %c0_21 = arith.constant 0 : index
    %20 = tpu.strided_load %arg9[%c21, %c0_21] {strides = array<i32: 2, 1>} : memref<400x32xf32, #tpu.memory_space<vmem>>, vector<9x32xf32>
    %c0_22 = arith.constant 0 : index
    %c160 = arith.constant 160 : index
    %21 = vector.load %arg10[%c0_22, %c160] : memref<81x512xf32, #tpu.memory_space<vmem>>, vector<9x32xf32>
    tpu.vector_store %arg10[%c0_22, %c160], %20 {strides = array<i32>} : memref<81x512xf32, #tpu.memory_space<vmem>>, vector<9x32xf32>,
    %c22 = arith.constant 22 : index
    %c0_23 = arith.constant 0 : index
    %22 = tpu.strided_load %arg9[%c22, %c0_23] {strides = array<i32: 2, 1>} : memref<400x32xf32, #tpu.memory_space<vmem>>, vector<9x32xf32>
    %c0_24 = arith.constant 0 : index
    %c192 = arith.constant 192 : index
    %23 = vector.load %arg10[%c0_24, %c192] : memref<81x512xf32, #tpu.memory_space<vmem>>, vector<9x32xf32>
    tpu.vector_store %arg10[%c0_24, %c192], %22 {strides = array<i32>} : memref<81x512xf32, #tpu.memory_space<vmem>>, vector<9x32xf32>,
    %c23 = arith.constant 23 : index
    %c0_25 = arith.constant 0 : index
    %24 = tpu.strided_load %arg9[%c23, %c0_25] {strides = array<i32: 2, 1>} : memref<400x32xf32, #tpu.memory_space<vmem>>, vector<9x32xf32>
    %c0_26 = arith.constant 0 : index
    %c224 = arith.constant 224 : index
    %25 = vector.load %arg10[%c0_26, %c224] : memref<81x512xf32, #tpu.memory_space<vmem>>, vector<9x32xf32>
    tpu.vector_store %arg10[%c0_26, %c224], %24 {strides = array<i32>} : memref<81x512xf32, #tpu.memory_space<vmem>>, vector<9x32xf32>,
    %c40 = arith.constant 40 : index
    %c0_27 = arith.constant 0 : index
    %26 = tpu.strided_load %arg9[%c40, %c0_27] {strides = array<i32: 2, 1>} : memref<400x32xf32, #tpu.memory_space<vmem>>, vector<9x32xf32>
    %c0_28 = arith.constant 0 : index
    %c256 = arith.constant 256 : index
    %27 = vector.load %arg10[%c0_28, %c256] : memref<81x512xf32, #tpu.memory_space<vmem>>, vector<9x32xf32>
    tpu.vector_store %arg10[%c0_28, %c256], %26 {strides = array<i32>} : memref<81x512xf32, #tpu.memory_space<vmem>>, vector<9x32xf32>,
    %c41 = arith.constant 41 : index
    %c0_29 = arith.constant 0 : index
    %28 = tpu.strided_load %arg9[%c41, %c0_29] {strides = array<i32: 2, 1>} : memref<400x32xf32, #tpu.memory_space<vmem>>, vector<9x32xf32>
    %c0_30 = arith.constant 0 : index
    %c288 = arith.constant 288 : index
    %29 = vector.load %arg10[%c0_30, %c288] : memref<81x512xf32, #tpu.memory_space<vmem>>, vector<9x32xf32>
    tpu.vector_store %arg10[%c0_30, %c288], %28 {strides = array<i32>} : memref<81x512xf32, #tpu.memory_space<vmem>>, vector<9x32xf32>,
    %c42 = arith.constant 42 : index
    %c0_31 = arith.constant 0 : index
    %30 = tpu.strided_load %arg9[%c42, %c0_31] {strides = array<i32: 2, 1>} : memref<400x32xf32, #tpu.memory_space<vmem>>, vector<9x32xf32>
    %c0_32 = arith.constant 0 : index
    %c320 = arith.constant 320 : index
    %31 = vector.load %arg10[%c0_32, %c320] : memref<81x512xf32, #tpu.memory_space<vmem>>, vector<9x32xf32>
    tpu.vector_store %arg10[%c0_32, %c320], %30 {strides = array<i32>} : memref<81x512xf32, #tpu.memory_space<vmem>>, vector<9x32xf32>,
    %c43 = arith.constant 43 : index
    %c0_33 = arith.constant 0 : index
    %32 = tpu.strided_load %arg9[%c43, %c0_33] {strides = array<i32: 2, 1>} : memref<400x32xf32, #tpu.memory_space<vmem>>, vector<9x32xf32>
    %c0_34 = arith.constant 0 : index
    %c352 = arith.constant 352 : index
    %33 = vector.load %arg10[%c0_34, %c352] : memref<81x512xf32, #tpu.memory_space<vmem>>, vector<9x32xf32>
    tpu.vector_store %arg10[%c0_34, %c352], %32 {strides = array<i32>} : memref<81x512xf32, #tpu.memory_space<vmem>>, vector<9x32xf32>,
    %c60 = arith.constant 60 : index
    %c0_35 = arith.constant 0 : index
    %34 = tpu.strided_load %arg9[%c60, %c0_35] {strides = array<i32: 2, 1>} : memref<400x32xf32, #tpu.memory_space<vmem>>, vector<9x32xf32>
    %c0_36 = arith.constant 0 : index
    %c384 = arith.constant 384 : index
    %35 = vector.load %arg10[%c0_36, %c384] : memref<81x512xf32, #tpu.memory_space<vmem>>, vector<9x32xf32>
    tpu.vector_store %arg10[%c0_36, %c384], %34 {strides = array<i32>} : memref<81x512xf32, #tpu.memory_space<vmem>>, vector<9x32xf32>,
    %c61 = arith.constant 61 : index
    %c0_37 = arith.constant 0 : index
    %36 = tpu.strided_load %arg9[%c61, %c0_37] {strides = array<i32: 2, 1>} : memref<400x32xf32, #tpu.memory_space<vmem>>, vector<9x32xf32>
    %c0_38 = arith.constant 0 : index
    %c416 = arith.constant 416 : index
    %37 = vector.load %arg10[%c0_38, %c416] : memref<81x512xf32, #tpu.memory_space<vmem>>, vector<9x32xf32>
    tpu.vector_store %arg10[%c0_38, %c416], %36 {strides = array<i32>} : memref<81x512xf32, #tpu.memory_space<vmem>>, vector<9x32xf32>,
    %c62 = arith.constant 62 : index
    %c0_39 = arith.constant 0 : index
    %38 = tpu.strided_load %arg9[%c62, %c0_39] {strides = array<i32: 2, 1>} : memref<400x32xf32, #tpu.memory_space<vmem>>, vector<9x32xf32>
    %c0_40 = arith.constant 0 : index
    %c448 = arith.constant 448 : index
    %39 = vector.load %arg10[%c0_40, %c448] : memref<81x512xf32, #tpu.memory_space<vmem>>, vector<9x32xf32>
    tpu.vector_store %arg10[%c0_40, %c448], %38 {strides = array<i32>} : memref<81x512xf32, #tpu.memory_space<vmem>>, vector<9x32xf32>,
    %c63 = arith.constant 63 : index
    %c0_41 = arith.constant 0 : index
    %40 = tpu.strided_load %arg9[%c63, %c0_41] {strides = array<i32: 2, 1>} : memref<400x32xf32, #tpu.memory_space<vmem>>, vector<9x32xf32>
    %c0_42 = arith.constant 0 : index
    %c480 = arith.constant 480 : index
    %41 = vector.load %arg10[%c0_42, %c480] : memref<81x512xf32, #tpu.memory_space<vmem>>, vector<9x32xf32>
    tpu.vector_store %arg10[%c0_42, %c480], %40 {strides = array<i32>} : memref<81x512xf32, #tpu.memory_space<vmem>>, vector<9x32xf32>,
    %c40_43 = arith.constant 40 : index
    %c0_44 = arith.constant 0 : index
    %42 = tpu.strided_load %arg9[%c40_43, %c0_44] {strides = array<i32: 2, 1>} : memref<400x32xf32, #tpu.memory_space<vmem>>, vector<9x32xf32>
    %c9 = arith.constant 9 : index
    %c0_45 = arith.constant 0 : index
    %43 = vector.load %arg10[%c9, %c0_45] : memref<81x512xf32, #tpu.memory_space<vmem>>, vector<9x32xf32>
    tpu.vector_store %arg10[%c9, %c0_45], %42 {strides = array<i32>} : memref<81x512xf32, #tpu.memory_space<vmem>>, vector<9x32xf32>,
    %c41_46 = arith.constant 41 : index
    %c0_47 = arith.constant 0 : index
    %44 = tpu.strided_load %arg9[%c41_46, %c0_47] {strides = array<i32: 2, 1>} : memref<400x32xf32, #tpu.memory_space<vmem>>, vector<9x32xf32>
    %c9_48 = arith.constant 9 : index
    %c32_49 = arith.constant 32 : index
    %45 = vector.load %arg10[%c9_48, %c32_49] : memref<81x512xf32, #tpu.memory_space<vmem>>, vector<9x32xf32>
    tpu.vector_store %arg10[%c9_48, %c32_49], %44 {strides = array<i32>} : memref<81x512xf32, #tpu.memory_space<vmem>>, vector<9x32xf32>,
    %c42_50 = arith.constant 42 : index
    %c0_51 = arith.constant 0 : index
    %46 = tpu.strided_load %arg9[%c42_50, %c0_51] {strides = array<i32: 2, 1>} : memref<400x32xf32, #tpu.memory_space<vmem>>, vector<9x32xf32>
    %c9_52 = arith.constant 9 : index
    %c64_53 = arith.constant 64 : index
    %47 = vector.load %arg10[%c9_52, %c64_53] : memref<81x512xf32, #tpu.memory_space<vmem>>, vector<9x32xf32>
    tpu.vector_store %arg10[%c9_52, %c64_53], %46 {strides = array<i32>} : memref<81x512xf32, #tpu.memory_space<vmem>>, vector<9x32xf32>,
    %c43_54 = arith.constant 43 : index
    %c0_55 = arith.constant 0 : index
    %48 = tpu.strided_load %arg9[%c43_54, %c0_55] {strides = array<i32: 2, 1>} : memref<400x32xf32, #tpu.memory_space<vmem>>, vector<9x32xf32>
    %c9_56 = arith.constant 9 : index
    %c96_57 = arith.constant 96 : index
    %49 = vector.load %arg10[%c9_56, %c96_57] : memref<81x512xf32, #tpu.memory_space<vmem>>, vector<9x32xf32>
    tpu.vector_store %arg10[%c9_56, %c96_57], %48 {strides = array<i32>} : memref<81x512xf32, #tpu.memory_space<vmem>>, vector<9x32xf32>,
    %c60_58 = arith.constant 60 : index
    %c0_59 = arith.constant 0 : index
    %50 = tpu.strided_load %arg9[%c60_58, %c0_59] {strides = array<i32: 2, 1>} : memref<400x32xf32, #tpu.memory_space<vmem>>, vector<9x32xf32>
    %c9_60 = arith.constant 9 : index
    %c128_61 = arith.constant 128 : index
    %51 = vector.load %arg10[%c9_60, %c128_61] : memref<81x512xf32, #tpu.memory_space<vmem>>, vector<9x32xf32>
    tpu.vector_store %arg10[%c9_60, %c128_61], %50 {strides = array<i32>} : memref<81x512xf32, #tpu.memory_space<vmem>>, vector<9x32xf32>,
    %c61_62 = arith.constant 61 : index
    %c0_63 = arith.constant 0 : index
    %52 = tpu.strided_load %arg9[%c61_62, %c0_63] {strides = array<i32: 2, 1>} : memref<400x32xf32, #tpu.memory_space<vmem>>, vector<9x32xf32>
    %c9_64 = arith.constant 9 : index
    %c160_65 = arith.constant 160 : index
    %53 = vector.load %arg10[%c9_64, %c160_65] : memref<81x512xf32, #tpu.memory_space<vmem>>, vector<9x32xf32>
    tpu.vector_store %arg10[%c9_64, %c160_65], %52 {strides = array<i32>} : memref<81x512xf32, #tpu.memory_space<vmem>>, vector<9x32xf32>,
    %c62_66 = arith.constant 62 : index
    %c0_67 = arith.constant 0 : index
    %54 = tpu.strided_load %arg9[%c62_66, %c0_67] {strides = array<i32: 2, 1>} : memref<400x32xf32, #tpu.memory_space<vmem>>, vector<9x32xf32>
    %c9_68 = arith.constant 9 : index
    %c192_69 = arith.constant 192 : index
    %55 = vector.load %arg10[%c9_68, %c192_69] : memref<81x512xf32, #tpu.memory_space<vmem>>, vector<9x32xf32>
    tpu.vector_store %arg10[%c9_68, %c192_69], %54 {strides = array<i32>} : memref<81x512xf32, #tpu.memory_space<vmem>>, vector<9x32xf32>,
    %c63_70 = arith.constant 63 : index
    %c0_71 = arith.constant 0 : index
    %56 = tpu.strided_load %arg9[%c63_70, %c0_71] {strides = array<i32: 2, 1>} : memref<400x32xf32, #tpu.memory_space<vmem>>, vector<9x32xf32>
    %c9_72 = arith.constant 9 : index
    %c224_73 = arith.constant 224 : index
    %57 = vector.load %arg10[%c9_72, %c224_73] : memref<81x512xf32, #tpu.memory_space<vmem>>, vector<9x32xf32>
    tpu.vector_store %arg10[%c9_72, %c224_73], %56 {strides = array<i32>} : memref<81x512xf32, #tpu.memory_space<vmem>>, vector<9x32xf32>,
    %c80 = arith.constant 80 : index
    %c0_74 = arith.constant 0 : index
    %58 = tpu.strided_load %arg9[%c80, %c0_74] {strides = array<i32: 2, 1>} : memref<400x32xf32, #tpu.memory_space<vmem>>, vector<9x32xf32>
    %c9_75 = arith.constant 9 : index
    %c256_76 = arith.constant 256 : index
    %59 = vector.load %arg10[%c9_75, %c256_76] : memref<81x512xf32, #tpu.memory_space<vmem>>, vector<9x32xf32>
    tpu.vector_store %arg10[%c9_75, %c256_76], %58 {strides = array<i32>} : memref<81x512xf32, #tpu.memory_space<vmem>>, vector<9x32xf32>,
    %c81 = arith.constant 81 : index
    %c0_77 = arith.constant 0 : index
    %60 = tpu.strided_load %arg9[%c81, %c0_77] {strides = array<i32: 2, 1>} : memref<400x32xf32, #tpu.memory_space<vmem>>, vector<9x32xf32>
    %c9_78 = arith.constant 9 : index
    %c288_79 = arith.constant 288 : index
    %61 = vector.load %arg10[%c9_78, %c288_79] : memref<81x512xf32, #tpu.memory_space<vmem>>, vector<9x32xf32>
    tpu.vector_store %arg10[%c9_78, %c288_79], %60 {strides = array<i32>} : memref<81x512xf32, #tpu.memory_space<vmem>>, vector<9x32xf32>,
    %c82 = arith.constant 82 : index
    %c0_80 = arith.constant 0 : index
    %62 = tpu.strided_load %arg9[%c82, %c0_80] {strides = array<i32: 2, 1>} : memref<400x32xf32, #tpu.memory_space<vmem>>, vector<9x32xf32>
    %c9_81 = arith.constant 9 : index
    %c320_82 = arith.constant 320 : index
    %63 = vector.load %arg10[%c9_81, %c320_82] : memref<81x512xf32, #tpu.memory_space<vmem>>, vector<9x32xf32>
    tpu.vector_store %arg10[%c9_81, %c320_82], %62 {strides = array<i32>} : memref<81x512xf32, #tpu.memory_space<vmem>>, vector<9x32xf32>,
    %c83 = arith.constant 83 : index
    %c0_83 = arith.constant 0 : index
    %64 = tpu.strided_load %arg9[%c83, %c0_83] {strides = array<i32: 2, 1>} : memref<400x32xf32, #tpu.memory_space<vmem>>, vector<9x32xf32>
    %c9_84 = arith.constant 9 : index
    %c352_85 = arith.constant 352 : index
    %65 = vector.load %arg10[%c9_84, %c352_85] : memref<81x512xf32, #tpu.memory_space<vmem>>, vector<9x32xf32>
    tpu.vector_store %arg10[%c9_84, %c352_85], %64 {strides = array<i32>} : memref<81x512xf32, #tpu.memory_space<vmem>>, vector<9x32xf32>,
    %c100 = arith.constant 100 : index
    %c0_86 = arith.constant 0 : index
    %66 = tpu.strided_load %arg9[%c100, %c0_86] {strides = array<i32: 2, 1>} : memref<400x32xf32, #tpu.memory_space<vmem>>, vector<9x32xf32>
    %c9_87 = arith.constant 9 : index
    %c384_88 = arith.constant 384 : index
    %67 = vector.load %arg10[%c9_87, %c384_88] : memref<81x512xf32, #tpu.memory_space<vmem>>, vector<9x32xf32>
    tpu.vector_store %arg10[%c9_87, %c384_88], %66 {strides = array<i32>} : memref<81x512xf32, #tpu.memory_space<vmem>>, vector<9x32xf32>,
    %c101 = arith.constant 101 : index
    %c0_89 = arith.constant 0 : index
    %68 = tpu.strided_load %arg9[%c101, %c0_89] {strides = array<i32: 2, 1>} : memref<400x32xf32, #tpu.memory_space<vmem>>, vector<9x32xf32>
    %c9_90 = arith.constant 9 : index
    %c416_91 = arith.constant 416 : index
    %69 = vector.load %arg10[%c9_90, %c416_91] : memref<81x512xf32, #tpu.memory_space<vmem>>, vector<9x32xf32>
    tpu.vector_store %arg10[%c9_90, %c416_91], %68 {strides = array<i32>} : memref<81x512xf32, #tpu.memory_space<vmem>>, vector<9x32xf32>,
    %c102 = arith.constant 102 : index
    %c0_92 = arith.constant 0 : index
    %70 = tpu.strided_load %arg9[%c102, %c0_92] {strides = array<i32: 2, 1>} : memref<400x32xf32, #tpu.memory_space<vmem>>, vector<9x32xf32>
    %c9_93 = arith.constant 9 : index
    %c448_94 = arith.constant 448 : index
    %71 = vector.load %arg10[%c9_93, %c448_94] : memref<81x512xf32, #tpu.memory_space<vmem>>, vector<9x32xf32>
    tpu.vector_store %arg10[%c9_93, %c448_94], %70 {strides = array<i32>} : memref<81x512xf32, #tpu.memory_space<vmem>>, vector<9x32xf32>,
    %c103 = arith.constant 103 : index
    %c0_95 = arith.constant 0 : index
    %72 = tpu.strided_load %arg9[%c103, %c0_95] {strides = array<i32: 2, 1>} : memref<400x32xf32, #tpu.memory_space<vmem>>, vector<9x32xf32>
    %c9_96 = arith.constant 9 : index
    %c480_97 = arith.constant 480 : index
    %73 = vector.load %arg10[%c9_96, %c480_97] : memref<81x512xf32, #tpu.memory_space<vmem>>, vector<9x32xf32>
    tpu.vector_store %arg10[%c9_96, %c480_97], %72 {strides = array<i32>} : memref<81x512xf32, #tpu.memory_space<vmem>>, vector<9x32xf32>,
    %c80_98 = arith.constant 80 : index
    %c0_99 = arith.constant 0 : index
    %74 = tpu.strided_load %arg9[%c80_98, %c0_99] {strides = array<i32: 2, 1>} : memref<400x32xf32, #tpu.memory_space<vmem>>, vector<9x32xf32>
    %c18 = arith.constant 18 : index
    %c0_100 = arith.constant 0 : index
    %75 = vector.load %arg10[%c18, %c0_100] : memref<81x512xf32, #tpu.memory_space<vmem>>, vector<9x32xf32>
    tpu.vector_store %arg10[%c18, %c0_100], %74 {strides = array<i32>} : memref<81x512xf32, #tpu.memory_space<vmem>>, vector<9x32xf32>,
    %c81_101 = arith.constant 81 : index
    %c0_102 = arith.constant 0 : index
    %76 = tpu.strided_load %arg9[%c81_101, %c0_102] {strides = array<i32: 2, 1>} : memref<400x32xf32, #tpu.memory_space<vmem>>, vector<9x32xf32>
    %c18_103 = arith.constant 18 : index
    %c32_104 = arith.constant 32 : index
    %77 = vector.load %arg10[%c18_103, %c32_104] : memref<81x512xf32, #tpu.memory_space<vmem>>, vector<9x32xf32>
    tpu.vector_store %arg10[%c18_103, %c32_104], %76 {strides = array<i32>} : memref<81x512xf32, #tpu.memory_space<vmem>>, vector<9x32xf32>,
    %c82_105 = arith.constant 82 : index
    %c0_106 = arith.constant 0 : index
    %78 = tpu.strided_load %arg9[%c82_105, %c0_106] {strides = array<i32: 2, 1>} : memref<400x32xf32, #tpu.memory_space<vmem>>, vector<9x32xf32>
    %c18_107 = arith.constant 18 : index
    %c64_108 = arith.constant 64 : index
    %79 = vector.load %arg10[%c18_107, %c64_108] : memref<81x512xf32, #tpu.memory_space<vmem>>, vector<9x32xf32>
    tpu.vector_store %arg10[%c18_107, %c64_108], %78 {strides = array<i32>} : memref<81x512xf32, #tpu.memory_space<vmem>>, vector<9x32xf32>,
    %c83_109 = arith.constant 83 : index
    %c0_110 = arith.constant 0 : index
    %80 = tpu.strided_load %arg9[%c83_109, %c0_110] {strides = array<i32: 2, 1>} : memref<400x32xf32, #tpu.memory_space<vmem>>, vector<9x32xf32>
    %c18_111 = arith.constant 18 : index
    %c96_112 = arith.constant 96 : index
    %81 = vector.load %arg10[%c18_111, %c96_112] : memref<81x512xf32, #tpu.memory_space<vmem>>, vector<9x32xf32>
    tpu.vector_store %arg10[%c18_111, %c96_112], %80 {strides = array<i32>} : memref<81x512xf32, #tpu.memory_space<vmem>>, vector<9x32xf32>,
    %c100_113 = arith.constant 100 : index
    %c0_114 = arith.constant 0 : index
    %82 = tpu.strided_load %arg9[%c100_113, %c0_114] {strides = array<i32: 2, 1>} : memref<400x32xf32, #tpu.memory_space<vmem>>, vector<9x32xf32>
    %c18_115 = arith.constant 18 : index
    %c128_116 = arith.constant 128 : index
    %83 = vector.load %arg10[%c18_115, %c128_116] : memref<81x512xf32, #tpu.memory_space<vmem>>, vector<9x32xf32>
    tpu.vector_store %arg10[%c18_115, %c128_116], %82 {strides = array<i32>} : memref<81x512xf32, #tpu.memory_space<vmem>>, vector<9x32xf32>,
    %c101_117 = arith.constant 101 : index
    %c0_118 = arith.constant 0 : index
    %84 = tpu.strided_load %arg9[%c101_117, %c0_118] {strides = array<i32: 2, 1>} : memref<400x32xf32, #tpu.memory_space<vmem>>, vector<9x32xf32>
    %c18_119 = arith.constant 18 : index
    %c160_120 = arith.constant 160 : index
    %85 = vector.load %arg10[%c18_119, %c160_120] : memref<81x512xf32, #tpu.memory_space<vmem>>, vector<9x32xf32>
    tpu.vector_store %arg10[%c18_119, %c160_120], %84 {strides = array<i32>} : memref<81x512xf32, #tpu.memory_space<vmem>>, vector<9x32xf32>,
    %c102_121 = arith.constant 102 : index
    %c0_122 = arith.constant 0 : index
    %86 = tpu.strided_load %arg9[%c102_121, %c0_122] {strides = array<i32: 2, 1>} : memref<400x32xf32, #tpu.memory_space<vmem>>, vector<9x32xf32>
    %c18_123 = arith.constant 18 : index
    %c192_124 = arith.constant 192 : index
    %87 = vector.load %arg10[%c18_123, %c192_124] : memref<81x512xf32, #tpu.memory_space<vmem>>, vector<9x32xf32>
    tpu.vector_store %arg10[%c18_123, %c192_124], %86 {strides = array<i32>} : memref<81x512xf32, #tpu.memory_space<vmem>>, vector<9x32xf32>,
    %c103_125 = arith.constant 103 : index
    %c0_126 = arith.constant 0 : index
    %88 = tpu.strided_load %arg9[%c103_125, %c0_126] {strides = array<i32: 2, 1>} : memref<400x32xf32, #tpu.memory_space<vmem>>, vector<9x32xf32>
    %c18_127 = arith.constant 18 : index
    %c224_128 = arith.constant 224 : index
    %89 = vector.load %arg10[%c18_127, %c224_128] : memref<81x512xf32, #tpu.memory_space<vmem>>, vector<9x32xf32>
    tpu.vector_store %arg10[%c18_127, %c224_128], %88 {strides = array<i32>} : memref<81x512xf32, #tpu.memory_space<vmem>>, vector<9x32xf32>,
    %c120 = arith.constant 120 : index
    %c0_129 = arith.constant 0 : index
    %90 = tpu.strided_load %arg9[%c120, %c0_129] {strides = array<i32: 2, 1>} : memref<400x32xf32, #tpu.memory_space<vmem>>, vector<9x32xf32>
    %c18_130 = arith.constant 18 : index
    %c256_131 = arith.constant 256 : index
    %91 = vector.load %arg10[%c18_130, %c256_131] : memref<81x512xf32, #tpu.memory_space<vmem>>, vector<9x32xf32>
    tpu.vector_store %arg10[%c18_130, %c256_131], %90 {strides = array<i32>} : memref<81x512xf32, #tpu.memory_space<vmem>>, vector<9x32xf32>,
    %c121 = arith.constant 121 : index
    %c0_132 = arith.constant 0 : index
    %92 = tpu.strided_load %arg9[%c121, %c0_132] {strides = array<i32: 2, 1>} : memref<400x32xf32, #tpu.memory_space<vmem>>, vector<9x32xf32>
    %c18_133 = arith.constant 18 : index
    %c288_134 = arith.constant 288 : index
    %93 = vector.load %arg10[%c18_133, %c288_134] : memref<81x512xf32, #tpu.memory_space<vmem>>, vector<9x32xf32>
    tpu.vector_store %arg10[%c18_133, %c288_134], %92 {strides = array<i32>} : memref<81x512xf32, #tpu.memory_space<vmem>>, vector<9x32xf32>,
    %c122 = arith.constant 122 : index
    %c0_135 = arith.constant 0 : index
    %94 = tpu.strided_load %arg9[%c122, %c0_135] {strides = array<i32: 2, 1>} : memref<400x32xf32, #tpu.memory_space<vmem>>, vector<9x32xf32>
    %c18_136 = arith.constant 18 : index
    %c320_137 = arith.constant 320 : index
    %95 = vector.load %arg10[%c18_136, %c320_137] : memref<81x512xf32, #tpu.memory_space<vmem>>, vector<9x32xf32>
    tpu.vector_store %arg10[%c18_136, %c320_137], %94 {strides = array<i32>} : memref<81x512xf32, #tpu.memory_space<vmem>>, vector<9x32xf32>,
    %c123 = arith.constant 123 : index
    %c0_138 = arith.constant 0 : index
    %96 = tpu.strided_load %arg9[%c123, %c0_138] {strides = array<i32: 2, 1>} : memref<400x32xf32, #tpu.memory_space<vmem>>, vector<9x32xf32>
    %c18_139 = arith.constant 18 : index
    %c352_140 = arith.constant 352 : index
    %97 = vector.load %arg10[%c18_139, %c352_140] : memref<81x512xf32, #tpu.memory_space<vmem>>, vector<9x32xf32>
    tpu.vector_store %arg10[%c18_139, %c352_140], %96 {strides = array<i32>} : memref<81x512xf32, #tpu.memory_space<vmem>>, vector<9x32xf32>,
    %c140 = arith.constant 140 : index
    %c0_141 = arith.constant 0 : index
    %98 = tpu.strided_load %arg9[%c140, %c0_141] {strides = array<i32: 2, 1>} : memref<400x32xf32, #tpu.memory_space<vmem>>, vector<9x32xf32>
    %c18_142 = arith.constant 18 : index
    %c384_143 = arith.constant 384 : index
    %99 = vector.load %arg10[%c18_142, %c384_143] : memref<81x512xf32, #tpu.memory_space<vmem>>, vector<9x32xf32>
    tpu.vector_store %arg10[%c18_142, %c384_143], %98 {strides = array<i32>} : memref<81x512xf32, #tpu.memory_space<vmem>>, vector<9x32xf32>,
    %c141 = arith.constant 141 : index
    %c0_144 = arith.constant 0 : index
    %100 = tpu.strided_load %arg9[%c141, %c0_144] {strides = array<i32: 2, 1>} : memref<400x32xf32, #tpu.memory_space<vmem>>, vector<9x32xf32>
    %c18_145 = arith.constant 18 : index
    %c416_146 = arith.constant 416 : index
    %101 = vector.load %arg10[%c18_145, %c416_146] : memref<81x512xf32, #tpu.memory_space<vmem>>, vector<9x32xf32>
    tpu.vector_store %arg10[%c18_145, %c416_146], %100 {strides = array<i32>} : memref<81x512xf32, #tpu.memory_space<vmem>>, vector<9x32xf32>,
    %c142 = arith.constant 142 : index
    %c0_147 = arith.constant 0 : index
    %102 = tpu.strided_load %arg9[%c142, %c0_147] {strides = array<i32: 2, 1>} : memref<400x32xf32, #tpu.memory_space<vmem>>, vector<9x32xf32>
    %c18_148 = arith.constant 18 : index
    %c448_149 = arith.constant 448 : index
    %103 = vector.load %arg10[%c18_148, %c448_149] : memref<81x512xf32, #tpu.memory_space<vmem>>, vector<9x32xf32>
    tpu.vector_store %arg10[%c18_148, %c448_149], %102 {strides = array<i32>} : memref<81x512xf32, #tpu.memory_space<vmem>>, vector<9x32xf32>,
    %c143 = arith.constant 143 : index
    %c0_150 = arith.constant 0 : index
    %104 = tpu.strided_load %arg9[%c143, %c0_150] {strides = array<i32: 2, 1>} : memref<400x32xf32, #tpu.memory_space<vmem>>, vector<9x32xf32>
    %c18_151 = arith.constant 18 : index
    %c480_152 = arith.constant 480 : index
    %105 = vector.load %arg10[%c18_151, %c480_152] : memref<81x512xf32, #tpu.memory_space<vmem>>, vector<9x32xf32>
    tpu.vector_store %arg10[%c18_151, %c480_152], %104 {strides = array<i32>} : memref<81x512xf32, #tpu.memory_space<vmem>>, vector<9x32xf32>,
    %c120_153 = arith.constant 120 : index
    %c0_154 = arith.constant 0 : index
    %106 = tpu.strided_load %arg9[%c120_153, %c0_154] {strides = array<i32: 2, 1>} : memref<400x32xf32, #tpu.memory_space<vmem>>, vector<9x32xf32>
    %c27 = arith.constant 27 : index
    %c0_155 = arith.constant 0 : index
    %107 = vector.load %arg10[%c27, %c0_155] : memref<81x512xf32, #tpu.memory_space<vmem>>, vector<9x32xf32>
    tpu.vector_store %arg10[%c27, %c0_155], %106 {strides = array<i32>} : memref<81x512xf32, #tpu.memory_space<vmem>>, vector<9x32xf32>,
    %c121_156 = arith.constant 121 : index
    %c0_157 = arith.constant 0 : index
    %108 = tpu.strided_load %arg9[%c121_156, %c0_157] {strides = array<i32: 2, 1>} : memref<400x32xf32, #tpu.memory_space<vmem>>, vector<9x32xf32>
    %c27_158 = arith.constant 27 : index
    %c32_159 = arith.constant 32 : index
    %109 = vector.load %arg10[%c27_158, %c32_159] : memref<81x512xf32, #tpu.memory_space<vmem>>, vector<9x32xf32>
    tpu.vector_store %arg10[%c27_158, %c32_159], %108 {strides = array<i32>} : memref<81x512xf32, #tpu.memory_space<vmem>>, vector<9x32xf32>,
    %c122_160 = arith.constant 122 : index
    %c0_161 = arith.constant 0 : index
    %110 = tpu.strided_load %arg9[%c122_160, %c0_161] {strides = array<i32: 2, 1>} : memref<400x32xf32, #tpu.memory_space<vmem>>, vector<9x32xf32>
    %c27_162 = arith.constant 27 : index
    %c64_163 = arith.constant 64 : index
    %111 = vector.load %arg10[%c27_162, %c64_163] : memref<81x512xf32, #tpu.memory_space<vmem>>, vector<9x32xf32>
    tpu.vector_store %arg10[%c27_162, %c64_163], %110 {strides = array<i32>} : memref<81x512xf32, #tpu.memory_space<vmem>>, vector<9x32xf32>,
    %c123_164 = arith.constant 123 : index
    %c0_165 = arith.constant 0 : index
    %112 = tpu.strided_load %arg9[%c123_164, %c0_165] {strides = array<i32: 2, 1>} : memref<400x32xf32, #tpu.memory_space<vmem>>, vector<9x32xf32>
    %c27_166 = arith.constant 27 : index
    %c96_167 = arith.constant 96 : index
    %113 = vector.load %arg10[%c27_166, %c96_167] : memref<81x512xf32, #tpu.memory_space<vmem>>, vector<9x32xf32>
    tpu.vector_store %arg10[%c27_166, %c96_167], %112 {strides = array<i32>} : memref<81x512xf32, #tpu.memory_space<vmem>>, vector<9x32xf32>,
    %c140_168 = arith.constant 140 : index
    %c0_169 = arith.constant 0 : index
    %114 = tpu.strided_load %arg9[%c140_168, %c0_169] {strides = array<i32: 2, 1>} : memref<400x32xf32, #tpu.memory_space<vmem>>, vector<9x32xf32>
    %c27_170 = arith.constant 27 : index
    %c128_171 = arith.constant 128 : index
    %115 = vector.load %arg10[%c27_170, %c128_171] : memref<81x512xf32, #tpu.memory_space<vmem>>, vector<9x32xf32>
    tpu.vector_store %arg10[%c27_170, %c128_171], %114 {strides = array<i32>} : memref<81x512xf32, #tpu.memory_space<vmem>>, vector<9x32xf32>,
    %c141_172 = arith.constant 141 : index
    %c0_173 = arith.constant 0 : index
    %116 = tpu.strided_load %arg9[%c141_172, %c0_173] {strides = array<i32: 2, 1>} : memref<400x32xf32, #tpu.memory_space<vmem>>, vector<9x32xf32>
    %c27_174 = arith.constant 27 : index
    %c160_175 = arith.constant 160 : index
    %117 = vector.load %arg10[%c27_174, %c160_175] : memref<81x512xf32, #tpu.memory_space<vmem>>, vector<9x32xf32>
    tpu.vector_store %arg10[%c27_174, %c160_175], %116 {strides = array<i32>} : memref<81x512xf32, #tpu.memory_space<vmem>>, vector<9x32xf32>,
    %c142_176 = arith.constant 142 : index
    %c0_177 = arith.constant 0 : index
    %118 = tpu.strided_load %arg9[%c142_176, %c0_177] {strides = array<i32: 2, 1>} : memref<400x32xf32, #tpu.memory_space<vmem>>, vector<9x32xf32>
    %c27_178 = arith.constant 27 : index
    %c192_179 = arith.constant 192 : index
    %119 = vector.load %arg10[%c27_178, %c192_179] : memref<81x512xf32, #tpu.memory_space<vmem>>, vector<9x32xf32>
    tpu.vector_store %arg10[%c27_178, %c192_179], %118 {strides = array<i32>} : memref<81x512xf32, #tpu.memory_space<vmem>>, vector<9x32xf32>,
    %c143_180 = arith.constant 143 : index
    %c0_181 = arith.constant 0 : index
    %120 = tpu.strided_load %arg9[%c143_180, %c0_181] {strides = array<i32: 2, 1>} : memref<400x32xf32, #tpu.memory_space<vmem>>, vector<9x32xf32>
    %c27_182 = arith.constant 27 : index
    %c224_183 = arith.constant 224 : index
    %121 = vector.load %arg10[%c27_182, %c224_183] : memref<81x512xf32, #tpu.memory_space<vmem>>, vector<9x32xf32>
    tpu.vector_store %arg10[%c27_182, %c224_183], %120 {strides = array<i32>} : memref<81x512xf32, #tpu.memory_space<vmem>>, vector<9x32xf32>,
    %c160_184 = arith.constant 160 : index
    %c0_185 = arith.constant 0 : index
    %122 = tpu.strided_load %arg9[%c160_184, %c0_185] {strides = array<i32: 2, 1>} : memref<400x32xf32, #tpu.memory_space<vmem>>, vector<9x32xf32>
    %c27_186 = arith.constant 27 : index
    %c256_187 = arith.constant 256 : index
    %123 = vector.load %arg10[%c27_186, %c256_187] : memref<81x512xf32, #tpu.memory_space<vmem>>, vector<9x32xf32>
    tpu.vector_store %arg10[%c27_186, %c256_187], %122 {strides = array<i32>} : memref<81x512xf32, #tpu.memory_space<vmem>>, vector<9x32xf32>,
    %c161 = arith.constant 161 : index
    %c0_188 = arith.constant 0 : index
    %124 = tpu.strided_load %arg9[%c161, %c0_188] {strides = array<i32: 2, 1>} : memref<400x32xf32, #tpu.memory_space<vmem>>, vector<9x32xf32>
    %c27_189 = arith.constant 27 : index
    %c288_190 = arith.constant 288 : index
    %125 = vector.load %arg10[%c27_189, %c288_190] : memref<81x512xf32, #tpu.memory_space<vmem>>, vector<9x32xf32>
    tpu.vector_store %arg10[%c27_189, %c288_190], %124 {strides = array<i32>} : memref<81x512xf32, #tpu.memory_space<vmem>>, vector<9x32xf32>,
    %c162 = arith.constant 162 : index
    %c0_191 = arith.constant 0 : index
    %126 = tpu.strided_load %arg9[%c162, %c0_191] {strides = array<i32: 2, 1>} : memref<400x32xf32, #tpu.memory_space<vmem>>, vector<9x32xf32>
    %c27_192 = arith.constant 27 : index
    %c320_193 = arith.constant 320 : index
    %127 = vector.load %arg10[%c27_192, %c320_193] : memref<81x512xf32, #tpu.memory_space<vmem>>, vector<9x32xf32>
    tpu.vector_store %arg10[%c27_192, %c320_193], %126 {strides = array<i32>} : memref<81x512xf32, #tpu.memory_space<vmem>>, vector<9x32xf32>,
    %c163 = arith.constant 163 : index
    %c0_194 = arith.constant 0 : index
    %128 = tpu.strided_load %arg9[%c163, %c0_194] {strides = array<i32: 2, 1>} : memref<400x32xf32, #tpu.memory_space<vmem>>, vector<9x32xf32>
    %c27_195 = arith.constant 27 : index
    %c352_196 = arith.constant 352 : index
    %129 = vector.load %arg10[%c27_195, %c352_196] : memref<81x512xf32, #tpu.memory_space<vmem>>, vector<9x32xf32>
    tpu.vector_store %arg10[%c27_195, %c352_196], %128 {strides = array<i32>} : memref<81x512xf32, #tpu.memory_space<vmem>>, vector<9x32xf32>,
    %c180 = arith.constant 180 : index
    %c0_197 = arith.constant 0 : index
    %130 = tpu.strided_load %arg9[%c180, %c0_197] {strides = array<i32: 2, 1>} : memref<400x32xf32, #tpu.memory_space<vmem>>, vector<9x32xf32>
    %c27_198 = arith.constant 27 : index
    %c384_199 = arith.constant 384 : index
    %131 = vector.load %arg10[%c27_198, %c384_199] : memref<81x512xf32, #tpu.memory_space<vmem>>, vector<9x32xf32>
    tpu.vector_store %arg10[%c27_198, %c384_199], %130 {strides = array<i32>} : memref<81x512xf32, #tpu.memory_space<vmem>>, vector<9x32xf32>,
    %c181 = arith.constant 181 : index
    %c0_200 = arith.constant 0 : index
    %132 = tpu.strided_load %arg9[%c181, %c0_200] {strides = array<i32: 2, 1>} : memref<400x32xf32, #tpu.memory_space<vmem>>, vector<9x32xf32>
    %c27_201 = arith.constant 27 : index
    %c416_202 = arith.constant 416 : index
    %133 = vector.load %arg10[%c27_201, %c416_202] : memref<81x512xf32, #tpu.memory_space<vmem>>, vector<9x32xf32>
    tpu.vector_store %arg10[%c27_201, %c416_202], %132 {strides = array<i32>} : memref<81x512xf32, #tpu.memory_space<vmem>>, vector<9x32xf32>,
    %c182 = arith.constant 182 : index
    %c0_203 = arith.constant 0 : index
    %134 = tpu.strided_load %arg9[%c182, %c0_203] {strides = array<i32: 2, 1>} : memref<400x32xf32, #tpu.memory_space<vmem>>, vector<9x32xf32>
    %c27_204 = arith.constant 27 : index
    %c448_205 = arith.constant 448 : index
    %135 = vector.load %arg10[%c27_204, %c448_205] : memref<81x512xf32, #tpu.memory_space<vmem>>, vector<9x32xf32>
    tpu.vector_store %arg10[%c27_204, %c448_205], %134 {strides = array<i32>} : memref<81x512xf32, #tpu.memory_space<vmem>>, vector<9x32xf32>,
    %c183 = arith.constant 183 : index
    %c0_206 = arith.constant 0 : index
    %136 = tpu.strided_load %arg9[%c183, %c0_206] {strides = array<i32: 2, 1>} : memref<400x32xf32, #tpu.memory_space<vmem>>, vector<9x32xf32>
    %c27_207 = arith.constant 27 : index
    %c480_208 = arith.constant 480 : index
    %137 = vector.load %arg10[%c27_207, %c480_208] : memref<81x512xf32, #tpu.memory_space<vmem>>, vector<9x32xf32>
    tpu.vector_store %arg10[%c27_207, %c480_208], %136 {strides = array<i32>} : memref<81x512xf32, #tpu.memory_space<vmem>>, vector<9x32xf32>,
    %c160_209 = arith.constant 160 : index
    %c0_210 = arith.constant 0 : index
    %138 = tpu.strided_load %arg9[%c160_209, %c0_210] {strides = array<i32: 2, 1>} : memref<400x32xf32, #tpu.memory_space<vmem>>, vector<9x32xf32>
    %c36 = arith.constant 36 : index
    %c0_211 = arith.constant 0 : index
    %139 = vector.load %arg10[%c36, %c0_211] : memref<81x512xf32, #tpu.memory_space<vmem>>, vector<9x32xf32>
    tpu.vector_store %arg10[%c36, %c0_211], %138 {strides = array<i32>} : memref<81x512xf32, #tpu.memory_space<vmem>>, vector<9x32xf32>,
    %c161_212 = arith.constant 161 : index
    %c0_213 = arith.constant 0 : index
    %140 = tpu.strided_load %arg9[%c161_212, %c0_213] {strides = array<i32: 2, 1>} : memref<400x32xf32, #tpu.memory_space<vmem>>, vector<9x32xf32>
    %c36_214 = arith.constant 36 : index
    %c32_215 = arith.constant 32 : index
    %141 = vector.load %arg10[%c36_214, %c32_215] : memref<81x512xf32, #tpu.memory_space<vmem>>, vector<9x32xf32>
    tpu.vector_store %arg10[%c36_214, %c32_215], %140 {strides = array<i32>} : memref<81x512xf32, #tpu.memory_space<vmem>>, vector<9x32xf32>,
    %c162_216 = arith.constant 162 : index
    %c0_217 = arith.constant 0 : index
    %142 = tpu.strided_load %arg9[%c162_216, %c0_217] {strides = array<i32: 2, 1>} : memref<400x32xf32, #tpu.memory_space<vmem>>, vector<9x32xf32>
    %c36_218 = arith.constant 36 : index
    %c64_219 = arith.constant 64 : index
    %143 = vector.load %arg10[%c36_218, %c64_219] : memref<81x512xf32, #tpu.memory_space<vmem>>, vector<9x32xf32>
    tpu.vector_store %arg10[%c36_218, %c64_219], %142 {strides = array<i32>} : memref<81x512xf32, #tpu.memory_space<vmem>>, vector<9x32xf32>,
    %c163_220 = arith.constant 163 : index
    %c0_221 = arith.constant 0 : index
    %144 = tpu.strided_load %arg9[%c163_220, %c0_221] {strides = array<i32: 2, 1>} : memref<400x32xf32, #tpu.memory_space<vmem>>, vector<9x32xf32>
    %c36_222 = arith.constant 36 : index
    %c96_223 = arith.constant 96 : index
    %145 = vector.load %arg10[%c36_222, %c96_223] : memref<81x512xf32, #tpu.memory_space<vmem>>, vector<9x32xf32>
    tpu.vector_store %arg10[%c36_222, %c96_223], %144 {strides = array<i32>} : memref<81x512xf32, #tpu.memory_space<vmem>>, vector<9x32xf32>,
    %c180_224 = arith.constant 180 : index
    %c0_225 = arith.constant 0 : index
    %146 = tpu.strided_load %arg9[%c180_224, %c0_225] {strides = array<i32: 2, 1>} : memref<400x32xf32, #tpu.memory_space<vmem>>, vector<9x32xf32>
    %c36_226 = arith.constant 36 : index
    %c128_227 = arith.constant 128 : index
    %147 = vector.load %arg10[%c36_226, %c128_227] : memref<81x512xf32, #tpu.memory_space<vmem>>, vector<9x32xf32>
    tpu.vector_store %arg10[%c36_226, %c128_227], %146 {strides = array<i32>} : memref<81x512xf32, #tpu.memory_space<vmem>>, vector<9x32xf32>,
    %c181_228 = arith.constant 181 : index
    %c0_229 = arith.constant 0 : index
    %148 = tpu.strided_load %arg9[%c181_228, %c0_229] {strides = array<i32: 2, 1>} : memref<400x32xf32, #tpu.memory_space<vmem>>, vector<9x32xf32>
    %c36_230 = arith.constant 36 : index
    %c160_231 = arith.constant 160 : index
    %149 = vector.load %arg10[%c36_230, %c160_231] : memref<81x512xf32, #tpu.memory_space<vmem>>, vector<9x32xf32>
    tpu.vector_store %arg10[%c36_230, %c160_231], %148 {strides = array<i32>} : memref<81x512xf32, #tpu.memory_space<vmem>>, vector<9x32xf32>,
    %c182_232 = arith.constant 182 : index
    %c0_233 = arith.constant 0 : index
    %150 = tpu.strided_load %arg9[%c182_232, %c0_233] {strides = array<i32: 2, 1>} : memref<400x32xf32, #tpu.memory_space<vmem>>, vector<9x32xf32>
    %c36_234 = arith.constant 36 : index
    %c192_235 = arith.constant 192 : index
    %151 = vector.load %arg10[%c36_234, %c192_235] : memref<81x512xf32, #tpu.memory_space<vmem>>, vector<9x32xf32>
    tpu.vector_store %arg10[%c36_234, %c192_235], %150 {strides = array<i32>} : memref<81x512xf32, #tpu.memory_space<vmem>>, vector<9x32xf32>,
    %c183_236 = arith.constant 183 : index
    %c0_237 = arith.constant 0 : index
    %152 = tpu.strided_load %arg9[%c183_236, %c0_237] {strides = array<i32: 2, 1>} : memref<400x32xf32, #tpu.memory_space<vmem>>, vector<9x32xf32>
    %c36_238 = arith.constant 36 : index
    %c224_239 = arith.constant 224 : index
    %153 = vector.load %arg10[%c36_238, %c224_239] : memref<81x512xf32, #tpu.memory_space<vmem>>, vector<9x32xf32>
    tpu.vector_store %arg10[%c36_238, %c224_239], %152 {strides = array<i32>} : memref<81x512xf32, #tpu.memory_space<vmem>>, vector<9x32xf32>,
    %c200 = arith.constant 200 : index
    %c0_240 = arith.constant 0 : index
    %154 = tpu.strided_load %arg9[%c200, %c0_240] {strides = array<i32: 2, 1>} : memref<400x32xf32, #tpu.memory_space<vmem>>, vector<9x32xf32>
    %c36_241 = arith.constant 36 : index
    %c256_242 = arith.constant 256 : index
    %155 = vector.load %arg10[%c36_241, %c256_242] : memref<81x512xf32, #tpu.memory_space<vmem>>, vector<9x32xf32>
    tpu.vector_store %arg10[%c36_241, %c256_242], %154 {strides = array<i32>} : memref<81x512xf32, #tpu.memory_space<vmem>>, vector<9x32xf32>,
    %c201 = arith.constant 201 : index
    %c0_243 = arith.constant 0 : index
    %156 = tpu.strided_load %arg9[%c201, %c0_243] {strides = array<i32: 2, 1>} : memref<400x32xf32, #tpu.memory_space<vmem>>, vector<9x32xf32>
    %c36_244 = arith.constant 36 : index
    %c288_245 = arith.constant 288 : index
    %157 = vector.load %arg10[%c36_244, %c288_245] : memref<81x512xf32, #tpu.memory_space<vmem>>, vector<9x32xf32>
    tpu.vector_store %arg10[%c36_244, %c288_245], %156 {strides = array<i32>} : memref<81x512xf32, #tpu.memory_space<vmem>>, vector<9x32xf32>,
    %c202 = arith.constant 202 : index
    %c0_246 = arith.constant 0 : index
    %158 = tpu.strided_load %arg9[%c202, %c0_246] {strides = array<i32: 2, 1>} : memref<400x32xf32, #tpu.memory_space<vmem>>, vector<9x32xf32>
    %c36_247 = arith.constant 36 : index
    %c320_248 = arith.constant 320 : index
    %159 = vector.load %arg10[%c36_247, %c320_248] : memref<81x512xf32, #tpu.memory_space<vmem>>, vector<9x32xf32>
    tpu.vector_store %arg10[%c36_247, %c320_248], %158 {strides = array<i32>} : memref<81x512xf32, #tpu.memory_space<vmem>>, vector<9x32xf32>,
    %c203 = arith.constant 203 : index
    %c0_249 = arith.constant 0 : index
    %160 = tpu.strided_load %arg9[%c203, %c0_249] {strides = array<i32: 2, 1>} : memref<400x32xf32, #tpu.memory_space<vmem>>, vector<9x32xf32>
    %c36_250 = arith.constant 36 : index
    %c352_251 = arith.constant 352 : index
    %161 = vector.load %arg10[%c36_250, %c352_251] : memref<81x512xf32, #tpu.memory_space<vmem>>, vector<9x32xf32>
    tpu.vector_store %arg10[%c36_250, %c352_251], %160 {strides = array<i32>} : memref<81x512xf32, #tpu.memory_space<vmem>>, vector<9x32xf32>,
    %c220 = arith.constant 220 : index
    %c0_252 = arith.constant 0 : index
    %162 = tpu.strided_load %arg9[%c220, %c0_252] {strides = array<i32: 2, 1>} : memref<400x32xf32, #tpu.memory_space<vmem>>, vector<9x32xf32>
    %c36_253 = arith.constant 36 : index
    %c384_254 = arith.constant 384 : index
    %163 = vector.load %arg10[%c36_253, %c384_254] : memref<81x512xf32, #tpu.memory_space<vmem>>, vector<9x32xf32>
    tpu.vector_store %arg10[%c36_253, %c384_254], %162 {strides = array<i32>} : memref<81x512xf32, #tpu.memory_space<vmem>>, vector<9x32xf32>,
    %c221 = arith.constant 221 : index
    %c0_255 = arith.constant 0 : index
    %164 = tpu.strided_load %arg9[%c221, %c0_255] {strides = array<i32: 2, 1>} : memref<400x32xf32, #tpu.memory_space<vmem>>, vector<9x32xf32>
    %c36_256 = arith.constant 36 : index
    %c416_257 = arith.constant 416 : index
    %165 = vector.load %arg10[%c36_256, %c416_257] : memref<81x512xf32, #tpu.memory_space<vmem>>, vector<9x32xf32>
    tpu.vector_store %arg10[%c36_256, %c416_257], %164 {strides = array<i32>} : memref<81x512xf32, #tpu.memory_space<vmem>>, vector<9x32xf32>,
    %c222 = arith.constant 222 : index
    %c0_258 = arith.constant 0 : index
    %166 = tpu.strided_load %arg9[%c222, %c0_258] {strides = array<i32: 2, 1>} : memref<400x32xf32, #tpu.memory_space<vmem>>, vector<9x32xf32>
    %c36_259 = arith.constant 36 : index
    %c448_260 = arith.constant 448 : index
    %167 = vector.load %arg10[%c36_259, %c448_260] : memref<81x512xf32, #tpu.memory_space<vmem>>, vector<9x32xf32>
    tpu.vector_store %arg10[%c36_259, %c448_260], %166 {strides = array<i32>} : memref<81x512xf32, #tpu.memory_space<vmem>>, vector<9x32xf32>,
    %c223 = arith.constant 223 : index
    %c0_261 = arith.constant 0 : index
    %168 = tpu.strided_load %arg9[%c223, %c0_261] {strides = array<i32: 2, 1>} : memref<400x32xf32, #tpu.memory_space<vmem>>, vector<9x32xf32>
    %c36_262 = arith.constant 36 : index
    %c480_263 = arith.constant 480 : index
    %169 = vector.load %arg10[%c36_262, %c480_263] : memref<81x512xf32, #tpu.memory_space<vmem>>, vector<9x32xf32>
    tpu.vector_store %arg10[%c36_262, %c480_263], %168 {strides = array<i32>} : memref<81x512xf32, #tpu.memory_space<vmem>>, vector<9x32xf32>,
    %c200_264 = arith.constant 200 : index
    %c0_265 = arith.constant 0 : index
    %170 = tpu.strided_load %arg9[%c200_264, %c0_265] {strides = array<i32: 2, 1>} : memref<400x32xf32, #tpu.memory_space<vmem>>, vector<9x32xf32>
    %c45 = arith.constant 45 : index
    %c0_266 = arith.constant 0 : index
    %171 = vector.load %arg10[%c45, %c0_266] : memref<81x512xf32, #tpu.memory_space<vmem>>, vector<9x32xf32>
    tpu.vector_store %arg10[%c45, %c0_266], %170 {strides = array<i32>} : memref<81x512xf32, #tpu.memory_space<vmem>>, vector<9x32xf32>,
    %c201_267 = arith.constant 201 : index
    %c0_268 = arith.constant 0 : index
    %172 = tpu.strided_load %arg9[%c201_267, %c0_268] {strides = array<i32: 2, 1>} : memref<400x32xf32, #tpu.memory_space<vmem>>, vector<9x32xf32>
    %c45_269 = arith.constant 45 : index
    %c32_270 = arith.constant 32 : index
    %173 = vector.load %arg10[%c45_269, %c32_270] : memref<81x512xf32, #tpu.memory_space<vmem>>, vector<9x32xf32>
    tpu.vector_store %arg10[%c45_269, %c32_270], %172 {strides = array<i32>} : memref<81x512xf32, #tpu.memory_space<vmem>>, vector<9x32xf32>,
    %c202_271 = arith.constant 202 : index
    %c0_272 = arith.constant 0 : index
    %174 = tpu.strided_load %arg9[%c202_271, %c0_272] {strides = array<i32: 2, 1>} : memref<400x32xf32, #tpu.memory_space<vmem>>, vector<9x32xf32>
    %c45_273 = arith.constant 45 : index
    %c64_274 = arith.constant 64 : index
    %175 = vector.load %arg10[%c45_273, %c64_274] : memref<81x512xf32, #tpu.memory_space<vmem>>, vector<9x32xf32>
    tpu.vector_store %arg10[%c45_273, %c64_274], %174 {strides = array<i32>} : memref<81x512xf32, #tpu.memory_space<vmem>>, vector<9x32xf32>,
    %c203_275 = arith.constant 203 : index
    %c0_276 = arith.constant 0 : index
    %176 = tpu.strided_load %arg9[%c203_275, %c0_276] {strides = array<i32: 2, 1>} : memref<400x32xf32, #tpu.memory_space<vmem>>, vector<9x32xf32>
    %c45_277 = arith.constant 45 : index
    %c96_278 = arith.constant 96 : index
    %177 = vector.load %arg10[%c45_277, %c96_278] : memref<81x512xf32, #tpu.memory_space<vmem>>, vector<9x32xf32>
    tpu.vector_store %arg10[%c45_277, %c96_278], %176 {strides = array<i32>} : memref<81x512xf32, #tpu.memory_space<vmem>>, vector<9x32xf32>,
    %c220_279 = arith.constant 220 : index
    %c0_280 = arith.constant 0 : index
    %178 = tpu.strided_load %arg9[%c220_279, %c0_280] {strides = array<i32: 2, 1>} : memref<400x32xf32, #tpu.memory_space<vmem>>, vector<9x32xf32>
    %c45_281 = arith.constant 45 : index
    %c128_282 = arith.constant 128 : index
    %179 = vector.load %arg10[%c45_281, %c128_282] : memref<81x512xf32, #tpu.memory_space<vmem>>, vector<9x32xf32>
    tpu.vector_store %arg10[%c45_281, %c128_282], %178 {strides = array<i32>} : memref<81x512xf32, #tpu.memory_space<vmem>>, vector<9x32xf32>,
    %c221_283 = arith.constant 221 : index
    %c0_284 = arith.constant 0 : index
    %180 = tpu.strided_load %arg9[%c221_283, %c0_284] {strides = array<i32: 2, 1>} : memref<400x32xf32, #tpu.memory_space<vmem>>, vector<9x32xf32>
    %c45_285 = arith.constant 45 : index
    %c160_286 = arith.constant 160 : index
    %181 = vector.load %arg10[%c45_285, %c160_286] : memref<81x512xf32, #tpu.memory_space<vmem>>, vector<9x32xf32>
    tpu.vector_store %arg10[%c45_285, %c160_286], %180 {strides = array<i32>} : memref<81x512xf32, #tpu.memory_space<vmem>>, vector<9x32xf32>,
    %c222_287 = arith.constant 222 : index
    %c0_288 = arith.constant 0 : index
    %182 = tpu.strided_load %arg9[%c222_287, %c0_288] {strides = array<i32: 2, 1>} : memref<400x32xf32, #tpu.memory_space<vmem>>, vector<9x32xf32>
    %c45_289 = arith.constant 45 : index
    %c192_290 = arith.constant 192 : index
    %183 = vector.load %arg10[%c45_289, %c192_290] : memref<81x512xf32, #tpu.memory_space<vmem>>, vector<9x32xf32>
    tpu.vector_store %arg10[%c45_289, %c192_290], %182 {strides = array<i32>} : memref<81x512xf32, #tpu.memory_space<vmem>>, vector<9x32xf32>,
    %c223_291 = arith.constant 223 : index
    %c0_292 = arith.constant 0 : index
    %184 = tpu.strided_load %arg9[%c223_291, %c0_292] {strides = array<i32: 2, 1>} : memref<400x32xf32, #tpu.memory_space<vmem>>, vector<9x32xf32>
    %c45_293 = arith.constant 45 : index
    %c224_294 = arith.constant 224 : index
    %185 = vector.load %arg10[%c45_293, %c224_294] : memref<81x512xf32, #tpu.memory_space<vmem>>, vector<9x32xf32>
    tpu.vector_store %arg10[%c45_293, %c224_294], %184 {strides = array<i32>} : memref<81x512xf32, #tpu.memory_space<vmem>>, vector<9x32xf32>,
    %c240 = arith.constant 240 : index
    %c0_295 = arith.constant 0 : index
    %186 = tpu.strided_load %arg9[%c240, %c0_295] {strides = array<i32: 2, 1>} : memref<400x32xf32, #tpu.memory_space<vmem>>, vector<9x32xf32>
    %c45_296 = arith.constant 45 : index
    %c256_297 = arith.constant 256 : index
    %187 = vector.load %arg10[%c45_296, %c256_297] : memref<81x512xf32, #tpu.memory_space<vmem>>, vector<9x32xf32>
    tpu.vector_store %arg10[%c45_296, %c256_297], %186 {strides = array<i32>} : memref<81x512xf32, #tpu.memory_space<vmem>>, vector<9x32xf32>,
    %c241 = arith.constant 241 : index
    %c0_298 = arith.constant 0 : index
    %188 = tpu.strided_load %arg9[%c241, %c0_298] {strides = array<i32: 2, 1>} : memref<400x32xf32, #tpu.memory_space<vmem>>, vector<9x32xf32>
    %c45_299 = arith.constant 45 : index
    %c288_300 = arith.constant 288 : index
    %189 = vector.load %arg10[%c45_299, %c288_300] : memref<81x512xf32, #tpu.memory_space<vmem>>, vector<9x32xf32>
    tpu.vector_store %arg10[%c45_299, %c288_300], %188 {strides = array<i32>} : memref<81x512xf32, #tpu.memory_space<vmem>>, vector<9x32xf32>,
    %c242 = arith.constant 242 : index
    %c0_301 = arith.constant 0 : index
    %190 = tpu.strided_load %arg9[%c242, %c0_301] {strides = array<i32: 2, 1>} : memref<400x32xf32, #tpu.memory_space<vmem>>, vector<9x32xf32>
    %c45_302 = arith.constant 45 : index
    %c320_303 = arith.constant 320 : index
    %191 = vector.load %arg10[%c45_302, %c320_303] : memref<81x512xf32, #tpu.memory_space<vmem>>, vector<9x32xf32>
    tpu.vector_store %arg10[%c45_302, %c320_303], %190 {strides = array<i32>} : memref<81x512xf32, #tpu.memory_space<vmem>>, vector<9x32xf32>,
    %c243 = arith.constant 243 : index
    %c0_304 = arith.constant 0 : index
    %192 = tpu.strided_load %arg9[%c243, %c0_304] {strides = array<i32: 2, 1>} : memref<400x32xf32, #tpu.memory_space<vmem>>, vector<9x32xf32>
    %c45_305 = arith.constant 45 : index
    %c352_306 = arith.constant 352 : index
    %193 = vector.load %arg10[%c45_305, %c352_306] : memref<81x512xf32, #tpu.memory_space<vmem>>, vector<9x32xf32>
    tpu.vector_store %arg10[%c45_305, %c352_306], %192 {strides = array<i32>} : memref<81x512xf32, #tpu.memory_space<vmem>>, vector<9x32xf32>,
    %c260 = arith.constant 260 : index
    %c0_307 = arith.constant 0 : index
    %194 = tpu.strided_load %arg9[%c260, %c0_307] {strides = array<i32: 2, 1>} : memref<400x32xf32, #tpu.memory_space<vmem>>, vector<9x32xf32>
    %c45_308 = arith.constant 45 : index
    %c384_309 = arith.constant 384 : index
    %195 = vector.load %arg10[%c45_308, %c384_309] : memref<81x512xf32, #tpu.memory_space<vmem>>, vector<9x32xf32>
    tpu.vector_store %arg10[%c45_308, %c384_309], %194 {strides = array<i32>} : memref<81x512xf32, #tpu.memory_space<vmem>>, vector<9x32xf32>,
    %c261 = arith.constant 261 : index
    %c0_310 = arith.constant 0 : index
    %196 = tpu.strided_load %arg9[%c261, %c0_310] {strides = array<i32: 2, 1>} : memref<400x32xf32, #tpu.memory_space<vmem>>, vector<9x32xf32>
    %c45_311 = arith.constant 45 : index
    %c416_312 = arith.constant 416 : index
    %197 = vector.load %arg10[%c45_311, %c416_312] : memref<81x512xf32, #tpu.memory_space<vmem>>, vector<9x32xf32>
    tpu.vector_store %arg10[%c45_311, %c416_312], %196 {strides = array<i32>} : memref<81x512xf32, #tpu.memory_space<vmem>>, vector<9x32xf32>,
    %c262 = arith.constant 262 : index
    %c0_313 = arith.constant 0 : index
    %198 = tpu.strided_load %arg9[%c262, %c0_313] {strides = array<i32: 2, 1>} : memref<400x32xf32, #tpu.memory_space<vmem>>, vector<9x32xf32>
    %c45_314 = arith.constant 45 : index
    %c448_315 = arith.constant 448 : index
    %199 = vector.load %arg10[%c45_314, %c448_315] : memref<81x512xf32, #tpu.memory_space<vmem>>, vector<9x32xf32>
    tpu.vector_store %arg10[%c45_314, %c448_315], %198 {strides = array<i32>} : memref<81x512xf32, #tpu.memory_space<vmem>>, vector<9x32xf32>,
    %c263 = arith.constant 263 : index
    %c0_316 = arith.constant 0 : index
    %200 = tpu.strided_load %arg9[%c263, %c0_316] {strides = array<i32: 2, 1>} : memref<400x32xf32, #tpu.memory_space<vmem>>, vector<9x32xf32>
    %c45_317 = arith.constant 45 : index
    %c480_318 = arith.constant 480 : index
    %201 = vector.load %arg10[%c45_317, %c480_318] : memref<81x512xf32, #tpu.memory_space<vmem>>, vector<9x32xf32>
    tpu.vector_store %arg10[%c45_317, %c480_318], %200 {strides = array<i32>} : memref<81x512xf32, #tpu.memory_space<vmem>>, vector<9x32xf32>,
    %c240_319 = arith.constant 240 : index
    %c0_320 = arith.constant 0 : index
    %202 = tpu.strided_load %arg9[%c240_319, %c0_320] {strides = array<i32: 2, 1>} : memref<400x32xf32, #tpu.memory_space<vmem>>, vector<9x32xf32>
    %c54 = arith.constant 54 : index
    %c0_321 = arith.constant 0 : index
    %203 = vector.load %arg10[%c54, %c0_321] : memref<81x512xf32, #tpu.memory_space<vmem>>, vector<9x32xf32>
    tpu.vector_store %arg10[%c54, %c0_321], %202 {strides = array<i32>} : memref<81x512xf32, #tpu.memory_space<vmem>>, vector<9x32xf32>,
    %c241_322 = arith.constant 241 : index
    %c0_323 = arith.constant 0 : index
    %204 = tpu.strided_load %arg9[%c241_322, %c0_323] {strides = array<i32: 2, 1>} : memref<400x32xf32, #tpu.memory_space<vmem>>, vector<9x32xf32>
    %c54_324 = arith.constant 54 : index
    %c32_325 = arith.constant 32 : index
    %205 = vector.load %arg10[%c54_324, %c32_325] : memref<81x512xf32, #tpu.memory_space<vmem>>, vector<9x32xf32>
    tpu.vector_store %arg10[%c54_324, %c32_325], %204 {strides = array<i32>} : memref<81x512xf32, #tpu.memory_space<vmem>>, vector<9x32xf32>,
    %c242_326 = arith.constant 242 : index
    %c0_327 = arith.constant 0 : index
    %206 = tpu.strided_load %arg9[%c242_326, %c0_327] {strides = array<i32: 2, 1>} : memref<400x32xf32, #tpu.memory_space<vmem>>, vector<9x32xf32>
    %c54_328 = arith.constant 54 : index
    %c64_329 = arith.constant 64 : index
    %207 = vector.load %arg10[%c54_328, %c64_329] : memref<81x512xf32, #tpu.memory_space<vmem>>, vector<9x32xf32>
    tpu.vector_store %arg10[%c54_328, %c64_329], %206 {strides = array<i32>} : memref<81x512xf32, #tpu.memory_space<vmem>>, vector<9x32xf32>,
    %c243_330 = arith.constant 243 : index
    %c0_331 = arith.constant 0 : index
    %208 = tpu.strided_load %arg9[%c243_330, %c0_331] {strides = array<i32: 2, 1>} : memref<400x32xf32, #tpu.memory_space<vmem>>, vector<9x32xf32>
    %c54_332 = arith.constant 54 : index
    %c96_333 = arith.constant 96 : index
    %209 = vector.load %arg10[%c54_332, %c96_333] : memref<81x512xf32, #tpu.memory_space<vmem>>, vector<9x32xf32>
    tpu.vector_store %arg10[%c54_332, %c96_333], %208 {strides = array<i32>} : memref<81x512xf32, #tpu.memory_space<vmem>>, vector<9x32xf32>,
    %c260_334 = arith.constant 260 : index
    %c0_335 = arith.constant 0 : index
    %210 = tpu.strided_load %arg9[%c260_334, %c0_335] {strides = array<i32: 2, 1>} : memref<400x32xf32, #tpu.memory_space<vmem>>, vector<9x32xf32>
    %c54_336 = arith.constant 54 : index
    %c128_337 = arith.constant 128 : index
    %211 = vector.load %arg10[%c54_336, %c128_337] : memref<81x512xf32, #tpu.memory_space<vmem>>, vector<9x32xf32>
    tpu.vector_store %arg10[%c54_336, %c128_337], %210 {strides = array<i32>} : memref<81x512xf32, #tpu.memory_space<vmem>>, vector<9x32xf32>,
    %c261_338 = arith.constant 261 : index
    %c0_339 = arith.constant 0 : index
    %212 = tpu.strided_load %arg9[%c261_338, %c0_339] {strides = array<i32: 2, 1>} : memref<400x32xf32, #tpu.memory_space<vmem>>, vector<9x32xf32>
    %c54_340 = arith.constant 54 : index
    %c160_341 = arith.constant 160 : index
    %213 = vector.load %arg10[%c54_340, %c160_341] : memref<81x512xf32, #tpu.memory_space<vmem>>, vector<9x32xf32>
    tpu.vector_store %arg10[%c54_340, %c160_341], %212 {strides = array<i32>} : memref<81x512xf32, #tpu.memory_space<vmem>>, vector<9x32xf32>,
    %c262_342 = arith.constant 262 : index
    %c0_343 = arith.constant 0 : index
    %214 = tpu.strided_load %arg9[%c262_342, %c0_343] {strides = array<i32: 2, 1>} : memref<400x32xf32, #tpu.memory_space<vmem>>, vector<9x32xf32>
    %c54_344 = arith.constant 54 : index
    %c192_345 = arith.constant 192 : index
    %215 = vector.load %arg10[%c54_344, %c192_345] : memref<81x512xf32, #tpu.memory_space<vmem>>, vector<9x32xf32>
    tpu.vector_store %arg10[%c54_344, %c192_345], %214 {strides = array<i32>} : memref<81x512xf32, #tpu.memory_space<vmem>>, vector<9x32xf32>,
    %c263_346 = arith.constant 263 : index
    %c0_347 = arith.constant 0 : index
    %216 = tpu.strided_load %arg9[%c263_346, %c0_347] {strides = array<i32: 2, 1>} : memref<400x32xf32, #tpu.memory_space<vmem>>, vector<9x32xf32>
    %c54_348 = arith.constant 54 : index
    %c224_349 = arith.constant 224 : index
    %217 = vector.load %arg10[%c54_348, %c224_349] : memref<81x512xf32, #tpu.memory_space<vmem>>, vector<9x32xf32>
    tpu.vector_store %arg10[%c54_348, %c224_349], %216 {strides = array<i32>} : memref<81x512xf32, #tpu.memory_space<vmem>>, vector<9x32xf32>,
    %c280 = arith.constant 280 : index
    %c0_350 = arith.constant 0 : index
    %218 = tpu.strided_load %arg9[%c280, %c0_350] {strides = array<i32: 2, 1>} : memref<400x32xf32, #tpu.memory_space<vmem>>, vector<9x32xf32>
    %c54_351 = arith.constant 54 : index
    %c256_352 = arith.constant 256 : index
    %219 = vector.load %arg10[%c54_351, %c256_352] : memref<81x512xf32, #tpu.memory_space<vmem>>, vector<9x32xf32>
    tpu.vector_store %arg10[%c54_351, %c256_352], %218 {strides = array<i32>} : memref<81x512xf32, #tpu.memory_space<vmem>>, vector<9x32xf32>,
    %c281 = arith.constant 281 : index
    %c0_353 = arith.constant 0 : index
    %220 = tpu.strided_load %arg9[%c281, %c0_353] {strides = array<i32: 2, 1>} : memref<400x32xf32, #tpu.memory_space<vmem>>, vector<9x32xf32>
    %c54_354 = arith.constant 54 : index
    %c288_355 = arith.constant 288 : index
    %221 = vector.load %arg10[%c54_354, %c288_355] : memref<81x512xf32, #tpu.memory_space<vmem>>, vector<9x32xf32>
    tpu.vector_store %arg10[%c54_354, %c288_355], %220 {strides = array<i32>} : memref<81x512xf32, #tpu.memory_space<vmem>>, vector<9x32xf32>,
    %c282 = arith.constant 282 : index
    %c0_356 = arith.constant 0 : index
    %222 = tpu.strided_load %arg9[%c282, %c0_356] {strides = array<i32: 2, 1>} : memref<400x32xf32, #tpu.memory_space<vmem>>, vector<9x32xf32>
    %c54_357 = arith.constant 54 : index
    %c320_358 = arith.constant 320 : index
    %223 = vector.load %arg10[%c54_357, %c320_358] : memref<81x512xf32, #tpu.memory_space<vmem>>, vector<9x32xf32>
    tpu.vector_store %arg10[%c54_357, %c320_358], %222 {strides = array<i32>} : memref<81x512xf32, #tpu.memory_space<vmem>>, vector<9x32xf32>,
    %c283 = arith.constant 283 : index
    %c0_359 = arith.constant 0 : index
    %224 = tpu.strided_load %arg9[%c283, %c0_359] {strides = array<i32: 2, 1>} : memref<400x32xf32, #tpu.memory_space<vmem>>, vector<9x32xf32>
    %c54_360 = arith.constant 54 : index
    %c352_361 = arith.constant 352 : index
    %225 = vector.load %arg10[%c54_360, %c352_361] : memref<81x512xf32, #tpu.memory_space<vmem>>, vector<9x32xf32>
    tpu.vector_store %arg10[%c54_360, %c352_361], %224 {strides = array<i32>} : memref<81x512xf32, #tpu.memory_space<vmem>>, vector<9x32xf32>,
    %c300 = arith.constant 300 : index
    %c0_362 = arith.constant 0 : index
    %226 = tpu.strided_load %arg9[%c300, %c0_362] {strides = array<i32: 2, 1>} : memref<400x32xf32, #tpu.memory_space<vmem>>, vector<9x32xf32>
    %c54_363 = arith.constant 54 : index
    %c384_364 = arith.constant 384 : index
    %227 = vector.load %arg10[%c54_363, %c384_364] : memref<81x512xf32, #tpu.memory_space<vmem>>, vector<9x32xf32>
    tpu.vector_store %arg10[%c54_363, %c384_364], %226 {strides = array<i32>} : memref<81x512xf32, #tpu.memory_space<vmem>>, vector<9x32xf32>,
    %c301 = arith.constant 301 : index
    %c0_365 = arith.constant 0 : index
    %228 = tpu.strided_load %arg9[%c301, %c0_365] {strides = array<i32: 2, 1>} : memref<400x32xf32, #tpu.memory_space<vmem>>, vector<9x32xf32>
    %c54_366 = arith.constant 54 : index
    %c416_367 = arith.constant 416 : index
    %229 = vector.load %arg10[%c54_366, %c416_367] : memref<81x512xf32, #tpu.memory_space<vmem>>, vector<9x32xf32>
    tpu.vector_store %arg10[%c54_366, %c416_367], %228 {strides = array<i32>} : memref<81x512xf32, #tpu.memory_space<vmem>>, vector<9x32xf32>,
    %c302 = arith.constant 302 : index
    %c0_368 = arith.constant 0 : index
    %230 = tpu.strided_load %arg9[%c302, %c0_368] {strides = array<i32: 2, 1>} : memref<400x32xf32, #tpu.memory_space<vmem>>, vector<9x32xf32>
    %c54_369 = arith.constant 54 : index
    %c448_370 = arith.constant 448 : index
    %231 = vector.load %arg10[%c54_369, %c448_370] : memref<81x512xf32, #tpu.memory_space<vmem>>, vector<9x32xf32>
    tpu.vector_store %arg10[%c54_369, %c448_370], %230 {strides = array<i32>} : memref<81x512xf32, #tpu.memory_space<vmem>>, vector<9x32xf32>,
    %c303 = arith.constant 303 : index
    %c0_371 = arith.constant 0 : index
    %232 = tpu.strided_load %arg9[%c303, %c0_371] {strides = array<i32: 2, 1>} : memref<400x32xf32, #tpu.memory_space<vmem>>, vector<9x32xf32>
    %c54_372 = arith.constant 54 : index
    %c480_373 = arith.constant 480 : index
    %233 = vector.load %arg10[%c54_372, %c480_373] : memref<81x512xf32, #tpu.memory_space<vmem>>, vector<9x32xf32>
    tpu.vector_store %arg10[%c54_372, %c480_373], %232 {strides = array<i32>} : memref<81x512xf32, #tpu.memory_space<vmem>>, vector<9x32xf32>,
    %c280_374 = arith.constant 280 : index
    %c0_375 = arith.constant 0 : index
    %234 = tpu.strided_load %arg9[%c280_374, %c0_375] {strides = array<i32: 2, 1>} : memref<400x32xf32, #tpu.memory_space<vmem>>, vector<9x32xf32>
    %c63_376 = arith.constant 63 : index
    %c0_377 = arith.constant 0 : index
    %235 = vector.load %arg10[%c63_376, %c0_377] : memref<81x512xf32, #tpu.memory_space<vmem>>, vector<9x32xf32>
    tpu.vector_store %arg10[%c63_376, %c0_377], %234 {strides = array<i32>} : memref<81x512xf32, #tpu.memory_space<vmem>>, vector<9x32xf32>,
    %c281_378 = arith.constant 281 : index
    %c0_379 = arith.constant 0 : index
    %236 = tpu.strided_load %arg9[%c281_378, %c0_379] {strides = array<i32: 2, 1>} : memref<400x32xf32, #tpu.memory_space<vmem>>, vector<9x32xf32>
    %c63_380 = arith.constant 63 : index
    %c32_381 = arith.constant 32 : index
    %237 = vector.load %arg10[%c63_380, %c32_381] : memref<81x512xf32, #tpu.memory_space<vmem>>, vector<9x32xf32>
    tpu.vector_store %arg10[%c63_380, %c32_381], %236 {strides = array<i32>} : memref<81x512xf32, #tpu.memory_space<vmem>>, vector<9x32xf32>,
    %c282_382 = arith.constant 282 : index
    %c0_383 = arith.constant 0 : index
    %238 = tpu.strided_load %arg9[%c282_382, %c0_383] {strides = array<i32: 2, 1>} : memref<400x32xf32, #tpu.memory_space<vmem>>, vector<9x32xf32>
    %c63_384 = arith.constant 63 : index
    %c64_385 = arith.constant 64 : index
    %239 = vector.load %arg10[%c63_384, %c64_385] : memref<81x512xf32, #tpu.memory_space<vmem>>, vector<9x32xf32>
    tpu.vector_store %arg10[%c63_384, %c64_385], %238 {strides = array<i32>} : memref<81x512xf32, #tpu.memory_space<vmem>>, vector<9x32xf32>,
    %c283_386 = arith.constant 283 : index
    %c0_387 = arith.constant 0 : index
    %240 = tpu.strided_load %arg9[%c283_386, %c0_387] {strides = array<i32: 2, 1>} : memref<400x32xf32, #tpu.memory_space<vmem>>, vector<9x32xf32>
    %c63_388 = arith.constant 63 : index
    %c96_389 = arith.constant 96 : index
    %241 = vector.load %arg10[%c63_388, %c96_389] : memref<81x512xf32, #tpu.memory_space<vmem>>, vector<9x32xf32>
    tpu.vector_store %arg10[%c63_388, %c96_389], %240 {strides = array<i32>} : memref<81x512xf32, #tpu.memory_space<vmem>>, vector<9x32xf32>,
    %c300_390 = arith.constant 300 : index
    %c0_391 = arith.constant 0 : index
    %242 = tpu.strided_load %arg9[%c300_390, %c0_391] {strides = array<i32: 2, 1>} : memref<400x32xf32, #tpu.memory_space<vmem>>, vector<9x32xf32>
    %c63_392 = arith.constant 63 : index
    %c128_393 = arith.constant 128 : index
    %243 = vector.load %arg10[%c63_392, %c128_393] : memref<81x512xf32, #tpu.memory_space<vmem>>, vector<9x32xf32>
    tpu.vector_store %arg10[%c63_392, %c128_393], %242 {strides = array<i32>} : memref<81x512xf32, #tpu.memory_space<vmem>>, vector<9x32xf32>,
    %c301_394 = arith.constant 301 : index
    %c0_395 = arith.constant 0 : index
    %244 = tpu.strided_load %arg9[%c301_394, %c0_395] {strides = array<i32: 2, 1>} : memref<400x32xf32, #tpu.memory_space<vmem>>, vector<9x32xf32>
    %c63_396 = arith.constant 63 : index
    %c160_397 = arith.constant 160 : index
    %245 = vector.load %arg10[%c63_396, %c160_397] : memref<81x512xf32, #tpu.memory_space<vmem>>, vector<9x32xf32>
    tpu.vector_store %arg10[%c63_396, %c160_397], %244 {strides = array<i32>} : memref<81x512xf32, #tpu.memory_space<vmem>>, vector<9x32xf32>,
    %c302_398 = arith.constant 302 : index
    %c0_399 = arith.constant 0 : index
    %246 = tpu.strided_load %arg9[%c302_398, %c0_399] {strides = array<i32: 2, 1>} : memref<400x32xf32, #tpu.memory_space<vmem>>, vector<9x32xf32>
    %c63_400 = arith.constant 63 : index
    %c192_401 = arith.constant 192 : index
    %247 = vector.load %arg10[%c63_400, %c192_401] : memref<81x512xf32, #tpu.memory_space<vmem>>, vector<9x32xf32>
    tpu.vector_store %arg10[%c63_400, %c192_401], %246 {strides = array<i32>} : memref<81x512xf32, #tpu.memory_space<vmem>>, vector<9x32xf32>,
    %c303_402 = arith.constant 303 : index
    %c0_403 = arith.constant 0 : index
    %248 = tpu.strided_load %arg9[%c303_402, %c0_403] {strides = array<i32: 2, 1>} : memref<400x32xf32, #tpu.memory_space<vmem>>, vector<9x32xf32>
    %c63_404 = arith.constant 63 : index
    %c224_405 = arith.constant 224 : index
    %249 = vector.load %arg10[%c63_404, %c224_405] : memref<81x512xf32, #tpu.memory_space<vmem>>, vector<9x32xf32>
    tpu.vector_store %arg10[%c63_404, %c224_405], %248 {strides = array<i32>} : memref<81x512xf32, #tpu.memory_space<vmem>>, vector<9x32xf32>,
    %c320_406 = arith.constant 320 : index
    %c0_407 = arith.constant 0 : index
    %250 = tpu.strided_load %arg9[%c320_406, %c0_407] {strides = array<i32: 2, 1>} : memref<400x32xf32, #tpu.memory_space<vmem>>, vector<9x32xf32>
    %c63_408 = arith.constant 63 : index
    %c256_409 = arith.constant 256 : index
    %251 = vector.load %arg10[%c63_408, %c256_409] : memref<81x512xf32, #tpu.memory_space<vmem>>, vector<9x32xf32>
    tpu.vector_store %arg10[%c63_408, %c256_409], %250 {strides = array<i32>} : memref<81x512xf32, #tpu.memory_space<vmem>>, vector<9x32xf32>,
    %c321 = arith.constant 321 : index
    %c0_410 = arith.constant 0 : index
    %252 = tpu.strided_load %arg9[%c321, %c0_410] {strides = array<i32: 2, 1>} : memref<400x32xf32, #tpu.memory_space<vmem>>, vector<9x32xf32>
    %c63_411 = arith.constant 63 : index
    %c288_412 = arith.constant 288 : index
    %253 = vector.load %arg10[%c63_411, %c288_412] : memref<81x512xf32, #tpu.memory_space<vmem>>, vector<9x32xf32>
    tpu.vector_store %arg10[%c63_411, %c288_412], %252 {strides = array<i32>} : memref<81x512xf32, #tpu.memory_space<vmem>>, vector<9x32xf32>,
    %c322 = arith.constant 322 : index
    %c0_413 = arith.constant 0 : index
    %254 = tpu.strided_load %arg9[%c322, %c0_413] {strides = array<i32: 2, 1>} : memref<400x32xf32, #tpu.memory_space<vmem>>, vector<9x32xf32>
    %c63_414 = arith.constant 63 : index
    %c320_415 = arith.constant 320 : index
    %255 = vector.load %arg10[%c63_414, %c320_415] : memref<81x512xf32, #tpu.memory_space<vmem>>, vector<9x32xf32>
    tpu.vector_store %arg10[%c63_414, %c320_415], %254 {strides = array<i32>} : memref<81x512xf32, #tpu.memory_space<vmem>>, vector<9x32xf32>,
    %c323 = arith.constant 323 : index
    %c0_416 = arith.constant 0 : index
    %256 = tpu.strided_load %arg9[%c323, %c0_416] {strides = array<i32: 2, 1>} : memref<400x32xf32, #tpu.memory_space<vmem>>, vector<9x32xf32>
    %c63_417 = arith.constant 63 : index
    %c352_418 = arith.constant 352 : index
    %257 = vector.load %arg10[%c63_417, %c352_418] : memref<81x512xf32, #tpu.memory_space<vmem>>, vector<9x32xf32>
    tpu.vector_store %arg10[%c63_417, %c352_418], %256 {strides = array<i32>} : memref<81x512xf32, #tpu.memory_space<vmem>>, vector<9x32xf32>,
    %c340 = arith.constant 340 : index
    %c0_419 = arith.constant 0 : index
    %258 = tpu.strided_load %arg9[%c340, %c0_419] {strides = array<i32: 2, 1>} : memref<400x32xf32, #tpu.memory_space<vmem>>, vector<9x32xf32>
    %c63_420 = arith.constant 63 : index
    %c384_421 = arith.constant 384 : index
    %259 = vector.load %arg10[%c63_420, %c384_421] : memref<81x512xf32, #tpu.memory_space<vmem>>, vector<9x32xf32>
    tpu.vector_store %arg10[%c63_420, %c384_421], %258 {strides = array<i32>} : memref<81x512xf32, #tpu.memory_space<vmem>>, vector<9x32xf32>,
    %c341 = arith.constant 341 : index
    %c0_422 = arith.constant 0 : index
    %260 = tpu.strided_load %arg9[%c341, %c0_422] {strides = array<i32: 2, 1>} : memref<400x32xf32, #tpu.memory_space<vmem>>, vector<9x32xf32>
    %c63_423 = arith.constant 63 : index
    %c416_424 = arith.constant 416 : index
    %261 = vector.load %arg10[%c63_423, %c416_424] : memref<81x512xf32, #tpu.memory_space<vmem>>, vector<9x32xf32>
    tpu.vector_store %arg10[%c63_423, %c416_424], %260 {strides = array<i32>} : memref<81x512xf32, #tpu.memory_space<vmem>>, vector<9x32xf32>,
    %c342 = arith.constant 342 : index
    %c0_425 = arith.constant 0 : index
    %262 = tpu.strided_load %arg9[%c342, %c0_425] {strides = array<i32: 2, 1>} : memref<400x32xf32, #tpu.memory_space<vmem>>, vector<9x32xf32>
    %c63_426 = arith.constant 63 : index
    %c448_427 = arith.constant 448 : index
    %263 = vector.load %arg10[%c63_426, %c448_427] : memref<81x512xf32, #tpu.memory_space<vmem>>, vector<9x32xf32>
    tpu.vector_store %arg10[%c63_426, %c448_427], %262 {strides = array<i32>} : memref<81x512xf32, #tpu.memory_space<vmem>>, vector<9x32xf32>,
    %c343 = arith.constant 343 : index
    %c0_428 = arith.constant 0 : index
    %264 = tpu.strided_load %arg9[%c343, %c0_428] {strides = array<i32: 2, 1>} : memref<400x32xf32, #tpu.memory_space<vmem>>, vector<9x32xf32>
    %c63_429 = arith.constant 63 : index
    %c480_430 = arith.constant 480 : index
    %265 = vector.load %arg10[%c63_429, %c480_430] : memref<81x512xf32, #tpu.memory_space<vmem>>, vector<9x32xf32>
    tpu.vector_store %arg10[%c63_429, %c480_430], %264 {strides = array<i32>} : memref<81x512xf32, #tpu.memory_space<vmem>>, vector<9x32xf32>,
    %c320_431 = arith.constant 320 : index
    %c0_432 = arith.constant 0 : index
    %266 = tpu.strided_load %arg9[%c320_431, %c0_432] {strides = array<i32: 2, 1>} : memref<400x32xf32, #tpu.memory_space<vmem>>, vector<9x32xf32>
    %c72 = arith.constant 72 : index
    %c0_433 = arith.constant 0 : index
    %267 = vector.load %arg10[%c72, %c0_433] : memref<81x512xf32, #tpu.memory_space<vmem>>, vector<9x32xf32>
    tpu.vector_store %arg10[%c72, %c0_433], %266 {strides = array<i32>} : memref<81x512xf32, #tpu.memory_space<vmem>>, vector<9x32xf32>,
    %c321_434 = arith.constant 321 : index
    %c0_435 = arith.constant 0 : index
    %268 = tpu.strided_load %arg9[%c321_434, %c0_435] {strides = array<i32: 2, 1>} : memref<400x32xf32, #tpu.memory_space<vmem>>, vector<9x32xf32>
    %c72_436 = arith.constant 72 : index
    %c32_437 = arith.constant 32 : index
    %269 = vector.load %arg10[%c72_436, %c32_437] : memref<81x512xf32, #tpu.memory_space<vmem>>, vector<9x32xf32>
    tpu.vector_store %arg10[%c72_436, %c32_437], %268 {strides = array<i32>} : memref<81x512xf32, #tpu.memory_space<vmem>>, vector<9x32xf32>,
    %c322_438 = arith.constant 322 : index
    %c0_439 = arith.constant 0 : index
    %270 = tpu.strided_load %arg9[%c322_438, %c0_439] {strides = array<i32: 2, 1>} : memref<400x32xf32, #tpu.memory_space<vmem>>, vector<9x32xf32>
    %c72_440 = arith.constant 72 : index
    %c64_441 = arith.constant 64 : index
    %271 = vector.load %arg10[%c72_440, %c64_441] : memref<81x512xf32, #tpu.memory_space<vmem>>, vector<9x32xf32>
    tpu.vector_store %arg10[%c72_440, %c64_441], %270 {strides = array<i32>} : memref<81x512xf32, #tpu.memory_space<vmem>>, vector<9x32xf32>,
    %c323_442 = arith.constant 323 : index
    %c0_443 = arith.constant 0 : index
    %272 = tpu.strided_load %arg9[%c323_442, %c0_443] {strides = array<i32: 2, 1>} : memref<400x32xf32, #tpu.memory_space<vmem>>, vector<9x32xf32>
    %c72_444 = arith.constant 72 : index
    %c96_445 = arith.constant 96 : index
    %273 = vector.load %arg10[%c72_444, %c96_445] : memref<81x512xf32, #tpu.memory_space<vmem>>, vector<9x32xf32>
    tpu.vector_store %arg10[%c72_444, %c96_445], %272 {strides = array<i32>} : memref<81x512xf32, #tpu.memory_space<vmem>>, vector<9x32xf32>,
    %c340_446 = arith.constant 340 : index
    %c0_447 = arith.constant 0 : index
    %274 = tpu.strided_load %arg9[%c340_446, %c0_447] {strides = array<i32: 2, 1>} : memref<400x32xf32, #tpu.memory_space<vmem>>, vector<9x32xf32>
    %c72_448 = arith.constant 72 : index
    %c128_449 = arith.constant 128 : index
    %275 = vector.load %arg10[%c72_448, %c128_449] : memref<81x512xf32, #tpu.memory_space<vmem>>, vector<9x32xf32>
    tpu.vector_store %arg10[%c72_448, %c128_449], %274 {strides = array<i32>} : memref<81x512xf32, #tpu.memory_space<vmem>>, vector<9x32xf32>,
    %c341_450 = arith.constant 341 : index
    %c0_451 = arith.constant 0 : index
    %276 = tpu.strided_load %arg9[%c341_450, %c0_451] {strides = array<i32: 2, 1>} : memref<400x32xf32, #tpu.memory_space<vmem>>, vector<9x32xf32>
    %c72_452 = arith.constant 72 : index
    %c160_453 = arith.constant 160 : index
    %277 = vector.load %arg10[%c72_452, %c160_453] : memref<81x512xf32, #tpu.memory_space<vmem>>, vector<9x32xf32>
    tpu.vector_store %arg10[%c72_452, %c160_453], %276 {strides = array<i32>} : memref<81x512xf32, #tpu.memory_space<vmem>>, vector<9x32xf32>,
    %c342_454 = arith.constant 342 : index
    %c0_455 = arith.constant 0 : index
    %278 = tpu.strided_load %arg9[%c342_454, %c0_455] {strides = array<i32: 2, 1>} : memref<400x32xf32, #tpu.memory_space<vmem>>, vector<9x32xf32>
    %c72_456 = arith.constant 72 : index
    %c192_457 = arith.constant 192 : index
    %279 = vector.load %arg10[%c72_456, %c192_457] : memref<81x512xf32, #tpu.memory_space<vmem>>, vector<9x32xf32>
    tpu.vector_store %arg10[%c72_456, %c192_457], %278 {strides = array<i32>} : memref<81x512xf32, #tpu.memory_space<vmem>>, vector<9x32xf32>,
    %c343_458 = arith.constant 343 : index
    %c0_459 = arith.constant 0 : index
    %280 = tpu.strided_load %arg9[%c343_458, %c0_459] {strides = array<i32: 2, 1>} : memref<400x32xf32, #tpu.memory_space<vmem>>, vector<9x32xf32>
    %c72_460 = arith.constant 72 : index
    %c224_461 = arith.constant 224 : index
    %281 = vector.load %arg10[%c72_460, %c224_461] : memref<81x512xf32, #tpu.memory_space<vmem>>, vector<9x32xf32>
    tpu.vector_store %arg10[%c72_460, %c224_461], %280 {strides = array<i32>} : memref<81x512xf32, #tpu.memory_space<vmem>>, vector<9x32xf32>,
    %c360 = arith.constant 360 : index
    %c0_462 = arith.constant 0 : index
    %282 = tpu.strided_load %arg9[%c360, %c0_462] {strides = array<i32: 2, 1>} : memref<400x32xf32, #tpu.memory_space<vmem>>, vector<9x32xf32>
    %c72_463 = arith.constant 72 : index
    %c256_464 = arith.constant 256 : index
    %283 = vector.load %arg10[%c72_463, %c256_464] : memref<81x512xf32, #tpu.memory_space<vmem>>, vector<9x32xf32>
    tpu.vector_store %arg10[%c72_463, %c256_464], %282 {strides = array<i32>} : memref<81x512xf32, #tpu.memory_space<vmem>>, vector<9x32xf32>,
    %c361 = arith.constant 361 : index
    %c0_465 = arith.constant 0 : index
    %284 = tpu.strided_load %arg9[%c361, %c0_465] {strides = array<i32: 2, 1>} : memref<400x32xf32, #tpu.memory_space<vmem>>, vector<9x32xf32>
    %c72_466 = arith.constant 72 : index
    %c288_467 = arith.constant 288 : index
    %285 = vector.load %arg10[%c72_466, %c288_467] : memref<81x512xf32, #tpu.memory_space<vmem>>, vector<9x32xf32>
    tpu.vector_store %arg10[%c72_466, %c288_467], %284 {strides = array<i32>} : memref<81x512xf32, #tpu.memory_space<vmem>>, vector<9x32xf32>,
    %c362 = arith.constant 362 : index
    %c0_468 = arith.constant 0 : index
    %286 = tpu.strided_load %arg9[%c362, %c0_468] {strides = array<i32: 2, 1>} : memref<400x32xf32, #tpu.memory_space<vmem>>, vector<9x32xf32>
    %c72_469 = arith.constant 72 : index
    %c320_470 = arith.constant 320 : index
    %287 = vector.load %arg10[%c72_469, %c320_470] : memref<81x512xf32, #tpu.memory_space<vmem>>, vector<9x32xf32>
    tpu.vector_store %arg10[%c72_469, %c320_470], %286 {strides = array<i32>} : memref<81x512xf32, #tpu.memory_space<vmem>>, vector<9x32xf32>,
    %c363 = arith.constant 363 : index
    %c0_471 = arith.constant 0 : index
    %288 = tpu.strided_load %arg9[%c363, %c0_471] {strides = array<i32: 2, 1>} : memref<400x32xf32, #tpu.memory_space<vmem>>, vector<9x32xf32>
    %c72_472 = arith.constant 72 : index
    %c352_473 = arith.constant 352 : index
    %289 = vector.load %arg10[%c72_472, %c352_473] : memref<81x512xf32, #tpu.memory_space<vmem>>, vector<9x32xf32>
    tpu.vector_store %arg10[%c72_472, %c352_473], %288 {strides = array<i32>} : memref<81x512xf32, #tpu.memory_space<vmem>>, vector<9x32xf32>,
    %c380 = arith.constant 380 : index
    %c0_474 = arith.constant 0 : index
    %290 = tpu.strided_load %arg9[%c380, %c0_474] {strides = array<i32: 2, 1>} : memref<400x32xf32, #tpu.memory_space<vmem>>, vector<9x32xf32>
    %c72_475 = arith.constant 72 : index
    %c384_476 = arith.constant 384 : index
    %291 = vector.load %arg10[%c72_475, %c384_476] : memref<81x512xf32, #tpu.memory_space<vmem>>, vector<9x32xf32>
    tpu.vector_store %arg10[%c72_475, %c384_476], %290 {strides = array<i32>} : memref<81x512xf32, #tpu.memory_space<vmem>>, vector<9x32xf32>,
    %c381 = arith.constant 381 : index
    %c0_477 = arith.constant 0 : index
    %292 = tpu.strided_load %arg9[%c381, %c0_477] {strides = array<i32: 2, 1>} : memref<400x32xf32, #tpu.memory_space<vmem>>, vector<9x32xf32>
    %c72_478 = arith.constant 72 : index
    %c416_479 = arith.constant 416 : index
    %293 = vector.load %arg10[%c72_478, %c416_479] : memref<81x512xf32, #tpu.memory_space<vmem>>, vector<9x32xf32>
    tpu.vector_store %arg10[%c72_478, %c416_479], %292 {strides = array<i32>} : memref<81x512xf32, #tpu.memory_space<vmem>>, vector<9x32xf32>,
    %c382 = arith.constant 382 : index
    %c0_480 = arith.constant 0 : index
    %294 = tpu.strided_load %arg9[%c382, %c0_480] {strides = array<i32: 2, 1>} : memref<400x32xf32, #tpu.memory_space<vmem>>, vector<9x32xf32>
    %c72_481 = arith.constant 72 : index
    %c448_482 = arith.constant 448 : index
    %295 = vector.load %arg10[%c72_481, %c448_482] : memref<81x512xf32, #tpu.memory_space<vmem>>, vector<9x32xf32>
    tpu.vector_store %arg10[%c72_481, %c448_482], %294 {strides = array<i32>} : memref<81x512xf32, #tpu.memory_space<vmem>>, vector<9x32xf32>,
    %c383 = arith.constant 383 : index
    %c0_483 = arith.constant 0 : index
    %296 = tpu.strided_load %arg9[%c383, %c0_483] {strides = array<i32: 2, 1>} : memref<400x32xf32, #tpu.memory_space<vmem>>, vector<9x32xf32>
    %c72_484 = arith.constant 72 : index
    %c480_485 = arith.constant 480 : index
    %297 = vector.load %arg10[%c72_484, %c480_485] : memref<81x512xf32, #tpu.memory_space<vmem>>, vector<9x32xf32>
    tpu.vector_store %arg10[%c72_484, %c480_485], %296 {strides = array<i32>} : memref<81x512xf32, #tpu.memory_space<vmem>>, vector<9x32xf32>,
    %c0_486 = arith.constant 0 : index
    %c0_487 = arith.constant 0 : index
    %298 = vector.load %arg10[%c0_486, %c0_487] : memref<81x512xf32, #tpu.memory_space<vmem>>, vector<81x512xf32>
    %299 = arith.truncf %298 : vector<81x512xf32> to vector<81x512xbf16>
    %c0_488 = arith.constant 0 : index
    %c0_489 = arith.constant 0 : index
    %300 = vector.load %arg4[%c0_488, %c0_489] : memref<512x64xbf16, #tpu.memory_space<vmem>>, vector<512x64xbf16>
    %cst_490 = arith.constant dense<0.000000e+00> : vector<81x64xf32>
    %301 = tpu.matmul %299, %300, %cst_490 {dimension_numbers = #tpu.dot_dimension_numbers<[1], [0], [0], [1], [0, 0, 1, 1], [], []>} : vector<81x512xbf16>, vector<512x64xbf16>, vector<81x64xf32> -> vector<81x64xf32>
    %c0_491 = arith.constant 0 : index
    %c0_492 = arith.constant 0 : index
    %302 = vector.load %arg5[%c0_491, %c0_492] : memref<1x64xf32, #tpu.memory_space<vmem>>, vector<1x64xf32>
    %303 = vector.broadcast %302 : vector<1x64xf32> to vector<81x64xf32>
    %304 = arith.addf %301, %303 : vector<81x64xf32>
    %cst_493 = arith.constant 0.000000e+00 : f32
    %305 = vector.broadcast %cst_493 : f32 to vector<81x64xf32>
    %306 = arith.maximumf %304, %305 : vector<81x64xf32>
    %c0_494 = arith.constant 0 : index
    %c0_495 = arith.constant 0 : index
    %307 = vector.load %arg11[%c0_494, %c0_495] : memref<81x64xf32, #tpu.memory_space<vmem>>, vector<81x64xf32>
    tpu.vector_store %arg11[%c0_494, %c0_495], %306 {strides = array<i32>} : memref<81x64xf32, #tpu.memory_space<vmem>>, vector<81x64xf32>,
    %c0_496 = arith.constant 0 : index
    %c0_497 = arith.constant 0 : index
    %308 = vector.load %arg11[%c0_496, %c0_497] : memref<81x64xf32, #tpu.memory_space<vmem>>, vector<7x64xf32>
    %c0_498 = arith.constant 0 : index
    %c0_499 = arith.constant 0 : index
    %309 = vector.load %arg12[%c0_498, %c0_499] : memref<49x576xf32, #tpu.memory_space<vmem>>, vector<7x64xf32>
    tpu.vector_store %arg12[%c0_498, %c0_499], %308 {strides = array<i32>} : memref<49x576xf32, #tpu.memory_space<vmem>>, vector<7x64xf32>,
    %c1_500 = arith.constant 1 : index
    %c0_501 = arith.constant 0 : index
    %310 = vector.load %arg11[%c1_500, %c0_501] : memref<81x64xf32, #tpu.memory_space<vmem>>, vector<7x64xf32>
    %c0_502 = arith.constant 0 : index
    %c64_503 = arith.constant 64 : index
    %311 = vector.load %arg12[%c0_502, %c64_503] : memref<49x576xf32, #tpu.memory_space<vmem>>, vector<7x64xf32>
    tpu.vector_store %arg12[%c0_502, %c64_503], %310 {strides = array<i32>} : memref<49x576xf32, #tpu.memory_space<vmem>>, vector<7x64xf32>,
    %c2_504 = arith.constant 2 : index
    %c0_505 = arith.constant 0 : index
    %312 = vector.load %arg11[%c2_504, %c0_505] : memref<81x64xf32, #tpu.memory_space<vmem>>, vector<7x64xf32>
    %c0_506 = arith.constant 0 : index
    %c128_507 = arith.constant 128 : index
    %313 = vector.load %arg12[%c0_506, %c128_507] : memref<49x576xf32, #tpu.memory_space<vmem>>, vector<7x64xf32>
    tpu.vector_store %arg12[%c0_506, %c128_507], %312 {strides = array<i32>} : memref<49x576xf32, #tpu.memory_space<vmem>>, vector<7x64xf32>,
    %c9_508 = arith.constant 9 : index
    %c0_509 = arith.constant 0 : index
    %314 = vector.load %arg11[%c9_508, %c0_509] : memref<81x64xf32, #tpu.memory_space<vmem>>, vector<7x64xf32>
    %c0_510 = arith.constant 0 : index
    %c192_511 = arith.constant 192 : index
    %315 = vector.load %arg12[%c0_510, %c192_511] : memref<49x576xf32, #tpu.memory_space<vmem>>, vector<7x64xf32>
    tpu.vector_store %arg12[%c0_510, %c192_511], %314 {strides = array<i32>} : memref<49x576xf32, #tpu.memory_space<vmem>>, vector<7x64xf32>,
    %c10 = arith.constant 10 : index
    %c0_512 = arith.constant 0 : index
    %316 = vector.load %arg11[%c10, %c0_512] : memref<81x64xf32, #tpu.memory_space<vmem>>, vector<7x64xf32>
    %c0_513 = arith.constant 0 : index
    %c256_514 = arith.constant 256 : index
    %317 = vector.load %arg12[%c0_513, %c256_514] : memref<49x576xf32, #tpu.memory_space<vmem>>, vector<7x64xf32>
    tpu.vector_store %arg12[%c0_513, %c256_514], %316 {strides = array<i32>} : memref<49x576xf32, #tpu.memory_space<vmem>>, vector<7x64xf32>,
    %c11 = arith.constant 11 : index
    %c0_515 = arith.constant 0 : index
    %318 = vector.load %arg11[%c11, %c0_515] : memref<81x64xf32, #tpu.memory_space<vmem>>, vector<7x64xf32>
    %c0_516 = arith.constant 0 : index
    %c320_517 = arith.constant 320 : index
    %319 = vector.load %arg12[%c0_516, %c320_517] : memref<49x576xf32, #tpu.memory_space<vmem>>, vector<7x64xf32>
    tpu.vector_store %arg12[%c0_516, %c320_517], %318 {strides = array<i32>} : memref<49x576xf32, #tpu.memory_space<vmem>>, vector<7x64xf32>,
    %c18_518 = arith.constant 18 : index
    %c0_519 = arith.constant 0 : index
    %320 = vector.load %arg11[%c18_518, %c0_519] : memref<81x64xf32, #tpu.memory_space<vmem>>, vector<7x64xf32>
    %c0_520 = arith.constant 0 : index
    %c384_521 = arith.constant 384 : index
    %321 = vector.load %arg12[%c0_520, %c384_521] : memref<49x576xf32, #tpu.memory_space<vmem>>, vector<7x64xf32>
    tpu.vector_store %arg12[%c0_520, %c384_521], %320 {strides = array<i32>} : memref<49x576xf32, #tpu.memory_space<vmem>>, vector<7x64xf32>,
    %c19 = arith.constant 19 : index
    %c0_522 = arith.constant 0 : index
    %322 = vector.load %arg11[%c19, %c0_522] : memref<81x64xf32, #tpu.memory_space<vmem>>, vector<7x64xf32>
    %c0_523 = arith.constant 0 : index
    %c448_524 = arith.constant 448 : index
    %323 = vector.load %arg12[%c0_523, %c448_524] : memref<49x576xf32, #tpu.memory_space<vmem>>, vector<7x64xf32>
    tpu.vector_store %arg12[%c0_523, %c448_524], %322 {strides = array<i32>} : memref<49x576xf32, #tpu.memory_space<vmem>>, vector<7x64xf32>,
    %c20_525 = arith.constant 20 : index
    %c0_526 = arith.constant 0 : index
    %324 = vector.load %arg11[%c20_525, %c0_526] : memref<81x64xf32, #tpu.memory_space<vmem>>, vector<7x64xf32>
    %c0_527 = arith.constant 0 : index
    %c512 = arith.constant 512 : index
    %325 = vector.load %arg12[%c0_527, %c512] : memref<49x576xf32, #tpu.memory_space<vmem>>, vector<7x64xf32>
    tpu.vector_store %arg12[%c0_527, %c512], %324 {strides = array<i32>} : memref<49x576xf32, #tpu.memory_space<vmem>>, vector<7x64xf32>,
    %c9_528 = arith.constant 9 : index
    %c0_529 = arith.constant 0 : index
    %326 = vector.load %arg11[%c9_528, %c0_529] : memref<81x64xf32, #tpu.memory_space<vmem>>, vector<7x64xf32>
    %c7 = arith.constant 7 : index
    %c0_530 = arith.constant 0 : index
    %327 = vector.load %arg12[%c7, %c0_530] : memref<49x576xf32, #tpu.memory_space<vmem>>, vector<7x64xf32>
    tpu.vector_store %arg12[%c7, %c0_530], %326 {strides = array<i32>} : memref<49x576xf32, #tpu.memory_space<vmem>>, vector<7x64xf32>,
    %c10_531 = arith.constant 10 : index
    %c0_532 = arith.constant 0 : index
    %328 = vector.load %arg11[%c10_531, %c0_532] : memref<81x64xf32, #tpu.memory_space<vmem>>, vector<7x64xf32>
    %c7_533 = arith.constant 7 : index
    %c64_534 = arith.constant 64 : index
    %329 = vector.load %arg12[%c7_533, %c64_534] : memref<49x576xf32, #tpu.memory_space<vmem>>, vector<7x64xf32>
    tpu.vector_store %arg12[%c7_533, %c64_534], %328 {strides = array<i32>} : memref<49x576xf32, #tpu.memory_space<vmem>>, vector<7x64xf32>,
    %c11_535 = arith.constant 11 : index
    %c0_536 = arith.constant 0 : index
    %330 = vector.load %arg11[%c11_535, %c0_536] : memref<81x64xf32, #tpu.memory_space<vmem>>, vector<7x64xf32>
    %c7_537 = arith.constant 7 : index
    %c128_538 = arith.constant 128 : index
    %331 = vector.load %arg12[%c7_537, %c128_538] : memref<49x576xf32, #tpu.memory_space<vmem>>, vector<7x64xf32>
    tpu.vector_store %arg12[%c7_537, %c128_538], %330 {strides = array<i32>} : memref<49x576xf32, #tpu.memory_space<vmem>>, vector<7x64xf32>,
    %c18_539 = arith.constant 18 : index
    %c0_540 = arith.constant 0 : index
    %332 = vector.load %arg11[%c18_539, %c0_540] : memref<81x64xf32, #tpu.memory_space<vmem>>, vector<7x64xf32>
    %c7_541 = arith.constant 7 : index
    %c192_542 = arith.constant 192 : index
    %333 = vector.load %arg12[%c7_541, %c192_542] : memref<49x576xf32, #tpu.memory_space<vmem>>, vector<7x64xf32>
    tpu.vector_store %arg12[%c7_541, %c192_542], %332 {strides = array<i32>} : memref<49x576xf32, #tpu.memory_space<vmem>>, vector<7x64xf32>,
    %c19_543 = arith.constant 19 : index
    %c0_544 = arith.constant 0 : index
    %334 = vector.load %arg11[%c19_543, %c0_544] : memref<81x64xf32, #tpu.memory_space<vmem>>, vector<7x64xf32>
    %c7_545 = arith.constant 7 : index
    %c256_546 = arith.constant 256 : index
    %335 = vector.load %arg12[%c7_545, %c256_546] : memref<49x576xf32, #tpu.memory_space<vmem>>, vector<7x64xf32>
    tpu.vector_store %arg12[%c7_545, %c256_546], %334 {strides = array<i32>} : memref<49x576xf32, #tpu.memory_space<vmem>>, vector<7x64xf32>,
    %c20_547 = arith.constant 20 : index
    %c0_548 = arith.constant 0 : index
    %336 = vector.load %arg11[%c20_547, %c0_548] : memref<81x64xf32, #tpu.memory_space<vmem>>, vector<7x64xf32>
    %c7_549 = arith.constant 7 : index
    %c320_550 = arith.constant 320 : index
    %337 = vector.load %arg12[%c7_549, %c320_550] : memref<49x576xf32, #tpu.memory_space<vmem>>, vector<7x64xf32>
    tpu.vector_store %arg12[%c7_549, %c320_550], %336 {strides = array<i32>} : memref<49x576xf32, #tpu.memory_space<vmem>>, vector<7x64xf32>,
    %c27_551 = arith.constant 27 : index
    %c0_552 = arith.constant 0 : index
    %338 = vector.load %arg11[%c27_551, %c0_552] : memref<81x64xf32, #tpu.memory_space<vmem>>, vector<7x64xf32>
    %c7_553 = arith.constant 7 : index
    %c384_554 = arith.constant 384 : index
    %339 = vector.load %arg12[%c7_553, %c384_554] : memref<49x576xf32, #tpu.memory_space<vmem>>, vector<7x64xf32>
    tpu.vector_store %arg12[%c7_553, %c384_554], %338 {strides = array<i32>} : memref<49x576xf32, #tpu.memory_space<vmem>>, vector<7x64xf32>,
    %c28 = arith.constant 28 : index
    %c0_555 = arith.constant 0 : index
    %340 = vector.load %arg11[%c28, %c0_555] : memref<81x64xf32, #tpu.memory_space<vmem>>, vector<7x64xf32>
    %c7_556 = arith.constant 7 : index
    %c448_557 = arith.constant 448 : index
    %341 = vector.load %arg12[%c7_556, %c448_557] : memref<49x576xf32, #tpu.memory_space<vmem>>, vector<7x64xf32>
    tpu.vector_store %arg12[%c7_556, %c448_557], %340 {strides = array<i32>} : memref<49x576xf32, #tpu.memory_space<vmem>>, vector<7x64xf32>,
    %c29 = arith.constant 29 : index
    %c0_558 = arith.constant 0 : index
    %342 = vector.load %arg11[%c29, %c0_558] : memref<81x64xf32, #tpu.memory_space<vmem>>, vector<7x64xf32>
    %c7_559 = arith.constant 7 : index
    %c512_560 = arith.constant 512 : index
    %343 = vector.load %arg12[%c7_559, %c512_560] : memref<49x576xf32, #tpu.memory_space<vmem>>, vector<7x64xf32>
    tpu.vector_store %arg12[%c7_559, %c512_560], %342 {strides = array<i32>} : memref<49x576xf32, #tpu.memory_space<vmem>>, vector<7x64xf32>,
    %c18_561 = arith.constant 18 : index
    %c0_562 = arith.constant 0 : index
    %344 = vector.load %arg11[%c18_561, %c0_562] : memref<81x64xf32, #tpu.memory_space<vmem>>, vector<7x64xf32>
    %c14 = arith.constant 14 : index
    %c0_563 = arith.constant 0 : index
    %345 = vector.load %arg12[%c14, %c0_563] : memref<49x576xf32, #tpu.memory_space<vmem>>, vector<7x64xf32>
    tpu.vector_store %arg12[%c14, %c0_563], %344 {strides = array<i32>} : memref<49x576xf32, #tpu.memory_space<vmem>>, vector<7x64xf32>,
    %c19_564 = arith.constant 19 : index
    %c0_565 = arith.constant 0 : index
    %346 = vector.load %arg11[%c19_564, %c0_565] : memref<81x64xf32, #tpu.memory_space<vmem>>, vector<7x64xf32>
    %c14_566 = arith.constant 14 : index
    %c64_567 = arith.constant 64 : index
    %347 = vector.load %arg12[%c14_566, %c64_567] : memref<49x576xf32, #tpu.memory_space<vmem>>, vector<7x64xf32>
    tpu.vector_store %arg12[%c14_566, %c64_567], %346 {strides = array<i32>} : memref<49x576xf32, #tpu.memory_space<vmem>>, vector<7x64xf32>,
    %c20_568 = arith.constant 20 : index
    %c0_569 = arith.constant 0 : index
    %348 = vector.load %arg11[%c20_568, %c0_569] : memref<81x64xf32, #tpu.memory_space<vmem>>, vector<7x64xf32>
    %c14_570 = arith.constant 14 : index
    %c128_571 = arith.constant 128 : index
    %349 = vector.load %arg12[%c14_570, %c128_571] : memref<49x576xf32, #tpu.memory_space<vmem>>, vector<7x64xf32>
    tpu.vector_store %arg12[%c14_570, %c128_571], %348 {strides = array<i32>} : memref<49x576xf32, #tpu.memory_space<vmem>>, vector<7x64xf32>,
    %c27_572 = arith.constant 27 : index
    %c0_573 = arith.constant 0 : index
    %350 = vector.load %arg11[%c27_572, %c0_573] : memref<81x64xf32, #tpu.memory_space<vmem>>, vector<7x64xf32>
    %c14_574 = arith.constant 14 : index
    %c192_575 = arith.constant 192 : index
    %351 = vector.load %arg12[%c14_574, %c192_575] : memref<49x576xf32, #tpu.memory_space<vmem>>, vector<7x64xf32>
    tpu.vector_store %arg12[%c14_574, %c192_575], %350 {strides = array<i32>} : memref<49x576xf32, #tpu.memory_space<vmem>>, vector<7x64xf32>,
    %c28_576 = arith.constant 28 : index
    %c0_577 = arith.constant 0 : index
    %352 = vector.load %arg11[%c28_576, %c0_577] : memref<81x64xf32, #tpu.memory_space<vmem>>, vector<7x64xf32>
    %c14_578 = arith.constant 14 : index
    %c256_579 = arith.constant 256 : index
    %353 = vector.load %arg12[%c14_578, %c256_579] : memref<49x576xf32, #tpu.memory_space<vmem>>, vector<7x64xf32>
    tpu.vector_store %arg12[%c14_578, %c256_579], %352 {strides = array<i32>} : memref<49x576xf32, #tpu.memory_space<vmem>>, vector<7x64xf32>,
    %c29_580 = arith.constant 29 : index
    %c0_581 = arith.constant 0 : index
    %354 = vector.load %arg11[%c29_580, %c0_581] : memref<81x64xf32, #tpu.memory_space<vmem>>, vector<7x64xf32>
    %c14_582 = arith.constant 14 : index
    %c320_583 = arith.constant 320 : index
    %355 = vector.load %arg12[%c14_582, %c320_583] : memref<49x576xf32, #tpu.memory_space<vmem>>, vector<7x64xf32>
    tpu.vector_store %arg12[%c14_582, %c320_583], %354 {strides = array<i32>} : memref<49x576xf32, #tpu.memory_space<vmem>>, vector<7x64xf32>,
    %c36_584 = arith.constant 36 : index
    %c0_585 = arith.constant 0 : index
    %356 = vector.load %arg11[%c36_584, %c0_585] : memref<81x64xf32, #tpu.memory_space<vmem>>, vector<7x64xf32>
    %c14_586 = arith.constant 14 : index
    %c384_587 = arith.constant 384 : index
    %357 = vector.load %arg12[%c14_586, %c384_587] : memref<49x576xf32, #tpu.memory_space<vmem>>, vector<7x64xf32>
    tpu.vector_store %arg12[%c14_586, %c384_587], %356 {strides = array<i32>} : memref<49x576xf32, #tpu.memory_space<vmem>>, vector<7x64xf32>,
    %c37 = arith.constant 37 : index
    %c0_588 = arith.constant 0 : index
    %358 = vector.load %arg11[%c37, %c0_588] : memref<81x64xf32, #tpu.memory_space<vmem>>, vector<7x64xf32>
    %c14_589 = arith.constant 14 : index
    %c448_590 = arith.constant 448 : index
    %359 = vector.load %arg12[%c14_589, %c448_590] : memref<49x576xf32, #tpu.memory_space<vmem>>, vector<7x64xf32>
    tpu.vector_store %arg12[%c14_589, %c448_590], %358 {strides = array<i32>} : memref<49x576xf32, #tpu.memory_space<vmem>>, vector<7x64xf32>,
    %c38 = arith.constant 38 : index
    %c0_591 = arith.constant 0 : index
    %360 = vector.load %arg11[%c38, %c0_591] : memref<81x64xf32, #tpu.memory_space<vmem>>, vector<7x64xf32>
    %c14_592 = arith.constant 14 : index
    %c512_593 = arith.constant 512 : index
    %361 = vector.load %arg12[%c14_592, %c512_593] : memref<49x576xf32, #tpu.memory_space<vmem>>, vector<7x64xf32>
    tpu.vector_store %arg12[%c14_592, %c512_593], %360 {strides = array<i32>} : memref<49x576xf32, #tpu.memory_space<vmem>>, vector<7x64xf32>,
    %c27_594 = arith.constant 27 : index
    %c0_595 = arith.constant 0 : index
    %362 = vector.load %arg11[%c27_594, %c0_595] : memref<81x64xf32, #tpu.memory_space<vmem>>, vector<7x64xf32>
    %c21_596 = arith.constant 21 : index
    %c0_597 = arith.constant 0 : index
    %363 = vector.load %arg12[%c21_596, %c0_597] : memref<49x576xf32, #tpu.memory_space<vmem>>, vector<7x64xf32>
    tpu.vector_store %arg12[%c21_596, %c0_597], %362 {strides = array<i32>} : memref<49x576xf32, #tpu.memory_space<vmem>>, vector<7x64xf32>,
    %c28_598 = arith.constant 28 : index
    %c0_599 = arith.constant 0 : index
    %364 = vector.load %arg11[%c28_598, %c0_599] : memref<81x64xf32, #tpu.memory_space<vmem>>, vector<7x64xf32>
    %c21_600 = arith.constant 21 : index
    %c64_601 = arith.constant 64 : index
    %365 = vector.load %arg12[%c21_600, %c64_601] : memref<49x576xf32, #tpu.memory_space<vmem>>, vector<7x64xf32>
    tpu.vector_store %arg12[%c21_600, %c64_601], %364 {strides = array<i32>} : memref<49x576xf32, #tpu.memory_space<vmem>>, vector<7x64xf32>,
    %c29_602 = arith.constant 29 : index
    %c0_603 = arith.constant 0 : index
    %366 = vector.load %arg11[%c29_602, %c0_603] : memref<81x64xf32, #tpu.memory_space<vmem>>, vector<7x64xf32>
    %c21_604 = arith.constant 21 : index
    %c128_605 = arith.constant 128 : index
    %367 = vector.load %arg12[%c21_604, %c128_605] : memref<49x576xf32, #tpu.memory_space<vmem>>, vector<7x64xf32>
    tpu.vector_store %arg12[%c21_604, %c128_605], %366 {strides = array<i32>} : memref<49x576xf32, #tpu.memory_space<vmem>>, vector<7x64xf32>,
    %c36_606 = arith.constant 36 : index
    %c0_607 = arith.constant 0 : index
    %368 = vector.load %arg11[%c36_606, %c0_607] : memref<81x64xf32, #tpu.memory_space<vmem>>, vector<7x64xf32>
    %c21_608 = arith.constant 21 : index
    %c192_609 = arith.constant 192 : index
    %369 = vector.load %arg12[%c21_608, %c192_609] : memref<49x576xf32, #tpu.memory_space<vmem>>, vector<7x64xf32>
    tpu.vector_store %arg12[%c21_608, %c192_609], %368 {strides = array<i32>} : memref<49x576xf32, #tpu.memory_space<vmem>>, vector<7x64xf32>,
    %c37_610 = arith.constant 37 : index
    %c0_611 = arith.constant 0 : index
    %370 = vector.load %arg11[%c37_610, %c0_611] : memref<81x64xf32, #tpu.memory_space<vmem>>, vector<7x64xf32>
    %c21_612 = arith.constant 21 : index
    %c256_613 = arith.constant 256 : index
    %371 = vector.load %arg12[%c21_612, %c256_613] : memref<49x576xf32, #tpu.memory_space<vmem>>, vector<7x64xf32>
    tpu.vector_store %arg12[%c21_612, %c256_613], %370 {strides = array<i32>} : memref<49x576xf32, #tpu.memory_space<vmem>>, vector<7x64xf32>,
    %c38_614 = arith.constant 38 : index
    %c0_615 = arith.constant 0 : index
    %372 = vector.load %arg11[%c38_614, %c0_615] : memref<81x64xf32, #tpu.memory_space<vmem>>, vector<7x64xf32>
    %c21_616 = arith.constant 21 : index
    %c320_617 = arith.constant 320 : index
    %373 = vector.load %arg12[%c21_616, %c320_617] : memref<49x576xf32, #tpu.memory_space<vmem>>, vector<7x64xf32>
    tpu.vector_store %arg12[%c21_616, %c320_617], %372 {strides = array<i32>} : memref<49x576xf32, #tpu.memory_space<vmem>>, vector<7x64xf32>,
    %c45_618 = arith.constant 45 : index
    %c0_619 = arith.constant 0 : index
    %374 = vector.load %arg11[%c45_618, %c0_619] : memref<81x64xf32, #tpu.memory_space<vmem>>, vector<7x64xf32>
    %c21_620 = arith.constant 21 : index
    %c384_621 = arith.constant 384 : index
    %375 = vector.load %arg12[%c21_620, %c384_621] : memref<49x576xf32, #tpu.memory_space<vmem>>, vector<7x64xf32>
    tpu.vector_store %arg12[%c21_620, %c384_621], %374 {strides = array<i32>} : memref<49x576xf32, #tpu.memory_space<vmem>>, vector<7x64xf32>,
    %c46 = arith.constant 46 : index
    %c0_622 = arith.constant 0 : index
    %376 = vector.load %arg11[%c46, %c0_622] : memref<81x64xf32, #tpu.memory_space<vmem>>, vector<7x64xf32>
    %c21_623 = arith.constant 21 : index
    %c448_624 = arith.constant 448 : index
    %377 = vector.load %arg12[%c21_623, %c448_624] : memref<49x576xf32, #tpu.memory_space<vmem>>, vector<7x64xf32>
    tpu.vector_store %arg12[%c21_623, %c448_624], %376 {strides = array<i32>} : memref<49x576xf32, #tpu.memory_space<vmem>>, vector<7x64xf32>,
    %c47 = arith.constant 47 : index
    %c0_625 = arith.constant 0 : index
    %378 = vector.load %arg11[%c47, %c0_625] : memref<81x64xf32, #tpu.memory_space<vmem>>, vector<7x64xf32>
    %c21_626 = arith.constant 21 : index
    %c512_627 = arith.constant 512 : index
    %379 = vector.load %arg12[%c21_626, %c512_627] : memref<49x576xf32, #tpu.memory_space<vmem>>, vector<7x64xf32>
    tpu.vector_store %arg12[%c21_626, %c512_627], %378 {strides = array<i32>} : memref<49x576xf32, #tpu.memory_space<vmem>>, vector<7x64xf32>,
    %c36_628 = arith.constant 36 : index
    %c0_629 = arith.constant 0 : index
    %380 = vector.load %arg11[%c36_628, %c0_629] : memref<81x64xf32, #tpu.memory_space<vmem>>, vector<7x64xf32>
    %c28_630 = arith.constant 28 : index
    %c0_631 = arith.constant 0 : index
    %381 = vector.load %arg12[%c28_630, %c0_631] : memref<49x576xf32, #tpu.memory_space<vmem>>, vector<7x64xf32>
    tpu.vector_store %arg12[%c28_630, %c0_631], %380 {strides = array<i32>} : memref<49x576xf32, #tpu.memory_space<vmem>>, vector<7x64xf32>,
    %c37_632 = arith.constant 37 : index
    %c0_633 = arith.constant 0 : index
    %382 = vector.load %arg11[%c37_632, %c0_633] : memref<81x64xf32, #tpu.memory_space<vmem>>, vector<7x64xf32>
    %c28_634 = arith.constant 28 : index
    %c64_635 = arith.constant 64 : index
    %383 = vector.load %arg12[%c28_634, %c64_635] : memref<49x576xf32, #tpu.memory_space<vmem>>, vector<7x64xf32>
    tpu.vector_store %arg12[%c28_634, %c64_635], %382 {strides = array<i32>} : memref<49x576xf32, #tpu.memory_space<vmem>>, vector<7x64xf32>,
    %c38_636 = arith.constant 38 : index
    %c0_637 = arith.constant 0 : index
    %384 = vector.load %arg11[%c38_636, %c0_637] : memref<81x64xf32, #tpu.memory_space<vmem>>, vector<7x64xf32>
    %c28_638 = arith.constant 28 : index
    %c128_639 = arith.constant 128 : index
    %385 = vector.load %arg12[%c28_638, %c128_639] : memref<49x576xf32, #tpu.memory_space<vmem>>, vector<7x64xf32>
    tpu.vector_store %arg12[%c28_638, %c128_639], %384 {strides = array<i32>} : memref<49x576xf32, #tpu.memory_space<vmem>>, vector<7x64xf32>,
    %c45_640 = arith.constant 45 : index
    %c0_641 = arith.constant 0 : index
    %386 = vector.load %arg11[%c45_640, %c0_641] : memref<81x64xf32, #tpu.memory_space<vmem>>, vector<7x64xf32>
    %c28_642 = arith.constant 28 : index
    %c192_643 = arith.constant 192 : index
    %387 = vector.load %arg12[%c28_642, %c192_643] : memref<49x576xf32, #tpu.memory_space<vmem>>, vector<7x64xf32>
    tpu.vector_store %arg12[%c28_642, %c192_643], %386 {strides = array<i32>} : memref<49x576xf32, #tpu.memory_space<vmem>>, vector<7x64xf32>,
    %c46_644 = arith.constant 46 : index
    %c0_645 = arith.constant 0 : index
    %388 = vector.load %arg11[%c46_644, %c0_645] : memref<81x64xf32, #tpu.memory_space<vmem>>, vector<7x64xf32>
    %c28_646 = arith.constant 28 : index
    %c256_647 = arith.constant 256 : index
    %389 = vector.load %arg12[%c28_646, %c256_647] : memref<49x576xf32, #tpu.memory_space<vmem>>, vector<7x64xf32>
    tpu.vector_store %arg12[%c28_646, %c256_647], %388 {strides = array<i32>} : memref<49x576xf32, #tpu.memory_space<vmem>>, vector<7x64xf32>,
    %c47_648 = arith.constant 47 : index
    %c0_649 = arith.constant 0 : index
    %390 = vector.load %arg11[%c47_648, %c0_649] : memref<81x64xf32, #tpu.memory_space<vmem>>, vector<7x64xf32>
    %c28_650 = arith.constant 28 : index
    %c320_651 = arith.constant 320 : index
    %391 = vector.load %arg12[%c28_650, %c320_651] : memref<49x576xf32, #tpu.memory_space<vmem>>, vector<7x64xf32>
    tpu.vector_store %arg12[%c28_650, %c320_651], %390 {strides = array<i32>} : memref<49x576xf32, #tpu.memory_space<vmem>>, vector<7x64xf32>,
    %c54_652 = arith.constant 54 : index
    %c0_653 = arith.constant 0 : index
    %392 = vector.load %arg11[%c54_652, %c0_653] : memref<81x64xf32, #tpu.memory_space<vmem>>, vector<7x64xf32>
    %c28_654 = arith.constant 28 : index
    %c384_655 = arith.constant 384 : index
    %393 = vector.load %arg12[%c28_654, %c384_655] : memref<49x576xf32, #tpu.memory_space<vmem>>, vector<7x64xf32>
    tpu.vector_store %arg12[%c28_654, %c384_655], %392 {strides = array<i32>} : memref<49x576xf32, #tpu.memory_space<vmem>>, vector<7x64xf32>,
    %c55 = arith.constant 55 : index
    %c0_656 = arith.constant 0 : index
    %394 = vector.load %arg11[%c55, %c0_656] : memref<81x64xf32, #tpu.memory_space<vmem>>, vector<7x64xf32>
    %c28_657 = arith.constant 28 : index
    %c448_658 = arith.constant 448 : index
    %395 = vector.load %arg12[%c28_657, %c448_658] : memref<49x576xf32, #tpu.memory_space<vmem>>, vector<7x64xf32>
    tpu.vector_store %arg12[%c28_657, %c448_658], %394 {strides = array<i32>} : memref<49x576xf32, #tpu.memory_space<vmem>>, vector<7x64xf32>,
    %c56 = arith.constant 56 : index
    %c0_659 = arith.constant 0 : index
    %396 = vector.load %arg11[%c56, %c0_659] : memref<81x64xf32, #tpu.memory_space<vmem>>, vector<7x64xf32>
    %c28_660 = arith.constant 28 : index
    %c512_661 = arith.constant 512 : index
    %397 = vector.load %arg12[%c28_660, %c512_661] : memref<49x576xf32, #tpu.memory_space<vmem>>, vector<7x64xf32>
    tpu.vector_store %arg12[%c28_660, %c512_661], %396 {strides = array<i32>} : memref<49x576xf32, #tpu.memory_space<vmem>>, vector<7x64xf32>,
    %c45_662 = arith.constant 45 : index
    %c0_663 = arith.constant 0 : index
    %398 = vector.load %arg11[%c45_662, %c0_663] : memref<81x64xf32, #tpu.memory_space<vmem>>, vector<7x64xf32>
    %c35 = arith.constant 35 : index
    %c0_664 = arith.constant 0 : index
    %399 = vector.load %arg12[%c35, %c0_664] : memref<49x576xf32, #tpu.memory_space<vmem>>, vector<7x64xf32>
    tpu.vector_store %arg12[%c35, %c0_664], %398 {strides = array<i32>} : memref<49x576xf32, #tpu.memory_space<vmem>>, vector<7x64xf32>,
    %c46_665 = arith.constant 46 : index
    %c0_666 = arith.constant 0 : index
    %400 = vector.load %arg11[%c46_665, %c0_666] : memref<81x64xf32, #tpu.memory_space<vmem>>, vector<7x64xf32>
    %c35_667 = arith.constant 35 : index
    %c64_668 = arith.constant 64 : index
    %401 = vector.load %arg12[%c35_667, %c64_668] : memref<49x576xf32, #tpu.memory_space<vmem>>, vector<7x64xf32>
    tpu.vector_store %arg12[%c35_667, %c64_668], %400 {strides = array<i32>} : memref<49x576xf32, #tpu.memory_space<vmem>>, vector<7x64xf32>,
    %c47_669 = arith.constant 47 : index
    %c0_670 = arith.constant 0 : index
    %402 = vector.load %arg11[%c47_669, %c0_670] : memref<81x64xf32, #tpu.memory_space<vmem>>, vector<7x64xf32>
    %c35_671 = arith.constant 35 : index
    %c128_672 = arith.constant 128 : index
    %403 = vector.load %arg12[%c35_671, %c128_672] : memref<49x576xf32, #tpu.memory_space<vmem>>, vector<7x64xf32>
    tpu.vector_store %arg12[%c35_671, %c128_672], %402 {strides = array<i32>} : memref<49x576xf32, #tpu.memory_space<vmem>>, vector<7x64xf32>,
    %c54_673 = arith.constant 54 : index
    %c0_674 = arith.constant 0 : index
    %404 = vector.load %arg11[%c54_673, %c0_674] : memref<81x64xf32, #tpu.memory_space<vmem>>, vector<7x64xf32>
    %c35_675 = arith.constant 35 : index
    %c192_676 = arith.constant 192 : index
    %405 = vector.load %arg12[%c35_675, %c192_676] : memref<49x576xf32, #tpu.memory_space<vmem>>, vector<7x64xf32>
    tpu.vector_store %arg12[%c35_675, %c192_676], %404 {strides = array<i32>} : memref<49x576xf32, #tpu.memory_space<vmem>>, vector<7x64xf32>,
    %c55_677 = arith.constant 55 : index
    %c0_678 = arith.constant 0 : index
    %406 = vector.load %arg11[%c55_677, %c0_678] : memref<81x64xf32, #tpu.memory_space<vmem>>, vector<7x64xf32>
    %c35_679 = arith.constant 35 : index
    %c256_680 = arith.constant 256 : index
    %407 = vector.load %arg12[%c35_679, %c256_680] : memref<49x576xf32, #tpu.memory_space<vmem>>, vector<7x64xf32>
    tpu.vector_store %arg12[%c35_679, %c256_680], %406 {strides = array<i32>} : memref<49x576xf32, #tpu.memory_space<vmem>>, vector<7x64xf32>,
    %c56_681 = arith.constant 56 : index
    %c0_682 = arith.constant 0 : index
    %408 = vector.load %arg11[%c56_681, %c0_682] : memref<81x64xf32, #tpu.memory_space<vmem>>, vector<7x64xf32>
    %c35_683 = arith.constant 35 : index
    %c320_684 = arith.constant 320 : index
    %409 = vector.load %arg12[%c35_683, %c320_684] : memref<49x576xf32, #tpu.memory_space<vmem>>, vector<7x64xf32>
    tpu.vector_store %arg12[%c35_683, %c320_684], %408 {strides = array<i32>} : memref<49x576xf32, #tpu.memory_space<vmem>>, vector<7x64xf32>,
    %c63_685 = arith.constant 63 : index
    %c0_686 = arith.constant 0 : index
    %410 = vector.load %arg11[%c63_685, %c0_686] : memref<81x64xf32, #tpu.memory_space<vmem>>, vector<7x64xf32>
    %c35_687 = arith.constant 35 : index
    %c384_688 = arith.constant 384 : index
    %411 = vector.load %arg12[%c35_687, %c384_688] : memref<49x576xf32, #tpu.memory_space<vmem>>, vector<7x64xf32>
    tpu.vector_store %arg12[%c35_687, %c384_688], %410 {strides = array<i32>} : memref<49x576xf32, #tpu.memory_space<vmem>>, vector<7x64xf32>,
    %c64_689 = arith.constant 64 : index
    %c0_690 = arith.constant 0 : index
    %412 = vector.load %arg11[%c64_689, %c0_690] : memref<81x64xf32, #tpu.memory_space<vmem>>, vector<7x64xf32>
    %c35_691 = arith.constant 35 : index
    %c448_692 = arith.constant 448 : index
    %413 = vector.load %arg12[%c35_691, %c448_692] : memref<49x576xf32, #tpu.memory_space<vmem>>, vector<7x64xf32>
    tpu.vector_store %arg12[%c35_691, %c448_692], %412 {strides = array<i32>} : memref<49x576xf32, #tpu.memory_space<vmem>>, vector<7x64xf32>,
    %c65 = arith.constant 65 : index
    %c0_693 = arith.constant 0 : index
    %414 = vector.load %arg11[%c65, %c0_693] : memref<81x64xf32, #tpu.memory_space<vmem>>, vector<7x64xf32>
    %c35_694 = arith.constant 35 : index
    %c512_695 = arith.constant 512 : index
    %415 = vector.load %arg12[%c35_694, %c512_695] : memref<49x576xf32, #tpu.memory_space<vmem>>, vector<7x64xf32>
    tpu.vector_store %arg12[%c35_694, %c512_695], %414 {strides = array<i32>} : memref<49x576xf32, #tpu.memory_space<vmem>>, vector<7x64xf32>,
    %c54_696 = arith.constant 54 : index
    %c0_697 = arith.constant 0 : index
    %416 = vector.load %arg11[%c54_696, %c0_697] : memref<81x64xf32, #tpu.memory_space<vmem>>, vector<7x64xf32>
    %c42_698 = arith.constant 42 : index
    %c0_699 = arith.constant 0 : index
    %417 = vector.load %arg12[%c42_698, %c0_699] : memref<49x576xf32, #tpu.memory_space<vmem>>, vector<7x64xf32>
    tpu.vector_store %arg12[%c42_698, %c0_699], %416 {strides = array<i32>} : memref<49x576xf32, #tpu.memory_space<vmem>>, vector<7x64xf32>,
    %c55_700 = arith.constant 55 : index
    %c0_701 = arith.constant 0 : index
    %418 = vector.load %arg11[%c55_700, %c0_701] : memref<81x64xf32, #tpu.memory_space<vmem>>, vector<7x64xf32>
    %c42_702 = arith.constant 42 : index
    %c64_703 = arith.constant 64 : index
    %419 = vector.load %arg12[%c42_702, %c64_703] : memref<49x576xf32, #tpu.memory_space<vmem>>, vector<7x64xf32>
    tpu.vector_store %arg12[%c42_702, %c64_703], %418 {strides = array<i32>} : memref<49x576xf32, #tpu.memory_space<vmem>>, vector<7x64xf32>,
    %c56_704 = arith.constant 56 : index
    %c0_705 = arith.constant 0 : index
    %420 = vector.load %arg11[%c56_704, %c0_705] : memref<81x64xf32, #tpu.memory_space<vmem>>, vector<7x64xf32>
    %c42_706 = arith.constant 42 : index
    %c128_707 = arith.constant 128 : index
    %421 = vector.load %arg12[%c42_706, %c128_707] : memref<49x576xf32, #tpu.memory_space<vmem>>, vector<7x64xf32>
    tpu.vector_store %arg12[%c42_706, %c128_707], %420 {strides = array<i32>} : memref<49x576xf32, #tpu.memory_space<vmem>>, vector<7x64xf32>,
    %c63_708 = arith.constant 63 : index
    %c0_709 = arith.constant 0 : index
    %422 = vector.load %arg11[%c63_708, %c0_709] : memref<81x64xf32, #tpu.memory_space<vmem>>, vector<7x64xf32>
    %c42_710 = arith.constant 42 : index
    %c192_711 = arith.constant 192 : index
    %423 = vector.load %arg12[%c42_710, %c192_711] : memref<49x576xf32, #tpu.memory_space<vmem>>, vector<7x64xf32>
    tpu.vector_store %arg12[%c42_710, %c192_711], %422 {strides = array<i32>} : memref<49x576xf32, #tpu.memory_space<vmem>>, vector<7x64xf32>,
    %c64_712 = arith.constant 64 : index
    %c0_713 = arith.constant 0 : index
    %424 = vector.load %arg11[%c64_712, %c0_713] : memref<81x64xf32, #tpu.memory_space<vmem>>, vector<7x64xf32>
    %c42_714 = arith.constant 42 : index
    %c256_715 = arith.constant 256 : index
    %425 = vector.load %arg12[%c42_714, %c256_715] : memref<49x576xf32, #tpu.memory_space<vmem>>, vector<7x64xf32>
    tpu.vector_store %arg12[%c42_714, %c256_715], %424 {strides = array<i32>} : memref<49x576xf32, #tpu.memory_space<vmem>>, vector<7x64xf32>,
    %c65_716 = arith.constant 65 : index
    %c0_717 = arith.constant 0 : index
    %426 = vector.load %arg11[%c65_716, %c0_717] : memref<81x64xf32, #tpu.memory_space<vmem>>, vector<7x64xf32>
    %c42_718 = arith.constant 42 : index
    %c320_719 = arith.constant 320 : index
    %427 = vector.load %arg12[%c42_718, %c320_719] : memref<49x576xf32, #tpu.memory_space<vmem>>, vector<7x64xf32>
    tpu.vector_store %arg12[%c42_718, %c320_719], %426 {strides = array<i32>} : memref<49x576xf32, #tpu.memory_space<vmem>>, vector<7x64xf32>,
    %c72_720 = arith.constant 72 : index
    %c0_721 = arith.constant 0 : index
    %428 = vector.load %arg11[%c72_720, %c0_721] : memref<81x64xf32, #tpu.memory_space<vmem>>, vector<7x64xf32>
    %c42_722 = arith.constant 42 : index
    %c384_723 = arith.constant 384 : index
    %429 = vector.load %arg12[%c42_722, %c384_723] : memref<49x576xf32, #tpu.memory_space<vmem>>, vector<7x64xf32>
    tpu.vector_store %arg12[%c42_722, %c384_723], %428 {strides = array<i32>} : memref<49x576xf32, #tpu.memory_space<vmem>>, vector<7x64xf32>,
    %c73 = arith.constant 73 : index
    %c0_724 = arith.constant 0 : index
    %430 = vector.load %arg11[%c73, %c0_724] : memref<81x64xf32, #tpu.memory_space<vmem>>, vector<7x64xf32>
    %c42_725 = arith.constant 42 : index
    %c448_726 = arith.constant 448 : index
    %431 = vector.load %arg12[%c42_725, %c448_726] : memref<49x576xf32, #tpu.memory_space<vmem>>, vector<7x64xf32>
    tpu.vector_store %arg12[%c42_725, %c448_726], %430 {strides = array<i32>} : memref<49x576xf32, #tpu.memory_space<vmem>>, vector<7x64xf32>,
    %c74 = arith.constant 74 : index
    %c0_727 = arith.constant 0 : index
    %432 = vector.load %arg11[%c74, %c0_727] : memref<81x64xf32, #tpu.memory_space<vmem>>, vector<7x64xf32>
    %c42_728 = arith.constant 42 : index
    %c512_729 = arith.constant 512 : index
    %433 = vector.load %arg12[%c42_728, %c512_729] : memref<49x576xf32, #tpu.memory_space<vmem>>, vector<7x64xf32>
    tpu.vector_store %arg12[%c42_728, %c512_729], %432 {strides = array<i32>} : memref<49x576xf32, #tpu.memory_space<vmem>>, vector<7x64xf32>,
    %c0_730 = arith.constant 0 : index
    %c0_731 = arith.constant 0 : index
    %434 = vector.load %arg12[%c0_730, %c0_731] : memref<49x576xf32, #tpu.memory_space<vmem>>, vector<49x576xf32>
    %435 = arith.truncf %434 : vector<49x576xf32> to vector<49x576xbf16>
    %c0_732 = arith.constant 0 : index
    %c0_733 = arith.constant 0 : index
    %436 = vector.load %arg6[%c0_732, %c0_733] : memref<576x64xbf16, #tpu.memory_space<vmem>>, vector<576x64xbf16>
    %cst_734 = arith.constant dense<0.000000e+00> : vector<49x64xf32>
    %437 = tpu.matmul %435, %436, %cst_734 {dimension_numbers = #tpu.dot_dimension_numbers<[1], [0], [0], [1], [0, 0, 1, 1], [], []>} : vector<49x576xbf16>, vector<576x64xbf16>, vector<49x64xf32> -> vector<49x64xf32>
    %c0_735 = arith.constant 0 : index
    %c0_736 = arith.constant 0 : index
    %438 = vector.load %arg7[%c0_735, %c0_736] : memref<1x64xf32, #tpu.memory_space<vmem>>, vector<1x64xf32>
    %439 = vector.broadcast %438 : vector<1x64xf32> to vector<49x64xf32>
    %440 = arith.addf %437, %439 : vector<49x64xf32>
    %cst_737 = arith.constant 0.000000e+00 : f32
    %441 = vector.broadcast %cst_737 : f32 to vector<49x64xf32>
    %442 = arith.maximumf %440, %441 : vector<49x64xf32>
    %443 = arith.truncf %442 : vector<49x64xf32> to vector<49x64xbf16>
    %c0_738 = arith.constant 0 : index
    %c0_739 = arith.constant 0 : index
    %c0_740 = arith.constant 0 : index
    %444 = vector.load %arg8[%c0_738, %c0_739, %c0_740] : memref<1x49x64xbf16, #tpu.memory_space<vmem>>, vector<1x49x64xbf16>
    %445 = vector.shape_cast %444 : vector<1x49x64xbf16> to vector<49x64xbf16>
    %446 = vector.shape_cast %443 : vector<49x64xbf16> to vector<1x49x64xbf16>
    tpu.vector_store %arg8[%c0_738, %c0_739, %c0_740], %446 {strides = array<i32>} : memref<1x49x64xbf16, #tpu.memory_space<vmem>>, vector<1x49x64xbf16>,
    return
  }
  func.func @transform_0(%arg0: i32) -> (i32, i32, i32) {
    %c0_i32 = arith.constant 0 : i32
    %c0_i32_0 = arith.constant 0 : i32
    %c0_i32_1 = arith.constant 0 : i32
    return %arg0, %c0_i32, %c0_i32_0 : i32, i32, i32
  }
  func.func @transform_1(%arg0: i32) -> (i32, i32) {
    %c0_i32 = arith.constant 0 : i32
    %c0_i32_0 = arith.constant 0 : i32
    %c0_i32_1 = arith.constant 0 : i32
    return %c0_i32, %c0_i32_0 : i32, i32
  }
  func.func @transform_2(%arg0: i32) -> (i32, i32) {
    %c0_i32 = arith.constant 0 : i32
    %c0_i32_0 = arith.constant 0 : i32
    %c0_i32_1 = arith.constant 0 : i32
    return %c0_i32, %c0_i32_0 : i32, i32
  }
  func.func @transform_3(%arg0: i32) -> (i32, i32) {
    %c0_i32 = arith.constant 0 : i32
    %c0_i32_0 = arith.constant 0 : i32
    %c0_i32_1 = arith.constant 0 : i32
    return %c0_i32, %c0_i32_0 : i32, i32
  }
  func.func @transform_4(%arg0: i32) -> (i32, i32) {
    %c0_i32 = arith.constant 0 : i32
    %c0_i32_0 = arith.constant 0 : i32
    %c0_i32_1 = arith.constant 0 : i32
    return %c0_i32, %c0_i32_0 : i32, i32
  }
  func.func @transform_5(%arg0: i32) -> (i32, i32) {
    %c0_i32 = arith.constant 0 : i32
    %c0_i32_0 = arith.constant 0 : i32
    %c0_i32_1 = arith.constant 0 : i32
    return %c0_i32, %c0_i32_0 : i32, i32
  }
  func.func @transform_6(%arg0: i32) -> (i32, i32) {
    %c0_i32 = arith.constant 0 : i32
    %c0_i32_0 = arith.constant 0 : i32
    %c0_i32_1 = arith.constant 0 : i32
    return %c0_i32, %c0_i32_0 : i32, i32
  }
  func.func @transform_7(%arg0: i32) -> (i32, i32, i32) {
    %c0_i32 = arith.constant 0 : i32
    %c0_i32_0 = arith.constant 0 : i32
    %c0_i32_1 = arith.constant 0 : i32
    return %arg0, %c0_i32, %c0_i32_0 : i32, i32, i32
  }
}

module attributes {stable_mosaic.version = 11 : i64} {
  func.func @_fc_head_kernel(%arg0: i32, %arg1: memref<2x3136xbf16, #tpu.memory_space<vmem>>, %arg2: memref<3136x512xbf16, #tpu.memory_space<vmem>>, %arg3: memref<1x512xf32, #tpu.memory_space<vmem>>, %arg4: memref<512x3xbf16, #tpu.memory_space<vmem>>, %arg5: memref<1x3xf32, #tpu.memory_space<vmem>>, %arg6: memref<2x3xf32, #tpu.memory_space<vmem>>) attributes {dimension_semantics = [#tpu.dimension_semantics<parallel>], iteration_bounds = array<i64: 1>, scalar_prefetch = 0 : i64, scratch_operands = 0 : i64, tpu.core_type = #tpu.core_type<tc>, window_params = [{transform_indices = @transform_0, window_bounds = array<i64: 2, 3136>}, {pipeline_mode = #tpu.pipeline_mode<synchronous>, transform_indices = @transform_1, window_bounds = array<i64: 3136, 512>}, {pipeline_mode = #tpu.pipeline_mode<synchronous>, transform_indices = @transform_2, window_bounds = array<i64: 1, 512>}, {pipeline_mode = #tpu.pipeline_mode<synchronous>, transform_indices = @transform_3, window_bounds = array<i64: 512, 3>}, {pipeline_mode = #tpu.pipeline_mode<synchronous>, transform_indices = @transform_4, window_bounds = array<i64: 1, 3>}, {transform_indices = @transform_5, window_bounds = array<i64: 2, 3>}]} {
    %c0 = arith.constant 0 : index
    %c0_0 = arith.constant 0 : index
    %0 = vector.load %arg1[%c0, %c0_0] : memref<2x3136xbf16, #tpu.memory_space<vmem>>, vector<2x3136xbf16>
    %c0_1 = arith.constant 0 : index
    %c0_2 = arith.constant 0 : index
    %1 = vector.load %arg2[%c0_1, %c0_2] : memref<3136x512xbf16, #tpu.memory_space<vmem>>, vector<3136x512xbf16>
    %cst = arith.constant dense<0.000000e+00> : vector<2x512xf32>
    %2 = tpu.matmul %0, %1, %cst {dimension_numbers = #tpu.dot_dimension_numbers<[1], [0], [0], [1], [0, 0, 1, 1], [], []>} : vector<2x3136xbf16>, vector<3136x512xbf16>, vector<2x512xf32> -> vector<2x512xf32>
    %c0_3 = arith.constant 0 : index
    %c0_4 = arith.constant 0 : index
    %3 = vector.load %arg3[%c0_3, %c0_4] : memref<1x512xf32, #tpu.memory_space<vmem>>, vector<1x512xf32>
    %4 = vector.broadcast %3 : vector<1x512xf32> to vector<2x512xf32>
    %5 = arith.addf %2, %4 : vector<2x512xf32>
    %cst_5 = arith.constant 0.000000e+00 : f32
    %6 = vector.broadcast %cst_5 : f32 to vector<2x512xf32>
    %7 = arith.maximumf %5, %6 : vector<2x512xf32>
    %8 = arith.truncf %7 : vector<2x512xf32> to vector<2x512xbf16>
    %c0_6 = arith.constant 0 : index
    %c0_7 = arith.constant 0 : index
    %9 = vector.load %arg4[%c0_6, %c0_7] : memref<512x3xbf16, #tpu.memory_space<vmem>>, vector<512x3xbf16>
    %cst_8 = arith.constant dense<0.000000e+00> : vector<2x3xf32>
    %10 = tpu.matmul %8, %9, %cst_8 {dimension_numbers = #tpu.dot_dimension_numbers<[1], [0], [0], [1], [0, 0, 1, 1], [], []>} : vector<2x512xbf16>, vector<512x3xbf16>, vector<2x3xf32> -> vector<2x3xf32>
    %c0_9 = arith.constant 0 : index
    %c0_10 = arith.constant 0 : index
    %11 = vector.load %arg5[%c0_9, %c0_10] : memref<1x3xf32, #tpu.memory_space<vmem>>, vector<1x3xf32>
    %12 = vector.broadcast %11 : vector<1x3xf32> to vector<2x3xf32>
    %13 = arith.addf %10, %12 : vector<2x3xf32>
    %c0_11 = arith.constant 0 : index
    %c0_12 = arith.constant 0 : index
    %14 = vector.load %arg6[%c0_11, %c0_12] : memref<2x3xf32, #tpu.memory_space<vmem>>, vector<2x3xf32>
    tpu.vector_store %arg6[%c0_11, %c0_12], %13 {strides = array<i32>} : memref<2x3xf32, #tpu.memory_space<vmem>>, vector<2x3xf32>,
    return
  }
  func.func @transform_0(%arg0: i32) -> (i32, i32) {
    %c0_i32 = arith.constant 0 : i32
    %c0_i32_0 = arith.constant 0 : i32
    return %arg0, %c0_i32 : i32, i32
  }
  func.func @transform_1(%arg0: i32) -> (i32, i32) {
    %c0_i32 = arith.constant 0 : i32
    %c0_i32_0 = arith.constant 0 : i32
    %c0_i32_1 = arith.constant 0 : i32
    return %c0_i32, %c0_i32_0 : i32, i32
  }
  func.func @transform_2(%arg0: i32) -> (i32, i32) {
    %c0_i32 = arith.constant 0 : i32
    %c0_i32_0 = arith.constant 0 : i32
    %c0_i32_1 = arith.constant 0 : i32
    return %c0_i32, %c0_i32_0 : i32, i32
  }
  func.func @transform_3(%arg0: i32) -> (i32, i32) {
    %c0_i32 = arith.constant 0 : i32
    %c0_i32_0 = arith.constant 0 : i32
    %c0_i32_1 = arith.constant 0 : i32
    return %c0_i32, %c0_i32_0 : i32, i32
  }
  func.func @transform_4(%arg0: i32) -> (i32, i32) {
    %c0_i32 = arith.constant 0 : i32
    %c0_i32_0 = arith.constant 0 : i32
    %c0_i32_1 = arith.constant 0 : i32
    return %c0_i32, %c0_i32_0 : i32, i32
  }
  func.func @transform_5(%arg0: i32) -> (i32, i32) {
    %c0_i32 = arith.constant 0 : i32
    %c0_i32_0 = arith.constant 0 : i32
    return %arg0, %c0_i32 : i32, i32
  }
}

</mosaic_0001>

<bundles_post_ra>
// kernel: cnn_model_forward.2
= control target key start
LH: loop header
LB: loop body
LE: loop exit
PB: predicated region body
PF: predicated region fallthrough
CT: control target
= control target key end

     0   :  { %s5364_s24 = smov 0   ;;  %s7196_s0 = inlined_call_operand.vmem [shape: bf16[2,400,256], index: 0, kind: input, shape index: {}]   ;;  %s7197_s1 = inlined_call_operand.vmem [shape: bf16[256,32], index: 1, kind: input, shape index: {}]   ;;  %s7198_s2 = inlined_call_operand.vmem [shape: f32[1,32], index: 2, kind: input, shape index: {}]   ;;  %s7199_s3 = inlined_call_operand.vmem [shape: bf16[512,64], index: 3, kind: input, shape index: {}]   ;;  %s7200_s4 = inlined_call_operand.vmem [shape: f32[1,64], index: 4, kind: input, shape index: {}]   ;;  %s7201_s5 = inlined_call_operand.vmem [shape: bf16[576,64], index: 5, kind: input, shape index: {}]   ;;  %s7202_s6 = inlined_call_operand.vmem [shape: f32[1,64], index: 6, kind: input, shape index: {}]   ;;  %s7203_s7 = inlined_call_operand.vmem [shape: bf16[2,49,64], index: 7, kind: output, shape index: {}]  }
   0x1 LB: > { %s4765_s25 = sadd.s32 4294967295, %s5318_s24   ;;  %p4769_p0 = scmp.ge.s32.totalorder %s5318_s24, 1  ;;  %s5318_s24 = sphi %s5364_s24, %s17_s24  }
   0x2   : > { %p237_p1 = scmp.lt.s32.totalorder %s5318_s24, 3 }
   0x4   : > { %p238_p2 = pnand %p4769_p0, %p237_p1 }
   0x5   : > { %v5151_v0 = vld [vmem:[%s7197_s1] sm:$0xff] (!%p238_p2)   ;;  %v5320_v1 = vmov (!%p238_p2), 0   ;;  %v5152_v2 = vld [vmem:[%s7197_s1 + $0x8] sm:$0xff] (!%p238_p2)   ;;  %p269_p3 = scmp.lt.s32.totalorder (!%p238_p2), %s4765_s25, 1  ;;  %v5153_v3 = vld [vmem:[%s7197_s1 + $0x10] sm:$0xff] (!%p238_p2)   ;;  %vm998_vm0 = vcmask (!%p238_p2), 261120  }
   0x6   : > { %241 = sbr.rel (%p238_p2) target bundleno = 1482 (0x5ca), region = 48  ;;  %715 = vmatprep.subr.bf16.mxu0 (!%p238_p2), %v5320_v1  ;;  %v5154_v4 = vld [vmem:[%s7197_s1 + $0x18] sm:$0xff] (!%p238_p2)   ;;  %v5155_v5 = vld [vmem:[%s7197_s1 + $0x20] sm:$0xff] (!%p238_p2)   ;;  %v5156_v7 = vld [vmem:[%s7197_s1 + $0x28] sm:$0xff] (!%p238_p2)   ;;  %s5321_s21 = smov (!%p238_p2), 32   ;;  %vm7204_vm1 = vcmask (!%p238_p2), 253952  }
   0x7   : > { %716 = vmatpush1.bf16.msra.mxu0 (!%p238_p2), %v5151_v0  ;;  %v5157_v8 = vld [vmem:[%s7197_s1 + $0x30] sm:$0xff] (!%p238_p2)   ;;  %v5158_v9 = vld [vmem:[%s7197_s1 + $0x38] sm:$0xff] (!%p238_p2)   ;;  %v5159_v10 = vld [vmem:[%s7197_s1 + $0x40] sm:$0xff] (!%p238_p2)   ;;  %s5322_s22 = smov (!%p238_p2), 64   ;;  %s5323_s23 = smov (!%p238_p2), 96   ;;  %vm1257_vm2 = vcmask (!%p238_p2), 261121  }
   0x8   : > { %717 = vmatprep.subr.bf16.mxu0 (!%p238_p2), %v5320_v1  ;;  %v5160_v11 = vld [vmem:[%s7197_s1 + $0x48] sm:$0xff] (!%p238_p2)   ;;  %v5161_v12 = vld [vmem:[%s7197_s1 + $0x50] sm:$0xff] (!%p238_p2)   ;;  %v5162_v13 = vld [vmem:[%s7197_s1 + $0x58] sm:$0xff] (!%p238_p2)   ;;  %vm1251_vm3 = vcmask (!%p238_p2), 1040384   ;;  %vm1259_vm4 = vcmask (!%p238_p2), 254976   ;;  %vm1506_vm5 = vcmask (!%p238_p2), 261122  }
   0x9   : > { %v5163_v14 = vld [vmem:[%s7197_s1 + $0x60] sm:$0xff] (!%p238_p2)   ;;  %v5164_v15 = vld [vmem:[%s7197_s1 + $0x68] sm:$0xff] (!%p238_p2)   ;;  %v5165_v16 = vld [vmem:[%s7197_s1 + $0x70] sm:$0xff] (!%p238_p2)   ;;  %vm1500_vm6 = vcmask (!%p238_p2), 1041408   ;;  %vm1508_vm7 = vcmask (!%p238_p2), 256000   ;;  %vm1755_vm8 = vcmask (!%p238_p2), 261123  }
   0xa   : > { %v5166_v17 = vld [vmem:[%s7197_s1 + $0x78] sm:$0xff] (!%p238_p2)   ;;  %v5475_v61 = vld [vmem:[%s7198_s2] ss:$0 sm:$0xff] (!%p238_p2)  ;;  %vm7211_vm9 = vcmask (!%p238_p2), 523520   ;;  %vm7210_vm10 = vcmask (!%p238_p2), 516352   ;;  %vm7212_vm11 = vcmask (!%p238_p2), 785920  }
   0xb   : > { %718 = vmatpush1.bf16.msra.mxu0 (!%p238_p2), %v5152_v2  ;;  %vm1749_vm12 = vcmask (!%p238_p2), 1042432   ;;  %vm7206_vm13 = vcmask (!%p238_p2), 778752   ;;  %vm7209_vm14 = vcmask (!%p238_p2), 1048320   ;;  %vm2004_vm15 = vcmask (!%p238_p2), 261124  }
   0xc   : > { %719 = vmatprep.subr.bf16.mxu0 (!%p238_p2), %v5320_v1 }
   0xd   : > { %s7288_s25 = smov (!%p269_p3, %s4765_s25), 1 }
   0xe   : > { %s5137_s11 = smul.u32 400, %s7288_s25 }
   0xf   : > { %720 = vmatpush1.bf16.msra.mxu0 %v5153_v3 }
  0x10   : > { %721 = vmatprep.subr.bf16.mxu0 %v5320_v1  ;;  %s5393_s16 = scalar_lea.vmem %s7196_s0, %s5137_s11  ;;  %s5138_s11 = smul.u32 28, %s7288_s25 }
  0x11   : > { %v5169_v6 = vld [vmem:[%s5393_s16 + $0x4] ss:$8 sps:$4 sm:$0xff]   ;;  %v5167_v18 = vld [vmem:[%s5393_s16] ss:$8 sps:$4 sm:$0xff]   ;;  %v5170_v19 = vld [vmem:[%s5393_s16 + $0x14] ss:$8 sps:$4 sm:$0xff]  }
  0x12   : > { %747 = vmatprep.mubr.bf16.mxu0 %v5169_v6  ;;  %v5172_v20 = vld [vmem:[%s5393_s16 + $0x10] ss:$8 sps:$4 sm:$0xff]   ;;  %v5173_v21 = vld [vmem:[%s5393_s16 + $0x24] ss:$8 sps:$4 sm:$0xff]   ;;  %v5175_v22 = vld [vmem:[%s5393_s16 + $0x20] ss:$8 sps:$4 sm:$0xff]   ;;  %s7176_s13 = scalar_lea.vmem %s7203_s7, %s5138_s11 }
  0x13   : > { %722 = vmatpush1.bf16.msra.mxu0 %v5154_v4  ;;  %v5176_v23 = vld [vmem:[%s5393_s16 + $0x34] ss:$8 sps:$4 sm:$0xff]   ;;  %v5178_v24 = vld [vmem:[%s5393_s16 + $0x30] ss:$8 sps:$4 sm:$0xff]   ;;  %v5179_v25 = vld [vmem:[%s5393_s16 + $0x44] ss:$8 sps:$4 sm:$0xff]  }
  0x14   : > { %723 = vmatprep.subr.bf16.mxu0 %v5320_v1  ;;  %v5181_v26 = vld [vmem:[%s5393_s16 + $0x40] ss:$8 sps:$4 sm:$0xff]   ;;  %v5182_v27 = vld [vmem:[%s5393_s16 + $0x54] ss:$8 sps:$4 sm:$0xff]   ;;  %v5184_v28 = vld [vmem:[%s5393_s16 + $0x50] ss:$8 sps:$4 sm:$0xff]  }
  0x15   : > { %v5185_v29 = vld [vmem:[%s5393_s16 + $0x64] ss:$8 sps:$4 sm:$0xff]   ;;  %v5187_v30 = vld [vmem:[%s5393_s16 + $0x60] ss:$8 sps:$4 sm:$0xff]   ;;  %v5188_v31 = vld [vmem:[%s5393_s16 + $0x74] ss:$8 sps:$4 sm:$0xff]  }
  0x16   : > { %v5190_v32 = vld [vmem:[%s5393_s16 + $0x70] ss:$8 sps:$4 sm:$0xff]   ;;  %v5191_v33 = vld [vmem:[%s5393_s16 + $0x84] ss:$8 sps:$4 sm:$0xff]   ;;  %v5193_v34 = vld [vmem:[%s5393_s16 + $0x80] ss:$8 sps:$4 sm:$0xff]  }
  0x17   : > { %724 = vmatpush1.bf16.msra.mxu0 %v5155_v5  ;;  %v5194_v35 = vld [vmem:[%s5393_s16 + $0x94] ss:$8 sps:$4 sm:$0xff]   ;;  %v5196_v36 = vld [vmem:[%s5393_s16 + $0x90] ss:$8 sps:$4 sm:$0xff]   ;;  %v5197_v37 = vld [vmem:[%s5393_s16 + $0xa4] ss:$8 sps:$4 sm:$0xff]  }
  0x18   : > { %725 = vmatprep.subr.bf16.mxu0 %v5320_v1  ;;  %v5199_v38 = vld [vmem:[%s5393_s16 + $0xa0] ss:$8 sps:$4 sm:$0xff]   ;;  %v5200_v39 = vld [vmem:[%s5393_s16 + $0xb4] ss:$8 sps:$4 sm:$0xff]   ;;  %v5202_v40 = vld [vmem:[%s5393_s16 + $0xb0] ss:$8 sps:$4 sm:$0xff]  }
  0x19   : > { %v5203_v41 = vld [vmem:[%s5393_s16 + $0xc4] ss:$8 sps:$4 sm:$0xff]   ;;  %v5205_v42 = vld [vmem:[%s5393_s16 + $0xc0] ss:$8 sps:$4 sm:$0xff]   ;;  %v5206_v43 = vld [vmem:[%s5393_s16 + $0xd4] ss:$8 sps:$4 sm:$0xff]  }
  0x1a   : > { %v5208_v44 = vld [vmem:[%s5393_s16 + $0xd0] ss:$8 sps:$4 sm:$0xff]   ;;  %v5209_v45 = vld [vmem:[%s5393_s16 + $0xe4] ss:$8 sps:$4 sm:$0xff]   ;;  %v5211_v46 = vld [vmem:[%s5393_s16 + $0xe0] ss:$8 sps:$4 sm:$0xff]  }
  0x1b   : > { %726 = vmatpush1.bf16.msra.mxu0 %v5156_v7  ;;  %v5212_v47 = vld [vmem:[%s5393_s16 + $0xf4] ss:$8 sps:$4 sm:$0xff]   ;;  %v5214_v48 = vld [vmem:[%s5393_s16 + $0xf0] ss:$8 sps:$4 sm:$0xff]   ;;  %v5215_v49 = vld [vmem:[%s5393_s16 + $0x104] ss:$8 sps:$4 sm:$0xff]  }
  0x1c   : > { %727 = vmatprep.subr.bf16.mxu0 %v5320_v1  ;;  %v5217_v50 = vld [vmem:[%s5393_s16 + $0x100] ss:$8 sps:$4 sm:$0xff]   ;;  %v5218_v51 = vld [vmem:[%s5393_s16 + $0x114] ss:$8 sps:$4 sm:$0xff]   ;;  %v5220_v52 = vld [vmem:[%s5393_s16 + $0x110] ss:$8 sps:$4 sm:$0xff]  }
  0x1d   : > { %v5221_v53 = vld [vmem:[%s5393_s16 + $0x124] ss:$8 sps:$4 sm:$0xff]   ;;  %v5223_v54 = vld [vmem:[%s5393_s16 + $0x120] ss:$8 sps:$4 sm:$0xff]   ;;  %v5224_v55 = vld [vmem:[%s5393_s16 + $0x134] ss:$8 sps:$4 sm:$0xff]  }
  0x1e   : > { %v5226_v56 = vld [vmem:[%s5393_s16 + $0x130] ss:$8 sps:$4 sm:$0xff]   ;;  %v5227_v57 = vld [vmem:[%s5393_s16 + $0x144] ss:$8 sps:$4 sm:$0xff]   ;;  %v5229_v58 = vld [vmem:[%s5393_s16 + $0x140] ss:$8 sps:$4 sm:$0xff]  }
  0x1f   : > { %728 = vmatpush1.bf16.msra.mxu0 %v5157_v8  ;;  %v5230_v59 = vld [vmem:[%s5393_s16 + $0x154] ss:$8 sps:$4 sm:$0xff]   ;;  %v5232_v60 = vld [vmem:[%s5393_s16 + $0x150] ss:$8 sps:$4 sm:$0xff]   ;;  %v5233_v7 = vld [vmem:[%s5393_s16 + $0x164] ss:$8 sps:$4 sm:$0xff]  }
  0x20   : > { %729 = vmatprep.subr.bf16.mxu0 %v5320_v1  ;;  %v5235_v8 = vld [vmem:[%s5393_s16 + $0x160] ss:$8 sps:$4 sm:$0xff]  }
  0x23   : > { %730 = vmatpush1.bf16.msra.mxu0 %v5158_v9 }
  0x24   : > { %731 = vmatprep.subr.bf16.mxu0 %v5320_v1 }
  0x27   : > { %732 = vmatpush1.bf16.msra.mxu0 %v5159_v10 }
  0x28   : > { %733 = vmatprep.subr.bf16.mxu0 %v5320_v1 }
  0x2b   : > { %734 = vmatpush1.bf16.msra.mxu0 %v5160_v11 }
  0x2c   : > { %735 = vmatprep.subr.bf16.mxu0 %v5320_v1 }
  0x2f   : > { %736 = vmatpush1.bf16.msra.mxu0 %v5161_v12 }
  0x30   : > { %737 = vmatprep.subr.bf16.mxu0 %v5320_v1 }
  0x33   : > { %738 = vmatpush1.bf16.msra.mxu0 %v5162_v13 }
  0x34   : > { %739 = vmatprep.subr.bf16.mxu0 %v5320_v1 }
  0x37   : > { %740 = vmatpush1.bf16.msra.mxu0 %v5163_v14 }
  0x38   : > { %741 = vmatprep.subr.bf16.mxu0 %v5320_v1 }
  0x3b   : > { %742 = vmatpush1.bf16.msra.mxu0 %v5164_v15 }
  0x3c   : > { %743 = vmatprep.subr.bf16.mxu0 %v5320_v1 }
  0x3f   : > { %744 = vmatpush1.bf16.msra.mxu0 %v5165_v16 }
  0x40   : > { %745 = vmatprep.subr.bf16.mxu0 %v5320_v1 }
  0x43   : > { %746 = vmatpush1.bf16.msra.mxu0 %v5166_v17 }
  0x46   : > { %748 = vmatmul.mubr.bf16.vlgmr.msra.gmra.mrb[0].mxu0 %v5167_v18 }
  0x47   : > { %755 = vmatprep.mubr.bf16.mxu0 %v5170_v19 }
  0x4e   : > { %756 = vmatmul.mubr.bf16.gmra.mrb[4].mxu0 %v5172_v20 }
  0x4f   : > { %763 = vmatprep.mubr.bf16.mxu0 %v5173_v21 }
  0x56   : > { %764 = vmatmul.mubr.bf16.gmra.mrb[8].mxu0 %v5175_v22 }
  0x57   : > { %771 = vmatprep.mubr.bf16.mxu0 %v5176_v23 }
  0x5e   : > { %772 = vmatmul.mubr.bf16.gmra.mrb[12].mxu0 %v5178_v24 }
  0x5f   : > { %779 = vmatprep.mubr.bf16.mxu0 %v5179_v25 }
  0x66   : > { %780 = vmatmul.mubr.bf16.gmra.mrb[16].mxu0 %v5181_v26 }
  0x67   : > { %787 = vmatprep.mubr.bf16.mxu0 %v5182_v27 }
  0x6e   : > { %788 = vmatmul.mubr.bf16.gmra.mrb[20].mxu0 %v5184_v28 }
  0x6f   : > { %795 = vmatprep.mubr.bf16.mxu0 %v5185_v29  ;;  %v5236_v29 = vld [vmem:[%s5393_s16 + $0x174] ss:$8 sps:$4 sm:$0xff]  }
  0x76   : > { %796 = vmatmul.mubr.bf16.gmra.mrb[24].mxu0 %v5187_v30  ;;  %v5238_v30 = vld [vmem:[%s5393_s16 + $0x170] ss:$8 sps:$4 sm:$0xff]  }
  0x77   : > { %803 = vmatprep.mubr.bf16.mxu0 %v5188_v31 }
  0x7e   : > { %804 = vmatmul.mubr.bf16.gmra.mrb[28].mxu0 %v5190_v32 }
  0x7f   : > { %811 = vmatprep.mubr.bf16.mxu0 %v5191_v33 }
  0x86   : > { %812 = vmatmul.mubr.bf16.gmra.mrb[32].mxu0 %v5193_v34 }
  0x87   : > { %819 = vmatprep.mubr.bf16.mxu0 %v5194_v35 }
  0x8e   : > { %820 = vmatmul.mubr.bf16.gmra.mrb[36].mxu0 %v5196_v36 }
  0x8f   : > { %827 = vmatprep.mubr.bf16.mxu0 %v5197_v37 }
  0x96   : > { %828 = vmatmul.mubr.bf16.gmra.mrb[40].mxu0 %v5199_v38 }
  0x97   : > { %835 = vmatprep.mubr.bf16.mxu0 %v5200_v39 }
  0x9e   : > { %836 = vmatmul.mubr.bf16.gmra.mrb[44].mxu0 %v5202_v40 }
  0x9f   : > { %843 = vmatprep.mubr.bf16.mxu0 %v5203_v41 }
  0xa6   : > { %844 = vmatmul.mubr.bf16.gmra.mrb[48].mxu0 %v5205_v42 }
  0xa7   : > { %851 = vmatprep.mubr.bf16.mxu0 %v5206_v43 }
  0xae   : > { %852 = vmatmul.mubr.bf16.gmra.mrb[52].mxu0 %v5208_v44 }
  0xaf   : > { %859 = vmatprep.mubr.bf16.mxu0 %v5209_v45 }
  0xb6   : > { %860 = vmatmul.mubr.bf16.gmra.mrb[56].mxu0 %v5211_v46 }
  0xb7   : > { %867 = vmatprep.mubr.bf16.mxu0 %v5212_v47 }
  0xbe   : > { %868 = vmatmul.mubr.bf16.gmra.mrb[60].mxu0 %v5214_v48 }
  0xbf   : > { %875 = vmatprep.mubr.bf16.mxu0 %v5215_v49 }
  0xc6   : > { %876 = vmatmul.mubr.bf16.gmra.mrb[64].mxu0 %v5217_v50 }
  0xc7   : > { %883 = vmatprep.mubr.bf16.mxu0 %v5218_v51 }
  0xce   : > { %884 = vmatmul.mubr.bf16.gmra.mrb[68].mxu0 %v5220_v52 }
  0xcf   : > { %891 = vmatprep.mubr.bf16.mxu0 %v5221_v53 }
  0xd6   : > { %892 = vmatmul.mubr.bf16.gmra.mrb[72].mxu0 %v5223_v54 }
  0xd7   : > { %899 = vmatprep.mubr.bf16.mxu0 %v5224_v55 }
  0xde   : > { %900 = vmatmul.mubr.bf16.gmra.mrb[76].mxu0 %v5226_v56 }
  0xdf   : > { %907 = vmatprep.mubr.bf16.mxu0 %v5227_v57 }
  0xe6   : > { %908 = vmatmul.mubr.bf16.gmra.mrb[80].mxu0 %v5229_v58 }
  0xe7   : > { %915 = vmatprep.mubr.bf16.mxu0 %v5230_v59 }
  0xee   : > { %916 = vmatmul.mubr.bf16.gmra.mrb[84].mxu0 %v5232_v60 }
  0xef   : > { %923 = vmatprep.mubr.bf16.mxu0 %v5233_v7 }
  0xf6   : > { %924 = vmatmul.mubr.bf16.gmra.mrb[88].mxu0 %v5235_v8 }
  0xf7   : > { %931 = vmatprep.mubr.bf16.mxu0 %v5236_v29 }
  0xfe   : > { %932 = vmatmul.mubr.bf16.gmra.mrb[92].mxu0 %v5238_v30  ;;  %v5239_v30 = vld [vmem:[%s7199_s3 + $0x40] sm:$0xff]  }
  0xff   : > { %4929 = vmatprep.subr.bf16.mxu1 %v5239_v30 }
 0x119   : > { %v749_v62 = vpop.f32.mrb[0].mxu0 }
 0x11a   : > { %v750_v63 = vadd.f32 %v5475_v61, %v749_v62  ;;  %v751_v0 = vpop.f32.mrb[1].mxu0 }
 0x11b   : > { %v752_v1 = vpop.f32.mrb[2].mxu0 }
 0x11c   : > { %v948_v2 = vmax.f32 %v750_v63, 0.0  ;;  %v753_v3 = vadd.f32 %v5475_v61, %v752_v1  ;;  %v754_v4 = vpop.f32.mrb[3].mxu0 }
 0x11e   : > { %999 = vst.msk [vmem:[#allocation2] sm:$0xff] %vm998_vm0, %v948_v2  ;;  %v949_v5 = vmax.f32 %v753_v3, 0.0 }
 0x120   : > { %1000 = vst.msk [vmem:[#allocation2 + $0x8] sm:$0xff] %vm998_vm0, %v949_v5 }
 0x121   : > { %v757_v6 = vpop.f32.mrb[4].mxu0 }
 0x122   : > { %v758_v9 = vadd.f32 %v5475_v61, %v757_v6  ;;  %v759_v10 = vpop.f32.mrb[5].mxu0 }
 0x123   : > { %v760_v11 = vpop.f32.mrb[6].mxu0 }
 0x124   : > { %v950_v12 = vmax.f32 %v758_v9, 0.0  ;;  %v761_v13 = vadd.f32 %v5475_v61, %v760_v11  ;;  %v762_v14 = vpop.f32.mrb[7].mxu0 }
 0x126   : > { %1001 = vst.msk [vmem:[#allocation2 + $0x10] sm:$0xff] %vm998_vm0, %v950_v12  ;;  %v951_v15 = vmax.f32 %v761_v13, 0.0 }
 0x127   : > { %v1056_v16 = vld [vmem:[#allocation2 + $0x1] ss:$2 sm:$0xff]  ;;  %v1049_v17 = vld [vmem:[#allocation2] ss:$2 sm:$0xff] }
 0x128   : > { %1002 = vst.msk [vmem:[#allocation2 + $0x18] sm:$0xff] %vm998_vm0, %v951_v15  ;;  %1061 = vrot.lane.b32.xlu1 %v1056_v16, %s5321_s21  ;;  %1052 = vst.msk [vmem:[#allocation3] sm:$0xff] %vm998_vm0, %v1049_v17 }
 0x129   : > { %v765_v18 = vpop.f32.mrb[8].mxu0 }
 0x12a   : > { %v766_v19 = vadd.f32 %v5475_v61, %v765_v18  ;;  %v767_v20 = vpop.f32.mrb[9].mxu0 }
 0x12b   : > { %v768_v21 = vpop.f32.mrb[10].mxu0 }
 0x12c   : > { %v952_v22 = vmax.f32 %v766_v19, 0.0  ;;  %v769_v23 = vadd.f32 %v5475_v61, %v768_v21  ;;  %v770_v24 = vpop.f32.mrb[11].mxu0 }
 0x12d   : > { %v1058_v25 = vld [vmem:[#allocation2 + $0x11] ss:$2 sm:$0x1]  ;;  %v1072_v26 = vld [vmem:[#allocation2 + $0x2] ss:$2 sm:$0xff] }
 0x12e   : > { %1003 = vst.msk [vmem:[#allocation2 + $0x20] sm:$0xff] %vm998_vm0, %v952_v22  ;;  %v953_v27 = vmax.f32 %v769_v23, 0.0  ;;  %1063 = vrot.lane.b32.xlu0 %v1058_v25, %s5321_s21  ;;  %1077 = vrot.lane.b32.xlu1 %v1072_v26, %s5322_s22  ;;  %v1051_v28 = vld [vmem:[#allocation2 + $0x10] ss:$2 sm:$0x1] }
 0x12f   : > { %1054 = vst.msk [vmem:[#allocation3 + $0x20] sm:$0x1] %vm7204_vm1, %v1051_v28  ;;  %v1074_v32 = vld [vmem:[#allocation2 + $0x12] ss:$2 sm:$0x1] }
 0x130   : > { %1004 = vst.msk [vmem:[#allocation2 + $0x28] sm:$0xff] %vm998_vm0, %v953_v27  ;;  %v1088_v33 = vld [vmem:[#allocation2 + $0x3] ss:$2 sm:$0xff]  ;;  %v1090_v40 = vld [vmem:[#allocation2 + $0x13] ss:$2 sm:$0x1] }
 0x131   : > { %v773_v31 = vpop.f32.mrb[12].mxu0 }
 0x132   : > { %v774_v34 = vadd.f32 %v5475_v61, %v773_v31  ;;  %v775_v35 = vpop.f32.mrb[13].mxu0  ;;  %1079 = vrot.lane.b32.xlu0 %v1074_v32, %s5322_s22  ;;  %1093 = vrot.lane.b32.xlu1 %v1088_v33, %s5323_s23 }
 0x133   : > { %v776_v36 = vpop.f32.mrb[14].mxu0 }
 0x134   : > { %v954_v37 = vmax.f32 %v774_v34, 0.0  ;;  %v777_v38 = vadd.f32 %v5475_v61, %v776_v36  ;;  %v778_v39 = vpop.f32.mrb[15].mxu0 }
 0x135   : > { %v1124_v41 = vld [vmem:[#allocation2 + $0x16] ss:$2 sm:$0xff]  ;;  %v1110_v46 = vld [vmem:[#allocation2 + $0x15] ss:$2 sm:$0xff] }
 0x136   : > { %1005 = vst.msk [vmem:[#allocation2 + $0x30] sm:$0xff] %vm998_vm0, %v954_v37  ;;  %v955_v42 = vmax.f32 %v777_v38, 0.0  ;;  %1095 = vrot.lane.b32.xlu0 %v1090_v40, %s5323_s23  ;;  %1129 = vrot.lane.b32.xlu1 %v1124_v41, %s5322_s22  ;;  %v1104_v43 = vld [vmem:[#allocation2 + $0x14] ss:$2 sm:$0xff]  ;;  %v1138_v47 = vld [vmem:[#allocation2 + $0x17] ss:$2 sm:$0xff] }
 0x137   : > { %1107 = vst.msk [vmem:[#allocation3 + $0x8] sm:$0xff] %vm998_vm0, %v1104_v43  ;;  %v1106_v44 = vld [vmem:[#allocation2 + $0x24] ss:$2 sm:$0x1]  ;;  %v5241_v43 = vld [vmem:[%s7199_s3 + $0x48] sm:$0xff]  }
 0x138   : > { %1006 = vst.msk [vmem:[#allocation2 + $0x38] sm:$0xff] %vm998_vm0, %v955_v42  ;;  %v1112_v53 = vld [vmem:[#allocation2 + $0x25] ss:$2 sm:$0x1] }
 0x139   : > { %v781_v45 = vpop.f32.mrb[16].mxu0  ;;  %1108 = vst.msk [vmem:[#allocation3 + $0x28] sm:$0x1] %vm7204_vm1, %v1106_v44  ;;  %v1126_v63 = vld [vmem:[#allocation2 + $0x26] ss:$2 sm:$0x1] }
 0x13a   : > { %v782_v48 = vadd.f32 %v5475_v61, %v781_v45  ;;  %v783_v49 = vpop.f32.mrb[17].mxu0  ;;  %1115 = vrot.lane.b32.xlu0 %v1110_v46, %s5321_s21  ;;  %1143 = vrot.lane.b32.xlu1 %v1138_v47, %s5323_s23  ;;  %v1140_v3 = vld [vmem:[#allocation2 + $0x27] ss:$2 sm:$0x1] }
 0x13b   : > { %v784_v50 = vpop.f32.mrb[18].mxu0  ;;  %v5240_v39 = vld [vmem:[%s7199_s3] sm:$0xff]  }
 0x13c   : > { %v956_v51 = vmax.f32 %v782_v48, 0.0  ;;  %v785_v52 = vadd.f32 %v5475_v61, %v784_v50  ;;  %v786_v54 = vpop.f32.mrb[19].mxu0  ;;  %4930 = vmatpush3.bf16.msra.mxu1 %v5240_v39 }
 0x13d   : > { %v1158_v55 = vld [vmem:[#allocation2 + $0x29] ss:$2 sm:$0xff]  ;;  %v1152_v57 = vld [vmem:[#allocation2 + $0x28] ss:$2 sm:$0xff]  ;;  %4931 = vmatprep.subr.bf16.mxu1 %v5241_v43 }
 0x13e   : > { %v5512_v56 = vld [vmem:[#allocation2 + $0x29] ss:$2 sm:$0xff]  ;;  %1007 = vst.msk [vmem:[#allocation2 + $0x40] sm:$0xff] %vm998_vm0, %v956_v51  ;;  %v957_v58 = vmax.f32 %v785_v52, 0.0  ;;  %1117 = vrot.lane.b32.xlu0 %v1112_v53, %s5321_s21  ;;  %1163 = vrot.lane.b32.xlu1 %v1158_v55, %s5321_s21  ;;  %1155 = vst.msk [vmem:[#allocation3 + $0x10] sm:$0xff] %vm998_vm0, %v1152_v57 }
 0x13f   : > { %v1247_v59 = vld [vmem:[#allocation2 + $0x28] ss:$2 sm:$0xff]  ;;  %v1265_v62 = vrot.slane %v5512_v56, 7  ;;  %v1154_v9 = vld [vmem:[#allocation2 + $0x38] ss:$2 sm:$0x1] }
 0x140   : > { %v1252_v60 = vrot.slane %v1247_v59, 7  ;;  %1008 = vst.msk [vmem:[#allocation2 + $0x48] sm:$0xff] %vm998_vm0, %v957_v58  ;;  %v1172_v6 = vld [vmem:[#allocation2 + $0x2a] ss:$2 sm:$0xff]  ;;  %v1186_v13 = vld [vmem:[#allocation2 + $0x2b] ss:$2 sm:$0xff] }
 0x141   : > { %v789_v0 = vpop.f32.mrb[20].mxu0  ;;  %1156 = vst.msk [vmem:[#allocation3 + $0x30] sm:$0x1] %vm7204_vm1, %v1154_v9  ;;  %v1248_v10 = vld [vmem:[#allocation2 + $0x38] ss:$2 sm:$0x1] }
 0x142   : > { %1258 = vst.msk [vmem:[#allocation3 + $0x20] sm:$0xfe] %vm1257_vm2, %v1252_v60  ;;  %1131 = vrot.lane.b32.xlu0 %v1126_v63, %s5322_s22  ;;  %1268 = vrot.lane.b32.xlu1 %v1265_v62, %s5321_s21  ;;  %v790_v1 = vadd.f32 %v5475_v61, %v789_v0  ;;  %v791_v2 = vpop.f32.mrb[21].mxu0  ;;  %v1160_v12 = vld [vmem:[#allocation2 + $0x39] ss:$2 sm:$0x1] }
 0x143   : > { %v792_v5 = vpop.f32.mrb[22].mxu0  ;;  %v5531_v14 = vld [vmem:[#allocation2 + $0x2a] ss:$2 sm:$0xff]  ;;  %v1253_v16 = vrot.slane %v1248_v10, 7  ;;  %v5539_v23 = vld [vmem:[#allocation2 + $0x2b] ss:$2 sm:$0xff] }
 0x144   : > { %v958_v4 = vmax.f32 %v790_v1, 0.0  ;;  %v793_v7 = vadd.f32 %v5475_v61, %v792_v5  ;;  %v794_v8 = vpop.f32.mrb[23].mxu0  ;;  %v1174_v19 = vld [vmem:[#allocation2 + $0x3a] ss:$2 sm:$0x1]  ;;  %v1282_v22 = vrot.slane %v5531_v14, 7 }
 0x145   : > { %v1254_v21 = vsel %vm1251_vm3, %v1252_v60, %v1253_v16  ;;  %v1262_v27 = vld [vmem:[#allocation2 + $0x39] ss:$2 sm:$0x1]  ;;  %v1188_v31 = vld [vmem:[#allocation2 + $0x3b] ss:$2 sm:$0x1] }
 0x146   : > { %1145 = vrot.lane.b32.xlu0 %v1140_v3, %s5323_s23  ;;  %1177 = vrot.lane.b32.xlu1 %v1172_v6, %s5322_s22  ;;  %1009 = vst.msk [vmem:[#allocation2 + $0x50] sm:$0xff] %vm998_vm0, %v958_v4  ;;  %v959_v11 = vmax.f32 %v793_v7, 0.0  ;;  %v1299_v32 = vrot.slane %v5539_v23, 7  ;;  %v1266_v34 = vrot.slane %v1262_v27, 7  ;;  %v5242_v56 = vld [vmem:[%s5393_s16 + $0x184] ss:$8 sps:$4 sm:$0xff]  }
 0x147   : > { %1260 = vst.msk [vmem:[#allocation3 + $0x40] sm:$0x3] %vm1259_vm4, %v1254_v21  ;;  %v1200_v28 = vld [vmem:[#allocation2 + $0x3c] ss:$2 sm:$0xff]  ;;  %939 = vmatprep.mubr.bf16.mxu0 %v5242_v56  ;;  %v5247_v6 = vld [vmem:[%s7199_s3 + $0x10] sm:$0xff]  }
 0x148   : > { %1010 = vst.msk [vmem:[#allocation2 + $0x58] sm:$0xff] %vm998_vm0, %v959_v11  ;;  %1203 = vst.msk [vmem:[#allocation3 + $0x18] sm:$0xff] %vm998_vm0, %v1200_v28  ;;  %v1202_v33 = vld [vmem:[#allocation2 + $0x4c] ss:$2 sm:$0x1]  ;;  %v1267_v54 = vsel %vm1251_vm3, %v1265_v62, %v1266_v34  ;;  %v5246_v62 = vld [vmem:[%s7199_s3 + $0x50] sm:$0xff]  }
 0x149   : > { %v797_v15 = vpop.f32.mrb[24].mxu0  ;;  %v1279_v35 = vld [vmem:[#allocation2 + $0x3a] ss:$2 sm:$0x1]  ;;  %1204 = vst.msk [vmem:[#allocation3 + $0x38] sm:$0x1] %vm7204_vm1, %v1202_v33 }
 0x14a   : > { %1165 = vrot.lane.b32.xlu0 %v1160_v12, %s5321_s21  ;;  %1191 = vrot.lane.b32.xlu1 %v1186_v13, %s5323_s23  ;;  %v798_v17 = vadd.f32 %v5475_v61, %v797_v15  ;;  %v799_v18 = vpop.f32.mrb[25].mxu0  ;;  %v1312_v36 = vld [vmem:[#allocation2 + $0x3c] ss:$2 sm:$0xff]  ;;  %v1208_v37 = vld [vmem:[#allocation2 + $0x4d] ss:$2 sm:$0x1] }
 0x14b   : > { %v800_v20 = vpop.f32.mrb[26].mxu0  ;;  %v1316_v40 = vrot.slane %v1312_v36, 7  ;;  %v1313_v48 = vld [vmem:[#allocation2 + $0x4c] ss:$2 sm:$0x1]  ;;  %v1283_v55 = vrot.slane %v1279_v35, 7 }
 0x14c   : > { %v960_v24 = vmax.f32 %v798_v17, 0.0  ;;  %v801_v25 = vadd.f32 %v5475_v61, %v800_v20  ;;  %v802_v26 = vpop.f32.mrb[27].mxu0  ;;  %v1317_v53 = vrot.slane %v1313_v48, 7  ;;  %v1296_v57 = vld [vmem:[#allocation2 + $0x3b] ss:$2 sm:$0x1] }
 0x14d   : > { %1321 = vst.msk [vmem:[#allocation3 + $0x28] sm:$0xfe] %vm1257_vm2, %v1316_v40  ;;  %v5244_v60 = vld [vmem:[%s7199_s3 + $0x8] sm:$0xff]   ;;  %v1284_v63 = vsel %vm1251_vm3, %v1282_v22, %v1283_v55  ;;  %v1300_v1 = vrot.slane %v1296_v57, 7  ;;  %v5248_v10 = vld [vmem:[%s7199_s3 + $0x58] sm:$0xff]   ;;  %v5250_v27 = vld [vmem:[%s7199_s3 + $0x60] sm:$0xff]  }
 0x14e   : > { %1179 = vrot.lane.b32.xlu0 %v1174_v19, %s5322_s22  ;;  %1285 = vrot.lane.b32.xlu1 %v1282_v22, %s5322_s22  ;;  %1011 = vst.msk [vmem:[#allocation2 + $0x60] sm:$0xff] %vm998_vm0, %v960_v24  ;;  %v961_v29 = vmax.f32 %v801_v25, 0.0  ;;  %v1318_v59 = vsel %vm1251_vm3, %v1316_v40, %v1317_v53  ;;  %v1220_v0 = vld [vmem:[#allocation2 + $0x3e] ss:$2 sm:$0xff]  ;;  %v1234_v12 = vld [vmem:[#allocation2 + $0x3f] ss:$2 sm:$0xff] }
 0x14f   : > { %v5564_v44 = vld [vmem:[#allocation2 + $0x50] ss:$2 sm:$0xff]  ;;  %1322 = vst.msk [vmem:[#allocation3 + $0x48] sm:$0x3] %vm1259_vm4, %v1318_v59  ;;  %4932 = vmatpush3.bf16.msra.mxu1 %v5244_v60  ;;  %v1301_v11 = vsel %vm1251_vm3, %v1299_v32, %v1300_v1  ;;  %v5608_v13 = vld [vmem:[#allocation2 + $0x3d] ss:$2 sm:$0xff] }
 0x150   : > { %1012 = vst.msk [vmem:[#allocation2 + $0x68] sm:$0xff] %vm998_vm0, %v961_v29  ;;  %v5566_v45 = vld [vmem:[#allocation2 + $0x50] ss:$2 sm:$0xff]  ;;  %v1374_v47 = vrot.slane %v5564_v44, 7  ;;  %4933 = vmatprep.subr.bf16.mxu1 %v5246_v62  ;;  %v1206_v18 = vld [vmem:[#allocation2 + $0x3d] ss:$2 sm:$0xff] }
 0x151   : > { %v805_v38 = vpop.f32.mrb[28].mxu0  ;;  %v1501_v49 = vrot.slane %v5566_v45, 6  ;;  %v1338_v14 = vld [vmem:[#allocation2 + $0x3e] ss:$2 sm:$0xff]  ;;  %v1327_v19 = vrot.slane %v5608_v13, 7  ;;  %v5254_v53 = vld [vmem:[%s7199_s3 + $0x70] sm:$0xff]  }
 0x152   : > { %1193 = vrot.lane.b32.xlu0 %v1188_v31, %s5323_s23  ;;  %1302 = vrot.lane.b32.xlu1 %v1299_v32, %s5323_s23  ;;  %v806_v41 = vadd.f32 %v5475_v61, %v805_v38  ;;  %v807_v42 = vpop.f32.mrb[29].mxu0  ;;  %1379 = vst.msk [vmem:[#allocation3 + $0x30] sm:$0xfe] %vm1257_vm2, %v1374_v47  ;;  %v1339_v15 = vld [vmem:[#allocation2 + $0x4e] ss:$2 sm:$0x1] }
 0x153   : > { %v808_v46 = vpop.f32.mrb[30].mxu0  ;;  %1507 = vst.msk [vmem:[#allocation3 + $0x40] sm:$0xfc] %vm1506_vm5, %v1501_v49  ;;  %4934 = vmatpush3.bf16.msra.mxu1 %v5247_v6  ;;  %v5249_v17 = vld [vmem:[%s7199_s3 + $0x18] sm:$0xff]   ;;  %v1342_v20 = vrot.slane %v1338_v14, 7  ;;  %v1343_v21 = vrot.slane %v1339_v15, 7 }
 0x154   : > { %v962_v50 = vmax.f32 %v806_v41, 0.0  ;;  %v809_v51 = vadd.f32 %v5475_v61, %v808_v46  ;;  %v810_v52 = vpop.f32.mrb[31].mxu0  ;;  %4935 = vmatprep.subr.bf16.mxu1 %v5248_v10  ;;  %v1353_v22 = vld [vmem:[#allocation2 + $0x3f] ss:$2 sm:$0xff]  ;;  %v5255_v56 = vld [vmem:[%s7199_s3 + $0x30] sm:$0xff]   ;;  %vm1998_vm1 = vcmask 1043456  }
 0x155   : > { %v1354_v24 = vld [vmem:[#allocation2 + $0x4f] ss:$2 sm:$0x1]  ;;  %v5245_v29 = vld [vmem:[%s5393_s16 + $0x180] ss:$8 sps:$4 sm:$0xff]   ;;  %v1344_v34 = vsel %vm1251_vm3, %v1342_v20, %v1343_v21  ;;  %v1357_v35 = vrot.slane %v1353_v22, 7 }
 0x156   : > { %1270 = vrot.lane.b32.xlu0 %v1267_v54, %s5321_s21  ;;  %1213 = vrot.lane.b32.xlu1 %v1208_v37, %s5321_s21  ;;  %1013 = vst.msk [vmem:[#allocation2 + $0x70] sm:$0xff] %vm998_vm0, %v962_v50  ;;  %v963_v58 = vmax.f32 %v809_v51, 0.0  ;;  %v1222_v33 = vld [vmem:[#allocation2 + $0x4e] ss:$2 sm:$0x1]  ;;  %v1358_v36 = vrot.slane %v1354_v24, 7 }
 0x157   : > { %4936 = vmatpush3.bf16.msra.mxu1 %v5249_v17  ;;  %940 = vmatmul.mubr.bf16.gmra.mrb[96].mxu0 %v5245_v29  ;;  %v5251_v38 = vld [vmem:[%s7199_s3 + $0x20] sm:$0xff]   ;;  %v5635_v39 = vld [vmem:[#allocation2 + $0x51] ss:$2 sm:$0xff]  ;;  %v1236_v40 = vld [vmem:[#allocation2 + $0x4f] ss:$2 sm:$0x1] }
 0x158   : > { %1014 = vst.msk [vmem:[#allocation2 + $0x78] sm:$0xff] %vm998_vm0, %v963_v58  ;;  %4937 = vmatprep.subr.bf16.mxu1 %v5250_v27  ;;  %v1359_v41 = vsel %vm1251_vm3, %v1357_v35, %v1358_v36  ;;  %v1387_v43 = vrot.slane %v5635_v39, 7  ;;  %v5252_v50 = vld [vmem:[%s7199_s3 + $0x68] sm:$0xff]   ;;  %v5653_v58 = vld [vmem:[#allocation2 + $0x53] ss:$2 sm:$0xff] }
 0x159   : > { %v813_v2 = vpop.f32.mrb[32].mxu0  ;;  %v5253_v51 = vld [vmem:[%s7199_s3 + $0x28] sm:$0xff]   ;;  %v5256_v62 = vld [vmem:[%s7199_s3 + $0x78] sm:$0xff]   ;;  %v1511_v15 = vld [vmem:[#allocation2 + $0x61] ss:$2 sm:$0x1] }
 0x15a   : > { %1287 = vrot.lane.b32.xlu0 %v1284_v63, %s5322_s22  ;;  %1225 = vrot.lane.b32.xlu1 %v1220_v0, %s5322_s22  ;;  %v814_v3 = vadd.f32 %v5475_v61, %v813_v2  ;;  %v815_v4 = vpop.f32.mrb[33].mxu0  ;;  %v1324_v59 = vld [vmem:[#allocation2 + $0x4d] ss:$2 sm:$0x1]  ;;  %v1548_v63 = vrot.slane %v5653_v58, 6  ;;  %v1515_v13 = vrot.slane %v1511_v15, 6 }
 0x15b   : > { %v816_v5 = vpop.f32.mrb[34].mxu0  ;;  %4938 = vmatpush3.bf16.msra.mxu1 %v5251_v38  ;;  %v1328_v0 = vrot.slane %v1324_v59, 7  ;;  %v5668_v1 = vld [vmem:[#allocation2 + $0x52] ss:$2 sm:$0xff]  ;;  %v1510_v6 = vld [vmem:[#allocation2 + $0x51] ss:$2 sm:$0xff] }
 0x15c   : > { %v964_v7 = vmax.f32 %v814_v3, 0.0  ;;  %v817_v8 = vadd.f32 %v5475_v61, %v816_v5  ;;  %v818_v9 = vpop.f32.mrb[35].mxu0  ;;  %4939 = vmatprep.subr.bf16.mxu1 %v5252_v50  ;;  %v5257_v3 = vld [vmem:[%s7199_s3 + $0x38] sm:$0xff]   ;;  %v1514_v17 = vrot.slane %v1510_v6, 6 }
 0x15d   : > { %v5679_v9 = vld [vmem:[#allocation2 + $0x53] ss:$2 sm:$0xff]  ;;  %v1329_v14 = vsel %vm1251_vm3, %v1327_v19, %v1328_v0  ;;  %v1545_v21 = vld [vmem:[#allocation2 + $0x63] ss:$2 sm:$0x1] }
 0x15e   : > { %1304 = vrot.lane.b32.xlu0 %v1301_v11, %s5323_s23  ;;  %1239 = vrot.lane.b32.xlu1 %v1234_v12, %s5323_s23  ;;  %1015 = vst.msk [vmem:[#allocation2 + $0x80] sm:$0xff] %vm998_vm0, %v964_v7  ;;  %v965_v16 = vmax.f32 %v817_v8, 0.0  ;;  %v1404_v8 = vrot.slane %v5668_v1, 7  ;;  %v1528_v22 = vld [vmem:[#allocation2 + $0x62] ss:$2 sm:$0x1]  ;;  %v1516_v38 = vsel %vm1500_vm6, %v1514_v17, %v1515_v13 }
 0x15f   : > { %4940 = vmatpush3.bf16.msra.mxu1 %v5253_v51  ;;  %v1371_v27 = vld [vmem:[#allocation2 + $0x60] ss:$2 sm:$0x1]  ;;  %v1384_v45 = vld [vmem:[#allocation2 + $0x61] ss:$2 sm:$0x1] }
 0x160   : > { %1016 = vst.msk [vmem:[#allocation2 + $0x88] sm:$0xff] %vm998_vm0, %v965_v16  ;;  %4941 = vmatprep.subr.bf16.mxu1 %v5254_v53  ;;  %v1401_v44 = vld [vmem:[#allocation2 + $0x62] ss:$2 sm:$0x1]  ;;  %v1388_v51 = vrot.slane %v1384_v45, 7 }
 0x161   : > { %v821_v23 = vpop.f32.mrb[36].mxu0  ;;  %v1587_v53 = vld [vmem:[#allocation2 + $0x66] ss:$2 sm:$0xff] }
 0x162   : > { %1211 = vrot.lane.b32.xlu0 %v1206_v18, %s5321_s21  ;;  %1330 = vrot.lane.b32.xlu1 %v1327_v19, %s5321_s21  ;;  %v822_v25 = vadd.f32 %v5475_v61, %v821_v23  ;;  %v823_v26 = vpop.f32.mrb[37].mxu0  ;;  %v1421_v18 = vrot.slane %v5679_v9, 7  ;;  %v1497_v23 = vld [vmem:[#allocation2 + $0x60] ss:$2 sm:$0x1] }
 0x163   : > { %v824_v28 = vpop.f32.mrb[38].mxu0  ;;  %4942 = vmatpush3.bf16.msra.mxu1 %v5255_v56  ;;  %v1502_v26 = vrot.slane %v1497_v23, 6  ;;  %v1562_v45 = vld [vmem:[#allocation2 + $0x74] ss:$2 sm:$0x1] }
 0x164   : > { %v966_v30 = vmax.f32 %v822_v25, 0.0  ;;  %v825_v31 = vadd.f32 %v5475_v61, %v824_v28  ;;  %v826_v32 = vpop.f32.mrb[39].mxu0  ;;  %4943 = vmatprep.subr.bf16.mxu1 %v5256_v62  ;;  %v1418_v62 = vld [vmem:[#allocation2 + $0x63] ss:$2 sm:$0x1] }
 0x166   : > { %1227 = vrot.lane.b32.xlu0 %v1222_v33, %s5322_s22  ;;  %1347 = vrot.lane.b32.xlu1 %v1344_v34, %s5322_s22  ;;  %1017 = vst.msk [vmem:[#allocation2 + $0x90] sm:$0xff] %vm998_vm0, %v966_v30  ;;  %v967_v37 = vmax.f32 %v825_v31, 0.0  ;;  %v1375_v30 = vrot.slane %v1371_v27, 7  ;;  %v5697_v31 = vld [vmem:[#allocation2 + $0x64] ss:$2 sm:$0xff] }
 0x167   : > { %4944 = vmatpush3.bf16.msra.mxu1 %v5257_v3  ;;  %v1565_v36 = vrot.slane %v5697_v31, 6  ;;  %v1389_v3 = vsel %vm1251_vm3, %v1387_v43, %v1388_v51  ;;  %v5784_v51 = vld [vmem:[#allocation2 + $0x7b] ss:$2 sm:$0xff] }
 0x168   : > { %1018 = vst.msk [vmem:[#allocation2 + $0x98] sm:$0xff] %vm998_vm0, %v967_v37  ;;  %v5704_v37 = vld [vmem:[#allocation2 + $0x64] ss:$2 sm:$0xff]  ;;  %v5807_v31 = vld [vmem:[#allocation2 + $0x7b] ss:$2 sm:$0xff] }
 0x169   : > { %v829_v42 = vpop.f32.mrb[40].mxu0  ;;  %1570 = vst.msk [vmem:[#allocation3 + $0x48] sm:$0xfc] %vm1506_vm5, %v1565_v36 }
 0x16a   : > { %1241 = vrot.lane.b32.xlu0 %v1236_v40, %s5323_s23  ;;  %1362 = vrot.lane.b32.xlu1 %v1359_v41, %s5323_s23  ;;  %v830_v46 = vadd.f32 %v5475_v61, %v829_v42  ;;  %v831_v48 = vpop.f32.mrb[41].mxu0  ;;  %v1549_v40 = vrot.slane %v1545_v21, 6  ;;  %v1532_v41 = vrot.slane %v1528_v22, 6  ;;  %v1376_v42 = vsel %vm1251_vm3, %v1374_v47, %v1375_v30  ;;  %v5750_v21 = vld [vmem:[#allocation2 + $0x66] ss:$2 sm:$0xff] }
 0x16b   : > { %v832_v52 = vpop.f32.mrb[42].mxu0  ;;  %1380 = vst.msk [vmem:[#allocation3 + $0x50] sm:$0x3] %vm1259_vm4, %v1376_v42  ;;  %v1618_v48 = vld [vmem:[#allocation2 + $0x78] ss:$2 sm:$0xff] }
 0x16c   : > { %v968_v54 = vmax.f32 %v830_v46, 0.0  ;;  %v833_v55 = vadd.f32 %v5475_v61, %v832_v52  ;;  %v834_v57 = vpop.f32.mrb[43].mxu0  ;;  %v1438_v46 = vrot.slane %v5704_v37, 7  ;;  %v1550_v47 = vsel %vm1500_vm6, %v1548_v63, %v1549_v40  ;;  %v5724_v52 = vld [vmem:[#allocation2 + $0x65] ss:$2 sm:$0xff] }
 0x16d   : > { %v1623_v56 = vrot.slane %v1618_v48, 6  ;;  %v1465_v22 = vld [vmem:[#allocation2 + $0x76] ss:$2 sm:$0x1]  ;;  %v5763_v30 = vld [vmem:[#allocation2 + $0x67] ss:$2 sm:$0xff] }
 0x16e   : > { %1345 = vrot.lane.b32.xlu0 %v1342_v20, %s5322_s22  ;;  %1390 = vrot.lane.b32.xlu1 %v1387_v43, %s5321_s21  ;;  %1019 = vst.msk [vmem:[#allocation2 + $0xa0] sm:$0xff] %vm998_vm0, %v968_v54  ;;  %v969_v60 = vmax.f32 %v833_v55, 0.0  ;;  %v1527_v20 = vld [vmem:[#allocation2 + $0x52] ss:$2 sm:$0xff]  ;;  %v5775_v40 = vld [vmem:[#allocation2 + $0x65] ss:$2 sm:$0xff] }
 0x16f   : > { %v1531_v28 = vrot.slane %v1527_v20, 6  ;;  %1443 = vst.msk [vmem:[#allocation3 + $0x38] sm:$0xfe] %vm1257_vm2, %v1438_v46  ;;  %v1588_v55 = vld [vmem:[#allocation2 + $0x76] ss:$2 sm:$0x1] }
 0x170   : > { %1020 = vst.msk [vmem:[#allocation2 + $0xa8] sm:$0xff] %vm998_vm0, %v969_v60  ;;  %v1576_v60 = vrot.slane %v5724_v52, 6  ;;  %v1592_v6 = vrot.slane %v1588_v55, 6  ;;  %v1566_v48 = vrot.slane %v1562_v45, 6  ;;  %vm1757_vm2 = vcmask 257024  }
 0x171   : > { %v837_v2 = vpop.f32.mrb[44].mxu0  ;;  %v1533_v50 = vsel %vm1500_vm6, %v1531_v28, %v1532_v41  ;;  %1628 = vst.msk [vmem:[#allocation3 + $0x50] sm:$0xfc] %vm1506_vm5, %v1623_v56  ;;  %v1811_v45 = vld [vmem:[#allocation2 + $0x9c] ss:$2 sm:$0x1] }
 0x172   : > { %1360 = vrot.lane.b32.xlu0 %v1357_v35, %s5323_s23  ;;  %1551 = vrot.lane.b32.xlu1 %v1548_v63, %s5323_s23  ;;  %v838_v4 = vadd.f32 %v5475_v61, %v837_v2  ;;  %v839_v5 = vpop.f32.mrb[45].mxu0  ;;  %v1503_v35 = vsel %vm1500_vm6, %v1501_v49, %v1502_v26 }
 0x173   : > { %v840_v7 = vpop.f32.mrb[46].mxu0  ;;  %1509 = vst.msk [vmem:[#allocation3 + $0x60] sm:$0x7] %vm1508_vm7, %v1503_v35  ;;  %v1591_v5 = vrot.slane %v1587_v53, 6 }
 0x174   : > { %v970_v10 = vmax.f32 %v838_v4, 0.0  ;;  %v841_v11 = vadd.f32 %v5475_v61, %v840_v7  ;;  %v842_v12 = vpop.f32.mrb[47].mxu0  ;;  %v1405_v4 = vrot.slane %v1401_v44, 7  ;;  %v1620_v7 = vld [vmem:[#allocation2 + $0x88] ss:$2 sm:$0x1] }
 0x175   : > { %v1624_v39 = vrot.slane %v1620_v7, 6  ;;  %v1593_v15 = vsel %vm1500_vm6, %v1591_v5, %v1592_v6  ;;  %v1435_v44 = vld [vmem:[#allocation2 + $0x74] ss:$2 sm:$0x1]  ;;  %v1670_v6 = vrot.slane %v5807_v31, 6 }
 0x176   : > { %1332 = vrot.lane.b32.xlu0 %v1329_v14, %s5321_s21  ;;  %1407 = vrot.lane.b32.xlu1 %v1404_v8, %s5322_s22  ;;  %1021 = vst.msk [vmem:[#allocation2 + $0xb0] sm:$0xff] %vm998_vm0, %v970_v10  ;;  %v971_v16 = vmax.f32 %v841_v11, 0.0  ;;  %v1602_v10 = vld [vmem:[#allocation2 + $0x67] ss:$2 sm:$0xff]  ;;  %v1422_v14 = vrot.slane %v1418_v62, 7  ;;  %v1406_v43 = vsel %vm1251_vm3, %v1404_v8, %v1405_v4  ;;  %v1439_v55 = vrot.slane %v1435_v44, 7 }
 0x177   : > { %v1603_v11 = vld [vmem:[#allocation2 + $0x77] ss:$2 sm:$0x1]  ;;  %v1625_v23 = vsel %vm1500_vm6, %v1623_v56, %v1624_v39  ;;  %v1567_v56 = vsel %vm1500_vm6, %v1565_v36, %v1566_v48  ;;  %v1573_v7 = vld [vmem:[#allocation2 + $0x75] ss:$2 sm:$0x1] }
 0x178   : > { %1022 = vst.msk [vmem:[#allocation2 + $0xb8] sm:$0xff] %vm998_vm0, %v971_v16  ;;  %v1606_v16 = vrot.slane %v1602_v10, 6  ;;  %v1423_v26 = vsel %vm1251_vm3, %v1421_v18, %v1422_v14  ;;  %v1440_v62 = vsel %vm1251_vm3, %v1438_v46, %v1439_v55  ;;  %v5815_v46 = vld [vmem:[#allocation2 + $0x79] ss:$2 sm:$0xff]  ;;  %v5828_v39 = vld [vmem:[#allocation2 + $0x7a] ss:$2 sm:$0xff] }
 0x179   : > { %v845_v19 = vpop.f32.mrb[48].mxu0  ;;  %1629 = vst.msk [vmem:[#allocation3 + $0x70] sm:$0x7] %vm1508_vm7, %v1625_v23  ;;  %1571 = vst.msk [vmem:[#allocation3 + $0x68] sm:$0x7] %vm1508_vm7, %v1567_v56 }
 0x17a   : > { %1517 = vrot.lane.b32.xlu0 %v1514_v17, %s5321_s21  ;;  %1424 = vrot.lane.b32.xlu1 %v1421_v18, %s5323_s23  ;;  %v846_v24 = vadd.f32 %v5475_v61, %v845_v19  ;;  %v847_v25 = vpop.f32.mrb[49].mxu0  ;;  %v1607_v17 = vrot.slane %v1603_v11, 6  ;;  %v1485_v18 = vrot.slane %v5763_v30, 7  ;;  %1444 = vst.msk [vmem:[#allocation3 + $0x58] sm:$0x3] %vm1259_vm4, %v1440_v62  ;;  %v1636_v11 = vrot.slane %v5815_v46, 6 }
 0x17b   : > { %v848_v29 = vpop.f32.mrb[50].mxu0  ;;  %v1650_v14 = vld [vmem:[#allocation2 + $0x8a] ss:$2 sm:$0x1]  ;;  %vm7208_vm4 = vcmask 1041152  }
 0x17c   : > { %v972_v32 = vmax.f32 %v846_v24, 0.0  ;;  %v849_v33 = vadd.f32 %v5475_v61, %v848_v29  ;;  %v850_v34 = vpop.f32.mrb[51].mxu0  ;;  %v1608_v27 = vsel %vm1500_vm6, %v1606_v16, %v1607_v17  ;;  %v1469_v29 = vrot.slane %v1465_v22, 7  ;;  %v1746_v23 = vld [vmem:[#allocation2 + $0x88] ss:$2 sm:$0x1] }
 0x17d   : > { %v1684_v55 = vld [vmem:[#allocation2 + $0x9c] ss:$2 sm:$0x1]  ;;  %v1867_v56 = vld [vmem:[#allocation2 + $0xa0] ss:$2 sm:$0xff] }
 0x17e   : > { %1534 = vrot.lane.b32.xlu0 %v1531_v28, %s5322_s22  ;;  %1519 = vrot.lane.b32.xlu1 %v1516_v38, %s5321_s21  ;;  %1023 = vst.msk [vmem:[#allocation2 + $0xc0] sm:$0xff] %vm998_vm0, %v972_v32  ;;  %v973_v49 = vmax.f32 %v849_v33, 0.0  ;;  %v1468_v28 = vrot.slane %v5750_v21, 7  ;;  %v1482_v32 = vld [vmem:[#allocation2 + $0x77] ss:$2 sm:$0x1] }
 0x17f   : > { %v1486_v34 = vrot.slane %v1482_v32, 7  ;;  %v5773_v38 = vld [vmem:[#allocation2 + $0x8c] ss:$2 sm:$0xff]  ;;  %v1688_v52 = vrot.slane %v1684_v55, 6 }
 0x180   : > { %1024 = vst.msk [vmem:[#allocation2 + $0xc8] sm:$0xff] %vm998_vm0, %v973_v49  ;;  %v1470_v9 = vsel %vm1251_vm3, %v1468_v28, %v1469_v29  ;;  %v1814_v49 = vrot.slane %v5773_v38, 5 }
 0x181   : > { %v853_v54 = vpop.f32.mrb[52].mxu0 }
 0x182   : > { %1553 = vrot.lane.b32.xlu0 %v1550_v47, %s5323_s23  ;;  %1536 = vrot.lane.b32.xlu1 %v1533_v50, %s5322_s22  ;;  %v854_v57 = vadd.f32 %v5475_v61, %v853_v54  ;;  %v855_v58 = vpop.f32.mrb[53].mxu0  ;;  %v5779_v47 = vld [vmem:[#allocation2 + $0x78] ss:$2 sm:$0xff]  ;;  %v1487_v50 = vsel %vm1251_vm3, %v1485_v18, %v1486_v34  ;;  %1819 = vst.msk [vmem:[#allocation3 + $0x68] sm:$0xf8] %vm1755_vm8, %v1814_v49 }
 0x183   : > { %v856_v59 = vpop.f32.mrb[54].mxu0 }
 0x184   : > { %v974_v63 = vmax.f32 %v854_v57, 0.0  ;;  %v857_v0 = vadd.f32 %v5475_v61, %v856_v59  ;;  %v858_v2 = vpop.f32.mrb[55].mxu0  ;;  %v1750_v59 = vrot.slane %v5779_v47, 5  ;;  %v5870_v47 = vld [vmem:[#allocation2 + $0x79] ss:$2 sm:$0xff] }
 0x185   : > { %v5860_v48 = vld [vmem:[#allocation2 + $0xb4] ss:$2 sm:$0xff] }
 0x186   : > { %1392 = vrot.lane.b32.xlu0 %v1389_v3, %s5321_s21  ;;  %1579 = vrot.lane.b32.xlu1 %v1576_v60, %s5321_s21  ;;  %1025 = vst.msk [vmem:[#allocation2 + $0xd0] sm:$0xff] %vm998_vm0, %v974_v63  ;;  %v975_v12 = vmax.f32 %v857_v0, 0.0  ;;  %v1451_v63 = vrot.slane %v5775_v40, 7  ;;  %v1797_v0 = vrot.slane %v5784_v51, 5 }
 0x187   : > { %1756 = vst.msk [vmem:[#allocation3 + $0x60] sm:$0xf8] %vm1755_vm8, %v1750_v59  ;;  %v1633_v3 = vld [vmem:[#allocation2 + $0x89] ss:$2 sm:$0x1] }
 0x188   : > { %1026 = vst.msk [vmem:[#allocation2 + $0xd8] sm:$0xff] %vm998_vm0, %v975_v12  ;;  %v1637_v12 = vrot.slane %v1633_v3, 6 }
 0x189   : > { %v861_v20 = vpop.f32.mrb[56].mxu0 }
 0x18a   : > { %1409 = vrot.lane.b32.xlu0 %v1406_v43, %s5322_s22  ;;  %1596 = vrot.lane.b32.xlu1 %v1593_v15, %s5322_s22  ;;  %v862_v13 = vadd.f32 %v5475_v61, %v861_v20  ;;  %v863_v19 = vpop.f32.mrb[57].mxu0  ;;  %v5831_v43 = vld [vmem:[#allocation2 + $0x8c] ss:$2 sm:$0xff] }
 0x18b   : > { %v864_v1 = vpop.f32.mrb[58].mxu0  ;;  %v1994_v15 = vld [vmem:[#allocation2 + $0xa0] ss:$2 sm:$0xff]  ;;  %v1687_v20 = vrot.slane %v5831_v43, 6 }
 0x18c   : > { %v976_v8 = vmax.f32 %v862_v13, 0.0  ;;  %v865_v24 = vadd.f32 %v5475_v61, %v864_v1  ;;  %v866_v25 = vpop.f32.mrb[59].mxu0  ;;  %v1577_v13 = vrot.slane %v1573_v7, 6  ;;  %v1999_v1 = vrot.slane %v1994_v15, 4 }
 0x18d   : > { %v1654_v25 = vrot.slane %v1650_v14, 6  ;;  %1692 = vst.msk [vmem:[#allocation3 + $0x58] sm:$0xfc] %vm1506_vm5, %v1687_v20  ;;  %vm2006_vm5 = vcmask 258048   ;;  %v1763_v15 = vrot.slane %v5870_v47, 5 }
 0x18e   : > { %1426 = vrot.lane.b32.xlu0 %v1423_v26, %s5323_s23  ;;  %1611 = vrot.lane.b32.xlu1 %v1608_v27, %s5323_s23  ;;  %1027 = vst.msk [vmem:[#allocation2 + $0xe0] sm:$0xff] %vm998_vm0, %v976_v8  ;;  %v977_v33 = vmax.f32 %v865_v24, 0.0  ;;  %v1638_v8 = vsel %vm1500_vm6, %v1636_v11, %v1637_v12  ;;  %v1653_v24 = vrot.slane %v5828_v39, 6  ;;  %v1751_v27 = vrot.slane %v1746_v23, 5 }
 0x18f   : > { %2005 = vst.msk [vmem:[#allocation3 + $0x80] sm:$0xf0] %vm2004_vm15, %v1999_v1  ;;  %v2118_v12 = vld [vmem:[#allocation2 + $0xd8] ss:$2 sm:$0x1] }
 0x190   : > { %1028 = vst.msk [vmem:[#allocation2 + $0xe8] sm:$0xff] %vm998_vm0, %v977_v33  ;;  %v1752_v30 = vsel %vm1749_vm12, %v1750_v59, %v1751_v27  ;;  %v1655_v44 = vsel %vm1500_vm6, %v1653_v24, %v1654_v25  ;;  %v2122_v14 = vrot.slane %v2118_v12, 4  ;;  %v2060_v43 = vld [vmem:[#allocation2 + $0xc4] ss:$2 sm:$0x1] }
 0x191   : > { %v869_v35 = vpop.f32.mrb[60].mxu0  ;;  %1758 = vst.msk [vmem:[#allocation3 + $0x80] sm:$0xf] %vm1757_vm2, %v1752_v30 }
 0x192   : > { %1594 = vrot.lane.b32.xlu0 %v1591_v5, %s5322_s22  ;;  %1473 = vrot.lane.b32.xlu1 %v1470_v9, %s5322_s22  ;;  %v870_v41 = vadd.f32 %v5475_v61, %v869_v35  ;;  %v871_v42 = vpop.f32.mrb[61].mxu0 }
 0x193   : > { %v872_v54 = vpop.f32.mrb[62].mxu0 }
 0x194   : > { %v978_v53 = vmax.f32 %v870_v41, 0.0  ;;  %v873_v57 = vadd.f32 %v5475_v61, %v872_v54  ;;  %v874_v58 = vpop.f32.mrb[63].mxu0  ;;  %v1815_v54 = vrot.slane %v1811_v45, 5  ;;  %v5931_v45 = vld [vmem:[#allocation2 + $0x7a] ss:$2 sm:$0xff] }
 0x195   : > { %v5878_v58 = vld [vmem:[#allocation2 + $0xb4] ss:$2 sm:$0xff]  ;;  %v1780_v46 = vrot.slane %v5931_v45, 5 }
 0x196   : > { %1609 = vrot.lane.b32.xlu0 %v1606_v16, %s5323_s23  ;;  %1490 = vrot.lane.b32.xlu1 %v1487_v50, %s5323_s23  ;;  %1029 = vst.msk [vmem:[#allocation2 + $0xf0] sm:$0xff] %vm998_vm0, %v978_v53  ;;  %v979_v2 = vmax.f32 %v873_v57, 0.0  ;;  %v5833_v16 = vld [vmem:[#allocation2 + $0x75] ss:$2 sm:$0x1]  ;;  %v1816_v62 = vsel %vm1749_vm12, %v1814_v49, %v1815_v54 }
 0x197   : > { %v1452_v33 = vrot.slane %v5833_v16, 7  ;;  %v5872_v50 = vld [vmem:[#allocation2 + $0x8e] ss:$2 sm:$0xff]  ;;  %1820 = vst.msk [vmem:[#allocation3 + $0x88] sm:$0xf] %vm1757_vm2, %v1816_v62 }
 0x198   : > { %1030 = vst.msk [vmem:[#allocation2 + $0xf8] sm:$0xff] %vm998_vm0, %v979_v2  ;;  %v1936_v2 = vrot.slane %v5878_v58, 5  ;;  %v1840_v40 = vrot.slane %v5872_v50, 5  ;;  %v5942_v58 = vld [vmem:[#allocation2 + $0x8d] ss:$2 sm:$0xff] }
 0x199   : > { %v877_v36 = vpop.f32.mrb[64].mxu0  ;;  %v1453_v38 = vsel %vm1251_vm3, %v1451_v63, %v1452_v33  ;;  %vm7213_vm3 = vcmask 1044480   ;;  %v2180_v33 = vld [vmem:[#allocation2 + $0xdc] ss:$2 sm:$0xff] }
 0x19a   : > { %1454 = vrot.lane.b32.xlu0 %v1451_v63, %s5321_s21  ;;  %1800 = vrot.lane.b32.xlu1 %v1797_v0, %s5323_s23  ;;  %v1062_v37 = vpop.permute.xlu1 %1061  ;;  %v878_v4 = vadd.f32 %v5475_v61, %v877_v36  ;;  %v879_v5 = vpop.f32.mrb[65].mxu0  ;;  %v1872_v36 = vrot.slane %v1867_v56, 5  ;;  %1941 = vst.msk [vmem:[#allocation3 + $0x78] sm:$0xf8] %vm1755_vm8, %v1936_v2  ;;  %v2185_v30 = vrot.slane %v2180_v33, 4 }
 0x19b   : > { %1068 = vst.msk [vmem:[#allocation3] sm:$0xff] %vm7211_vm9, %v1062_v37  ;;  %v880_v17 = vpop.f32.mrb[66].mxu0  ;;  %v1869_v37 = vld [vmem:[#allocation2 + $0xb0] ss:$2 sm:$0x1]  ;;  %v1689_v5 = vsel %vm1500_vm6, %v1687_v20, %v1688_v52 }
 0x19c   : > { %v980_v10 = vmax.f32 %v878_v4, 0.0  ;;  %v881_v19 = vadd.f32 %v5475_v61, %v880_v17  ;;  %v882_v26 = vpop.f32.mrb[67].mxu0  ;;  %v1873_v7 = vrot.slane %v1869_v37, 5  ;;  %1693 = vst.msk [vmem:[#allocation3 + $0x78] sm:$0x7] %vm1508_vm7, %v1689_v5  ;;  %v2064_v17 = vrot.slane %v2060_v43, 4 }
 0x19d   : > { %1877 = vst.msk [vmem:[#allocation3 + $0x70] sm:$0xf8] %vm1755_vm8, %v1872_v36  ;;  %v2308_v20 = vld [vmem:[#allocation2 + $0xdc] ss:$2 sm:$0xff]  ;;  %vm2253_vm7 = vcmask 261125   ;;  %vm2255_vm8 = vcmask 259072  }
 0x19e   : > { %1471 = vrot.lane.b32.xlu0 %v1468_v28, %s5322_s22  ;;  %1673 = vrot.lane.b32.xlu1 %v1670_v6, %s5323_s23  ;;  %1031 = vst.msk [vmem:[#allocation2 + $0x100] sm:$0xff] %vm998_vm0, %v980_v10  ;;  %v5850_v28 = vld [vmem:[#allocation2 + $0x8d] ss:$2 sm:$0xff]  ;;  %v981_v29 = vmax.f32 %v881_v19, 0.0  ;;  %v2116_v10 = vld [vmem:[#allocation2 + $0xc8] ss:$2 sm:$0xff]  ;;  %v1874_v16 = vsel %vm1749_vm12, %v1872_v36, %v1873_v7 }
 0x19f   : > { %v1825_v59 = vrot.slane %v5850_v28, 5  ;;  %v2121_v49 = vrot.slane %v2116_v10, 4  ;;  %1878 = vst.msk [vmem:[#allocation3 + $0x90] sm:$0xf] %vm1757_vm2, %v1874_v16 }
 0x1a0   : > { %v1064_v22 = vpop.permute.xlu0 %1063  ;;  %v1078_v21 = vpop.permute.xlu1 %1077  ;;  %1032 = vst.msk [vmem:[#allocation2 + $0x108] sm:$0xff] %vm998_vm0, %v981_v29  ;;  %v1837_v36 = vld [vmem:[#allocation2 + $0x9e] ss:$2 sm:$0x1] }
 0x1a1   : > { %1070 = vst.msk [vmem:[#allocation3 + $0x20] sm:$0x1] %vm7210_vm10, %v1064_v22  ;;  %v885_v32 = vpop.f32.mrb[68].mxu0  ;;  %v5906_v22 = vld [vmem:[#allocation2 + $0x8f] ss:$2 sm:$0xff]  ;;  %v2123_v23 = vsel %vm1998_vm1, %v2121_v49, %v2122_v14 }
 0x1a2   : > { %1084 = vst.msk [vmem:[#allocation3] sm:$0xff] %vm7212_vm11, %v1078_v21  ;;  %1488 = vrot.lane.b32.xlu0 %v1485_v18, %s5323_s23  ;;  %1641 = vrot.lane.b32.xlu1 %v1638_v8, %s5321_s21  ;;  %v886_v9 = vadd.f32 %v5475_v61, %v885_v32  ;;  %v887_v34 = vpop.f32.mrb[69].mxu0  ;;  %v1995_v18 = vld [vmem:[#allocation2 + $0xb0] ss:$2 sm:$0x1]  ;;  %v1578_v61 = vsel %vm1500_vm6, %v1576_v60, %v1577_v13  ;;  %v2063_v60 = vrot.slane %v5860_v48, 4 }
 0x1a3   : > { %v2000_v42 = vrot.slane %v1995_v18, 4  ;;  %v888_v63 = vpop.f32.mrb[70].mxu0  ;;  %v5911_v21 = vld [vmem:[%s7198_s2] ss:$0 sm:$0xff]  ;;  %2126 = vst.msk [vmem:[#allocation3 + $0x90] sm:$0xf0] %vm2004_vm15, %v2121_v49 }
 0x1a4   : > { %v1080_v35 = vpop.permute.xlu0 %1079  ;;  %v1094_v41 = vpop.permute.xlu1 %1093  ;;  %v982_v53 = vmax.f32 %v886_v9, 0.0  ;;  %2068 = vst.msk [vmem:[#allocation3 + $0x88] sm:$0xf0] %vm2004_vm15, %v2063_v60  ;;  %v889_v13 = vadd.f32 %v5911_v21, %v888_v63  ;;  %v2312_v8 = vrot.slane %v2308_v20, 3  ;;  %v2065_v27 = vsel %vm1998_vm1, %v2063_v60, %v2064_v17  ;;  %v2243_v32 = vld [vmem:[#allocation2 + $0xc8] ss:$2 sm:$0xff] }
 0x1a5   : > { %1086 = vst.msk [vmem:[#allocation3 + $0x20] sm:$0x1] %vm7206_vm13, %v1080_v35  ;;  %v2001_v57 = vsel %vm1998_vm1, %v1999_v1, %v2000_v42  ;;  %v890_v19 = vpop.f32.mrb[71].mxu0  ;;  %v1933_v1 = vld [vmem:[#allocation2 + $0xc4] ss:$2 sm:$0x1] }
 0x1a6   : > { %1100 = vst.msk [vmem:[#allocation3] sm:$0xff] %vm7209_vm14, %v1094_v41  ;;  %1581 = vrot.lane.b32.xlu0 %v1578_v61, %s5321_s21  ;;  %1658 = vrot.lane.b32.xlu1 %v1655_v44, %s5322_s22  ;;  %v1937_v29 = vrot.slane %v1933_v1, 5  ;;  %v983_v9 = vmax.f32 %v889_v13, 0.0  ;;  %v2248_v34 = vrot.slane %v2243_v32, 3  ;;  %v1855_v55 = vrot.slane %v5906_v22, 5 }
 0x1a7   : > { %1033 = vst.msk [vmem:[#allocation2 + $0x110] sm:$0xff] %vm998_vm0, %v982_v53  ;;  %v2244_v18 = vld [vmem:[#allocation2 + $0xd8] ss:$2 sm:$0x1] }
 0x1a8   : > { %2007 = vst.msk [vmem:[#allocation3 + $0xa0] sm:$0x1f] %vm2006_vm5, %v2001_v57  ;;  %v1096_v3 = vpop.permute.xlu0 %1095  ;;  %v1130_v4 = vpop.permute.xlu1 %1129  ;;  %2127 = vst.msk [vmem:[#allocation3 + $0xb0] sm:$0x1f] %vm2006_vm5, %v2123_v23  ;;  %v1938_v41 = vsel %vm1749_vm12, %v1936_v2, %v1937_v29  ;;  %v2249_v42 = vrot.slane %v2244_v18, 3 }
 0x1a9   : > { %1102 = vst.msk [vmem:[#allocation3 + $0x20] sm:$0x1] %vm7208_vm4, %v1096_v3  ;;  %v893_v35 = vpop.f32.mrb[72].mxu0  ;;  %v2309_v44 = vld [vmem:[#allocation2 + $0xec] ss:$2 sm:$0x1] }
 0x1aa   : > { %1456 = vrot.lane.b32.xlu0 %v1453_v38, %s5321_s21  ;;  %1828 = vrot.lane.b32.xlu1 %v1825_v59, %s5321_s21  ;;  %2069 = vst.msk [vmem:[#allocation3 + $0xa8] sm:$0x1f] %vm2006_vm5, %v2065_v27  ;;  %v894_v48 = vadd.f32 %v5911_v21, %v893_v35  ;;  %v895_v61 = vpop.f32.mrb[73].mxu0  ;;  %v2250_v57 = vsel %vm7213_vm3, %v2248_v34, %v2249_v42  ;;  %v2313_v52 = vrot.slane %v2309_v44, 3  ;;  %v1841_v38 = vrot.slane %v1837_v36, 5 }
 0x1ab   : > { %2317 = vst.msk [vmem:[#allocation3 + $0xa8] sm:$0xe0] %vm2253_vm7, %v2312_v8  ;;  %2254 = vst.msk [vmem:[#allocation3 + $0xa0] sm:$0xe0] %vm2253_vm7, %v2248_v34  ;;  %v896_v62 = vpop.f32.mrb[74].mxu0 }
 0x1ac   : > { %v1116_v25 = vpop.permute.xlu0 %1115  ;;  %v1144_v26 = vpop.permute.xlu1 %1143  ;;  %1034 = vst.msk [vmem:[#allocation2 + $0x118] sm:$0xff] %vm998_vm0, %v983_v9  ;;  %v2182_v60 = vld [vmem:[#allocation2 + $0xec] ss:$2 sm:$0x1]  ;;  %v984_v56 = vmax.f32 %v894_v48, 0.0  ;;  %v897_v37 = vadd.f32 %v5911_v21, %v896_v62  ;;  %v2314_v3 = vsel %vm7213_vm3, %v2312_v8, %v2313_v52  ;;  %v1842_v16 = vsel %vm1749_vm12, %v1840_v40, %v1841_v38 }
 0x1ad   : > { %1121 = vst.msk [vmem:[#allocation3 + $0x8] sm:$0xff] %vm7211_vm9, %v1116_v25  ;;  %v2186_v2 = vrot.slane %v2182_v60, 4  ;;  %v1760_v49 = vld [vmem:[#allocation2 + $0x89] ss:$2 sm:$0x1] }
 0x1ae   : > { %1135 = vst.msk [vmem:[#allocation3 + $0x8] sm:$0xff] %vm7212_vm11, %v1130_v4  ;;  %1766 = vrot.lane.b32.xlu0 %v1763_v15, %s5321_s21  ;;  %1843 = vrot.lane.b32.xlu1 %v1840_v40, %s5322_s22  ;;  %v898_v4 = vpop.f32.mrb[75].mxu0  ;;  %v985_v12 = vmax.f32 %v897_v37, 0.0  ;;  %v1852_v14 = vld [vmem:[#allocation2 + $0x9f] ss:$2 sm:$0x1] }
 0x1af   : > { %1149 = vst.msk [vmem:[#allocation3 + $0x8] sm:$0xff] %vm7209_vm14, %v1144_v26  ;;  %v2187_v5 = vsel %vm1998_vm1, %v2185_v30, %v2186_v2  ;;  %v1764_v17 = vrot.slane %v1760_v49, 5  ;;  %v1856_v20 = vrot.slane %v1852_v14, 5  ;;  %v1777_v22 = vld [vmem:[#allocation2 + $0x8a] ss:$2 sm:$0x1] }
 0x1b0   : > { %1942 = vst.msk [vmem:[#allocation3 + $0x98] sm:$0xf] %vm1757_vm2, %v1938_v41  ;;  %v1118_v53 = vpop.permute.xlu0 %1117  ;;  %v1164_v54 = vpop.permute.xlu1 %1163  ;;  %v5973_v13 = vld [vmem:[#allocation2 + $0x8e] ss:$2 sm:$0xff]  ;;  %v1781_v8 = vrot.slane %v1777_v22, 5  ;;  %vm7205_vm2 = vcmask 785921  }
 0x1b1   : > { %2190 = vst.msk [vmem:[#allocation3 + $0x98] sm:$0xf0] %vm2004_vm15, %v2185_v30  ;;  %vm7214_vm15 = vcmask 523521   ;;  %v1714_v19 = vld [vmem:[#allocation2 + $0x9e] ss:$2 sm:$0x1]  ;;  %v1765_v50 = vsel %vm1749_vm12, %v1763_v15, %v1764_v17  ;;  %v1857_v40 = vsel %vm1749_vm12, %v1855_v55, %v1856_v20 }
 0x1b2   : > { %1122 = vst.msk [vmem:[#allocation3 + $0x28] sm:$0x1] %vm7210_vm10, %v1118_v53  ;;  %1639 = vrot.lane.b32.xlu0 %v1636_v11, %s5321_s21  ;;  %1858 = vrot.lane.b32.xlu1 %v1855_v55, %s5323_s23  ;;  %v1700_v11 = vrot.slane %v5942_v58, 6  ;;  %v1717_v39 = vrot.slane %v5973_v13, 6  ;;  %v5984_v26 = vld [vmem:[#allocation2 + $0x8f] ss:$2 sm:$0xff]  ;;  %v1782_v47 = vsel %vm1749_vm12, %v1780_v46, %v1781_v8 }
 0x1b3   : > { %1169 = vst.msk [vmem:[#allocation3 + $0x10] sm:$0xff] %vm7211_vm9, %v1164_v54  ;;  %v1794_v25 = vld [vmem:[#allocation2 + $0x8b] ss:$2 sm:$0x1]  ;;  %v1734_v9 = vrot.slane %v5984_v26, 6 }
 0x1b4   : > { %2256 = vst.msk [vmem:[#allocation3 + $0xc0] sm:$0x3f] %vm2255_vm8, %v2250_v57  ;;  %2318 = vst.msk [vmem:[#allocation3 + $0xc8] sm:$0x3f] %vm2255_vm8, %v2314_v3  ;;  %v1132_v7 = vpop.permute.xlu0 %1131  ;;  %v1269_v10 = vpop.permute.xlu1 %1268  ;;  %v1798_v33 = vrot.slane %v1794_v25, 5 }
 0x1b5   : > { %1035 = vst.msk [vmem:[#allocation2 + $0x120] sm:$0xff] %vm998_vm0, %v984_v56  ;;  %1036 = vst.msk [vmem:[#allocation2 + $0x128] sm:$0xff] %vm998_vm0, %v985_v12  ;;  %v1731_v27 = vld [vmem:[#allocation2 + $0x9f] ss:$2 sm:$0x1] }
 0x1b6   : > { %2191 = vst.msk [vmem:[#allocation3 + $0xb8] sm:$0x1f] %vm2006_vm5, %v2187_v5  ;;  %1783 = vrot.lane.b32.xlu0 %v1780_v46, %s5322_s22  ;;  %1703 = vrot.lane.b32.xlu1 %v1700_v11, %s5321_s21  ;;  %v1735_v34 = vrot.slane %v1731_v27, 6  ;;  %vm7207_vm5 = vcmask 1048321   ;;  %v5995_v41 = vld [vmem:[#allocation2 + $0xa3] ss:$2 sm:$0xff]  ;;  %v1799_v42 = vsel %vm1749_vm12, %v1797_v0, %v1798_v33 }
 0x1b7   : > { %1136 = vst.msk [vmem:[#allocation3 + $0x28] sm:$0x1] %vm7206_vm13, %v1132_v7  ;;  %v1667_v30 = vld [vmem:[#allocation2 + $0x8b] ss:$2 sm:$0x1]  ;;  %v2046_v61 = vrot.slane %v5995_v41, 4 }
 0x1b8   : > { %1275 = vst.msk [vmem:[#allocation3 + $0x20] sm:$0xfe] %vm7214_vm15, %v1269_v10  ;;  %v1146_v43 = vpop.permute.xlu0 %1145  ;;  %v1178_v63 = vpop.permute.xlu1 %1177  ;;  %v1736_v45 = vsel %vm1500_vm6, %v1734_v9, %v1735_v34  ;;  %v1671_v48 = vrot.slane %v1667_v30, 6  ;;  %v2492_v44 = vld [vmem:[#allocation2 + $0xf0] ss:$2 sm:$0xff] }
 0x1b9   : > { %1150 = vst.msk [vmem:[#allocation3 + $0x28] sm:$0x1] %vm7208_vm4, %v1146_v43  ;;  %v2009_v55 = vld [vmem:[#allocation2 + $0xb1] ss:$2 sm:$0x1]  ;;  %v2497_v0 = vrot.slane %v2492_v44, 2 }
 0x1ba   : > { %1183 = vst.msk [vmem:[#allocation3 + $0x10] sm:$0xff] %vm7212_vm11, %v1178_v63  ;;  %1656 = vrot.lane.b32.xlu0 %v1653_v24, %s5322_s22  ;;  %1845 = vrot.lane.b32.xlu1 %v1842_v16, %s5322_s22  ;;  %v1718_v24 = vrot.slane %v1714_v19, 6  ;;  %v2493_v51 = vld [vmem:[#allocation2 + $0x100] ss:$2 sm:$0x1]  ;;  %v1672_v57 = vsel %vm1500_vm6, %v1670_v6, %v1671_v48  ;;  %v2013_v7 = vrot.slane %v2009_v55, 4 }
 0x1bb   : > { %v6013_v52 = vld [vmem:[#allocation2 + $0xa3] ss:$2 sm:$0xff]  ;;  %v2498_v60 = vrot.slane %v2493_v51, 2  ;;  %v2365_v56 = vld [vmem:[#allocation2 + $0xf0] ss:$2 sm:$0xff]  ;;  %v901_v46 = vpop.f32.mrb[76].mxu0 }
 0x1bc   : > { %v1166_v23 = vpop.permute.xlu0 %1165  ;;  %v1192_v1 = vpop.permute.xlu1 %1191  ;;  %v1719_v15 = vsel %vm1500_vm6, %v1717_v39, %v1718_v24  ;;  %v6019_v62 = vld [vmem:[#allocation2 + $0xa1] ss:$2 sm:$0xff]  ;;  %v2370_v2 = vrot.slane %v2365_v56, 3  ;;  %v2367_v36 = vld [vmem:[#allocation2 + $0x100] ss:$2 sm:$0x1]  ;;  %v902_v49 = vadd.f32 %v5911_v21, %v901_v46 }
 0x1bd   : > { %1170 = vst.msk [vmem:[#allocation3 + $0x30] sm:$0x1] %vm7210_vm10, %v1166_v23  ;;  %v1919_v3 = vrot.slane %v6013_v52, 5  ;;  %v2371_v4 = vrot.slane %v2367_v36, 3  ;;  %v2012_v5 = vrot.slane %v6019_v62, 4  ;;  %v903_v14 = vpop.f32.mrb[77].mxu0 }
 0x1be   : > { %1197 = vst.msk [vmem:[#allocation3 + $0x10] sm:$0xff] %vm7209_vm14, %v1192_v1  ;;  %1768 = vrot.lane.b32.xlu0 %v1765_v50, %s5321_s21  ;;  %1860 = vrot.lane.b32.xlu1 %v1857_v40, %s5323_s23  ;;  %vm2504_vm14 = vcmask 260096   ;;  %v1822_v10 = vld [vmem:[#allocation2 + $0x9d] ss:$2 sm:$0x1]  ;;  %v904_v63 = vpop.f32.mrb[78].mxu0 }
 0x1bf   : > { %2375 = vst.msk [vmem:[#allocation3 + $0xb0] sm:$0xe0] %vm2253_vm7, %v2370_v2  ;;  %v6034_v12 = vld [vmem:[#allocation2 + $0xa2] ss:$2 sm:$0xff]  ;;  %v2372_v43 = vsel %vm7213_vm3, %v2370_v2, %v2371_v4  ;;  %v1826_v20 = vrot.slane %v1822_v10, 5  ;;  %v986_v22 = vmax.f32 %v902_v49, 0.0  ;;  %v905_v13 = vadd.f32 %v5911_v21, %v904_v63 }
 0x1c0   : > { %v1180_v29 = vpop.permute.xlu0 %1179  ;;  %v1286_v32 = vpop.permute.xlu1 %1285  ;;  %v2026_v38 = vld [vmem:[#allocation2 + $0xb2] ss:$2 sm:$0x1]  ;;  %2376 = vst.msk [vmem:[#allocation3 + $0xd0] sm:$0x3f] %vm2255_vm8, %v2372_v43  ;;  %v2014_v19 = vsel %vm1998_vm1, %v2012_v5, %v2013_v7  ;;  %v2029_v23 = vrot.slane %v6034_v12, 4 }
 0x1c1   : > { %1184 = vst.msk [vmem:[#allocation3 + $0x30] sm:$0x1] %vm7206_vm13, %v1180_v29  ;;  %vm1293_vm13 = vcmask 779776   ;;  %v2030_v1 = vrot.slane %v2026_v38, 4  ;;  %v906_v50 = vpop.f32.mrb[79].mxu0  ;;  %v987_v40 = vmax.f32 %v905_v13, 0.0  ;;  %v1827_v26 = vsel %vm1749_vm12, %v1825_v59, %v1826_v20 }
 0x1c2   : > { %1292 = vst.msk [vmem:[#allocation3 + $0x20] sm:$0xfe] %vm7205_vm2, %v1286_v32  ;;  %1785 = vrot.lane.b32.xlu0 %v1782_v47, %s5322_s22  ;;  %1722 = vrot.lane.b32.xlu1 %v1719_v15, %s5322_s22  ;;  %vm1276_vm2 = vcmask 517376   ;;  %v1697_v8 = vld [vmem:[#allocation2 + $0x9d] ss:$2 sm:$0x1] }
 0x1c3   : > { %1037 = vst.msk [vmem:[#allocation2 + $0x130] sm:$0xff] %vm998_vm0, %v986_v22  ;;  %v2429_v24 = vld [vmem:[#allocation2 + $0x104] ss:$2 sm:$0xff]  ;;  %v2558_v29 = vld [vmem:[#allocation2 + $0x114] ss:$2 sm:$0x1] }
 0x1c4   : > { %v1194_v18 = vpop.permute.xlu0 %1193  ;;  %v1303_v35 = vpop.permute.xlu1 %1302  ;;  %v2434_v27 = vrot.slane %v2429_v24, 3  ;;  %1038 = vst.msk [vmem:[#allocation2 + $0x138] sm:$0xff] %vm998_vm0, %v987_v40  ;;  %v2562_v47 = vrot.slane %v2558_v29, 2  ;;  %v2431_v15 = vld [vmem:[#allocation2 + $0x114] ss:$2 sm:$0x1] }
 0x1c5   : > { %1198 = vst.msk [vmem:[#allocation3 + $0x30] sm:$0x1] %vm7208_vm4, %v1194_v18  ;;  %vm2502_vm4 = vcmask 261126   ;;  %v1701_v34 = vrot.slane %v1697_v8, 6  ;;  %v6059_v30 = vld [vmem:[#allocation2 + $0xb5] ss:$2 sm:$0xff] }
 0x1c6   : > { %1309 = vst.msk [vmem:[#allocation3 + $0x20] sm:$0xfe] %vm7207_vm5, %v1303_v35  ;;  %1802 = vrot.lane.b32.xlu0 %v1799_v42, %s5323_s23  ;;  %1739 = vrot.lane.b32.xlu1 %v1736_v45, %s5323_s23  ;;  %vm7216_vm5 = vcmask 1045504   ;;  %v2435_v18 = vrot.slane %v2431_v15, 3  ;;  %v2074_v45 = vrot.slane %v6059_v30, 4  ;;  %v909_v24 = vpop.f32.mrb[80].mxu0 }
 0x1c7   : > { %2503 = vst.msk [vmem:[#allocation3 + $0xc0] sm:$0xc0] %vm2502_vm4, %v2497_v0  ;;  %v2499_v31 = vsel %vm7216_vm5, %v2497_v0, %v2498_v60  ;;  %v1702_v48 = vsel %vm1500_vm6, %v1700_v11, %v1701_v34  ;;  %v6078_v44 = vld [vmem:[#allocation2 + $0xb5] ss:$2 sm:$0xff]  ;;  %v6090_v58 = vld [vmem:[#allocation2 + $0xb6] ss:$2 sm:$0xff] }
 0x1c8   : > { %v1271_v53 = vpop.permute.xlu0 %1270  ;;  %v1214_v54 = vpop.permute.xlu1 %1213  ;;  %2505 = vst.msk [vmem:[#allocation3 + $0xe0] sm:$0x7f] %vm2504_vm14, %v2499_v31  ;;  %v2436_v59 = vsel %vm7213_vm3, %v2434_v27, %v2435_v18  ;;  %v1949_v55 = vrot.slane %v6078_v44, 5  ;;  %v6087_v51 = vld [vmem:[#allocation2 + $0xa1] ss:$2 sm:$0xff]  ;;  %v1966_v56 = vrot.slane %v6090_v58, 5 }
 0x1c9   : > { %1277 = vst.msk [vmem:[#allocation3 + $0x40] sm:$0x3] %vm1276_vm2, %v1271_v53  ;;  %v1885_v11 = vrot.slane %v6087_v51, 5  ;;  %v6099_v0 = vld [vmem:[#allocation2 + $0xb7] ss:$2 sm:$0xff]  ;;  %vm7220_vm6 = vcmask 785921  }
 0x1ca   : > { %1218 = vst.msk [vmem:[#allocation3 + $0x38] sm:$0x1] %vm7210_vm10, %v1214_v54  ;;  %1675 = vrot.lane.b32.xlu0 %v1672_v57, %s5323_s23  ;;  %2049 = vrot.lane.b32.xlu1 %v2046_v61, %s5323_s23  ;;  %vm1310_vm10 = vcmask 1042176   ;;  %v6102_v2 = vld [vmem:[#allocation2 + $0xb6] ss:$2 sm:$0xff]  ;;  %v1983_v31 = vrot.slane %v6099_v0, 5 }
 0x1cb   : > { %2439 = vst.msk [vmem:[#allocation3 + $0xb8] sm:$0xe0] %vm2253_vm7, %v2434_v27  ;;  %vm7218_vm7 = vcmask 778752   ;;  %v2086_v36 = vld [vmem:[#allocation2 + $0xc6] ss:$2 sm:$0x1]  ;;  %v910_v27 = vadd.f32 %v5911_v21, %v909_v24 }
 0x1cc   : > { %v1288_v6 = vpop.permute.xlu0 %1287  ;;  %v1226_v37 = vpop.permute.xlu1 %1225  ;;  %2440 = vst.msk [vmem:[#allocation3 + $0xd8] sm:$0x3f] %vm2255_vm8, %v2436_v59  ;;  %v2614_v62 = vld [vmem:[#allocation2 + $0x118] ss:$2 sm:$0xff]  ;;  %v2090_v4 = vrot.slane %v2086_v36, 4  ;;  %vm2751_vm8 = vcmask 261127  }
 0x1cd   : > { %1294 = vst.msk [vmem:[#allocation3 + $0x40] sm:$0x3] %vm1293_vm13, %v1288_v6  ;;  %v6113_v6 = vld [vmem:[#allocation2 + $0xa2] ss:$2 sm:$0xff]  ;;  %v2619_v7 = vrot.slane %v2614_v62, 2  ;;  %v911_v29 = vpop.f32.mrb[81].mxu0 }
 0x1ce   : > { %1720 = vrot.lane.b32.xlu0 %v1717_v39, %s5322_s22  ;;  %1922 = vrot.lane.b32.xlu1 %v1919_v3, %s5323_s23  ;;  %v2557_v39 = vld [vmem:[#allocation2 + $0x104] ss:$2 sm:$0xff]  ;;  %v988_v18 = vmax.f32 %v910_v27, 0.0  ;;  %vm7215_vm3 = vcmask 518400  }
 0x1cf   : > { %v2561_v25 = vrot.slane %v2557_v39, 2  ;;  %v2616_v38 = vld [vmem:[#allocation2 + $0x128] ss:$2 sm:$0x1]  ;;  %v2741_v49 = vld [vmem:[#allocation2 + $0x118] ss:$2 sm:$0xff] }
 0x1d0   : > { %v1305_v16 = vpop.permute.xlu0 %1304  ;;  %v1240_v17 = vpop.permute.xlu1 %1239  ;;  %v2620_v14 = vrot.slane %v2616_v38, 2  ;;  %2624 = vst.msk [vmem:[#allocation3 + $0xd0] sm:$0xc0] %vm2502_vm4, %v2619_v7  ;;  %v2746_v43 = vrot.slane %v2741_v49, 1 }
 0x1d1   : > { %1311 = vst.msk [vmem:[#allocation3 + $0x40] sm:$0x3] %vm1310_vm10, %v1305_v16  ;;  %v2563_v28 = vsel %vm7216_vm5, %v2561_v25, %v2562_v47  ;;  %v2742_v63 = vld [vmem:[#allocation2 + $0x128] ss:$2 sm:$0x1] }
 0x1d2   : > { %1737 = vrot.lane.b32.xlu0 %v1734_v9, %s5323_s23  ;;  %2017 = vrot.lane.b32.xlu1 %v2014_v19, %s5321_s21  ;;  %v2031_v9 = vsel %vm1998_vm1, %v2029_v23, %v2030_v1  ;;  %2566 = vst.msk [vmem:[#allocation3 + $0xc8] sm:$0xc0] %vm2502_vm4, %v2561_v25  ;;  %v6126_v16 = vld [vmem:[#allocation2 + $0xb7] ss:$2 sm:$0xff]  ;;  %v2747_v20 = vrot.slane %v2742_v63, 1  ;;  %v2621_v22 = vsel %vm7216_vm5, %v2619_v7, %v2620_v14  ;;  %v1902_v1 = vrot.slane %v6113_v6, 5 }
 0x1d3   : > { %2567 = vst.msk [vmem:[#allocation3 + $0xe8] sm:$0x7f] %vm2504_vm14, %v2563_v28  ;;  %2625 = vst.msk [vmem:[#allocation3 + $0xf0] sm:$0x7f] %vm2504_vm14, %v2621_v22  ;;  %v2104_v50 = vrot.slane %v6126_v16, 4 }
 0x1d4   : > { %v1212_v32 = vpop.permute.xlu0 %1211  ;;  %v1331_v33 = vpop.permute.xlu1 %1330  ;;  %2752 = vst.msk [vmem:[#allocation3 + $0xe0] sm:$0x80] %vm2751_vm8, %v2746_v43  ;;  %v1882_v39 = vld [vmem:[#allocation2 + $0xb1] ss:$2 sm:$0x1] }
 0x1d5   : > { %1217 = vst.msk [vmem:[#allocation3 + $0x18] sm:$0xff] %vm7211_vm9, %v1212_v32  ;;  %vm7217_vm9 = vcmask 1048320   ;;  %v1963_v25 = vld [vmem:[#allocation2 + $0xc6] ss:$2 sm:$0x1]  ;;  %v3166_v32 = vld [vmem:[#allocation3 + $0x20] sm:$0xff] }
 0x1d6   : > { %1336 = vst.msk [vmem:[#allocation3 + $0x28] sm:$0xfe] %vm7214_vm15, %v1331_v33  ;;  %1830 = vrot.lane.b32.xlu0 %v1827_v26, %s5321_s21  ;;  %2034 = vrot.lane.b32.xlu1 %v2031_v9, %s5322_s22  ;;  %v912_v33 = vpop.f32.mrb[82].mxu0  ;;  %v3163_v26 = vld [vmem:[#allocation3 + $0x8] sm:$0xff]  ;;  %v1886_v34 = vrot.slane %v1882_v39, 5 }
 0x1d7   : > { %1231 = vst.msk [vmem:[#allocation3 + $0x18] sm:$0xff] %vm7212_vm11, %v1226_v37  ;;  %v2089_v37 = vrot.slane %v6102_v2, 4  ;;  %v913_v28 = vadd.f32 %v5911_v21, %v912_v33  ;;  %vm7222_vm11 = vcmask 1048321   ;;  %v1980_v36 = vld [vmem:[#allocation2 + $0xc7] ss:$2 sm:$0x1] }
 0x1d8   : > { %1245 = vst.msk [vmem:[#allocation3 + $0x18] sm:$0xff] %vm7217_vm9, %v1240_v17  ;;  %v1228_v35 = vpop.permute.xlu0 %1227  ;;  %v6070_v42 = vpop.permute.xlu1 %1347  ;;  %vm7219_vm9 = vcmask 1041152   ;;  %v2101_v17 = vld [vmem:[#allocation2 + $0xc7] ss:$2 sm:$0x1]  ;;  %v1887_v38 = vsel %vm1749_vm12, %v1885_v11, %v1886_v34  ;;  %v1984_v14 = vrot.slane %v1980_v36, 5 }
 0x1d9   : > { %1232 = vst.msk [vmem:[#allocation3 + $0x38] sm:$0x1] %vm7218_vm7, %v1228_v35  ;;  %vm7221_vm7 = vcmask 1048321   ;;  %v2105_v40 = vrot.slane %v2101_v17, 4  ;;  %v989_v41 = vmax.f32 %v913_v28, 0.0 }
 0x1da   : > { %1705 = vrot.lane.b32.xlu0 %v1702_v48, %s5321_s21  ;;  %2077 = vrot.lane.b32.xlu1 %v2074_v45, %s5321_s21  ;;  %v3162_v48 = vld [vmem:[#allocation3] sm:$0xff]  ;;  %1039 = vst.msk [vmem:[#allocation2 + $0x140] sm:$0xff] %vm998_vm0, %v988_v18  ;;  %v2131_v24 = vld [vmem:[#allocation2 + $0xd9] ss:$2 sm:$0x1] }
 0x1db   : > { %v2106_v35 = vsel %vm1998_vm1, %v2104_v50, %v2105_v40  ;;  %1040 = vst.msk [vmem:[#allocation2 + $0x148] sm:$0xff] %vm998_vm0, %v989_v41  ;;  %v1916_v63 = vld [vmem:[#allocation2 + $0xb3] ss:$2 sm:$0x1] }
 0x1dc   : > { %v1242_v53 = vpop.permute.xlu0 %1241  ;;  %v6084_v54 = vpop.permute.xlu1 %1362  ;;  %v1920_v22 = vrot.slane %v1916_v63, 5  ;;  %v6203_v39 = vld [vmem:[#allocation2 + $0xc9] ss:$2 sm:$0xff]  ;;  %v1946_v36 = vld [vmem:[#allocation2 + $0xc5] ss:$2 sm:$0x1] }
 0x1dd   : > { %1246 = vst.msk [vmem:[#allocation3 + $0x38] sm:$0x1] %vm7219_vm9, %v1242_v53  ;;  %vm2745_vm9 = vcmask 1046528   ;;  %v1967_v53 = vrot.slane %v1963_v25, 5  ;;  %v2134_v33 = vrot.slane %v6203_v39, 4 }
 0x1de   : > { %2015 = vrot.lane.b32.xlu0 %v2012_v5, %s5321_s21  ;;  %1952 = vrot.lane.b32.xlu1 %v1949_v55, %s5321_s21  ;;  %v2043_v5 = vld [vmem:[#allocation2 + $0xb3] ss:$2 sm:$0x1]  ;;  %v2748_v12 = vsel %vm2745_vm9, %v2746_v43, %v2747_v20  ;;  %v1985_v20 = vsel %vm1749_vm12, %v1983_v31, %v1984_v14  ;;  %v2350_v39 = vld [vmem:[#allocation2 + $0xef] ss:$2 sm:$0x1] }
 0x1df   : > { %v2047_v8 = vrot.slane %v2043_v5, 4  ;;  %2753 = vst.msk [vmem:[#allocation3 + $0x100] sm:$0xff] %vm998_vm0, %v2748_v12  ;;  %v1968_v49 = vsel %vm1749_vm12, %v1966_v56, %v1967_v53  ;;  %v2680_v53 = vld [vmem:[#allocation2 + $0x13c] ss:$2 sm:$0x1] }
 0x1e0   : > { %v1346_v57 = vpop.permute.xlu0 %1345  ;;  %v1391_v60 = vpop.permute.xlu1 %1390 }
 0x1e1   : > { %1351 = vst.msk [vmem:[#allocation3 + $0x28] sm:$0xfe] %vm7220_vm6, %v1346_v57  ;;  %v2048_v59 = vsel %vm1998_vm1, %v2046_v61, %v2047_v8  ;;  %v914_v57 = vpop.f32.mrb[83].mxu0 }
 0x1e2   : > { %1396 = vst.msk [vmem:[#allocation3 + $0x30] sm:$0xfe] %vm7214_vm15, %v1391_v60  ;;  %1888 = vrot.lane.b32.xlu0 %v1885_v11, %s5321_s21  ;;  %1969 = vrot.lane.b32.xlu1 %v1966_v56, %s5322_s22  ;;  %v3206_v60 = vpack.c.bf16 %v3166_v32, %v3162_v48  ;;  %v917_v61 = vpop.f32.mrb[84].mxu0  ;;  %vm1542_vm15 = vcmask 780800  }
 0x1e3   : > { %v918_v62 = vadd.f32 %v5911_v21, %v917_v61  ;;  %v2071_v32 = vld [vmem:[#allocation2 + $0xc5] ss:$2 sm:$0x1]  ;;  %v2803_v48 = vld [vmem:[#allocation2 + $0x13c] ss:$2 sm:$0x1] }
 0x1e4   : > { %v1361_v10 = vpop.permute.xlu0 %1360  ;;  %v6116_v46 = vpop.permute.xlu1 %1551  ;;  %v2075_v34 = vrot.slane %v2071_v32, 4  ;;  %v2807_v57 = vrot.slane %v2803_v48, 1  ;;  %v2275_v48 = vld [vmem:[#allocation2 + $0xda] ss:$2 sm:$0x1] }
 0x1e5   : > { %1366 = vst.msk [vmem:[#allocation3 + $0x28] sm:$0xfe] %vm7221_vm7, %v1361_v10  ;;  %vm1523_vm7 = vcmask 523522   ;;  %v990_v43 = vmax.f32 %v918_v62, 0.0 }
 0x1e6   : > { %2032 = vrot.lane.b32.xlu0 %v2029_v23, %s5322_s22  ;;  %1986 = vrot.lane.b32.xlu1 %v1983_v31, %s5323_s23  ;;  %v2091_v23 = vsel %vm1998_vm1, %v2089_v37, %v2090_v4  ;;  %v919_v4 = vpop.f32.mrb[85].mxu0  ;;  %v1921_v31 = vsel %vm1749_vm12, %v1919_v3, %v1920_v22  ;;  %v6208_v3 = vld [vmem:[#allocation2 + $0xca] ss:$2 sm:$0xff]  ;;  %v2076_v16 = vsel %vm1998_vm1, %v2074_v45, %v2075_v34 }
 0x1e7   : > { %v920_v17 = vpop.f32.mrb[86].mxu0  ;;  %1041 = vst.msk [vmem:[#allocation2 + $0x150] sm:$0xff] %vm998_vm0, %v990_v43  ;;  %v2151_v18 = vrot.slane %v6208_v3, 4 }
 0x1e8   : > { %v1333_v13 = vpop.permute.xlu0 %1332  ;;  %v1408_v19 = vpop.permute.xlu1 %1407  ;;  %v921_v51 = vadd.f32 %v5911_v21, %v920_v17 }
 0x1e9   : > { %1337 = vst.msk [vmem:[#allocation3 + $0x48] sm:$0x3] %vm1276_vm2, %v1333_v13  ;;  %v922_v58 = vpop.f32.mrb[87].mxu0  ;;  %v6184_v13 = vld [vmem:[#allocation2 + $0xcb] ss:$2 sm:$0xff] }
 0x1ea   : > { %1413 = vst.msk [vmem:[#allocation3 + $0x30] sm:$0xfe] %vm7220_vm6, %v1408_v19  ;;  %1905 = vrot.lane.b32.xlu0 %v1902_v1, %s5322_s22  ;;  %2094 = vrot.lane.b32.xlu1 %v2091_v23, %s5322_s22  ;;  %vm1540_vm6 = vcmask 785922   ;;  %v991_v19 = vmax.f32 %v921_v51, 0.0  ;;  %v925_v8 = vpop.f32.mrb[88].mxu0 }
 0x1eb   : > { %1352 = vst.msk [vmem:[#allocation3 + $0x48] sm:$0x3] %vm1293_vm13, %v6070_v42  ;;  %v926_v0 = vadd.f32 %v5911_v21, %v925_v8  ;;  %v6197_v23 = vld [vmem:[#allocation2 + $0xcb] ss:$2 sm:$0xff]  ;;  %v927_v40 = vpop.f32.mrb[89].mxu0 }
 0x1ec   : > { %1367 = vst.msk [vmem:[#allocation3 + $0x48] sm:$0x3] %vm1310_vm10, %v6084_v54  ;;  %v1518_v47 = vpop.permute.xlu0 %1517  ;;  %v1425_v15 = vpop.permute.xlu1 %1424  ;;  %v3167_v9 = vld [vmem:[#allocation3 + $0x28] sm:$0xff]  ;;  %v1899_v54 = vld [vmem:[#allocation2 + $0xb2] ss:$2 sm:$0x1] }
 0x1ed   : > { %1524 = vst.msk [vmem:[#allocation3 + $0x40] sm:$0xfc] %vm1523_vm7, %v1518_v47  ;;  %v3207_v42 = vpack.c.bf16 %v3167_v9, %v3163_v26  ;;  %v1903_v10 = vrot.slane %v1899_v54, 5  ;;  %v992_v25 = vmax.f32 %v926_v0, 0.0  ;;  %v2168_v52 = vrot.slane %v6197_v23, 4  ;;  %v928_v54 = vpop.f32.mrb[90].mxu0 }
 0x1ee   : > { %1430 = vst.msk [vmem:[#allocation3 + $0x30] sm:$0xfe] %vm7222_vm11, %v1425_v15  ;;  %2051 = vrot.lane.b32.xlu0 %v2048_v59, %s5323_s23  ;;  %2109 = vrot.lane.b32.xlu1 %v2106_v35, %s5323_s23  ;;  %vm1557_vm11 = vcmask 1048322   ;;  %v2135_v47 = vrot.slane %v2131_v24, 4  ;;  %v2802_v26 = vld [vmem:[#allocation2 + $0x12c] ss:$2 sm:$0xff]  ;;  %v929_v41 = vadd.f32 %v5911_v21, %v928_v54 }
 0x1ef   : > { %3525 = vmatprep.mubr.bf16.mxu1 %v3207_v42  ;;  %1042 = vst.msk [vmem:[#allocation2 + $0x158] sm:$0xff] %vm998_vm0, %v991_v19  ;;  %1043 = vst.msk [vmem:[#allocation2 + $0x160] sm:$0xff] %vm998_vm0, %v992_v25  ;;  %v2148_v15 = vld [vmem:[#allocation2 + $0xda] ss:$2 sm:$0x1]  ;;  %v2806_v28 = vrot.slane %v2802_v26, 1 }
 0x1f0   : > { %v1535_v5 = vpop.permute.xlu0 %1534  ;;  %v1520_v7 = vpop.permute.xlu1 %1519  ;;  %3526 = vmatmul.mubr.bf16.vlgmr.msra.gmra.mrb[0].mxu1 %v3206_v60  ;;  %v2678_v9 = vld [vmem:[#allocation2 + $0x12c] ss:$2 sm:$0xff]  ;;  %v2136_v2 = vsel %vm1998_vm1, %v2134_v33, %v2135_v47  ;;  %v2684_v60 = vrot.slane %v2680_v53, 2  ;;  %v2257_v51 = vld [vmem:[#allocation2 + $0xc9] ss:$2 sm:$0xff] }
 0x1f1   : > { %1541 = vst.msk [vmem:[#allocation3 + $0x40] sm:$0xfc] %vm1540_vm6, %v1535_v5  ;;  %v2683_v59 = vrot.slane %v2678_v9, 2  ;;  %v930_v61 = vpop.f32.mrb[91].mxu0  ;;  %v2808_v62 = vsel %vm2745_vm9, %v2806_v28, %v2807_v57  ;;  %v2334_v58 = vld [vmem:[#allocation2 + $0xde] ss:$2 sm:$0xff] }
 0x1f2   : > { %1526 = vst.msk [vmem:[#allocation3 + $0x60] sm:$0x7] %vm7215_vm3, %v1520_v7  ;;  %1890 = vrot.lane.b32.xlu0 %v1887_v38, %s5321_s21  ;;  %1971 = vrot.lane.b32.xlu1 %v1968_v49, %s5322_s22  ;;  %vm1559_vm3 = vcmask 1043200   ;;  %v1950_v38 = vrot.slane %v1946_v36, 5  ;;  %v6246_v49 = vld [vmem:[#allocation2 + $0xdd] ss:$2 sm:$0xff] }
 0x1f3   : > { %1558 = vst.msk [vmem:[#allocation3 + $0x40] sm:$0xfc] %vm1557_vm11, %v6116_v46  ;;  %v1904_v46 = vsel %vm1749_vm12, %v1902_v1, %v1903_v10  ;;  %v2295_v1 = vrot.slane %v6184_v13, 3  ;;  %v2685_v4 = vsel %vm7216_vm5, %v2683_v59, %v2684_v60  ;;  %v993_v10 = vmax.f32 %v929_v41, 0.0  ;;  %v933_v14 = vpop.f32.mrb[92].mxu0 }
 0x1f4   : > { %v1554_v11 = vpop.permute.xlu0 %1553  ;;  %v1537_v56 = vpop.permute.xlu1 %1536  ;;  %2811 = vst.msk [vmem:[#allocation3 + $0xe8] sm:$0x80] %vm2751_vm8, %v2806_v28  ;;  %v2323_v30 = vrot.slane %v6246_v49, 3  ;;  %v934_v45 = vadd.f32 %v5911_v21, %v933_v14  ;;  %v1951_v17 = vsel %vm1749_vm12, %v1949_v55, %v1950_v38  ;;  %v2261_v44 = vrot.slane %v2257_v51, 3  ;;  %v2349_v55 = vld [vmem:[#allocation2 + $0xdf] ss:$2 sm:$0xff] }
 0x1f5   : > { %1543 = vst.msk [vmem:[#allocation3 + $0x60] sm:$0x7] %vm1542_vm15, %v1537_v56  ;;  %vm7223_vm12 = vcmask 523521   ;;  %v2274_v40 = vld [vmem:[#allocation2 + $0xca] ss:$2 sm:$0xff]  ;;  %vm7228_vm5 = vcmask 1044480  }
 0x1f6   : > { %1560 = vst.msk [vmem:[#allocation3 + $0x60] sm:$0x7] %vm1559_vm3, %v1554_v11  ;;  %1907 = vrot.lane.b32.xlu0 %v1904_v46, %s5322_s22  ;;  %1988 = vrot.lane.b32.xlu1 %v1985_v20, %s5323_s23  ;;  %v935_v11 = vpop.f32.mrb[93].mxu0  ;;  %v994_v56 = vmax.f32 %v934_v45, 0.0  ;;  %v6274_v24 = vld [vmem:[#allocation2 + $0xdd] ss:$2 sm:$0xff] }
 0x1f7   : > { %2688 = vst.msk [vmem:[#allocation3 + $0xd8] sm:$0xc0] %vm2502_vm4, %v2683_v59  ;;  %v936_v46 = vpop.f32.mrb[94].mxu0  ;;  %v2335_v25 = vld [vmem:[#allocation2 + $0xee] ss:$2 sm:$0x1] }
 0x1f8   : > { %v1393_v6 = vpop.permute.xlu0 %1392  ;;  %v1580_v12 = vpop.permute.xlu1 %1579  ;;  %2812 = vst.msk [vmem:[#allocation3 + $0x108] sm:$0xff] %vm998_vm0, %v2808_v62  ;;  %1044 = vst.msk [vmem:[#allocation2 + $0x168] sm:$0xff] %vm998_vm0, %v993_v10  ;;  %v937_v20 = vadd.f32 %v5911_v21, %v936_v46  ;;  %v2278_v47 = vrot.slane %v2274_v40, 3  ;;  %vm7225_vm4 = vcmask 1048321   ;;  %v2339_v26 = vrot.slane %v2335_v25, 3 }
 0x1f9   : > { %1397 = vst.msk [vmem:[#allocation3 + $0x50] sm:$0x3] %vm1276_vm2, %v1393_v6  ;;  %v938_v22 = vpop.f32.mrb[95].mxu0  ;;  %v2338_v6 = vrot.slane %v2334_v58, 3  ;;  %v6290_v53 = vld [vmem:[#allocation2 + $0xde] ss:$2 sm:$0xff] }
 0x1fa   : > { %1585 = vst.msk [vmem:[#allocation3 + $0x48] sm:$0xfc] %vm1523_vm7, %v1580_v12  ;;  %1924 = vrot.lane.b32.xlu0 %v1921_v31, %s5323_s23  ;;  %2298 = vrot.lane.b32.xlu1 %v2295_v1, %s5323_s23  ;;  %v995_v12 = vmax.f32 %v937_v20, 0.0  ;;  %v2353_v31 = vrot.slane %v2349_v55, 3  ;;  %v2279_v36 = vrot.slane %v2275_v48, 3 }
 0x1fb   : > { %2689 = vst.msk [vmem:[#allocation3 + $0xf8] sm:$0x7f] %vm2504_vm14, %v2685_v4  ;;  %vm7224_vm14 = vcmask 785921   ;;  %v2258_v9 = vld [vmem:[#allocation2 + $0xd9] ss:$2 sm:$0x1]  ;;  %v2340_v59 = vsel %vm7228_vm5, %v2338_v6, %v2339_v26 }
 0x1fc   : > { %v1410_v27 = vpop.permute.xlu0 %1409  ;;  %v6205_v29 = vpop.permute.xlu1 %1596  ;;  %1045 = vst.msk [vmem:[#allocation2 + $0x170] sm:$0xff] %vm998_vm0, %v994_v56  ;;  %1046 = vst.msk [vmem:[#allocation2 + $0x178] sm:$0xff] %vm998_vm0, %v995_v12  ;;  %v2262_v28 = vrot.slane %v2258_v9, 3  ;;  %v2859_v41 = vld [vmem:[#allocation2 + $0x140] ss:$2 sm:$0xff] }
 0x1fd   : > { %1414 = vst.msk [vmem:[#allocation3 + $0x50] sm:$0x3] %vm1293_vm13, %v1410_v27  ;;  %v2229_v62 = vld [vmem:[#allocation2 + $0xef] ss:$2 sm:$0x1] }
 0x1fe   : > { %2092 = vrot.lane.b32.xlu0 %v2089_v37, %s5322_s22  ;;  %2171 = vrot.lane.b32.xlu1 %v2168_v52, %s5323_s23  ;;  %v2152_v37 = vrot.slane %v2148_v15, 4  ;;  %v2198_v15 = vrot.slane %v6274_v24, 4  ;;  %v2263_v60 = vsel %vm7228_vm5, %v2261_v44, %v2262_v28  ;;  %v6310_v4 = vld [vmem:[#allocation2 + $0xdf] ss:$2 sm:$0xff]  ;;  %v2233_v45 = vrot.slane %v2229_v62, 4 }
 0x1ff   : > { %v3026_v11 = vld [vmem:[#allocation2 + $0x154] ss:$2 sm:$0xff]  ;;  %v6334_v22 = vld [vmem:[#allocation2 + $0xf3] ss:$2 sm:$0xff] }
 0x200   : > { %v1427_v35 = vpop.permute.xlu0 %1426  ;;  %v6220_v42 = vpop.permute.xlu1 %1611  ;;  %3028 = vst.msk [vmem:[#allocation3 + $0x128] sm:$0xff] %vm998_vm0, %v3026_v11  ;;  %v2544_v12 = vrot.slane %v6334_v22, 2  ;;  %v6346_v40 = vld [vmem:[#allocation2 + $0xf3] ss:$2 sm:$0xff]  ;;  %v6372_v28 = vld [vmem:[#allocation2 + $0xf2] ss:$2 sm:$0xff] }
 0x201   : > { %1431 = vst.msk [vmem:[#allocation3 + $0x50] sm:$0x3] %vm1310_vm10, %v1427_v35  ;;  %v2354_v35 = vrot.slane %v2350_v39, 3  ;;  %v6355_v25 = vld [vmem:[#allocation2 + $0xf1] ss:$2 sm:$0xff] }
 0x202   : > { %2107 = vrot.lane.b32.xlu0 %v2104_v50, %s5323_s23  ;;  %2139 = vrot.lane.b32.xlu1 %v2136_v2, %s5321_s21  ;;  %v2153_v50 = vsel %vm1998_vm1, %v2151_v18, %v2152_v37  ;;  %v2212_v2 = vld [vmem:[#allocation2 + $0xee] ss:$2 sm:$0x1]  ;;  %v2510_v39 = vrot.slane %v6355_v25, 2  ;;  %v2395_v25 = vld [vmem:[#allocation2 + $0xf2] ss:$2 sm:$0xff] }
 0x203   : > { %v2986_v37 = vld [vmem:[#allocation2 + $0x140] ss:$2 sm:$0xff]  ;;  %v2216_v61 = vrot.slane %v2212_v2, 4  ;;  %v3170_v2 = vld [vmem:[#allocation3 + $0x40] sm:$0xff] }
 0x204   : > { %v1595_v5 = vpop.permute.xlu0 %1594  ;;  %v6235_v7 = vpop.permute.xlu1 %1473  ;;  %2988 = vst.msk [vmem:[#allocation3 + $0x120] sm:$0xff] %vm998_vm0, %v2986_v37 }
 0x205   : > { %1600 = vst.msk [vmem:[#allocation3 + $0x48] sm:$0xfc] %vm1540_vm6, %v1595_v5  ;;  %v2861_v5 = vld [vmem:[#allocation2 + $0x150] ss:$2 sm:$0x1] }
 0x206   : > { %2079 = vrot.lane.b32.xlu0 %v2076_v16, %s5321_s21  ;;  %2156 = vrot.lane.b32.xlu1 %v2153_v50, %s5322_s22  ;;  %v2865_v10 = vrot.slane %v2861_v5, 1 }
 0x208   : > { %v1610_v43 = vpop.permute.xlu0 %1609  ;;  %v6251_v63 = vpop.permute.xlu1 %1490 }
 0x209   : > { %1615 = vst.msk [vmem:[#allocation3 + $0x48] sm:$0xfc] %vm1557_vm11, %v1610_v43  ;;  %v2232_v43 = vrot.slane %v6310_v4, 4  ;;  %v6394_v4 = vld [vmem:[#allocation2 + $0x105] ss:$2 sm:$0xff] }
 0x20a   : > { %1954 = vrot.lane.b32.xlu0 %v1951_v17, %s5321_s21  ;;  %2326 = vrot.lane.b32.xlu1 %v2323_v30, %s5321_s21  ;;  %v2165_v17 = vld [vmem:[#allocation2 + $0xdb] ss:$2 sm:$0x1] }
 0x20b   : > { %v2234_v46 = vsel %vm1998_vm1, %v2232_v43, %v2233_v45  ;;  %v2169_v20 = vrot.slane %v2165_v17, 4 }
 0x20c   : > { %v1455_v19 = vpop.permute.xlu0 %1454  ;;  %v6264_v8 = vpop.permute.xlu1 %1800 }
 0x20d   : > { %1460 = vst.msk [vmem:[#allocation3 + $0x38] sm:$0xfe] %vm7223_vm12, %v1455_v19  ;;  %vm7226_vm12 = vcmask 518400   ;;  %v2987_v19 = vld [vmem:[#allocation2 + $0x150] ss:$2 sm:$0x1] }
 0x20e   : > { %2264 = vrot.lane.b32.xlu0 %v2261_v44, %s5321_s21  ;;  %2341 = vrot.lane.b32.xlu1 %v2338_v6, %s5322_s22  ;;  %v2923_v44 = vld [vmem:[#allocation2 + $0x154] ss:$2 sm:$0xff]  ;;  %v2925_v6 = vld [vmem:[#allocation2 + $0x164] ss:$2 sm:$0x1] }
 0x20f   : > { %v2928_v13 = vrot.slane %v2923_v44, 1 }
 0x210   : > { %v1472_v0 = vpop.permute.xlu0 %1471  ;;  %v6271_v21 = vpop.permute.xlu1 %1673  ;;  %v3171_v26 = vld [vmem:[#allocation3 + $0x48] sm:$0xff] }
 0x211   : > { %1477 = vst.msk [vmem:[#allocation3 + $0x38] sm:$0xfe] %vm7224_vm14, %v1472_v0  ;;  %vm7227_vm14 = vmmov %vm7226_vm12  ;;  %v2929_v0 = vrot.slane %v2925_v6, 1  ;;  %v6437_v6 = vld [vmem:[#allocation2 + $0x106] ss:$2 sm:$0xff] }
 0x212   : > { %2137 = vrot.lane.b32.xlu0 %v2134_v33, %s5321_s21  ;;  %2356 = vrot.lane.b32.xlu1 %v2353_v31, %s5323_s23  ;;  %2933 = vst.msk [vmem:[#allocation3 + $0xf8] sm:$0x80] %vm2751_vm8, %v2928_v13 }
 0x213   : > { %v2930_v23 = vsel %vm2745_vm9, %v2928_v13, %v2929_v0  ;;  %v6433_v13 = vld [vmem:[#allocation2 + $0x107] ss:$2 sm:$0xff] }
 0x214   : > { %v1489_v27 = vpop.permute.xlu0 %1488  ;;  %v1642_v32 = vpop.permute.xlu1 %1641  ;;  %2934 = vst.msk [vmem:[#allocation3 + $0x118] sm:$0xff] %vm998_vm0, %v2930_v23 }
 0x215   : > { %1494 = vst.msk [vmem:[#allocation3 + $0x38] sm:$0xfe] %vm7225_vm4, %v1489_v27  ;;  %vm1772_vm4 = vcmask 523523   ;;  %v2507_v27 = vld [vmem:[#allocation2 + $0x101] ss:$2 sm:$0x1] }
 0x216   : > { %1646 = vst.msk [vmem:[#allocation3 + $0x70] sm:$0x7] %vm7226_vm12, %v1642_v32  ;;  %2281 = vrot.lane.b32.xlu0 %v2278_v47, %s5322_s22  ;;  %2201 = vrot.lane.b32.xlu1 %v2198_v15, %s5321_s21  ;;  %vm7229_vm12 = vmmov %vm7228_vm5 }
 0x217   : > { %v2355_v3 = vsel %vm7229_vm12, %v2353_v31, %v2354_v35  ;;  %v2170_v31 = vsel %vm1998_vm1, %v2168_v52, %v2169_v20  ;;  %vm1791_vm12 = vcmask 781824  }
 0x218   : > { %v1582_v33 = vpop.permute.xlu0 %1581  ;;  %v1659_v34 = vpop.permute.xlu1 %1658 }
 0x219   : > { %1586 = vst.msk [vmem:[#allocation3 + $0x68] sm:$0x7] %vm7227_vm14, %v1582_v33  ;;  %vm1789_vm14 = vcmask 785923   ;;  %v2511_v33 = vrot.slane %v2507_v27, 2  ;;  %v2587_v27 = vrot.slane %v6437_v6, 2 }
 0x21a   : > { %1663 = vst.msk [vmem:[#allocation3 + $0x70] sm:$0x7] %vm1542_vm15, %v1659_v34  ;;  %1601 = vst.msk [vmem:[#allocation3 + $0x68] sm:$0x7] %vm1542_vm15, %v6205_v29  ;;  %2154 = vrot.lane.b32.xlu0 %v2151_v18, %s5322_s22  ;;  %2343 = vrot.lane.b32.xlu1 %v2340_v59, %s5322_s22  ;;  %v2215_v18 = vrot.slane %v6290_v53, 4 }
 0x21b   : > { %1616 = vst.msk [vmem:[#allocation3 + $0x68] sm:$0x7] %vm1559_vm3, %v6220_v42  ;;  %v2292_v29 = vld [vmem:[#allocation2 + $0xdb] ss:$2 sm:$0x1]  ;;  %v2864_v42 = vrot.slane %v2859_v41, 1 }
 0x21c   : > { %v1457_v54 = vpop.permute.xlu0 %1456  ;;  %v1829_v57 = vpop.permute.xlu1 %1828  ;;  %v2296_v14 = vrot.slane %v2292_v29, 3  ;;  %v2320_v34 = vld [vmem:[#allocation2 + $0xed] ss:$2 sm:$0x1]  ;;  %v3067_v41 = vld [vmem:[#allocation2 + $0x168] ss:$2 sm:$0xff] }
 0x21d   : > { %1461 = vst.msk [vmem:[#allocation3 + $0x58] sm:$0x3] %vm1276_vm2, %v1457_v54  ;;  %vm7230_vm2 = vmmov %vm7228_vm5  ;;  %vm7232_vm5 = vcmask 253952   ;;  %v2524_v59 = vld [vmem:[#allocation2 + $0x102] ss:$2 sm:$0x1] }
 0x21e   : > { %1834 = vst.msk [vmem:[#allocation3 + $0x68] sm:$0xf8] %vm1772_vm4, %v1829_v57  ;;  %2266 = vrot.lane.b32.xlu0 %v2263_v60, %s5321_s21  ;;  %2358 = vrot.lane.b32.xlu1 %v2355_v3, %s5323_s23  ;;  %v2280_v38 = vsel %vm7230_vm2, %v2278_v47, %v2279_v36  ;;  %v2417_v47 = vrot.slane %v6346_v40, 3  ;;  %v2324_v53 = vrot.slane %v2320_v34, 3  ;;  %v2527_v54 = vrot.slane %v6372_v28, 2 }
 0x21f   : > { %1478 = vst.msk [vmem:[#allocation3 + $0x58] sm:$0x3] %vm1293_vm13, %v6235_v7  ;;  %v2217_v7 = vsel %vm1998_vm1, %v2215_v18, %v2216_v61  ;;  %vm7231_vm13 = vmmov %vm7230_vm2  ;;  %v2528_v57 = vrot.slane %v2524_v59, 2  ;;  %v2195_v36 = vld [vmem:[#allocation2 + $0xed] ss:$2 sm:$0x1] }
 0x220   : > { %1495 = vst.msk [vmem:[#allocation3 + $0x58] sm:$0x3] %vm1310_vm10, %v6251_v63  ;;  %v1767_v16 = vpop.permute.xlu0 %1766  ;;  %v1844_v50 = vpop.permute.xlu1 %1843  ;;  %v2866_v63 = vsel %vm2745_vm9, %v2864_v42, %v2865_v10  ;;  %vm1806_vm10 = vcmask 1048323   ;;  %v2297_v56 = vsel %vm7231_vm13, %v2295_v1, %v2296_v14  ;;  %v3027_v29 = vld [vmem:[#allocation2 + $0x164] ss:$2 sm:$0x1]  ;;  %vm7234_vm2 = vmmov %vm7232_vm5  ;;  %v2325_v61 = vsel %vm7231_vm13, %v2323_v30, %v2324_v53 }
 0x221   : > { %2869 = vst.msk [vmem:[#allocation3 + $0xf0] sm:$0x80] %vm2751_vm8, %v2864_v42  ;;  %vm1774_vm8 = vcmask 519424   ;;  %v2199_v42 = vrot.slane %v2195_v36, 4  ;;  %v6405_v30 = vld [vmem:[#allocation2 + $0x105] ss:$2 sm:$0xff] }
 0x222   : > { %1773 = vst.msk [vmem:[#allocation3 + $0x60] sm:$0xf8] %vm1772_vm4, %v1767_v16  ;;  %2283 = vrot.lane.b32.xlu0 %v2280_v38, %s5322_s22  ;;  %2220 = vrot.lane.b32.xlu1 %v2217_v7, %s5322_s22  ;;  %v2572_v16 = vrot.slane %v6394_v4, 2  ;;  %v5311_v38 = vld [vmem:[%s7198_s2] ss:$0 sm:$0xff]  ;;  %vm7237_vm13 = vcmask 518400  }
 0x223   : > { %1849 = vst.msk [vmem:[#allocation3 + $0x68] sm:$0xf8] %vm1789_vm14, %v1844_v50  ;;  %v2200_v49 = vsel %vm1998_vm1, %v2198_v15, %v2199_v42  ;;  %v2447_v15 = vrot.slane %v6405_v30, 3  ;;  %vm2023_vm1 = vcmask 520448  }
 0x224   : > { %2870 = vst.msk [vmem:[#allocation3 + $0x110] sm:$0xff] %vm998_vm0, %v2866_v63  ;;  %v1640_v51 = vpop.permute.xlu0 %1639  ;;  %v1859_v58 = vpop.permute.xlu1 %1858  ;;  %3070 = vst.msk [vmem:[#allocation3 + $0x130] sm:$0xff] %vm998_vm0, %v3067_v41  ;;  %v2478_v36 = vld [vmem:[#allocation2 + $0x117] ss:$2 sm:$0x1] }
 0x225   : > { %1645 = vst.msk [vmem:[#allocation3 + $0x50] sm:$0xfc] %vm1523_vm7, %v1640_v51  ;;  %v6418_v51 = vld [vmem:[#allocation2 + $0xf1] ss:$2 sm:$0xff] }
 0x226   : > { %1864 = vst.msk [vmem:[#allocation3 + $0x68] sm:$0xf8] %vm1806_vm10, %v1859_v58  ;;  %2300 = vrot.lane.b32.xlu0 %v2297_v56, %s5323_s23  ;;  %2237 = vrot.lane.b32.xlu1 %v2234_v46, %s5323_s23  ;;  %v6420_v58 = vld [vmem:[#allocation2 + $0x106] ss:$2 sm:$0xff] }
 0x227   : > { %2989 = vst.msk [vmem:[#allocation3 + $0x140] sm:$0x1] %vm7232_vm5, %v2987_v19  ;;  %v2383_v19 = vrot.slane %v6418_v51, 3  ;;  %v2464_v44 = vrot.slane %v6420_v58, 3 }
 0x228   : > { %v1784_v1 = vpop.permute.xlu0 %1783  ;;  %v1704_v55 = vpop.permute.xlu1 %1703  ;;  %3029 = vst.msk [vmem:[#allocation3 + $0x148] sm:$0x1] %vm7234_vm2, %v3027_v29  ;;  %vm2021_vm2 = vcmask 523524   ;;  %v2569_v51 = vld [vmem:[#allocation2 + $0x115] ss:$2 sm:$0x1] }
 0x229   : > { %1790 = vst.msk [vmem:[#allocation3 + $0x60] sm:$0xf8] %vm1789_vm14, %v1784_v1  ;;  %v2584_v1 = vld [vmem:[#allocation2 + $0x116] ss:$2 sm:$0x1] }
 0x22a   : > { %1709 = vst.msk [vmem:[#allocation3 + $0x58] sm:$0xfc] %vm1523_vm7, %v1704_v55  ;;  %2173 = vrot.lane.b32.xlu0 %v2170_v31, %s5323_s23  ;;  %2547 = vrot.lane.b32.xlu1 %v2544_v12, %s5323_s23  ;;  %vm7233_vm7 = vcmask 1045504   ;;  %v941_v50 = vpop.f32.mrb[96].mxu0  ;;  %v2481_v31 = vrot.slane %v6433_v13, 3  ;;  %v2588_v23 = vrot.slane %v2584_v1, 2 }
 0x22b   : > { %1807 = vst.msk [vmem:[#allocation3 + $0x60] sm:$0xf8] %vm1806_vm10, %v6264_v8  ;;  %vm7235_vm5 = vmmov %vm7233_vm7  ;;  %v942_v14 = vadd.f32 %v5311_v38, %v941_v50  ;;  %v943_v7 = vpop.f32.mrb[97].mxu0  ;;  %v2629_v50 = vld [vmem:[#allocation2 + $0x129] ss:$2 sm:$0x1] }
 0x22c   : > { %v1657_v52 = vpop.permute.xlu0 %1656  ;;  %v6359_v32 = vpop.permute.xlu1 %1845  ;;  %v2529_v62 = vsel %vm7235_vm5, %v2527_v54, %v2528_v57  ;;  %v2829_v30 = vld [vmem:[#allocation2 + $0x13e] ss:$2 sm:$0x1] }
 0x22d   : > { %v3175_v8 = vld [vmem:[#allocation3 + $0x68] sm:$0xff]  ;;  %1662 = vst.msk [vmem:[#allocation3 + $0x50] sm:$0xfc] %vm1540_vm6, %v1657_v52  ;;  %v996_v63 = vmax.f32 %v942_v14, 0.0 }
 0x22e   : > { %v3211_v9 = vpack.c.bf16 %v3175_v8, %v3171_v26  ;;  %1679 = vst.msk [vmem:[#allocation3 + $0x50] sm:$0xfc] %vm1557_vm11, %v6271_v21  ;;  %2218 = vrot.lane.b32.xlu0 %v2215_v18, %s5322_s22  ;;  %2420 = vrot.lane.b32.xlu1 %v2417_v47, %s5323_s23  ;;  %v2512_v21 = vsel %vm7233_vm7, %v2510_v39, %v2511_v33  ;;  %vm1808_vm7 = vcmask 1044224   ;;  %v2541_v52 = vld [vmem:[#allocation2 + $0x103] ss:$2 sm:$0x1] }
 0x22f   : > { %1047 = vst.msk [vmem:[#allocation2 + $0x180] sm:$0xff] %vm998_vm0, %v996_v63  ;;  %v6447_v26 = vld [vmem:[#allocation2 + $0x107] ss:$2 sm:$0xff]  ;;  %v2599_v8 = vld [vmem:[#allocation2 + $0x117] ss:$2 sm:$0x1] }
 0x230   : > { %3533 = vmatprep.mubr.bf16.mxu1 %v3211_v9  ;;  %v1769_v35 = vpop.permute.xlu0 %1768  ;;  %v6374_v48 = vpop.permute.xlu1 %1860  ;;  %v2400_v33 = vrot.slane %v2395_v25, 3  ;;  %v2545_v59 = vrot.slane %v2541_v52, 2  ;;  %v2602_v28 = vrot.slane %v6447_v26, 2  ;;  %v2633_v63 = vrot.slane %v2629_v50, 2 }
 0x231   : > { %1775 = vst.msk [vmem:[#allocation3 + $0x80] sm:$0xf] %vm1774_vm8, %v1769_v35  ;;  %v2603_v35 = vrot.slane %v2599_v8, 2 }
 0x232   : > { %v3174_v37 = vld [vmem:[#allocation3 + $0x60] sm:$0xff]  ;;  %2235 = vrot.lane.b32.xlu0 %v2232_v43, %s5323_s23  ;;  %2515 = vrot.lane.b32.xlu1 %v2512_v21, %s5321_s21  ;;  %v944_v43 = vpop.f32.mrb[98].mxu0  ;;  %v2380_v21 = vld [vmem:[#allocation2 + $0x101] ss:$2 sm:$0x1] }
 0x233   : > { %v3210_v60 = vpack.c.bf16 %v3174_v37, %v3170_v2  ;;  %v945_v17 = vadd.f32 %v5311_v38, %v944_v43  ;;  %v946_v11 = vpop.f32.mrb[99].mxu0  ;;  %v2461_v2 = vld [vmem:[#allocation2 + $0x116] ss:$2 sm:$0x1]  ;;  %v2384_v57 = vrot.slane %v2380_v21, 3 }
 0x234   : > { %v1786_v3 = vpop.permute.xlu0 %1785  ;;  %v6383_v18 = vpop.permute.xlu1 %1722  ;;  %v2844_v21 = vld [vmem:[#allocation2 + $0x13f] ss:$2 sm:$0x1] }
 0x235   : > { %3534 = vmatmul.mubr.bf16.gmra.mrb[4].mxu1 %v3210_v60  ;;  %1792 = vst.msk [vmem:[#allocation3 + $0x80] sm:$0xf] %vm1791_vm12, %v1786_v3  ;;  %v997_v56 = vmax.f32 %v945_v17, 0.0  ;;  %v2465_v60 = vrot.slane %v2461_v2, 3 }
 0x236   : > { %2328 = vrot.lane.b32.xlu0 %v2325_v61, %s5321_s21  ;;  %2532 = vrot.lane.b32.xlu1 %v2529_v62, %s5322_s22  ;;  %v3069_v17 = vld [vmem:[#allocation2 + $0x178] ss:$2 sm:$0x1] }
 0x237   : > { %1048 = vst.msk [vmem:[#allocation2 + $0x188] sm:$0xff] %vm998_vm0, %v997_v56 }
 0x238   : > { %v1803_v5 = vpop.permute.xlu0 %1802  ;;  %v6398_v10 = vpop.permute.xlu1 %1739 }
 0x239   : > { %1809 = vst.msk [vmem:[#allocation3 + $0x80] sm:$0xf] %vm1808_vm7, %v1803_v5 }
 0x23a   : > { %2203 = vrot.lane.b32.xlu0 %v2200_v49, %s5321_s21  ;;  %2575 = vrot.lane.b32.xlu1 %v2572_v16, %s5321_s21  ;;  %v6489_v49 = vld [vmem:[#allocation2 + $0x119] ss:$2 sm:$0xff] }
 0x23c   : > { %v1676_v45 = vpop.permute.xlu0 %1675  ;;  %v6414_v24 = vpop.permute.xlu1 %2049 }
 0x23d   : > { %1680 = vst.msk [vmem:[#allocation3 + $0x70] sm:$0x7] %vm1559_vm3, %v1676_v45  ;;  %v2632_v45 = vrot.slane %v6489_v49, 2 }
 0x23e   : > { %2513 = vrot.lane.b32.xlu0 %v2510_v39, %s5321_s21  ;;  %2450 = vrot.lane.b32.xlu1 %v2447_v15, %s5321_s21  ;;  %v3115_v43 = vld [vmem:[#allocation2 + $0x17c] ss:$2 sm:$0xff]  ;;  %v3117_v1 = vld [vmem:[#allocation2 + $0x18c] ss:$2 sm:$0x1] }
 0x23f   : > { %3118 = vst.msk [vmem:[#allocation3 + $0x138] sm:$0xff] %vm998_vm0, %v3115_v43  ;;  %vm7244_vm0 = vcmask 1045504   ;;  %v5259_v43 = vld [vmem:[%s7199_s3 + $0x80] sm:$0xff]  }
 0x240   : > { %v1721_v46 = vpop.permute.xlu0 %1720  ;;  %v6427_v20 = vpop.permute.xlu1 %1922  ;;  %v2634_v56 = vsel %vm7244_vm0, %v2632_v45, %v2633_v63 }
 0x241   : > { %1726 = vst.msk [vmem:[#allocation3 + $0x58] sm:$0xfc] %vm1540_vm6, %v1721_v46  ;;  %vm2040_vm6 = vcmask 782848   ;;  %v2573_v46 = vrot.slane %v2569_v51, 2  ;;  %v3014_v51 = vld [vmem:[#allocation2 + $0x143] ss:$2 sm:$0xff] }
 0x242   : > { %2386 = vrot.lane.b32.xlu0 %v2383_v19, %s5321_s21  ;;  %2467 = vrot.lane.b32.xlu1 %v2464_v44, %s5322_s22 }
 0x244   : > { %v1738_v55 = vpop.permute.xlu0 %1737  ;;  %v2018_v0 = vpop.permute.xlu1 %2017 }
 0x245   : > { %1743 = vst.msk [vmem:[#allocation3 + $0x58] sm:$0xfc] %vm1557_vm11, %v1738_v55  ;;  %vm7236_vm11 = vmmov %vm7235_vm5 }
 0x246   : > { %2024 = vst.msk [vmem:[#allocation3 + $0xa0] sm:$0x1f] %vm2023_vm1, %v2018_v0  ;;  %2530 = vrot.lane.b32.xlu0 %v2527_v54, %s5322_s22  ;;  %2484 = vrot.lane.b32.xlu1 %v2481_v31, %s5323_s23  ;;  %v2589_v34 = vsel %vm7236_vm11, %v2587_v27, %v2588_v23  ;;  %v2546_v54 = vsel %vm7235_vm5, %v2544_v12, %v2545_v59  ;;  %vm7238_vm11 = vmmov %vm7235_vm5  ;;  %v2828_v0 = vld [vmem:[#allocation2 + $0x12e] ss:$2 sm:$0xff]  ;;  %v2843_v23 = vld [vmem:[#allocation2 + $0x12f] ss:$2 sm:$0xff] }
 0x247   : > { %v2770_v59 = vld [vmem:[#allocation2 + $0x11a] ss:$2 sm:$0xff] }
 0x248   : > { %v1831_v9 = vpop.permute.xlu0 %1830  ;;  %v2035_v39 = vpop.permute.xlu1 %2034 }
 0x249   : > { %1835 = vst.msk [vmem:[#allocation3 + $0x88] sm:$0xf] %vm1774_vm8, %v1831_v9  ;;  %v2847_v9 = vrot.slane %v2843_v23, 1 }
 0x24a   : > { %2041 = vst.msk [vmem:[#allocation3 + $0xa0] sm:$0x1f] %vm2040_vm6, %v2035_v39  ;;  %2403 = vrot.lane.b32.xlu0 %v2400_v33, %s5322_s22  ;;  %2592 = vrot.lane.b32.xlu1 %v2589_v34, %s5322_s22  ;;  %v6540_v39 = vld [vmem:[#allocation2 + $0x12d] ss:$2 sm:$0xff] }
 0x24b   : > { %1850 = vst.msk [vmem:[#allocation3 + $0x88] sm:$0xf] %vm1791_vm12, %v6359_v32  ;;  %v2604_v32 = vsel %vm7238_vm11, %v2602_v28, %v2603_v35  ;;  %vm2038_vm11 = vcmask 785924   ;;  %v2696_v34 = vrot.slane %v6540_v39, 2 }
 0x24c   : > { %1865 = vst.msk [vmem:[#allocation3 + $0x88] sm:$0xf] %vm1808_vm7, %v6374_v48  ;;  %v1706_v37 = vpop.permute.xlu0 %1705  ;;  %v2078_v53 = vpop.permute.xlu1 %2077  ;;  %v2397_v48 = vld [vmem:[#allocation2 + $0x102] ss:$2 sm:$0x1] }
 0x24d   : > { %1710 = vst.msk [vmem:[#allocation3 + $0x78] sm:$0x7] %vm7237_vm13, %v1706_v37  ;;  %vm7239_vm13 = vcmask 1044480   ;;  %v2401_v3 = vrot.slane %v2397_v48, 3  ;;  %v2708_v48 = vld [vmem:[#allocation2 + $0x12e] ss:$2 sm:$0xff] }
 0x24e   : > { %2083 = vst.msk [vmem:[#allocation3 + $0x88] sm:$0xf0] %vm2021_vm2, %v2078_v53  ;;  %2549 = vrot.lane.b32.xlu0 %v2546_v54, %s5323_s23  ;;  %2607 = vrot.lane.b32.xlu1 %v2604_v32, %s5323_s23  ;;  %v2385_v29 = vsel %vm7239_vm13, %v2383_v19, %v2384_v57  ;;  %vm7240_vm5 = vmmov %vm7239_vm13  ;;  %vm2055_vm13 = vcmask 1048324   ;;  %v2444_v19 = vld [vmem:[#allocation2 + $0x115] ss:$2 sm:$0x1] }
 0x24f   : > { %1727 = vst.msk [vmem:[#allocation3 + $0x78] sm:$0x7] %vm1542_vm15, %v6383_v18  ;;  %v2466_v41 = vsel %vm7240_vm5, %v2464_v44, %v2465_v60  ;;  %v2482_v18 = vrot.slane %v2478_v36, 3  ;;  %v2448_v55 = vrot.slane %v2444_v19, 3  ;;  %v2774_v53 = vrot.slane %v2770_v59, 1  ;;  %v5261_v19 = vld [vmem:[%s7199_s3 + $0x88] sm:$0xff]  }
 0x250   : > { %1744 = vst.msk [vmem:[#allocation3 + $0x78] sm:$0x7] %vm1559_vm3, %v6398_v10  ;;  %v2016_v22 = vpop.permute.xlu0 %2015  ;;  %v1953_v12 = vpop.permute.xlu1 %1952  ;;  %vm7241_vm3 = vmmov %vm7240_vm5  ;;  %v6485_v10 = vld [vmem:[#allocation2 + $0x11b] ss:$2 sm:$0xff]  ;;  %vm2057_vm5 = vcmask 1045248   ;;  %v2848_v57 = vrot.slane %v2844_v21, 1 }
 0x251   : > { %2022 = vst.msk [vmem:[#allocation3 + $0x80] sm:$0xf0] %vm2021_vm2, %v2016_v22  ;;  %v2402_v42 = vsel %vm7241_vm3, %v2400_v33, %v2401_v3  ;;  %vm7242_vm15 = vmmov %vm7241_vm3  ;;  %v2790_v7 = vrot.slane %v6485_v10, 1  ;;  %v2449_v4 = vsel %vm7241_vm3, %v2447_v15, %v2448_v55  ;;  %v2755_v35 = vld [vmem:[#allocation2 + $0x129] ss:$2 sm:$0x1] }
 0x252   : > { %1958 = vst.msk [vmem:[#allocation3 + $0x78] sm:$0xf8] %vm1772_vm4, %v1953_v12  ;;  %2388 = vrot.lane.b32.xlu0 %v2385_v29, %s5321_s21  ;;  %2469 = vrot.lane.b32.xlu1 %v2466_v41, %s5322_s22  ;;  %v2483_v5 = vsel %vm7242_vm15, %v2481_v31, %v2482_v18  ;;  %v2759_v32 = vrot.slane %v2755_v35, 1  ;;  %v2771_v60 = vld [vmem:[#allocation2 + $0x12a] ss:$2 sm:$0x1]  ;;  %v2849_v3 = vsel %vm2745_vm9, %v2847_v9, %v2848_v57  ;;  %vm7247_vm15 = vmmov %vm7244_vm0 }
 0x253   : > { %v2710_v36 = vld [vmem:[#allocation2 + $0x13e] ss:$2 sm:$0x1]  ;;  %v2775_v29 = vrot.slane %v2771_v60, 1  ;;  %v2713_v18 = vrot.slane %v2708_v48, 2  ;;  %v5267_v57 = vld [vmem:[%s7199_s3 + $0xa0] sm:$0xff]  }
 0x254   : > { %v1889_v61 = vpop.permute.xlu0 %1888  ;;  %v1970_v62 = vpop.permute.xlu1 %1969  ;;  %v3003_v55 = vld [vmem:[#allocation2 + $0x152] ss:$2 sm:$0x1]  ;;  %v3042_v35 = vld [vmem:[#allocation2 + $0x156] ss:$2 sm:$0xff] }
 0x255   : > { %1894 = vst.msk [vmem:[#allocation3 + $0x70] sm:$0xf8] %vm1772_vm4, %v1889_v61  ;;  %vm7243_vm4 = vcmask 253952   ;;  %v2714_v61 = vrot.slane %v2710_v36, 2  ;;  %v2776_v49 = vsel %vm2745_vm9, %v2774_v53, %v2775_v29  ;;  %v3002_v36 = vld [vmem:[#allocation2 + $0x142] ss:$2 sm:$0xff] }
 0x256   : > { %1975 = vst.msk [vmem:[#allocation3 + $0x78] sm:$0xf8] %vm1789_vm14, %v1970_v62  ;;  %2405 = vrot.lane.b32.xlu0 %v2402_v42, %s5322_s22  ;;  %2486 = vrot.lane.b32.xlu1 %v2483_v5, %s5323_s23  ;;  %v2787_v62 = vld [vmem:[#allocation2 + $0x12b] ss:$2 sm:$0x1] }
 0x257   : > { %3071 = vst.msk [vmem:[#allocation3 + $0x150] sm:$0x1] %vm7243_vm4, %v3069_v17  ;;  %v2715_v50 = vsel %vm7247_vm15, %v2713_v18, %v2714_v61  ;;  %vm2521_vm15 = vcmask 522496  }
 0x258   : > { %v2033_v38 = vpop.permute.xlu0 %2032  ;;  %v1987_v14 = vpop.permute.xlu1 %1986 }
 0x259   : > { %2039 = vst.msk [vmem:[#allocation3 + $0x80] sm:$0xf0] %vm2038_vm11, %v2033_v38  ;;  %v2791_v38 = vrot.slane %v2787_v62, 1  ;;  %v3031_v62 = vld [vmem:[#allocation2 + $0x165] ss:$2 sm:$0x1] }
 0x25a   : > { %1992 = vst.msk [vmem:[#allocation3 + $0x78] sm:$0xf8] %vm1806_vm10, %v1987_v14  ;;  %2590 = vrot.lane.b32.xlu0 %v2587_v27, %s5322_s22  ;;  %2793 = vrot.lane.b32.xlu1 %v2790_v7, %s5323_s23  ;;  %v2832_v27 = vrot.slane %v2828_v0, 1  ;;  %v5258_v14 = vld [vmem:[%s7199_s3 + $0xc0] sm:$0xff]  }
 0x25b   : > { %2056 = vst.msk [vmem:[#allocation3 + $0x80] sm:$0xf0] %vm2055_vm13, %v6414_v24  ;;  %v6509_v24 = vld [vmem:[#allocation2 + $0x12d] ss:$2 sm:$0xff]  ;;  %v2792_v17 = vsel %vm2745_vm9, %v2790_v7, %v2791_v38  ;;  %4981 = vmatprep.subr.bf16.mxu1 %v5258_v14 }
 0x25c   : > { %v1906_v58 = vpop.permute.xlu0 %1905  ;;  %v6505_v11 = vpop.permute.xlu1 %2094  ;;  %v2817_v6 = vrot.slane %v6509_v24, 1  ;;  %4982 = vmatpush3.bf16.msra.mxu1 %v5259_v43  ;;  %v5269_v38 = vld [vmem:[%s7199_s3 + $0xa8] sm:$0xff]  }
 0x25d   : > { %1911 = vst.msk [vmem:[#allocation3 + $0x70] sm:$0xf8] %vm1789_vm14, %v1906_v58  ;;  %vm7245_vm14 = vmmov %vm7244_vm0  ;;  %vm2287_vm0 = vcmask 785925   ;;  %v2814_v58 = vld [vmem:[#allocation2 + $0x13d] ss:$2 sm:$0x1] }
 0x25e   : > { %1928 = vst.msk [vmem:[#allocation3 + $0x70] sm:$0xf8] %vm1806_vm10, %v6427_v20  ;;  %2605 = vrot.lane.b32.xlu0 %v2602_v28, %s5323_s23  ;;  %2637 = vrot.lane.b32.xlu1 %v2634_v56, %s5321_s21  ;;  %v2574_v20 = vsel %vm7245_vm14, %v2572_v16, %v2573_v46  ;;  %vm7246_vm10 = vmmov %vm7243_vm4  ;;  %v2754_v16 = vld [vmem:[#allocation2 + $0x119] ss:$2 sm:$0xff]  ;;  %v2833_v28 = vrot.slane %v2829_v30, 1  ;;  %vm2270_vm4 = vcmask 523525  }
 0x25f   : > { %3119 = vst.msk [vmem:[#allocation3 + $0x158] sm:$0x1] %vm7246_vm10, %v3117_v1  ;;  %v2758_v8 = vrot.slane %v2754_v16, 1  ;;  %v2818_v7 = vrot.slane %v2814_v58, 1  ;;  %v5260_v46 = vld [vmem:[%s7199_s3 + $0xc8] sm:$0xff]   ;;  %v5271_v58 = vld [vmem:[%s7199_s3 + $0xb0] sm:$0xff]  }
 0x260   : > { %v2052_v44 = vpop.permute.xlu0 %2051  ;;  %v6517_v13 = vpop.permute.xlu1 %2109  ;;  %v2834_v54 = vsel %vm2745_vm9, %v2832_v27, %v2833_v28  ;;  %4983 = vmatprep.subr.bf16.mxu1 %v5260_v46  ;;  %v6626_v30 = vld [vmem:[#allocation2 + $0x141] ss:$2 sm:$0xff] }
 0x261   : > { %2058 = vst.msk [vmem:[#allocation3 + $0xa0] sm:$0x1f] %vm2057_vm5, %v2052_v44  ;;  %v2760_v41 = vsel %vm2745_vm9, %v2758_v8, %v2759_v32  ;;  %v2693_v44 = vld [vmem:[#allocation2 + $0x13d] ss:$2 sm:$0x1]  ;;  %4984 = vmatpush3.bf16.msra.mxu1 %v5261_v19  ;;  %v2877_v28 = vrot.slane %v6626_v30, 1 }
 0x262   : > { %2577 = vrot.lane.b32.xlu0 %v2574_v20, %s5321_s21  ;;  %2820 = vrot.lane.b32.xlu1 %v2817_v6, %s5321_s21  ;;  %v2819_v20 = vsel %vm2745_vm9, %v2817_v6, %v2818_v7  ;;  %v2697_v0 = vrot.slane %v2693_v44, 2  ;;  %v3015_v6 = vld [vmem:[#allocation2 + $0x153] ss:$2 sm:$0x1]  ;;  %v6687_v46 = vld [vmem:[#allocation2 + $0x143] ss:$2 sm:$0xff] }
 0x263   : > { %v3178_v21 = vld [vmem:[#allocation3 + $0x80] sm:$0xff]  ;;  %v2646_v32 = vld [vmem:[#allocation2 + $0x12a] ss:$2 sm:$0x1]  ;;  %v3121_v30 = vld [vmem:[#allocation2 + $0x17d] ss:$2 sm:$0xff] }
 0x264   : > { %v1891_v31 = vpop.permute.xlu0 %1890  ;;  %v6529_v25 = vpop.permute.xlu1 %1971  ;;  %v2650_v29 = vrot.slane %v2646_v32, 2  ;;  %v3055_v7 = vld [vmem:[#allocation2 + $0x167] ss:$2 sm:$0x1] }
 0x265   : > { %1895 = vst.msk [vmem:[#allocation3 + $0x90] sm:$0xf] %vm1774_vm8, %v1891_v31  ;;  %v5262_v31 = vld [vmem:[%s7199_s3 + $0xd0] sm:$0xff]  }
 0x266   : > { %2452 = vrot.lane.b32.xlu0 %v2449_v4, %s5321_s21  ;;  %2835 = vrot.lane.b32.xlu1 %v2832_v27, %s5322_s22 }
 0x267   : > { %4985 = vmatprep.subr.bf16.mxu1 %v5262_v31 }
 0x268   : > { %v1908_v52 = vpop.permute.xlu0 %1907  ;;  %v6537_v26 = vpop.permute.xlu1 %1988 }
 0x269   : > { %1912 = vst.msk [vmem:[#allocation3 + $0x90] sm:$0xf] %vm1791_vm12, %v1908_v52 }
 0x26a   : > { %2761 = vrot.lane.b32.xlu0 %v2758_v8, %s5321_s21  ;;  %2850 = vrot.lane.b32.xlu1 %v2847_v9, %s5323_s23  ;;  %v2990_v8 = vld [vmem:[#allocation2 + $0x141] ss:$2 sm:$0xff] }
 0x26b   : > { %v3030_v9 = vld [vmem:[#allocation2 + $0x155] ss:$2 sm:$0xff] }
 0x26c   : > { %v1925_v15 = vpop.permute.xlu0 %1924  ;;  %v6544_v33 = vpop.permute.xlu1 %2298 }
 0x26d   : > { %1929 = vst.msk [vmem:[#allocation3 + $0x90] sm:$0xf] %vm1808_vm7, %v1925_v15  ;;  %v5264_v15 = vld [vmem:[%s7199_s3 + $0xd8] sm:$0xff]  }
 0x26e   : > { %2635 = vrot.lane.b32.xlu0 %v2632_v45, %s5321_s21  ;;  %2699 = vrot.lane.b32.xlu1 %v2696_v34, %s5321_s21 }
 0x270   : > { %v2093_v2 = vpop.permute.xlu0 %2092  ;;  %v6552_v37 = vpop.permute.xlu1 %2171 }
 0x271   : > { %2098 = vst.msk [vmem:[#allocation3 + $0x88] sm:$0xf0] %vm2038_vm11, %v2093_v2 }
 0x272   : > { %2777 = vrot.lane.b32.xlu0 %v2774_v53, %s5322_s22  ;;  %2837 = vrot.lane.b32.xlu1 %v2834_v54, %s5322_s22  ;;  %v2644_v54 = vld [vmem:[#allocation2 + $0x11a] ss:$2 sm:$0xff] }
 0x274   : > { %v2108_v22 = vpop.permute.xlu0 %2107  ;;  %v2140_v12 = vpop.permute.xlu1 %2139 }
 0x275   : > { %2113 = vst.msk [vmem:[#allocation3 + $0x88] sm:$0xf0] %vm2055_vm13, %v2108_v22  ;;  %v3054_v22 = vld [vmem:[#allocation2 + $0x157] ss:$2 sm:$0xff] }
 0x276   : > { %2144 = vst.msk [vmem:[#allocation3 + $0xb0] sm:$0x1f] %vm2023_vm1, %v2140_v12  ;;  %2763 = vrot.lane.b32.xlu0 %v2760_v41, %s5321_s21  ;;  %2852 = vrot.lane.b32.xlu1 %v2849_v3, %s5323_s23  ;;  %v2649_v12 = vrot.slane %v2644_v54, 2  ;;  %v2725_v41 = vld [vmem:[#allocation2 + $0x12f] ss:$2 sm:$0xff] }
 0x277   : > { %v2727_v3 = vld [vmem:[#allocation2 + $0x13f] ss:$2 sm:$0x1] }
 0x278   : > { %v2080_v42 = vpop.permute.xlu0 %2079  ;;  %v2157_v5 = vpop.permute.xlu1 %2156 }
 0x279   : > { %2084 = vst.msk [vmem:[#allocation3 + $0xa8] sm:$0x1f] %vm2023_vm1, %v2080_v42 }
 0x27a   : > { %2161 = vst.msk [vmem:[#allocation3 + $0xb0] sm:$0x1f] %vm2040_vm6, %v2157_v5  ;;  %2099 = vst.msk [vmem:[#allocation3 + $0xa8] sm:$0x1f] %vm2040_vm6, %v6505_v11  ;;  %2779 = vrot.lane.b32.xlu0 %v2776_v49, %s5322_s22  ;;  %2718 = vrot.lane.b32.xlu1 %v2715_v50, %s5322_s22  ;;  %v2730_v5 = vrot.slane %v2725_v41, 2  ;;  %v2731_v49 = vrot.slane %v2727_v3, 2 }
 0x27b   : > { %2114 = vst.msk [vmem:[#allocation3 + $0xa8] sm:$0x1f] %vm2057_vm5, %v6517_v13  ;;  %v2991_v11 = vld [vmem:[#allocation2 + $0x151] ss:$2 sm:$0x1]  ;;  %v5268_v50 = vld [vmem:[%s7199_s3 + $0xe8] sm:$0xff]  }
 0x27c   : > { %v1955_v45 = vpop.permute.xlu0 %1954  ;;  %v2327_v63 = vpop.permute.xlu1 %2326  ;;  %v3179_v52 = vld [vmem:[#allocation3 + $0x88] sm:$0xff]  ;;  %v2938_v41 = vld [vmem:[#allocation2 + $0x165] ss:$2 sm:$0x1] }
 0x27d   : > { %1959 = vst.msk [vmem:[#allocation3 + $0x98] sm:$0xf] %vm1774_vm8, %v1955_v45  ;;  %vm2304_vm8 = vcmask 1048325   ;;  %v3043_v45 = vld [vmem:[#allocation2 + $0x166] ss:$2 sm:$0x1] }
 0x27e   : > { %2332 = vst.msk [vmem:[#allocation3 + $0xa8] sm:$0xe0] %vm2270_vm4, %v2327_v63  ;;  %2795 = vrot.lane.b32.xlu0 %v2792_v17, %s5323_s23  ;;  %3018 = vrot.lane.b32.xlu1 %v3014_v51, %s5323_s23  ;;  %v6673_v17 = vld [vmem:[#allocation2 + $0x11b] ss:$2 sm:$0xff]  ;;  %v5270_v51 = vld [vmem:[%s7199_s3 + $0xf0] sm:$0xff]  }
 0x27f   : > { %1976 = vst.msk [vmem:[#allocation3 + $0x98] sm:$0xf] %vm1791_vm12, %v6529_v25  ;;  %v5263_v25 = vld [vmem:[%s7199_s3 + $0x90] sm:$0xff]   ;;  %vm7248_vm12 = vmmov %vm7245_vm14  ;;  %vm2306_vm14 = vcmask 1046272  }
 0x280   : > { %1993 = vst.msk [vmem:[#allocation3 + $0x98] sm:$0xf] %vm1808_vm7, %v6537_v26  ;;  %v2265_v56 = vpop.permute.xlu0 %2264  ;;  %v2342_v10 = vpop.permute.xlu1 %2341  ;;  %v2698_v24 = vsel %vm7248_vm12, %v2696_v34, %v2697_v0  ;;  %4986 = vmatpush3.bf16.msra.mxu1 %v5263_v25  ;;  %vm2272_vm7 = vcmask 521472   ;;  %vm7249_vm10 = vmmov %vm7248_vm12  ;;  %vm2553_vm12 = vcmask 1048326  }
 0x281   : > { %2271 = vst.msk [vmem:[#allocation3 + $0xa0] sm:$0xe0] %vm2270_vm4, %v2265_v56  ;;  %4987 = vmatprep.subr.bf16.mxu1 %v5264_v15  ;;  %v2651_v42 = vsel %vm7249_vm10, %v2649_v12, %v2650_v29  ;;  %vm7250_vm3 = vmmov %vm7249_vm10  ;;  %vm7255_vm10 = vcmask 1048320  }
 0x282   : > { %2347 = vst.msk [vmem:[#allocation3 + $0xa8] sm:$0xe0] %vm2287_vm0, %v2342_v10  ;;  %2716 = vrot.lane.b32.xlu0 %v2713_v18, %s5322_s22  ;;  %2996 = vrot.lane.b32.xlu1 %v2991_v11, %s5321_s21  ;;  %v2732_v63 = vsel %vm7250_vm3, %v2730_v5, %v2731_v49  ;;  %v2666_v10 = vrot.slane %v6673_v17, 2  ;;  %v3135_v49 = vld [vmem:[#allocation2 + $0x17e] ss:$2 sm:$0xff] }
 0x284   : > { %v2138_v13 = vpop.permute.xlu0 %2137  ;;  %v2357_v1 = vpop.permute.xlu1 %2356 }
 0x285   : > { %2143 = vst.msk [vmem:[#allocation3 + $0x90] sm:$0xf0] %vm2021_vm2, %v2138_v13  ;;  %v2911_v13 = vrot.slane %v6687_v46, 1 }
 0x286   : > { %2362 = vst.msk [vmem:[#allocation3 + $0xa8] sm:$0xe0] %vm2304_vm8, %v2357_v1  ;;  %2822 = vrot.lane.b32.xlu0 %v2819_v20, %s5321_s21  ;;  %3008 = vrot.lane.b32.xlu1 %v3003_v55, %s5322_s22  ;;  %v6696_v1 = vld [vmem:[#allocation2 + $0x155] ss:$2 sm:$0xff] }
 0x287   : > { %v5272_v20 = vld [vmem:[%s7199_s3 + $0xf8] sm:$0xff]   ;;  %v2941_v25 = vrot.slane %v6696_v1, 1 }
 0x288   : > { %v2282_v27 = vpop.permute.xlu0 %2281  ;;  %v2202_v4 = vpop.permute.xlu1 %2201  ;;  %v5273_v55 = vld [vmem:[%s7199_s3 + $0xb8] sm:$0xff]  }
 0x289   : > { %2288 = vst.msk [vmem:[#allocation3 + $0xa0] sm:$0xe0] %vm2287_vm0, %v2282_v27  ;;  %v6711_v27 = vld [vmem:[#allocation2 + $0x142] ss:$2 sm:$0xff] }
 0x28a   : > { %2207 = vst.msk [vmem:[#allocation3 + $0x98] sm:$0xf0] %vm2021_vm2, %v2202_v4  ;;  %2701 = vrot.lane.b32.xlu0 %v2698_v24, %s5321_s21  ;;  %3020 = vrot.lane.b32.xlu1 %v3015_v6, %s5323_s23  ;;  %vm2289_vm2 = vcmask 783872   ;;  %v2953_v4 = vld [vmem:[#allocation2 + $0x156] ss:$2 sm:$0xff] }
 0x28b   : > { %2305 = vst.msk [vmem:[#allocation3 + $0xa0] sm:$0xe0] %vm2304_vm8, %v6544_v33  ;;  %v5265_v33 = vld [vmem:[%s7199_s3 + $0x98] sm:$0xff]   ;;  %v2414_v24 = vld [vmem:[#allocation2 + $0x103] ss:$2 sm:$0x1] }
 0x28c   : > { %v2155_v16 = vpop.permute.xlu0 %2154  ;;  %v6623_v23 = vpop.permute.xlu1 %2343  ;;  %4988 = vmatpush3.bf16.msra.mxu1 %v5265_v33 }
 0x28d   : > { %v3183_v26 = vld [vmem:[#allocation3 + $0xa8] sm:$0xff]  ;;  %2160 = vst.msk [vmem:[#allocation3 + $0x90] sm:$0xf0] %vm2038_vm11, %v2155_v16 }
 0x28e   : > { %v3215_v39 = vpack.c.bf16 %v3183_v26, %v3179_v52  ;;  %2177 = vst.msk [vmem:[#allocation3 + $0x90] sm:$0xf0] %vm2055_vm13, %v6552_v37  ;;  %2994 = vrot.lane.b32.xlu0 %v2990_v8, %s5321_s21  ;;  %3034 = vrot.lane.b32.xlu1 %v3030_v9, %s5321_s21  ;;  %v5266_v37 = vld [vmem:[%s7199_s3 + $0xe0] sm:$0xff]   ;;  %v2894_v52 = vrot.slane %v6711_v27, 1  ;;  %v2958_v26 = vrot.slane %v2953_v4, 1 }
 0x28f   : > { %4989 = vmatprep.subr.bf16.mxu1 %v5266_v37  ;;  %v2970_v8 = vld [vmem:[#allocation2 + $0x157] ss:$2 sm:$0xff]  ;;  %v2663_v9 = vld [vmem:[#allocation2 + $0x12b] ss:$2 sm:$0x1] }
 0x290   : > { %3541 = vmatprep.mubr.bf16.mxu1 %v3215_v39  ;;  %v2267_v34 = vpop.permute.xlu0 %2266  ;;  %v6638_v59 = vpop.permute.xlu1 %2358  ;;  %4990 = vmatpush3.bf16.msra.mxu1 %v5267_v57  ;;  %v2955_v39 = vld [vmem:[#allocation2 + $0x166] ss:$2 sm:$0x1]  ;;  %v2972_v37 = vld [vmem:[#allocation2 + $0x167] ss:$2 sm:$0x1] }
 0x291   : > { %2273 = vst.msk [vmem:[#allocation3 + $0xc0] sm:$0x3f] %vm2272_vm7, %v2267_v34  ;;  %4991 = vmatprep.subr.bf16.mxu1 %v5268_v50  ;;  %v2975_v34 = vrot.slane %v2970_v8, 1  ;;  %v2976_v57 = vrot.slane %v2972_v37, 1 }
 0x292   : > { %v3182_v2 = vld [vmem:[#allocation3 + $0xa0] sm:$0xff]  ;;  %2880 = vrot.lane.b32.xlu0 %v2877_v28, %s5321_s21  ;;  %3046 = vrot.lane.b32.xlu1 %v3042_v35, %s5322_s22  ;;  %v2667_v35 = vrot.slane %v2663_v9, 2  ;;  %v3123_v4 = vld [vmem:[#allocation2 + $0x18d] ss:$2 sm:$0x1] }
 0x293   : > { %v3214_v53 = vpack.c.bf16 %v3182_v2, %v3178_v21  ;;  %v2959_v21 = vrot.slane %v2955_v39, 1  ;;  %v2874_v2 = vld [vmem:[#allocation2 + $0x151] ss:$2 sm:$0x1] }
 0x294   : > { %v2284_v60 = vpop.permute.xlu0 %2283  ;;  %v6652_v48 = vpop.permute.xlu1 %2220  ;;  %4992 = vmatpush3.bf16.msra.mxu1 %v5269_v38  ;;  %v2878_v32 = vrot.slane %v2874_v2, 1 }
 0x295   : > { %3542 = vmatmul.mubr.bf16.gmra.mrb[8].mxu1 %v3214_v53  ;;  %2290 = vst.msk [vmem:[#allocation3 + $0xc0] sm:$0x3f] %vm2289_vm2, %v2284_v60  ;;  %4993 = vmatprep.subr.bf16.mxu1 %v5270_v51  ;;  %v2891_v60 = vld [vmem:[#allocation2 + $0x152] ss:$2 sm:$0x1] }
 0x296   : > { %3006 = vrot.lane.b32.xlu0 %v3002_v36, %s5322_s22  ;;  %3058 = vrot.lane.b32.xlu1 %v3054_v22, %s5323_s23  ;;  %v2879_v22 = vsel %vm2745_vm9, %v2877_v28, %v2878_v32  ;;  %v2895_v29 = vrot.slane %v2891_v60, 1 }
 0x298   : > { %v2301_v18 = vpop.permute.xlu0 %2300  ;;  %v6657_v61 = vpop.permute.xlu1 %2237  ;;  %4994 = vmatpush3.bf16.msra.mxu1 %v5271_v58  ;;  %v2908_v58 = vld [vmem:[#allocation2 + $0x153] ss:$2 sm:$0x1] }
 0x299   : > { %2307 = vst.msk [vmem:[#allocation3 + $0xc0] sm:$0x3f] %vm2306_vm14, %v2301_v18  ;;  %4995 = vmatprep.subr.bf16.mxu1 %v5272_v20  ;;  %v2912_v1 = vrot.slane %v2908_v58, 1 }
 0x29a   : > { %3036 = vrot.lane.b32.xlu0 %v3031_v62, %s5321_s21  ;;  %2654 = vrot.lane.b32.xlu1 %v2651_v42, %s5322_s22  ;;  %v2942_v62 = vrot.slane %v2938_v41, 1 }
 0x29c   : > { %v2174_v14 = vpop.permute.xlu0 %2173  ;;  %v6669_v43 = vpop.permute.xlu1 %2547  ;;  %4996 = vmatpush3.bf16.msra.mxu1 %v5273_v55 }
 0x29d   : > { %2178 = vst.msk [vmem:[#allocation3 + $0xb0] sm:$0x1f] %vm2057_vm5, %v2174_v14 }
 0x29e   : > { %3048 = vrot.lane.b32.xlu0 %v3043_v45, %s5322_s22  ;;  %2735 = vrot.lane.b32.xlu1 %v2732_v63, %s5323_s23  ;;  %v3073_v45 = vld [vmem:[#allocation2 + $0x169] ss:$2 sm:$0xff] }
 0x29f   : > { %v3149_v63 = vld [vmem:[#allocation2 + $0x17f] ss:$2 sm:$0xff] }
 0x2a0   : > { %v2219_v11 = vpop.permute.xlu0 %2218  ;;  %v6683_v56 = vpop.permute.xlu1 %2420 }
 0x2a1   : > { %2224 = vst.msk [vmem:[#allocation3 + $0x98] sm:$0xf0] %vm2038_vm11, %v2219_v11  ;;  %vm2538_vm11 = vcmask 784896  }
 0x2a2   : > { %3060 = vrot.lane.b32.xlu0 %v3055_v7, %s5323_s23  ;;  %2669 = vrot.lane.b32.xlu1 %v2666_v10, %s5323_s23 }
 0x2a4   : > { %v2236_v19 = vpop.permute.xlu0 %2235  ;;  %v2516_v44 = vpop.permute.xlu1 %2515 }
 0x2a5   : > { %2241 = vst.msk [vmem:[#allocation3 + $0x98] sm:$0xf0] %vm2055_vm13, %v2236_v19  ;;  %vm2519_vm13 = vcmask 523526   ;;  %v3087_v19 = vld [vmem:[#allocation2 + $0x16a] ss:$2 sm:$0xff] }
 0x2a6   : > { %2522 = vst.msk [vmem:[#allocation3 + $0xe0] sm:$0x7f] %vm2521_vm15, %v2516_v44  ;;  %2652 = vrot.lane.b32.xlu0 %v2649_v12, %s5322_s22  ;;  %2914 = vrot.lane.b32.xlu1 %v2911_v13, %s5323_s23  ;;  %v2977_v12 = vsel %vm2745_vm9, %v2975_v34, %v2976_v57  ;;  %v3101_v44 = vld [vmem:[#allocation2 + $0x16b] ss:$2 sm:$0xff] }
 0x2a8   : > { %v2329_v0 = vpop.permute.xlu0 %2328  ;;  %v2533_v31 = vpop.permute.xlu1 %2532 }
 0x2a9   : > { %2333 = vst.msk [vmem:[#allocation3 + $0xc8] sm:$0x3f] %vm2272_vm7, %v2329_v0  ;;  %v2913_v0 = vsel %vm2745_vm9, %v2911_v13, %v2912_v1 }
 0x2aa   : > { %2539 = vst.msk [vmem:[#allocation3 + $0xe0] sm:$0x7f] %vm2538_vm11, %v2533_v31  ;;  %2733 = vrot.lane.b32.xlu0 %v2730_v5, %s5323_s23  ;;  %2944 = vrot.lane.b32.xlu1 %v2941_v25, %s5321_s21  ;;  %v2943_v5 = vsel %vm2745_vm9, %v2941_v25, %v2942_v62  ;;  %v3075_v31 = vld [vmem:[#allocation2 + $0x179] ss:$2 sm:$0x1] }
 0x2ab   : > { %2348 = vst.msk [vmem:[#allocation3 + $0xc8] sm:$0x3f] %vm2289_vm2, %v6623_v23  ;;  %v2418_v23 = vrot.slane %v2414_v24, 3  ;;  %v3089_v24 = vld [vmem:[#allocation2 + $0x17a] ss:$2 sm:$0x1] }
 0x2ac   : > { %2363 = vst.msk [vmem:[#allocation3 + $0xc8] sm:$0x3f] %vm2306_vm14, %v6638_v59  ;;  %v2204_v6 = vpop.permute.xlu0 %2203  ;;  %v2576_v16 = vpop.permute.xlu1 %2575 }
 0x2ad   : > { %2208 = vst.msk [vmem:[#allocation3 + $0xb8] sm:$0x1f] %vm2023_vm1, %v2204_v6  ;;  %vm7251_vm1 = vcmask 1044480   ;;  %v3137_v6 = vld [vmem:[#allocation2 + $0x18e] ss:$2 sm:$0x1] }
 0x2ae   : > { %2581 = vst.msk [vmem:[#allocation3 + $0xc8] sm:$0xc0] %vm2519_vm13, %v2576_v16  ;;  %2897 = vrot.lane.b32.xlu0 %v2894_v52, %s5322_s22  ;;  %2961 = vrot.lane.b32.xlu1 %v2958_v26, %s5322_s22  ;;  %v2419_v59 = vsel %vm7251_vm1, %v2417_v47, %v2418_v23  ;;  %v2960_v47 = vsel %vm2745_vm9, %v2958_v26, %v2959_v21  ;;  %v3103_v16 = vld [vmem:[#allocation2 + $0x17b] ss:$2 sm:$0x1]  ;;  %vm7258_vm1 = vcmask 778752  }
 0x2af   : > { %2225 = vst.msk [vmem:[#allocation3 + $0xb8] sm:$0x1f] %vm2040_vm6, %v6652_v48  ;;  %vm7252_vm6 = vmmov %vm7250_vm3  ;;  %v3151_v23 = vld [vmem:[#allocation2 + $0x18f] ss:$2 sm:$0x1]  ;;  %vm7256_vm3 = vcmask 516352  }
 0x2b0   : > { %2242 = vst.msk [vmem:[#allocation3 + $0xb8] sm:$0x1f] %vm2057_vm5, %v6657_v61  ;;  %v2514_v15 = vpop.permute.xlu0 %2513  ;;  %v2451_v33 = vpop.permute.xlu1 %2450  ;;  %v2668_v40 = vsel %vm7252_vm6, %v2666_v10, %v2667_v35  ;;  %vm2536_vm5 = vcmask 785926   ;;  %v2896_v61 = vsel %vm2745_vm9, %v2894_v52, %v2895_v29  ;;  %vm2783_vm9 = vcmask 785927  }
 0x2b1   : > { %2520 = vst.msk [vmem:[#allocation3 + $0xc0] sm:$0xc0] %vm2519_vm13, %v2514_v15 }
 0x2b2   : > { %2456 = vst.msk [vmem:[#allocation3 + $0xb8] sm:$0xe0] %vm2270_vm4, %v2451_v33  ;;  %2422 = vrot.lane.b32.xlu0 %v2419_v59, %s5323_s23  ;;  %2978 = vrot.lane.b32.xlu1 %v2975_v34, %s5323_s23 }
 0x2b4   : > { %v2387_v53 = vpop.permute.xlu0 %2386  ;;  %v2468_v54 = vpop.permute.xlu1 %2467 }
 0x2b5   : > { %2392 = vst.msk [vmem:[#allocation3 + $0xb0] sm:$0xe0] %vm2270_vm4, %v2387_v53  ;;  %vm2555_vm4 = vcmask 1047296  }
 0x2b6   : > { %2473 = vst.msk [vmem:[#allocation3 + $0xb8] sm:$0xe0] %vm2287_vm0, %v2468_v54  ;;  %2671 = vrot.lane.b32.xlu0 %v2668_v40, %s5323_s23  ;;  %2963 = vrot.lane.b32.xlu1 %v2960_v47, %s5322_s22 }
 0x2b8   : > { %v2531_v48 = vpop.permute.xlu0 %2530  ;;  %v2485_v36 = vpop.permute.xlu1 %2484 }
 0x2b9   : > { %2537 = vst.msk [vmem:[#allocation3 + $0xc0] sm:$0xc0] %vm2536_vm5, %v2531_v48 }
 0x2ba   : > { %2490 = vst.msk [vmem:[#allocation3 + $0xb8] sm:$0xe0] %vm2304_vm8, %v2485_v36  ;;  %2882 = vrot.lane.b32.xlu0 %v2879_v22, %s5321_s21  ;;  %2980 = vrot.lane.b32.xlu1 %v2977_v12, %s5323_s23 }
 0x2bb   : > { %2554 = vst.msk [vmem:[#allocation3 + $0xc0] sm:$0xc0] %vm2553_vm12, %v6669_v43 }
 0x2bc   : > { %v2404_v3 = vpop.permute.xlu0 %2403  ;;  %v2593_v18 = vpop.permute.xlu1 %2592 }
 0x2bd   : > { %2409 = vst.msk [vmem:[#allocation3 + $0xb0] sm:$0xe0] %vm2287_vm0, %v2404_v3  ;;  %vm2767_vm0 = vcmask 523527  }
 0x2be   : > { %2426 = vst.msk [vmem:[#allocation3 + $0xb0] sm:$0xe0] %vm2304_vm8, %v6683_v56  ;;  %2899 = vrot.lane.b32.xlu0 %v2896_v61, %s5322_s22  ;;  %3126 = vrot.lane.b32.xlu1 %v3121_v30, %s5321_s21  ;;  %vm2799_vm8 = vcmask 1048327  }
 0x2c0   : > { %v2550_v28 = vpop.permute.xlu0 %2549  ;;  %v2608_v42 = vpop.permute.xlu1 %2607 }
 0x2c1   : > { %2556 = vst.msk [vmem:[#allocation3 + $0xe0] sm:$0x7f] %vm2555_vm4, %v2550_v28 }
 0x2c2   : > { %2946 = vrot.lane.b32.xlu0 %v2943_v5, %s5321_s21  ;;  %3140 = vrot.lane.b32.xlu1 %v3135_v49, %s5322_s22  ;;  %v3186_v40 = vld [vmem:[#allocation3 + $0xc0] sm:$0xff] }
 0x2c3   : > { %v4945_v50 = vpop.f32.mrb[0].mxu1 }
 0x2c4   : > { %v2389_v38 = vpop.permute.xlu0 %2388  ;;  %v2470_v14 = vpop.permute.xlu1 %2469 }
 0x2c5   : > { %2393 = vst.msk [vmem:[#allocation3 + $0xd0] sm:$0x3f] %vm2272_vm7, %v2389_v38  ;;  %v4946_v43 = vpop.f32.mrb[1].mxu1 }
 0x2c6   : > { %v6768_v17 = vadd.f32 %v4946_v43, %v4945_v50  ;;  %v4948_v51 = vpop.f32.mrb[2].mxu1  ;;  %3078 = vrot.lane.b32.xlu0 %v3073_v45, %s5321_s21  ;;  %3154 = vrot.lane.b32.xlu1 %v3149_v63, %s5323_s23 }
 0x2c7   : > { %v4949_v11 = vpop.f32.mrb[3].mxu1 }
 0x2c8   : > { %v6772_v56 = vadd.f32 %v4949_v11, %v4948_v51  ;;  %v2406_v10 = vpop.permute.xlu0 %2405  ;;  %v2487_v7 = vpop.permute.xlu1 %2486 }
 0x2c9   : > { %2410 = vst.msk [vmem:[#allocation3 + $0xd0] sm:$0x3f] %vm2289_vm2, %v2406_v10 }
 0x2ca   : > { %3092 = vrot.lane.b32.xlu0 %v3087_v19, %s5322_s22  ;;  %3106 = vrot.lane.b32.xlu1 %v3101_v44, %s5323_s23 }
 0x2cc   : > { %v2591_v20 = vpop.permute.xlu0 %2590  ;;  %v2794_v55 = vpop.permute.xlu1 %2793 }
 0x2cd   : > { %2596 = vst.msk [vmem:[#allocation3 + $0xc8] sm:$0xc0] %vm2536_vm5, %v2591_v20 }
 0x2ce   : > { %2916 = vrot.lane.b32.xlu0 %v2913_v0, %s5323_s23  ;;  %3080 = vrot.lane.b32.xlu1 %v3075_v31, %s5321_s21 }
 0x2d0   : > { %v2606_v25 = vpop.permute.xlu0 %2605  ;;  %v2638_v27 = vpop.permute.xlu1 %2637 }
 0x2d1   : > { %2611 = vst.msk [vmem:[#allocation3 + $0xc8] sm:$0xc0] %vm2553_vm12, %v2606_v25 }
 0x2d2   : > { %2642 = vst.msk [vmem:[#allocation3 + $0xf0] sm:$0x7f] %vm2521_vm15, %v2638_v27  ;;  %3128 = vrot.lane.b32.xlu0 %v3123_v4, %s5321_s21  ;;  %3094 = vrot.lane.b32.xlu1 %v3089_v24, %s5322_s22  ;;  %v3169_v24 = vld [vmem:[#allocation3 + $0x38] sm:$0xff] }
 0x2d4   : > { %v2578_v46 = vpop.permute.xlu0 %2577  ;;  %v2821_v13 = vpop.permute.xlu1 %2820 }
 0x2d5   : > { %2582 = vst.msk [vmem:[#allocation3 + $0xe8] sm:$0x7f] %vm2521_vm15, %v2578_v46 }
 0x2d6   : > { %2826 = vst.msk [vmem:[#allocation3 + $0xe8] sm:$0x80] %vm2767_vm0, %v2821_v13  ;;  %3142 = vrot.lane.b32.xlu0 %v3137_v6, %s5322_s22  ;;  %3108 = vrot.lane.b32.xlu1 %v3103_v16, %s5323_s23  ;;  %v3165_v6 = vld [vmem:[#allocation3 + $0x18] sm:$0xff] }
 0x2d7   : > { %2597 = vst.msk [vmem:[#allocation3 + $0xe8] sm:$0x7f] %vm2538_vm11, %v2593_v18  ;;  %v3209_v16 = vpack.c.bf16 %v3169_v24, %v3165_v6 }
 0x2d8   : > { %2612 = vst.msk [vmem:[#allocation3 + $0xe8] sm:$0x7f] %vm2555_vm4, %v2608_v42  ;;  %v2453_v52 = vpop.permute.xlu0 %2452  ;;  %v2836_v26 = vpop.permute.xlu1 %2835  ;;  %v3187_v59 = vld [vmem:[#allocation3 + $0xc8] sm:$0xff] }
 0x2d9   : > { %2457 = vst.msk [vmem:[#allocation3 + $0xd8] sm:$0x3f] %vm2272_vm7, %v2453_v52  ;;  %vm7253_vm7 = vcmask 523520  }
 0x2da   : > { %2841 = vst.msk [vmem:[#allocation3 + $0xe8] sm:$0x80] %vm2783_vm9, %v2836_v26  ;;  %3156 = vrot.lane.b32.xlu0 %v3151_v23, %s5323_s23  ;;  %v3168_v23 = vld [vmem:[#allocation3 + $0x30] sm:$0xff] }
 0x2db   : > { %2474 = vst.msk [vmem:[#allocation3 + $0xd8] sm:$0x3f] %vm2289_vm2, %v2470_v14  ;;  %vm7254_vm2 = vcmask 785920  }
 0x2dc   : > { %2491 = vst.msk [vmem:[#allocation3 + $0xd8] sm:$0x3f] %vm2306_vm14, %v2487_v7  ;;  %v2762_v8 = vpop.permute.xlu0 %2761  ;;  %v2851_v9 = vpop.permute.xlu1 %2850  ;;  %vm7259_vm6 = vmmov %vm7254_vm2 }
 0x2dd   : > { %2768 = vst.msk [vmem:[#allocation3 + $0xe0] sm:$0x80] %vm2767_vm0, %v2762_v8 }
 0x2de   : > { %2856 = vst.msk [vmem:[#allocation3 + $0xe8] sm:$0x80] %vm2799_vm8, %v2851_v9 }
 0x2e0   : > { %v2636_v39 = vpop.permute.xlu0 %2635  ;;  %v2700_v15 = vpop.permute.xlu1 %2699 }
 0x2e1   : > { %2641 = vst.msk [vmem:[#allocation3 + $0xd0] sm:$0xc0] %vm2519_vm13, %v2636_v39  ;;  %2705 = vst.msk [vmem:[#allocation3 + $0xd8] sm:$0xc0] %vm2519_vm13, %v2700_v15  ;;  %v3177_v39 = vld [vmem:[#allocation3 + $0x78] sm:$0xff]  ;;  %v3164_v15 = vld [vmem:[#allocation3 + $0x10] sm:$0xff] }
 0x2e2   : > { %vm7257_vm13 = vmmov %vm7253_vm7 }
 0x2e4   : > { %v2778_v33 = vpop.permute.xlu0 %2777  ;;  %v2838_v34 = vpop.permute.xlu1 %2837 }
 0x2e5   : > { %v3191_v35 = vld [vmem:[#allocation3 + $0xe8] sm:$0xff]  ;;  %2784 = vst.msk [vmem:[#allocation3 + $0xe0] sm:$0x80] %vm2783_vm9, %v2778_v33  ;;  %v3208_v33 = vpack.c.bf16 %v3168_v23, %v3164_v15  ;;  %v5274_v15 = vld [vmem:[%s7201_s5 + $0x40] sm:$0xff]  }
 0x2e6   : > { %v3219_v21 = vpack.c.bf16 %v3191_v35, %v3187_v59  ;;  %2800 = vst.msk [vmem:[#allocation3 + $0xe0] sm:$0x80] %vm2799_vm8, %v2794_v55  ;;  %5033 = vmatprep.subr.bf16.mxu1 %v5274_v15 }
 0x2e8   : > { %3549 = vmatprep.mubr.bf16.mxu1 %v3219_v21  ;;  %v2764_v2 = vpop.permute.xlu0 %2763  ;;  %v2853_v37 = vpop.permute.xlu1 %2852 }
 0x2e9   : > { %2769 = vst.msk [vmem:[#allocation3 + $0x100] sm:$0xff] %vm7253_vm7, %v2764_v2  ;;  %vm7260_vm7 = vmmov %vm7255_vm10  ;;  %v3176_v2 = vld [vmem:[#allocation3 + $0x70] sm:$0xff] }
 0x2ec   : > { %v2780_v53 = vpop.permute.xlu0 %2779  ;;  %v2719_v54 = vpop.permute.xlu1 %2718 }
 0x2ed   : > { %2785 = vst.msk [vmem:[#allocation3 + $0x100] sm:$0xff] %vm7254_vm2, %v2780_v53  ;;  %v3190_v47 = vld [vmem:[#allocation3 + $0xe0] sm:$0xff]  ;;  %vm7261_vm2 = vcmask 1041152  }
 0x2ee   : > { %v3218_v32 = vpack.c.bf16 %v3190_v47, %v3186_v40  ;;  %v3172_v40 = vld [vmem:[#allocation3 + $0x50] sm:$0xff] }
 0x2ef   : > { %v3212_v47 = vpack.c.bf16 %v3176_v2, %v3172_v40 }
 0x2f0   : > { %v2796_v57 = vpop.permute.xlu0 %2795  ;;  %v3019_v60 = vpop.permute.xlu1 %3018  ;;  %3550 = vmatmul.mubr.bf16.gmra.mrb[12].mxu1 %v3218_v32  ;;  %v3181_v32 = vld [vmem:[#allocation3 + $0x98] sm:$0xff] }
 0x2f1   : > { %2801 = vst.msk [vmem:[#allocation3 + $0x100] sm:$0xff] %vm7255_vm10, %v2796_v57  ;;  %vm7262_vm10 = vmmov %vm7257_vm13 }
 0x2f4   : > { %v2717_v48 = vpop.permute.xlu0 %2716  ;;  %v2997_v36 = vpop.permute.xlu1 %2996 }
 0x2f5   : > { %2722 = vst.msk [vmem:[#allocation3 + $0xd8] sm:$0xc0] %vm2536_vm5, %v2717_v48 }
 0x2f6   : > { %3001 = vst.msk [vmem:[#allocation3 + $0x140] sm:$0x1] %vm7256_vm3, %v2997_v36  ;;  %vm7263_vm3 = vmmov %vm7262_vm10  ;;  %v3184_v36 = vld [vmem:[#allocation3 + $0xb0] sm:$0xff] }
 0x2f8   : > { %v2823_v22 = vpop.permute.xlu0 %2822  ;;  %v3009_v12 = vpop.permute.xlu1 %3008  ;;  %v3194_v7 = vld [vmem:[#allocation3 + $0x100] sm:$0xff] }
 0x2f9   : > { %2827 = vst.msk [vmem:[#allocation3 + $0x108] sm:$0xff] %vm7257_vm13, %v2823_v22  ;;  %vm7264_vm13 = vmmov %vm7259_vm6 }
 0x2fa   : > { %3013 = vst.msk [vmem:[#allocation3 + $0x140] sm:$0x1] %vm7258_vm1, %v3009_v12  ;;  %vm7266_vm1 = vmmov %vm7260_vm7 }
 0x2fb   : > { %2842 = vst.msk [vmem:[#allocation3 + $0x108] sm:$0xff] %vm7259_vm6, %v2838_v34  ;;  %v3173_v34 = vld [vmem:[#allocation3 + $0x58] sm:$0xff] }
 0x2fc   : > { %2857 = vst.msk [vmem:[#allocation3 + $0x108] sm:$0xff] %vm7260_vm7, %v2853_v37  ;;  %v2702_v29 = vpop.permute.xlu0 %2701  ;;  %v3021_v41 = vpop.permute.xlu1 %3020  ;;  %vm7268_vm7 = vcmask 516352   ;;  %v3213_v59 = vpack.c.bf16 %v3177_v39, %v3173_v34  ;;  %v5276_v34 = vld [vmem:[%s7201_s5 + $0x48] sm:$0xff]  }
 0x2fd   : > { %2706 = vst.msk [vmem:[#allocation3 + $0xf8] sm:$0x7f] %vm2521_vm15, %v2702_v29  ;;  %vm7265_vm15 = vmmov %vm7259_vm6 }
 0x2fe   : > { %3025 = vst.msk [vmem:[#allocation3 + $0x140] sm:$0x1] %vm7261_vm2, %v3021_v41  ;;  %vm7267_vm6 = vmmov %vm7266_vm1  ;;  %vm7269_vm2 = vcmask 778752   ;;  %v3180_v41 = vld [vmem:[#allocation3 + $0x90] sm:$0xff] }
 0x2ff   : > { %2723 = vst.msk [vmem:[#allocation3 + $0xf8] sm:$0x7f] %vm2538_vm11, %v2719_v54  ;;  %v3185_v54 = vld [vmem:[#allocation3 + $0xb8] sm:$0xff] }
 0x300   : > { %v2995_v3 = vpop.permute.xlu0 %2994  ;;  %v3035_v18 = vpop.permute.xlu1 %3034  ;;  %v3217_v57 = vpack.c.bf16 %v3185_v54, %v3181_v32 }
 0x301   : > { %3000 = vst.msk [vmem:[#allocation3 + $0x120] sm:$0xff] %vm7262_vm10, %v2995_v3  ;;  %vm7270_vm10 = vcmask 1041152   ;;  %v3216_v3 = vpack.c.bf16 %v3184_v36, %v3180_v41 }
 0x302   : > { %3040 = vst.msk [vmem:[#allocation3 + $0x128] sm:$0xff] %vm7263_vm3, %v3035_v18 }
 0x303   : > { %v3195_v58 = vld [vmem:[#allocation3 + $0x108] sm:$0xff] }
 0x304   : > { %v2881_v61 = vpop.permute.xlu0 %2880  ;;  %v3047_v30 = vpop.permute.xlu1 %3046 }
 0x305   : > { %2886 = vst.msk [vmem:[#allocation3 + $0xf0] sm:$0x80] %vm2767_vm0, %v2881_v61  ;;  %v3202_v31 = vld [vmem:[#allocation3 + $0x140] sm:$0x1] }
 0x306   : > { %3052 = vst.msk [vmem:[#allocation3 + $0x128] sm:$0xff] %vm7264_vm13, %v3047_v30  ;;  %v3226_v13 = vpack.c.bf16 %v3202_v31, %v3202_v31 }
 0x308   : > { %v4951_v62 = vpop.f32.mrb[4].mxu1  ;;  %v3007_v28 = vpop.permute.xlu0 %3006 }
 0x309   : > { %v3059_v42 = vpop.permute.xlu1 %3058  ;;  %3012 = vst.msk [vmem:[#allocation3 + $0x120] sm:$0xff] %vm7265_vm15, %v3007_v28  ;;  %v4952_v5 = vpop.f32.mrb[5].mxu1  ;;  %vm7281_vm15 = vmmov %vm7266_vm1 }
 0x30a   : > { %3064 = vst.msk [vmem:[#allocation3 + $0x128] sm:$0xff] %vm7266_vm1, %v3059_v42  ;;  %v6823_v49 = vadd.f32 %v4952_v5, %v4951_v62  ;;  %v4954_v50 = vpop.f32.mrb[6].mxu1 }
 0x30b   : > { %3024 = vst.msk [vmem:[#allocation3 + $0x120] sm:$0xff] %vm7267_vm6, %v3019_v60  ;;  %v4955_v38 = vpop.f32.mrb[7].mxu1  ;;  %vm7282_vm6 = vmmov %vm7268_vm7 }
 0x30c   : > { %v6825_v14 = vadd.f32 %v4955_v38, %v4954_v50  ;;  %v3037_v43 = vpop.permute.xlu0 %3036 }
 0x30d   : > { %v2655_v45 = vpop.permute.xlu1 %2654  ;;  %3041 = vst.msk [vmem:[#allocation3 + $0x148] sm:$0x1] %vm7268_vm7, %v3037_v43  ;;  %vm7283_vm7 = vmmov %vm7282_vm6 }
 0x30e   : > { %2659 = vst.msk [vmem:[#allocation3 + $0xf0] sm:$0x7f] %vm2538_vm11, %v2655_v45  ;;  %vm7271_vm11 = vmmov %vm7263_vm3 }
 0x310   : > { %v3049_v63 = vpop.permute.xlu0 %3048 }
 0x311   : > { %v2736_v51 = vpop.permute.xlu1 %2735  ;;  %v3199_v11 = vld [vmem:[#allocation3 + $0x128] sm:$0xff]  ;;  %3053 = vst.msk [vmem:[#allocation3 + $0x148] sm:$0x1] %vm7269_vm2, %v3049_v63 }
 0x312   : > { %2740 = vst.msk [vmem:[#allocation3 + $0xf8] sm:$0x7f] %vm2555_vm4, %v2736_v51  ;;  %v3223_v10 = vpack.c.bf16 %v3199_v11, %v3195_v58  ;;  %v3198_v19 = vld [vmem:[#allocation3 + $0x120] sm:$0xff] }
 0x313   : > { %v3222_v44 = vpack.c.bf16 %v3198_v19, %v3194_v7 }
 0x314   : > { %3557 = vmatprep.mubr.bf16.mxu1 %v3223_v10  ;;  %v3061_v1 = vpop.permute.xlu0 %3060 }
 0x315   : > { %v2670_v20 = vpop.permute.xlu1 %2669  ;;  %3558 = vmatmul.mubr.bf16.gmra.mrb[16].mxu1 %v3222_v44  ;;  %3065 = vst.msk [vmem:[#allocation3 + $0x148] sm:$0x1] %vm7270_vm10, %v3061_v1  ;;  %vm7284_vm10 = vmmov %vm7269_vm2 }
 0x318   : > { %v2653_v55 = vpop.permute.xlu0 %2652 }
 0x319   : > { %v2915_v0 = vpop.permute.xlu1 %2914  ;;  %2658 = vst.msk [vmem:[#allocation3 + $0xd0] sm:$0xc0] %vm2536_vm5, %v2653_v55  ;;  %vm7273_vm5 = vmmov %vm7263_vm3 }
 0x31a   : > { %2675 = vst.msk [vmem:[#allocation3 + $0xd0] sm:$0xc0] %vm2553_vm12, %v2670_v20 }
 0x31c   : > { %v2734_v25 = vpop.permute.xlu0 %2733  ;;  %v3203_v4 = vld [vmem:[#allocation3 + $0x148] sm:$0x1] }
 0x31d   : > { %v2945_v27 = vpop.permute.xlu1 %2944  ;;  %2739 = vst.msk [vmem:[#allocation3 + $0xd8] sm:$0xc0] %vm2553_vm12, %v2734_v25  ;;  %v3227_v46 = vpack.c.bf16 %v3203_v4, %v3203_v4  ;;  %vm7274_vm12 = vmmov %vm7263_vm3 }
 0x31e   : > { %2950 = vst.msk [vmem:[#allocation3 + $0xf8] sm:$0x80] %vm2767_vm0, %v2945_v27 }
 0x31f   : > { %3565 = vmatprep.mubr.bf16.mxu1 %v3227_v46 }
 0x320   : > { %v2898_v52 = vpop.permute.xlu0 %2897  ;;  %3566 = vmatmul.mubr.bf16.gmra.mrb[20].mxu1 %v3226_v13 }
 0x321   : > { %v2962_v26 = vpop.permute.xlu1 %2961  ;;  %2903 = vst.msk [vmem:[#allocation3 + $0xf0] sm:$0x80] %vm2783_vm9, %v2898_v52  ;;  %3605 = vmatprep.mubr.bf16.mxu1 %v3209_v16 }
 0x322   : > { %2967 = vst.msk [vmem:[#allocation3 + $0xf8] sm:$0x80] %vm2783_vm9, %v2962_v26  ;;  %vm7277_vm9 = vmmov %vm7266_vm1 }
 0x323   : > { %2920 = vst.msk [vmem:[#allocation3 + $0xf0] sm:$0x80] %vm2799_vm8, %v2915_v0 }
 0x324   : > { %v2423_v8 = vpop.permute.xlu0 %2422  ;;  %v3189_v18 = vld [vmem:[#allocation3 + $0xd8] sm:$0xff] }
 0x325   : > { %v2979_v9 = vpop.permute.xlu1 %2978  ;;  %2427 = vst.msk [vmem:[#allocation3 + $0xd0] sm:$0x3f] %vm2306_vm14, %v2423_v8  ;;  %vm7272_vm14 = vmmov %vm7264_vm13 }
 0x326   : > { %2984 = vst.msk [vmem:[#allocation3 + $0xf8] sm:$0x80] %vm2799_vm8, %v2979_v9  ;;  %vm7278_vm8 = vmmov %vm7263_vm3 }
 0x327   : > { %vm7279_vm3 = vmmov %vm7266_vm1 }
 0x328   : > { %v2672_v35 = vpop.permute.xlu0 %2671  ;;  %3606 = vmatmul.mubr.bf16.vlgmr.msra.gmra.mrb[24].mxu1 %v3208_v33  ;;  %v5275_v33 = vld [vmem:[%s7201_s5] sm:$0xff]  }
 0x329   : > { %v2964_v21 = vpop.permute.xlu1 %2963  ;;  %2676 = vst.msk [vmem:[#allocation3 + $0xf0] sm:$0x7f] %vm2555_vm4, %v2672_v35  ;;  %3613 = vmatprep.mubr.bf16.mxu1 %v3213_v59  ;;  %vm7275_vm4 = vmmov %vm7264_vm13  ;;  %5034 = vmatpush3.bf16.msra.mxu1 %v5275_v33  ;;  %v5277_v59 = vld [vmem:[%s7201_s5 + $0x8] sm:$0xff]   ;;  %v5278_v35 = vld [vmem:[%s7201_s5 + $0x50] sm:$0xff]  }
 0x32a   : > { %vm7276_vm0 = vmmov %vm7275_vm4  ;;  %5035 = vmatprep.subr.bf16.mxu1 %v5276_v34 }
 0x32b   : > { %vm7280_vm13 = vmmov %vm7276_vm0 }
 0x32c   : > { %v2883_v37 = vpop.permute.xlu0 %2882  ;;  %v3188_v50 = vld [vmem:[#allocation3 + $0xd0] sm:$0xff] }
 0x32d   : > { %v2981_v53 = vpop.permute.xlu1 %2980  ;;  %2887 = vst.msk [vmem:[#allocation3 + $0x110] sm:$0xff] %vm7271_vm11, %v2883_v37  ;;  %v3193_v29 = vld [vmem:[#allocation3 + $0xf8] sm:$0xff]  ;;  %vm7285_vm11 = vcmask 1041152   ;;  %5036 = vmatpush3.bf16.msra.mxu1 %v5277_v59 }
 0x32e   : > { %v3221_v61 = vpack.c.bf16 %v3193_v29, %v3189_v18  ;;  %5037 = vmatprep.subr.bf16.mxu1 %v5278_v35 }
 0x330   : > { %v2900_v60 = vpop.permute.xlu0 %2899  ;;  %3614 = vmatmul.mubr.bf16.gmra.mrb[28].mxu1 %v3212_v47  ;;  %v3192_v28 = vld [vmem:[#allocation3 + $0xf0] sm:$0xff] }
 0x331   : > { %v3127_v48 = vpop.permute.xlu1 %3126  ;;  %2904 = vst.msk [vmem:[#allocation3 + $0x110] sm:$0xff] %vm7272_vm14, %v2900_v60  ;;  %3621 = vmatprep.mubr.bf16.mxu1 %v3217_v57  ;;  %v3220_v38 = vpack.c.bf16 %v3192_v28, %v3188_v50  ;;  %vm7286_vm14 = vmmov %vm7285_vm11 }
 0x332   : > { %3132 = vst.msk [vmem:[#allocation3 + $0x138] sm:$0xff] %vm7273_vm5, %v3127_v48  ;;  %vm3664_vm5 = vcmask 523264  }
 0x334   : > { %v2947_v22 = vpop.permute.xlu0 %2946 }
 0x335   : > { %v3141_v12 = vpop.permute.xlu1 %3140  ;;  %2951 = vst.msk [vmem:[#allocation3 + $0x118] sm:$0xff] %vm7274_vm12, %v2947_v22  ;;  %v6895_v22 = vld [vmem:[%s7200_s4] ss:$0 sm:$0xff]  ;;  %vm3678_vm12 = vcmask 522240  }
 0x336   : > { %3146 = vst.msk [vmem:[#allocation3 + $0x138] sm:$0xff] %vm7275_vm4, %v3141_v12  ;;  %v3528_v41 = vadd.f32 %v6768_v17, %v6895_v22  ;;  %v5282_v17 = vld [vmem:[%s7201_s5 + $0x60] sm:$0xff]   ;;  %vm3717_vm4 = vcmask 523271  }
 0x337   : > { %2968 = vst.msk [vmem:[#allocation3 + $0x118] sm:$0xff] %vm7276_vm0, %v2964_v21  ;;  %v5279_v21 = vld [vmem:[%s7201_s5 + $0x10] sm:$0xff]   ;;  %vm3719_vm0 = vcmask 521216  }
 0x338   : > { %2985 = vst.msk [vmem:[#allocation3 + $0x118] sm:$0xff] %vm7277_vm9, %v2981_v53  ;;  %v3079_v30 = vpop.permute.xlu0 %3078  ;;  %3622 = vmatmul.mubr.bf16.gmra.mrb[32].mxu1 %v3216_v3  ;;  %vm3783_vm9 = vcmask 523270  }
 0x339   : > { %v3155_v62 = vpop.permute.xlu1 %3154  ;;  %3084 = vst.msk [vmem:[#allocation3 + $0x130] sm:$0xff] %vm7278_vm8, %v3079_v30  ;;  %3629 = vmatprep.mubr.bf16.mxu1 %v3221_v61  ;;  %5038 = vmatpush3.bf16.msra.mxu1 %v5279_v21  ;;  %v3531_v30 = vadd.f32 %v6772_v56, %v6895_v22  ;;  %vm3785_vm8 = vcmask 520192  }
 0x33a   : > { %3160 = vst.msk [vmem:[#allocation3 + $0x138] sm:$0xff] %vm7279_vm3, %v3155_v62  ;;  %vm3849_vm3 = vcmask 523269  }
 0x33c   : > { %v3093_v42 = vpop.permute.xlu0 %3092 }
 0x33d   : > { %v3107_v5 = vpop.permute.xlu1 %3106  ;;  %3098 = vst.msk [vmem:[#allocation3 + $0x130] sm:$0xff] %vm7280_vm13, %v3093_v42  ;;  %v5280_v42 = vld [vmem:[%s7201_s5 + $0x58] sm:$0xff]   ;;  %vm3851_vm13 = vcmask 519168  }
 0x33e   : > { %3112 = vst.msk [vmem:[#allocation3 + $0x130] sm:$0xff] %vm7281_vm15, %v3107_v5  ;;  %v5281_v5 = vld [vmem:[%s7201_s5 + $0x18] sm:$0xff]   ;;  %5039 = vmatprep.subr.bf16.mxu1 %v5280_v42  ;;  %vm3915_vm15 = vcmask 523268  }
 0x33f   : > { %v3197_v63 = vld [vmem:[#allocation3 + $0x118] sm:$0xff]  ;;  %5040 = vmatpush3.bf16.msra.mxu1 %v5281_v5 }
 0x340   : > { %v2917_v43 = vpop.permute.xlu0 %2916  ;;  %3630 = vmatmul.mubr.bf16.gmra.mrb[36].mxu1 %v3220_v38  ;;  %5041 = vmatprep.subr.bf16.mxu1 %v5282_v17  ;;  %v5288_v17 = vld [vmem:[%s7201_s5 + $0x78] sm:$0xff]  }
 0x341   : > { %v3081_v45 = vpop.permute.xlu1 %3080  ;;  %v3201_v51 = vld [vmem:[#allocation3 + $0x138] sm:$0xff]  ;;  %2921 = vst.msk [vmem:[#allocation3 + $0x110] sm:$0xff] %vm7266_vm1, %v2917_v43  ;;  %vm3917_vm1 = vcmask 518144  }
 0x342   : > { %3085 = vst.msk [vmem:[#allocation3 + $0x150] sm:$0x1] %vm7282_vm6, %v3081_v45  ;;  %v3225_v58 = vpack.c.bf16 %v3201_v51, %v3197_v63  ;;  %v5283_v45 = vld [vmem:[%s7201_s5 + $0x20] sm:$0xff]   ;;  %v3536_v51 = vadd.f32 %v6823_v49, %v6895_v22  ;;  %vm3981_vm6 = vcmask 523267  }
 0x343   : > { %5042 = vmatpush3.bf16.msra.mxu1 %v5283_v45 }
 0x344   : > { %3637 = vmatprep.mubr.bf16.mxu1 %v3225_v58  ;;  %v3129_v11 = vpop.permute.xlu0 %3128 }
 0x345   : > { %v3095_v10 = vpop.permute.xlu1 %3094  ;;  %3133 = vst.msk [vmem:[#allocation3 + $0x158] sm:$0x1] %vm7283_vm7, %v3129_v11  ;;  %v3200_v1 = vld [vmem:[#allocation3 + $0x130] sm:$0xff]  ;;  %vm3983_vm7 = vcmask 517120  }
 0x346   : > { %3099 = vst.msk [vmem:[#allocation3 + $0x150] sm:$0x1] %vm7269_vm2, %v3095_v10  ;;  %vm3675_vm2 = vcmask 516096  }
 0x348   : > { %v3143_v7 = vpop.permute.xlu0 %3142  ;;  %v3196_v44 = vld [vmem:[#allocation3 + $0x110] sm:$0xff] }
 0x349   : > { %v3109_v19 = vpop.permute.xlu1 %3108  ;;  %3147 = vst.msk [vmem:[#allocation3 + $0x158] sm:$0x1] %vm7284_vm10, %v3143_v7  ;;  %v3224_v20 = vpack.c.bf16 %v3200_v1, %v3196_v44  ;;  %v3539_v7 = vadd.f32 %v6825_v14, %v6895_v22  ;;  %vm4047_vm10 = vcmask 523266  }
 0x34a   : > { %3113 = vst.msk [vmem:[#allocation3 + $0x150] sm:$0x1] %vm7285_vm11, %v3109_v19  ;;  %vm3685_vm11 = vcmask 1047040  }
 0x34b   : > { %3638 = vmatmul.mubr.bf16.gmra.mrb[40].mxu1 %v3224_v20 }
 0x34c   : > { %v3157_v55 = vpop.permute.xlu0 %3156 }
 0x34d   : > { %3161 = vst.msk [vmem:[#allocation3 + $0x158] sm:$0x1] %vm7286_vm14, %v3157_v55  ;;  %vm3727_vm14 = vcmask 1048071  }
 0x351   : > { %v3204_v0 = vld [vmem:[#allocation3 + $0x150] sm:$0x1] }
 0x352   : > { %v3228_v27 = vpack.c.bf16 %v3204_v0, %v3204_v0 }
 0x354   : > { %v3205_v31 = vld [vmem:[#allocation3 + $0x158] sm:$0x1] }
 0x355   : > { %v3229_v25 = vpack.c.bf16 %v3205_v31, %v3205_v31 }
 0x357   : > { %3645 = vmatprep.mubr.bf16.mxu1 %v3229_v25 }
 0x358   : > { %3646 = vmatmul.mubr.bf16.gmra.mrb[44].mxu1 %v3228_v27 }
 0x368   : > { %v4957_v4 = vpop.f32.mrb[8].mxu1 }
 0x369   : > { %v4958_v24 = vpop.f32.mrb[9].mxu1 }
 0x36a   : > { %v6860_v46 = vadd.f32 %v4958_v24, %v4957_v4  ;;  %v4960_v13 = vpop.f32.mrb[10].mxu1 }
 0x36b   : > { %v4961_v6 = vpop.f32.mrb[11].mxu1 }
 0x36c   : > { %v6862_v16 = vadd.f32 %v4961_v6, %v4960_v13  ;;  %v3544_v14 = vadd.f32 %v6860_v46, %v6895_v22  ;;  %v5285_v46 = vld [vmem:[%s7201_s5 + $0x28] sm:$0xff]  }
 0x3c3   : > { %v4963_v52 = vpop.f32.mrb[12].mxu1 }
 0x3c4   : > { %v4964_v26 = vpop.f32.mrb[13].mxu1 }
 0x3c5   : > { %v6864_v23 = vadd.f32 %v4964_v26, %v4963_v52  ;;  %v4966_v8 = vpop.f32.mrb[14].mxu1  ;;  %v5284_v26 = vld [vmem:[%s7201_s5 + $0x68] sm:$0xff]  }
 0x3c6   : > { %v4967_v9 = vpop.f32.mrb[15].mxu1  ;;  %5043 = vmatprep.subr.bf16.mxu1 %v5284_v26 }
 0x3c7   : > { %v6866_v39 = vadd.f32 %v4967_v9, %v4966_v8  ;;  %v3547_v9 = vadd.f32 %v6862_v16, %v6895_v22  ;;  %5044 = vmatpush3.bf16.msra.mxu1 %v5285_v46  ;;  %v5286_v16 = vld [vmem:[%s7201_s5 + $0x70] sm:$0xff]  }
 0x3c8   : > { %5045 = vmatprep.subr.bf16.mxu1 %v5286_v16 }
 0x3e8   : > { %v4969_v2 = vpop.f32.mrb[16].mxu1 }
 0x3e9   : > { %v4970_v37 = vpop.f32.mrb[17].mxu1 }
 0x3ea   : > { %v6886_v53 = vadd.f32 %v4970_v37, %v4969_v2  ;;  %v4972_v54 = vpop.f32.mrb[18].mxu1 }
 0x3eb   : > { %v4973_v40 = vpop.f32.mrb[19].mxu1 }
 0x3ec   : > { %v6888_v47 = vadd.f32 %v4973_v40, %v4972_v54 }
 0x3f3   : > { %v4975_v32 = vpop.f32.mrb[20].mxu1 }
 0x3f4   : > { %v4976_v57 = vpop.f32.mrb[21].mxu1 }
 0x3f5   : > { %v6890_v60 = vadd.f32 %v4976_v57, %v4975_v32  ;;  %v4978_v48 = vpop.f32.mrb[22].mxu1  ;;  %v3552_v57 = vadd.f32 %v6864_v23, %v6895_v22  ;;  %v3555_v23 = vadd.f32 %v6866_v39, %v6895_v22 }
 0x3f6   : > { %v4979_v36 = vpop.f32.mrb[23].mxu1 }
 0x3fb   : > { %v4997_v12 = vpop.f32.mrb[24].mxu1 }
 0x3fc   : > { %v4998_v29 = vpop.f32.mrb[25].mxu1 }
 0x3fd   : > { %v4999_v3 = vadd.f32 %v4998_v29, %v4997_v12  ;;  %v5000_v18 = vpop.f32.mrb[26].mxu1  ;;  %v5287_v29 = vld [vmem:[%s7201_s5 + $0x30] sm:$0xff]  }
 0x3fe   : > { %v5001_v61 = vpop.f32.mrb[27].mxu1  ;;  %5046 = vmatpush3.bf16.msra.mxu1 %v5287_v29 }
 0x3ff   : > { %v3608_v62 = vadd.f32 %v4999_v3, %v3528_v41  ;;  %v5002_v28 = vadd.f32 %v5001_v61, %v5000_v18  ;;  %5047 = vmatprep.subr.bf16.mxu1 %v5288_v17 }
 0x401   : > { %v3653_v50 = vmax.f32 %v3608_v62, 0.0  ;;  %v3611_v38 = vadd.f32 %v5002_v28, %v3531_v30 }
 0x403   : > { %3665 = vst.msk [vmem:[#allocation4] sm:$0xff] %vm3664_vm5, %v3653_v50  ;;  %v3654_v56 = vmax.f32 %v3611_v38, 0.0  ;;  %v5003_v43 = vpop.f32.mrb[28].mxu1 }
 0x404   : > { %v5004_v63 = vpop.f32.mrb[29].mxu1 }
 0x405   : > { %3666 = vst.msk [vmem:[#allocation4 + $0x8] sm:$0xff] %vm3664_vm5, %v3654_v56  ;;  %v5005_v58 = vadd.f32 %v5004_v63, %v5003_v43  ;;  %v5006_v11 = vpop.f32.mrb[30].mxu1 }
 0x406   : > { %v5007_v10 = vpop.f32.mrb[31].mxu1 }
 0x407   : > { %v3616_v19 = vadd.f32 %v5005_v58, %v3536_v51  ;;  %v5008_v44 = vadd.f32 %v5007_v10, %v5006_v11 }
 0x409   : > { %v3655_v1 = vmax.f32 %v3616_v19, 0.0  ;;  %v3619_v20 = vadd.f32 %v5008_v44, %v3539_v7 }
 0x40a   : > { %v3680_v55 = vld [vmem:[#allocation4 + $0x1] sm:$0x7f] }
 0x40b   : > { %v3677_v0 = vld [vmem:[#allocation4] sm:$0x7f]  ;;  %3667 = vst.msk [vmem:[#allocation4 + $0x10] sm:$0xff] %vm3664_vm5, %v3655_v1  ;;  %v3656_v31 = vmax.f32 %v3619_v20, 0.0  ;;  %v5009_v49 = vpop.f32.mrb[32].mxu1  ;;  %3682 = vrot.lane.b32.xlu1 %v3680_v55, %s5322_s22 }
 0x40c   : > { %3679 = vst.msk [vmem:[#allocation5] sm:$0x7f] %vm3678_vm12, %v3677_v0  ;;  %v5010_v25 = vpop.f32.mrb[33].mxu1  ;;  %v3689_v27 = vld [vmem:[#allocation4 + $0x9] sm:$0x7f] }
 0x40d   : > { %v3687_v4 = vld [vmem:[#allocation4 + $0x2] sm:$0x7f]  ;;  %3668 = vst.msk [vmem:[#allocation4 + $0x18] sm:$0xff] %vm3664_vm5, %v3656_v31  ;;  %v5011_v24 = vadd.f32 %v5010_v25, %v5009_v49  ;;  %v5012_v13 = vpop.f32.mrb[34].mxu1  ;;  %3691 = vrot.lane.b32.xlu0 %v3689_v27, %s5322_s22  ;;  %v3713_v6 = vld [vmem:[#allocation4 + $0x9] sm:$0x7f]  ;;  %v3560_v31 = vadd.f32 %v6886_v53, %v6895_v22 }
 0x40e   : > { %3688 = vst.msk [vmem:[#allocation5 + $0x8] sm:$0x7f] %vm3678_vm12, %v3687_v4  ;;  %v5013_v52 = vpop.f32.mrb[35].mxu1  ;;  %v3715_v8 = vrot.slane %v3713_v6, 1  ;;  %v5289_v0 = vld [vmem:[%s7201_s5 + $0x38] sm:$0xff]  }
 0x40f   : > { %v3624_v15 = vadd.f32 %v5011_v24, %v3544_v14  ;;  %v5014_v33 = vadd.f32 %v5013_v52, %v5012_v13  ;;  %5048 = vmatpush3.bf16.msra.mxu1 %v5289_v0  ;;  %v3563_v52 = vadd.f32 %v6888_v47, %v6895_v22 }
 0x410   : > { %3718 = vst.msk [vmem:[#allocation5] sm:$0x80] %vm3717_vm4, %v3715_v8 }
 0x411   : > { %3720 = vst.msk [vmem:[#allocation5 + $0x28] sm:$0x3f] %vm3719_vm0, %v3715_v8  ;;  %v3657_v34 = vmax.f32 %v3624_v15, 0.0  ;;  %v3627_v59 = vadd.f32 %v5014_v33, %v3547_v9 }
 0x412   : > { %v3731_v35 = vld [vmem:[#allocation4 + $0xb] sm:$0x7f] }
 0x413   : > { %3669 = vst.msk [vmem:[#allocation4 + $0x20] sm:$0xff] %vm3664_vm5, %v3657_v34  ;;  %v3658_v21 = vmax.f32 %v3627_v59, 0.0  ;;  %v5015_v2 = vpop.f32.mrb[36].mxu1  ;;  %v3733_v37 = vrot.slane %v3731_v35, 1  ;;  %v3695_v54 = vld [vmem:[#allocation4 + $0xa] sm:$0x7f] }
 0x414   : > { %v5016_v40 = vpop.f32.mrb[37].mxu1  ;;  %v3737_v32 = vld [vmem:[#allocation4 + $0x12] sm:$0x7f]  ;;  %3696 = vst.msk [vmem:[#allocation5 + $0x10] sm:$0x7f] %vm3678_vm12, %v3695_v54 }
 0x415   : > { %3670 = vst.msk [vmem:[#allocation4 + $0x28] sm:$0xff] %vm3664_vm5, %v3658_v21  ;;  %v5017_v48 = vadd.f32 %v5016_v40, %v5015_v2  ;;  %v5018_v36 = vpop.f32.mrb[38].mxu1  ;;  %v3739_v12 = vrot.slane %v3737_v32, 1  ;;  %v3787_v3 = vld [vmem:[#allocation4 + $0x13] sm:$0x7f] }
 0x416   : > { %3735 = vst.msk [vmem:[#allocation5 + $0x8] sm:$0x80] %vm3717_vm4, %v3733_v37  ;;  %v5019_v41 = vpop.f32.mrb[39].mxu1  ;;  %v3711_v18 = vld [vmem:[#allocation4 + $0x14] sm:$0x7f]  ;;  %v3789_v56 = vrot.slane %v3787_v3, 2 }
 0x417   : > { %3736 = vst.msk [vmem:[#allocation5 + $0x30] sm:$0x3f] %vm3719_vm0, %v3733_v37  ;;  %v3632_v61 = vadd.f32 %v5017_v48, %v3552_v57  ;;  %v5020_v30 = vadd.f32 %v5019_v41, %v5018_v36  ;;  %3740 = vrot.lane.b32.xlu1 %v3739_v12, %s5322_s22  ;;  %v3779_v62 = vld [vmem:[#allocation4 + $0x12] sm:$0x7f]  ;;  %v3721_v51 = vld [vmem:[#allocation4 + $0xa] sm:$0x7f] }
 0x418   : > { %3712 = vst.msk [vmem:[#allocation5 + $0x20] sm:$0x7f] %vm3678_vm12, %v3711_v18  ;;  %v3797_v28 = vld [vmem:[#allocation4 + $0x14] sm:$0x7f]  ;;  %v3781_v42 = vrot.slane %v3779_v62, 2  ;;  %v3723_v11 = vrot.slane %v3721_v51, 1 }
 0x419   : > { %v3799_v5 = vrot.slane %v3797_v28, 2  ;;  %v3659_v50 = vmax.f32 %v3632_v61, 0.0  ;;  %v3635_v38 = vadd.f32 %v5020_v30, %v3555_v23  ;;  %v3703_v39 = vld [vmem:[#allocation4 + $0x12] sm:$0x7f] }
 0x41a   : > { %v3803_v43 = vld [vmem:[#allocation4 + $0x1b] sm:$0x7f]  ;;  %3784 = vst.msk [vmem:[#allocation5 + $0x28] sm:$0xc0] %vm3783_vm9, %v3781_v42  ;;  %v3745_v2 = vld [vmem:[#allocation4 + $0x13] sm:$0x7f] }
 0x41b   : > { %3786 = vst.msk [vmem:[#allocation5 + $0x50] sm:$0x1f] %vm3785_vm8, %v3781_v42  ;;  %3802 = vst.msk [vmem:[#allocation5 + $0x58] sm:$0x1f] %vm3785_vm8, %v3799_v5  ;;  %v3660_v45 = vmax.f32 %v3635_v38, 0.0  ;;  %3790 = vrot.lane.b32.xlu1 %v3789_v56, %s5322_s22  ;;  %v3805_v63 = vrot.slane %v3803_v43, 2 }
 0x41c   : > { %3801 = vst.msk [vmem:[#allocation5 + $0x30] sm:$0xc0] %vm3783_vm9, %v3799_v5  ;;  %v3869_v10 = vld [vmem:[#allocation4 + $0x24] sm:$0x7f]  ;;  %v3773_v7 = vld [vmem:[#allocation4 + $0x1d] sm:$0x7f] }
 0x41d   : > { %3704 = vst.msk [vmem:[#allocation5 + $0x18] sm:$0x7f] %vm3678_vm12, %v3703_v39  ;;  %3806 = vrot.lane.b32.xlu0 %v3805_v63, %s5322_s22  ;;  %v3839_v19 = vld [vmem:[#allocation4 + $0x26] sm:$0x7f]  ;;  %v3775_v1 = vrot.slane %v3773_v7, 1  ;;  %v3871_v15 = vrot.slane %v3869_v10, 3 }
 0x41e   : > { %3671 = vst.msk [vmem:[#allocation4 + $0x30] sm:$0xff] %vm3664_vm5, %v3659_v50  ;;  %3672 = vst.msk [vmem:[#allocation4 + $0x38] sm:$0xff] %vm3664_vm5, %v3660_v45  ;;  %v5021_v58 = vpop.f32.mrb[40].mxu1  ;;  %v3841_v20 = vrot.slane %v3839_v19, 2  ;;  %v3863_v55 = vld [vmem:[#allocation4 + $0x1d] sm:$0x7f]  ;;  %v3568_v45 = vadd.f32 %v6890_v60, %v6895_v22 }
 0x41f   : > { %v5022_v44 = vpop.f32.mrb[41].mxu1  ;;  %v3865_v27 = vrot.slane %v3863_v55, 3  ;;  %v3929_v4 = vld [vmem:[#allocation4 + $0x26] sm:$0x7f]  ;;  %v3845_v14 = vld [vmem:[#allocation4 + $0x1b] sm:$0x7f] }
 0x420   : > { %v5023_v49 = vadd.f32 %v5022_v44, %v5021_v58  ;;  %v5024_v25 = vpop.f32.mrb[42].mxu1  ;;  %3777 = vst.msk [vmem:[#allocation5 + $0x20] sm:$0x80] %vm3717_vm4, %v3775_v1  ;;  %v3931_v13 = vrot.slane %v3929_v4, 4  ;;  %v3847_v6 = vrot.slane %v3845_v14, 3  ;;  %v5290_v36 = vld [vmem:[%s7201_s5 + $0xc0] sm:$0xff]  }
 0x421   : > { %v5025_v24 = vpop.f32.mrb[43].mxu1  ;;  %3724 = vrot.lane.b32.xlu0 %v3723_v11, %s5322_s22  ;;  %3778 = vst.msk [vmem:[#allocation5 + $0x48] sm:$0x3f] %vm3719_vm0, %v3775_v1  ;;  %v3911_v53 = vld [vmem:[#allocation4 + $0x24] sm:$0x7f]  ;;  %v3747_v18 = vrot.slane %v3745_v2, 1  ;;  %5073 = vmatprep.subr.bf16.mxu1 %v5290_v36 }
 0x422   : > { %3843 = vst.msk [vmem:[#allocation5 + $0x48] sm:$0xc0] %vm3783_vm9, %v3841_v20  ;;  %v3640_v26 = vadd.f32 %v5023_v49, %v3560_v31  ;;  %v5026_v46 = vadd.f32 %v5025_v24, %v5024_v25  ;;  %v3853_v9 = vld [vmem:[#allocation4 + $0x1c] sm:$0x7f]  ;;  %v3919_v34 = vld [vmem:[#allocation4 + $0x25] sm:$0x7f] }
 0x423   : > { %3844 = vst.msk [vmem:[#allocation5 + $0x70] sm:$0x1f] %vm3785_vm8, %v3841_v20  ;;  %v3913_v47 = vrot.slane %v3911_v53, 4  ;;  %v3855_v21 = vrot.slane %v3853_v9, 3  ;;  %v3921_v54 = vrot.slane %v3919_v34, 4  ;;  %vm3729_vm12 = vcmask 1046016  }
 0x424   : > { %3867 = vst.msk [vmem:[#allocation5 + $0x58] sm:$0xe0] %vm3849_vm3, %v3865_v27  ;;  %3850 = vst.msk [vmem:[#allocation5 + $0x50] sm:$0xe0] %vm3849_vm3, %v3847_v6  ;;  %v3661_v59 = vmax.f32 %v3640_v26, 0.0  ;;  %v3643_v35 = vadd.f32 %v5026_v46, %v3563_v52 }
 0x425   : > { %v3935_v8 = vld [vmem:[#allocation4 + $0x2d] sm:$0x7f]  ;;  %3868 = vst.msk [vmem:[#allocation5 + $0x80] sm:$0xf] %vm3851_vm13, %v3865_v27  ;;  %3852 = vst.msk [vmem:[#allocation5 + $0x78] sm:$0xf] %vm3851_vm13, %v3847_v6  ;;  %3872 = vrot.lane.b32.xlu0 %v3871_v15, %s5322_s22 }
 0x426   : > { %v3937_v33 = vrot.slane %v3935_v8, 4  ;;  %3933 = vst.msk [vmem:[#allocation5 + $0x80] sm:$0xf0] %vm3915_vm15, %v3931_v13  ;;  %3916 = vst.msk [vmem:[#allocation5 + $0x78] sm:$0xf0] %vm3915_vm15, %v3913_v47  ;;  %v3662_v37 = vmax.f32 %v3643_v35, 0.0 }
 0x427   : > { %3934 = vst.msk [vmem:[#allocation5 + $0xa8] sm:$0x7] %vm3917_vm1, %v3931_v13  ;;  %3918 = vst.msk [vmem:[#allocation5 + $0xa0] sm:$0x7] %vm3917_vm1, %v3913_v47  ;;  %v4001_v40 = vld [vmem:[#allocation4 + $0x36] sm:$0x7f] }
 0x428   : > { %3938 = vrot.lane.b32.xlu1 %v3937_v33, %s5322_s22  ;;  %3673 = vst.msk [vmem:[#allocation4 + $0x40] sm:$0xff] %vm3664_vm5, %v3661_v59  ;;  %v3905_v32 = vld [vmem:[#allocation4 + $0x2f] sm:$0x7f]  ;;  %v3971_v57 = vld [vmem:[#allocation4 + $0x38] sm:$0x7f]  ;;  %3674 = vst.msk [vmem:[#allocation4 + $0x48] sm:$0xff] %vm3664_vm5, %v3662_v37 }
 0x429   : > { %v3907_v16 = vrot.slane %v3905_v32, 3  ;;  %v3995_v48 = vld [vmem:[#allocation4 + $0x2f] sm:$0x7f]  ;;  %v3973_v12 = vrot.slane %v3971_v57, 4  ;;  %3856 = vrot.lane.b32.xlu0 %v3855_v21, %s5322_s22  ;;  %v4060_v41 = vld [vmem:[#allocation4 + $0x38] sm:$0x7f] }
 0x42a   : > { %v3997_v29 = vrot.slane %v3995_v48, 5  ;;  %v3977_v3 = vld [vmem:[#allocation4 + $0x2d] sm:$0x7f]  ;;  %v4003_v23 = vrot.slane %v4001_v40, 5  ;;  %v4062_v30 = vrot.slane %v4060_v41, 6 }
 0x42b   : > { %3909 = vst.msk [vmem:[#allocation5 + $0x70] sm:$0xe0] %vm3849_vm3, %v3907_v16  ;;  %v3985_v61 = vld [vmem:[#allocation4 + $0x2e] sm:$0x7f]  ;;  %v3979_v62 = vrot.slane %v3977_v3, 5  ;;  %v5027_v42 = vpop.f32.mrb[44].mxu1 }
 0x42c   : > { %3922 = vrot.lane.b32.xlu1 %v3921_v54, %s5322_s22  ;;  %3910 = vst.msk [vmem:[#allocation5 + $0x98] sm:$0xf] %vm3851_vm13, %v3907_v16  ;;  %v4043_v28 = vld [vmem:[#allocation4 + $0x36] sm:$0x7f]  ;;  %v3825_v50 = vld [vmem:[#allocation4 + $0x24] sm:$0x7f] }
 0x42d   : > { %3975 = vst.msk [vmem:[#allocation5 + $0x98] sm:$0xf0] %vm3915_vm15, %v3973_v12  ;;  %v4045_v5 = vrot.slane %v4043_v28, 6  ;;  %v3759_v17 = vld [vmem:[#allocation4 + $0x1b] sm:$0x7f]  ;;  %v5028_v38 = vpop.f32.mrb[45].mxu1  ;;  %4004 = vrot.lane.b32.xlu0 %v4003_v23, %s5322_s22 }
 0x42e   : > { %3976 = vst.msk [vmem:[#allocation5 + $0xc0] sm:$0x7] %vm3917_vm1, %v3973_v12  ;;  %v3761_v56 = vrot.slane %v3759_v17, 1  ;;  %v3827_v39 = vrot.slane %v3825_v50, 2  ;;  %v3811_v43 = vld [vmem:[#allocation4 + $0x1c] sm:$0x7f]  ;;  %v5029_v63 = vadd.f32 %v5028_v38, %v5027_v42 }
 0x42f   : > { %3999 = vst.msk [vmem:[#allocation5 + $0xa8] sm:$0xf8] %vm3981_vm6, %v3997_v29  ;;  %3982 = vst.msk [vmem:[#allocation5 + $0xa0] sm:$0xf8] %vm3981_vm6, %v3979_v62  ;;  %v5030_v51 = vpop.f32.mrb[46].mxu1  ;;  %v3813_v60 = vrot.slane %v3811_v43, 2 }
 0x430   : > { %4000 = vst.msk [vmem:[#allocation5 + $0xd0] sm:$0x3] %vm3983_vm7, %v3997_v29  ;;  %3984 = vst.msk [vmem:[#allocation5 + $0xc8] sm:$0x3] %vm3983_vm7, %v3979_v62  ;;  %v4066_v58 = vld [vmem:[#allocation4 + $0x3f] sm:$0x7f]  ;;  %v3648_v22 = vadd.f32 %v5029_v63, %v3568_v45 }
 0x431   : > { %3749 = vst.msk [vmem:[#allocation5 + $0x10] sm:$0x80] %vm3717_vm4, %v3747_v18  ;;  %v5031_v11 = vpop.f32.mrb[47].mxu1  ;;  %v4068_v10 = vrot.slane %v4066_v58, 6  ;;  %3763 = vst.msk [vmem:[#allocation5 + $0x18] sm:$0x80] %vm3717_vm4, %v3761_v56 }
 0x432   : > { %3750 = vst.msk [vmem:[#allocation5 + $0x38] sm:$0x3f] %vm3719_vm0, %v3747_v18  ;;  %3764 = vst.msk [vmem:[#allocation5 + $0x40] sm:$0x3f] %vm3719_vm0, %v3761_v56  ;;  %v3987_v7 = vrot.slane %v3985_v61, 5  ;;  %v3663_v55 = vmax.f32 %v3648_v22, 0.0 }
 0x433   : > { %4064 = vst.msk [vmem:[#allocation5 + $0xd0] sm:$0xfc] %vm4047_vm10, %v4062_v30  ;;  %4048 = vst.msk [vmem:[#allocation5 + $0xc8] sm:$0xfc] %vm4047_vm10, %v4045_v5  ;;  %v4050_v19 = vld [vmem:[#allocation4 + $0x37] sm:$0x7f]  ;;  %4069 = vrot.lane.b32.xlu1 %v4068_v10, %s5322_s22 }
 0x434   : > { %4065 = vst.msk [vmem:[#allocation5 + $0xf8] sm:$0x1] %vm3675_vm2, %v4062_v30  ;;  %4049 = vst.msk [vmem:[#allocation5 + $0xf0] sm:$0x1] %vm3675_vm2, %v4045_v5  ;;  %v4037_v44 = vld [vmem:[#allocation4 + $0x41] sm:$0x7f]  ;;  %3988 = vrot.lane.b32.xlu0 %v3987_v7, %s5322_s22 }
 0x435   : > { %3829 = vst.msk [vmem:[#allocation5 + $0x40] sm:$0xc0] %vm3783_vm9, %v3827_v39  ;;  %v4039_v1 = vrot.slane %v4037_v44, 5  ;;  %3815 = vst.msk [vmem:[#allocation5 + $0x38] sm:$0xc0] %vm3783_vm9, %v3813_v60  ;;  %v4052_v25 = vrot.slane %v4050_v19, 6 }
 0x436   : > { %3830 = vst.msk [vmem:[#allocation5 + $0x68] sm:$0x1f] %vm3785_vm8, %v3827_v39  ;;  %3816 = vst.msk [vmem:[#allocation5 + $0x60] sm:$0x1f] %vm3785_vm8, %v3813_v60  ;;  %v3891_v20 = vld [vmem:[#allocation4 + $0x2d] sm:$0x7f] }
 0x437   : > { %v3765_v0 = vld [vmem:[#allocation4 + $0x1c] sm:$0x7f]  ;;  %v3893_v31 = vrot.slane %v3891_v20, 3  ;;  %v3705_v27 = vld [vmem:[#allocation4 + $0x13] sm:$0x7f]  ;;  %4053 = vrot.lane.b32.xlu1 %v4052_v25, %s5322_s22  ;;  %vm3793_vm4 = vcmask 1048070  }
 0x438   : > { %v3957_v49 = vld [vmem:[#allocation4 + $0x36] sm:$0x7f]  ;;  %4041 = vst.msk [vmem:[#allocation5 + $0xc0] sm:$0xf8] %vm3981_vm6, %v4039_v1  ;;  %v3877_v14 = vld [vmem:[#allocation4 + $0x25] sm:$0x7f]  ;;  %3707 = vrot.lane.b32.xlu0 %v3705_v27, %s5322_s22 }
 0x439   : > { %4042 = vst.msk [vmem:[#allocation5 + $0xe8] sm:$0x3] %vm3983_vm7, %v4039_v1  ;;  %v3959_v4 = vrot.slane %v3957_v49, 4  ;;  %v3943_v24 = vld [vmem:[#allocation4 + $0x2e] sm:$0x7f]  ;;  %v3879_v13 = vrot.slane %v3877_v14, 3 }
 0x43a   : > { %3676 = vst.msk [vmem:[#allocation4 + $0x50] sm:$0x1] %vm3675_vm2, %v3663_v55  ;;  %v3945_v6 = vrot.slane %v3943_v24, 4  ;;  %v4023_v53 = vld [vmem:[#allocation4 + $0x3f] sm:$0x7f]  ;;  %v3767_v34 = vrot.slane %v3765_v0, 1 }
 0x43b   : > { %3895 = vst.msk [vmem:[#allocation5 + $0x68] sm:$0xe0] %vm3849_vm3, %v3893_v31  ;;  %v4088_v52 = vld [vmem:[#allocation4 + $0x48] sm:$0x7f]  ;;  %v4025_v46 = vrot.slane %v4023_v53, 5  ;;  %vm3795_vm0 = vcmask 1044992  }
 0x43c   : > { %3896 = vst.msk [vmem:[#allocation5 + $0x90] sm:$0xf] %vm3851_vm13, %v3893_v31  ;;  %v3831_v26 = vld [vmem:[#allocation4 + $0x25] sm:$0x7f]  ;;  %v4090_v8 = vrot.slane %v4088_v52, 6  ;;  %3768 = vrot.lane.b32.xlu1 %v3767_v34, %s5322_s22  ;;  %vm3859_vm9 = vcmask 1048069  }
 0x43d   : > { %3961 = vst.msk [vmem:[#allocation5 + $0x90] sm:$0xf0] %vm3915_vm15, %v3959_v4  ;;  %v4009_v9 = vld [vmem:[#allocation4 + $0x37] sm:$0x7f]  ;;  %3947 = vst.msk [vmem:[#allocation5 + $0x88] sm:$0xf0] %vm3915_vm15, %v3945_v6 }
 0x43e   : > { %3962 = vst.msk [vmem:[#allocation5 + $0xb8] sm:$0x7] %vm3917_vm1, %v3959_v4  ;;  %3948 = vst.msk [vmem:[#allocation5 + $0xb0] sm:$0x7] %vm3917_vm1, %v3945_v6  ;;  %v4011_v15 = vrot.slane %v4009_v9, 5  ;;  %v3833_v59 = vrot.slane %v3831_v26, 2 }
 0x43f   : > { %3881 = vst.msk [vmem:[#allocation5 + $0x60] sm:$0xe0] %vm3849_vm3, %v3879_v13  ;;  %v4074_v33 = vld [vmem:[#allocation4 + $0x40] sm:$0x7f]  ;;  %v3751_v35 = vld [vmem:[#allocation4 + $0x14] sm:$0x7f] }
 0x440   : > { %3882 = vst.msk [vmem:[#allocation5 + $0x88] sm:$0xf] %vm3851_vm13, %v3879_v13  ;;  %v4076_v47 = vrot.slane %v4074_v33, 6  ;;  %3834 = vrot.lane.b32.xlu0 %v3833_v59, %s5322_s22  ;;  %v3697_v2 = vld [vmem:[#allocation4 + $0xb] sm:$0x7f]  ;;  %v3753_v37 = vrot.slane %v3751_v35, 1 }
 0x441   : > { %4027 = vst.msk [vmem:[#allocation5 + $0xb8] sm:$0xf8] %vm3981_vm6, %v4025_v46  ;;  %4013 = vst.msk [vmem:[#allocation5 + $0xb0] sm:$0xf8] %vm3981_vm6, %v4011_v15  ;;  %v4102_v21 = vld [vmem:[#allocation4 + $0x4a] sm:$0x7f]  ;;  %3699 = vrot.lane.b32.xlu1 %v3697_v2, %s5322_s22 }
 0x442   : > { %4028 = vst.msk [vmem:[#allocation5 + $0xe0] sm:$0x3] %vm3983_vm7, %v4025_v46  ;;  %4014 = vst.msk [vmem:[#allocation5 + $0xd8] sm:$0x3] %vm3983_vm7, %v4011_v15  ;;  %v3817_v54 = vld [vmem:[#allocation4 + $0x1d] sm:$0x7f] }
 0x443   : > { %4092 = vst.msk [vmem:[#allocation5 + $0xe0] sm:$0xfc] %vm4047_vm10, %v4090_v8  ;;  %4078 = vst.msk [vmem:[#allocation5 + $0xd8] sm:$0xfc] %vm4047_vm10, %v4076_v47  ;;  %v4104_v40 = vrot.slane %v4102_v21, 6  ;;  %v3819_v16 = vrot.slane %v3817_v54, 2 }
 0x444   : > { %4093 = vst.msk [vmem:[#allocation5 + $0x108] sm:$0x1] %vm3675_vm2, %v4090_v8  ;;  %4079 = vst.msk [vmem:[#allocation5 + $0x100] sm:$0x1] %vm3675_vm2, %v4076_v47  ;;  %v3897_v32 = vld [vmem:[#allocation4 + $0x2e] sm:$0x7f]  ;;  %3754 = vrot.lane.b32.xlu0 %v3753_v37, %s5322_s22 }
 0x445   : > { %4106 = vst.msk [vmem:[#allocation5 + $0xe8] sm:$0xfc] %vm4047_vm10, %v4104_v40  ;;  %v3899_v57 = vrot.slane %v3897_v32, 3  ;;  %v3963_v48 = vld [vmem:[#allocation4 + $0x37] sm:$0x7f]  ;;  %3820 = vrot.lane.b32.xlu1 %v3819_v16, %s5322_s22  ;;  %vm3861_vm8 = vcmask 1043968  }
 0x446   : > { %4107 = vst.msk [vmem:[#allocation5 + $0x110] sm:$0x1] %vm3675_vm2, %v4104_v40  ;;  %v3883_v36 = vld [vmem:[#allocation4 + $0x26] sm:$0x7f]  ;;  %v3965_v12 = vrot.slane %v3963_v48, 4  ;;  %vm3925_vm3 = vcmask 1048068  }
 0x447   : > { %v3885_v29 = vrot.slane %v3883_v36, 3  ;;  %v3949_v41 = vld [vmem:[#allocation4 + $0x2f] sm:$0x7f]  ;;  %v4029_v3 = vld [vmem:[#allocation4 + $0x40] sm:$0x7f]  ;;  %vm3927_vm15 = vcmask 1042944  }
 0x448   : > { %3900 = vrot.lane.b32.xlu0 %v3899_v57, %s5322_s22  ;;  %v3951_v18 = vrot.slane %v3949_v41, 4  ;;  %v4031_v23 = vrot.slane %v4029_v3, 5  ;;  %v4094_v61 = vld [vmem:[#allocation4 + $0x49] sm:$0x7f]  ;;  %v4015_v30 = vld [vmem:[#allocation4 + $0x38] sm:$0x7f] }
 0x449   : > { %3966 = vrot.lane.b32.xlu1 %v3965_v12, %s5322_s22  ;;  %v4096_v62 = vrot.slane %v4094_v61, 6  ;;  %v4017_v28 = vrot.slane %v4015_v30, 5  ;;  %v4080_v42 = vld [vmem:[#allocation4 + $0x41] sm:$0x7f]  ;;  %v5291_v19 = vld [vmem:[%s7201_s5 + $0x80] sm:$0xff]   ;;  %v5292_v1 = vld [vmem:[%s7201_s5 + $0xc8] sm:$0xff]  }
 0x44a   : > { %v4082_v5 = vrot.slane %v4080_v42, 6  ;;  %vm3991_vm1 = vcmask 1048067   ;;  %vm3993_vm6 = vcmask 1041920   ;;  %v5293_v31 = vld [vmem:[%s7201_s5 + $0x88] sm:$0xff]   ;;  %vm4056_vm7 = vcmask 1048066   ;;  %v5294_v25 = vld [vmem:[%s7201_s5 + $0xd0] sm:$0xff]  }
 0x44b   : > { %vm4058_vm10 = vcmask 1040896   ;;  %v5295_v13 = vld [vmem:[%s7201_s5 + $0x90] sm:$0xff]   ;;  %v5296_v53 = vld [vmem:[%s7201_s5 + $0xd8] sm:$0xff]   ;;  %v5298_v8 = vld [vmem:[%s7201_s5 + $0xe0] sm:$0xff]  }
 0x44c   : > { %3886 = vrot.lane.b32.xlu0 %v3885_v29, %s5322_s22  ;;  %v5297_v46 = vld [vmem:[%s7201_s5 + $0x98] sm:$0xff]   ;;  %v5299_v59 = vld [vmem:[%s7201_s5 + $0xa0] sm:$0xff]   ;;  %v5300_v35 = vld [vmem:[%s7201_s5 + $0xe8] sm:$0xff]  }
 0x44d   : > { %3952 = vrot.lane.b32.xlu1 %v3951_v18, %s5322_s22  ;;  %v5301_v16 = vld [vmem:[%s7201_s5 + $0xa8] sm:$0xff]   ;;  %v5302_v48 = vld [vmem:[%s7201_s5 + $0xf0] sm:$0xff]   ;;  %v5304_v3 = vld [vmem:[%s7201_s5 + $0xf8] sm:$0xff]  }
 0x44e   : > { %v5303_v29 = vld [vmem:[%s7201_s5 + $0xb0] sm:$0xff]  }
 0x450   : > { %4032 = vrot.lane.b32.xlu0 %v4031_v23, %s5322_s22 }
 0x451   : > { %4097 = vrot.lane.b32.xlu1 %v4096_v62, %s5322_s22 }
 0x454   : > { %4018 = vrot.lane.b32.xlu0 %v4017_v28, %s5322_s22  ;;  %v5305_v28 = vld [vmem:[%s7201_s5 + $0xb8] sm:$0xff]  }
 0x455   : > { %4083 = vrot.lane.b32.xlu1 %v4082_v5, %s5322_s22  ;;  %v5306_v5 = vld [vmem:[%s7201_s5 + $0x100] sm:$0xff]  }
 0x47d   : > { %v3683_v17 = vpop.permute.xlu1 %3682 }
 0x47e   : > { %3686 = vst.msk [vmem:[#allocation5] sm:$0x7f] %vm3685_vm11, %v3683_v17 }
 0x47f   : > { %v3692_v50 = vpop.permute.xlu0 %3691 }
 0x480   : > { %3694 = vst.msk [vmem:[#allocation5 + $0x8] sm:$0x7f] %vm3685_vm11, %v3692_v50 }
 0x489   : > { %v3741_v38 = vpop.permute.xlu1 %3740 }
 0x48a   : > { %3743 = vst.msk [vmem:[#allocation5 + $0x8] sm:$0x80] %vm3727_vm14, %v3741_v38 }
 0x48b   : > { %3744 = vst.msk [vmem:[#allocation5 + $0x30] sm:$0x3f] %vm3729_vm12, %v3741_v38 }
 0x48d   : > { %v3791_v56 = vpop.permute.xlu1 %3790 }
 0x48e   : > { %3794 = vst.msk [vmem:[#allocation5 + $0x28] sm:$0xc0] %vm3793_vm4, %v3791_v56 }
 0x48f   : > { %3796 = vst.msk [vmem:[#allocation5 + $0x50] sm:$0x1f] %vm3795_vm0, %v3791_v56  ;;  %v3807_v39 = vpop.permute.xlu0 %3806 }
 0x490   : > { %3809 = vst.msk [vmem:[#allocation5 + $0x30] sm:$0xc0] %vm3793_vm4, %v3807_v39 }
 0x491   : > { %3810 = vst.msk [vmem:[#allocation5 + $0x58] sm:$0x1f] %vm3795_vm0, %v3807_v39  ;;  %v4109_v51 = vld [vmem:[#allocation5 + $0x8] sm:$0xff] }
 0x493   : > { %v3725_v43 = vpop.permute.xlu0 %3724 }
 0x494   : > { %3728 = vst.msk [vmem:[#allocation5] sm:$0x80] %vm3727_vm14, %v3725_v43 }
 0x495   : > { %3730 = vst.msk [vmem:[#allocation5 + $0x28] sm:$0x3f] %vm3729_vm12, %v3725_v43 }
 0x497   : > { %v3873_v45 = vpop.permute.xlu0 %3872  ;;  %v4114_v58 = vld [vmem:[#allocation5 + $0x30] sm:$0xff] }
 0x498   : > { %3875 = vst.msk [vmem:[#allocation5 + $0x58] sm:$0xe0] %vm3859_vm9, %v3873_v45  ;;  %v4144_v11 = vpack.c.bf16 %v4114_v58, %v4109_v51 }
 0x499   : > { %3876 = vst.msk [vmem:[#allocation5 + $0x80] sm:$0xf] %vm3861_vm8, %v3873_v45 }
 0x49a   : > { %v3939_v63 = vpop.permute.xlu1 %3938  ;;  %4502 = vmatprep.mubr.bf16.mxu1 %v4144_v11  ;;  %v5307_v11 = vld [vmem:[%s7201_s5 + $0x108] sm:$0xff]  }
 0x49b   : > { %3941 = vst.msk [vmem:[#allocation5 + $0x80] sm:$0xf0] %vm3925_vm3, %v3939_v63  ;;  %v3857_v10 = vpop.permute.xlu0 %3856  ;;  %v4108_v22 = vld [vmem:[#allocation5] sm:$0xff] }
 0x49c   : > { %3942 = vst.msk [vmem:[#allocation5 + $0xa8] sm:$0x7] %vm3927_vm15, %v3939_v63  ;;  %v4113_v7 = vld [vmem:[#allocation5 + $0x28] sm:$0xff] }
 0x49d   : > { %3860 = vst.msk [vmem:[#allocation5 + $0x50] sm:$0xe0] %vm3859_vm9, %v3857_v10  ;;  %v4143_v44 = vpack.c.bf16 %v4113_v7, %v4108_v22 }
 0x49e   : > { %v3923_v60 = vpop.permute.xlu1 %3922  ;;  %3862 = vst.msk [vmem:[#allocation5 + $0x78] sm:$0xf] %vm3861_vm8, %v3857_v10 }
 0x49f   : > { %3926 = vst.msk [vmem:[#allocation5 + $0x78] sm:$0xf0] %vm3925_vm3, %v3923_v60  ;;  %4503 = vmatmul.mubr.bf16.vlgmr.msra.gmra.mrb[48].mxu1 %v4143_v44  ;;  %v4005_v20 = vpop.permute.xlu0 %4004  ;;  %v4119_v55 = vld [vmem:[#allocation5 + $0x58] sm:$0xff] }
 0x4a0   : > { %3928 = vst.msk [vmem:[#allocation5 + $0xa0] sm:$0x7] %vm3927_vm15, %v3923_v60  ;;  %5074 = vmatpush3.bf16.msra.mxu1 %v5291_v19  ;;  %v5308_v60 = vld [vmem:[%s7201_s5 + $0x110] sm:$0xff]  }
 0x4a1   : > { %4007 = vst.msk [vmem:[#allocation5 + $0xa8] sm:$0xf8] %vm3991_vm1, %v4005_v20  ;;  %5075 = vmatprep.subr.bf16.mxu1 %v5292_v1 }
 0x4a2   : > { %v4124_v0 = vld [vmem:[#allocation5 + $0x80] sm:$0xff]  ;;  %4008 = vst.msk [vmem:[#allocation5 + $0xd0] sm:$0x3] %vm3993_vm6, %v4005_v20 }
 0x4a3   : > { %v4149_v49 = vpack.c.bf16 %v4124_v0, %v4119_v55  ;;  %v5309_v55 = vld [vmem:[%s7201_s5 + $0x118] sm:$0xff]  }
 0x4a4   : > { %5076 = vmatpush3.bf16.msra.mxu1 %v5293_v31  ;;  %v4118_v14 = vld [vmem:[#allocation5 + $0x50] sm:$0xff] }
 0x4a5   : > { %v4070_v27 = vpop.permute.xlu1 %4069  ;;  %4510 = vmatprep.mubr.bf16.mxu1 %v4149_v49  ;;  %5077 = vmatprep.subr.bf16.mxu1 %v5294_v25 }
 0x4a6   : > { %4072 = vst.msk [vmem:[#allocation5 + $0xd0] sm:$0xfc] %vm4056_vm7, %v4070_v27  ;;  %v3989_v4 = vpop.permute.xlu0 %3988  ;;  %v4123_v24 = vld [vmem:[#allocation5 + $0x78] sm:$0xff] }
 0x4a7   : > { %4073 = vst.msk [vmem:[#allocation5 + $0xf8] sm:$0x1] %vm4058_vm10, %v4070_v27  ;;  %v4148_v6 = vpack.c.bf16 %v4123_v24, %v4118_v14  ;;  %v4117_v14 = vld [vmem:[#allocation5 + $0x48] sm:$0xff] }
 0x4a8   : > { %3992 = vst.msk [vmem:[#allocation5 + $0xa0] sm:$0xf8] %vm3991_vm1, %v3989_v4  ;;  %5078 = vmatpush3.bf16.msra.mxu1 %v5295_v13  ;;  %v4129_v15 = vld [vmem:[#allocation5 + $0xa8] sm:$0xff]  ;;  %v4112_v13 = vld [vmem:[#allocation5 + $0x20] sm:$0xff] }
 0x4a9   : > { %3994 = vst.msk [vmem:[#allocation5 + $0xc8] sm:$0x3] %vm3993_vm6, %v3989_v4  ;;  %v4054_v52 = vpop.permute.xlu1 %4053  ;;  %4511 = vmatmul.mubr.bf16.gmra.mrb[52].mxu1 %v4148_v6  ;;  %5079 = vmatprep.subr.bf16.mxu1 %v5296_v53  ;;  %v4147_v6 = vpack.c.bf16 %v4117_v14, %v4112_v13  ;;  %v4127_v53 = vld [vmem:[#allocation5 + $0x98] sm:$0xff] }
 0x4aa   : > { %4057 = vst.msk [vmem:[#allocation5 + $0xc8] sm:$0xfc] %vm4056_vm7, %v4054_v52  ;;  %v3708_v26 = vpop.permute.xlu0 %3707 }
 0x4ab   : > { %4059 = vst.msk [vmem:[#allocation5 + $0xf0] sm:$0x1] %vm4058_vm10, %v4054_v52  ;;  %v4137_v52 = vld [vmem:[#allocation5 + $0xe8] sm:$0xff] }
 0x4ac   : > { %3710 = vst.msk [vmem:[#allocation5 + $0x18] sm:$0x7f] %vm3685_vm11, %v3708_v26  ;;  %5080 = vmatpush3.bf16.msra.mxu1 %v5297_v46  ;;  %v4122_v26 = vld [vmem:[#allocation5 + $0x70] sm:$0xff] }
 0x4ad   : > { %v4134_v33 = vld [vmem:[#allocation5 + $0xd0] sm:$0xff]  ;;  %5081 = vmatprep.subr.bf16.mxu1 %v5298_v8  ;;  %v4152_v46 = vpack.c.bf16 %v4127_v53, %v4122_v26  ;;  %v4132_v8 = vld [vmem:[#allocation5 + $0xc0] sm:$0xff] }
 0x4ae   : > { %v3769_v9 = vpop.permute.xlu1 %3768  ;;  %v4154_v47 = vpack.c.bf16 %v4134_v33, %v4129_v15  ;;  %v4139_v21 = vld [vmem:[#allocation5 + $0xf8] sm:$0x1]  ;;  %v4142_v15 = vld [vmem:[#allocation5 + $0x110] sm:$0x1] }
 0x4af   : > { %3771 = vst.msk [vmem:[#allocation5 + $0x18] sm:$0x80] %vm3727_vm14, %v3769_v9  ;;  %v4128_v37 = vld [vmem:[#allocation5 + $0xa0] sm:$0xff]  ;;  %v4159_v57 = vpack.c.bf16 %v4139_v21, %v4139_v21  ;;  %v4162_v33 = vpack.c.bf16 %v4142_v15, %v4142_v15 }
 0x4b0   : > { %3772 = vst.msk [vmem:[#allocation5 + $0x40] sm:$0x3f] %vm3729_vm12, %v3769_v9  ;;  %4518 = vmatprep.mubr.bf16.mxu1 %v4154_v47  ;;  %5082 = vmatpush3.bf16.msra.mxu1 %v5299_v59  ;;  %v4157_v9 = vpack.c.bf16 %v4137_v52, %v4132_v8 }
 0x4b1   : > { %v4133_v54 = vld [vmem:[#allocation5 + $0xc8] sm:$0xff]  ;;  %5083 = vmatprep.subr.bf16.mxu1 %v5300_v35 }
 0x4b2   : > { %v3835_v34 = vpop.permute.xlu0 %3834  ;;  %v4153_v32 = vpack.c.bf16 %v4133_v54, %v4128_v37  ;;  %v4138_v41 = vld [vmem:[#allocation5 + $0xf0] sm:$0x1] }
 0x4b3   : > { %3837 = vst.msk [vmem:[#allocation5 + $0x40] sm:$0xc0] %vm3793_vm4, %v3835_v34  ;;  %v3700_v2 = vpop.permute.xlu1 %3699  ;;  %v4158_v62 = vpack.c.bf16 %v4138_v41, %v4138_v41 }
 0x4b4   : > { %3838 = vst.msk [vmem:[#allocation5 + $0x68] sm:$0x1f] %vm3795_vm0, %v3835_v34  ;;  %4519 = vmatmul.mubr.bf16.gmra.mrb[56].mxu1 %v4153_v32 }
 0x4b5   : > { %3702 = vst.msk [vmem:[#allocation5 + $0x10] sm:$0x7f] %vm3685_vm11, %v3700_v2  ;;  %4526 = vmatprep.mubr.bf16.mxu1 %v4159_v57  ;;  %5084 = vmatpush3.bf16.msra.mxu1 %v5301_v16 }
 0x4b6   : > { %v3755_v40 = vpop.permute.xlu0 %3754  ;;  %5085 = vmatprep.subr.bf16.mxu1 %v5302_v48  ;;  %v4111_v18 = vld [vmem:[#allocation5 + $0x18] sm:$0xff] }
 0x4b7   : > { %3757 = vst.msk [vmem:[#allocation5 + $0x10] sm:$0x80] %vm3727_vm14, %v3755_v40  ;;  %v3821_v36 = vpop.permute.xlu1 %3820 }
 0x4b8   : > { %3758 = vst.msk [vmem:[#allocation5 + $0x38] sm:$0x3f] %vm3729_vm12, %v3755_v40 }
 0x4b9   : > { %3823 = vst.msk [vmem:[#allocation5 + $0x38] sm:$0xc0] %vm3793_vm4, %v3821_v36  ;;  %5086 = vmatpush3.bf16.msra.mxu1 %v5303_v29 }
 0x4ba   : > { %3824 = vst.msk [vmem:[#allocation5 + $0x60] sm:$0x1f] %vm3795_vm0, %v3821_v36  ;;  %v3901_v12 = vpop.permute.xlu0 %3900  ;;  %v4116_v23 = vld [vmem:[#allocation5 + $0x40] sm:$0xff]  ;;  %5087 = vmatprep.subr.bf16.mxu1 %v5304_v3 }
 0x4bb   : > { %3903 = vst.msk [vmem:[#allocation5 + $0x68] sm:$0xe0] %vm3859_vm9, %v3901_v12  ;;  %v3967_v61 = vpop.permute.xlu1 %3966  ;;  %v4146_v42 = vpack.c.bf16 %v4116_v23, %v4111_v18 }
 0x4bc   : > { %3904 = vst.msk [vmem:[#allocation5 + $0x90] sm:$0xf] %vm3861_vm8, %v3901_v12  ;;  %4527 = vmatmul.mubr.bf16.gmra.mrb[60].mxu1 %v4158_v62 }
 0x4bd   : > { %3969 = vst.msk [vmem:[#allocation5 + $0x90] sm:$0xf0] %vm3925_vm3, %v3967_v61  ;;  %4566 = vmatprep.mubr.bf16.mxu1 %v4146_v42  ;;  %5088 = vmatpush3.bf16.msra.mxu1 %v5305_v28  ;;  %v4872_v28 = vld [vmem:[%s7202_s6] ss:$0 sm:$0xff] }
 0x4be   : > { %3970 = vst.msk [vmem:[#allocation5 + $0xb8] sm:$0x7] %vm3927_vm15, %v3967_v61  ;;  %v3887_v30 = vpop.permute.xlu0 %3886  ;;  %5121 = vmatprep.subr.bf16.mxu1 %v5306_v5  ;;  %v4110_v39 = vld [vmem:[#allocation5 + $0x10] sm:$0xff] }
 0x4bf   : > { %3889 = vst.msk [vmem:[#allocation5 + $0x60] sm:$0xe0] %vm3859_vm9, %v3887_v30  ;;  %v3953_v17 = vpop.permute.xlu1 %3952 }
 0x4c0   : > { %3890 = vst.msk [vmem:[#allocation5 + $0x88] sm:$0xf] %vm3861_vm8, %v3887_v30  ;;  %v4115_v38 = vld [vmem:[#allocation5 + $0x38] sm:$0xff] }
 0x4c1   : > { %3955 = vst.msk [vmem:[#allocation5 + $0x88] sm:$0xf0] %vm3925_vm3, %v3953_v17  ;;  %v4145_v51 = vpack.c.bf16 %v4115_v38, %v4110_v39 }
 0x4c2   : > { %3956 = vst.msk [vmem:[#allocation5 + $0xb0] sm:$0x7] %vm3927_vm15, %v3953_v17  ;;  %v4033_v50 = vpop.permute.xlu0 %4032  ;;  %v4121_v43 = vld [vmem:[#allocation5 + $0x68] sm:$0xff] }
 0x4c3   : > { %4035 = vst.msk [vmem:[#allocation5 + $0xb8] sm:$0xf8] %vm3991_vm1, %v4033_v50  ;;  %v4098_v56 = vpop.permute.xlu1 %4097 }
 0x4c4   : > { %4036 = vst.msk [vmem:[#allocation5 + $0xe0] sm:$0x3] %vm3993_vm6, %v4033_v50  ;;  %v4126_v45 = vld [vmem:[#allocation5 + $0x90] sm:$0xff]  ;;  %4567 = vmatmul.mubr.bf16.vlgmr.msra.gmra.mrb[64].mxu1 %v4145_v51 }
 0x4c5   : > { %4100 = vst.msk [vmem:[#allocation5 + $0xe0] sm:$0xfc] %vm4056_vm7, %v4098_v56  ;;  %v4151_v58 = vpack.c.bf16 %v4126_v45, %v4121_v43  ;;  %5122 = vmatpush3.bf16.msra.mxu1 %v5306_v5 }
 0x4c6   : > { %4101 = vst.msk [vmem:[#allocation5 + $0x108] sm:$0x1] %vm4058_vm10, %v4098_v56  ;;  %v4019_v63 = vpop.permute.xlu0 %4018  ;;  %5123 = vmatprep.subr.bf16.mxu1 %v5307_v11  ;;  %v4120_v7 = vld [vmem:[#allocation5 + $0x60] sm:$0xff] }
 0x4c7   : > { %4021 = vst.msk [vmem:[#allocation5 + $0xb0] sm:$0xf8] %vm3991_vm1, %v4019_v63  ;;  %v4084_v10 = vpop.permute.xlu1 %4083  ;;  %4574 = vmatprep.mubr.bf16.mxu1 %v4151_v58 }
 0x4c8   : > { %4022 = vst.msk [vmem:[#allocation5 + $0xd8] sm:$0x3] %vm3993_vm6, %v4019_v63  ;;  %v4125_v22 = vld [vmem:[#allocation5 + $0x88] sm:$0xff] }
 0x4c9   : > { %4086 = vst.msk [vmem:[#allocation5 + $0xd8] sm:$0xfc] %vm4056_vm7, %v4084_v10  ;;  %5124 = vmatpush3.bf16.msra.mxu1 %v5307_v11  ;;  %v4150_v1 = vpack.c.bf16 %v4125_v22, %v4120_v7 }
 0x4ca   : > { %4087 = vst.msk [vmem:[#allocation5 + $0x100] sm:$0x1] %vm4058_vm10, %v4084_v10  ;;  %v4131_v19 = vld [vmem:[#allocation5 + $0xb8] sm:$0xff]  ;;  %5125 = vmatprep.subr.bf16.mxu1 %v5308_v60 }
 0x4cc   : > { %v4136_v44 = vld [vmem:[#allocation5 + $0xe0] sm:$0xff]  ;;  %4575 = vmatmul.mubr.bf16.gmra.mrb[68].mxu1 %v4150_v1 }
 0x4cd   : > { %v4156_v20 = vpack.c.bf16 %v4136_v44, %v4131_v19  ;;  %5126 = vmatpush3.bf16.msra.mxu1 %v5308_v60  ;;  %v4141_v31 = vld [vmem:[#allocation5 + $0x108] sm:$0x1] }
 0x4ce   : > { %5127 = vmatprep.subr.bf16.mxu1 %v5309_v55  ;;  %v4130_v49 = vld [vmem:[#allocation5 + $0xb0] sm:$0xff]  ;;  %v4161_v27 = vpack.c.bf16 %v4141_v31, %v4141_v31 }
 0x4cf   : > { %4582 = vmatprep.mubr.bf16.mxu1 %v4156_v20 }
 0x4d0   : > { %v4135_v0 = vld [vmem:[#allocation5 + $0xd8] sm:$0xff] }
 0x4d1   : > { %5128 = vmatpush3.bf16.msra.mxu1 %v5309_v55  ;;  %v4155_v25 = vpack.c.bf16 %v4135_v0, %v4130_v49  ;;  %v4140_v4 = vld [vmem:[#allocation5 + $0x100] sm:$0x1] }
 0x4d2   : > { %v4160_v24 = vpack.c.bf16 %v4140_v4, %v4140_v4 }
 0x4d4   : > { %4583 = vmatmul.mubr.bf16.gmra.mrb[72].mxu1 %v4155_v25 }
 0x4d5   : > { %4590 = vmatprep.mubr.bf16.mxu1 %v4161_v27 }
 0x4dc   : > { %4591 = vmatmul.mubr.bf16.gmra.mrb[76].mxu1 %v4160_v24 }
 0x4dd   : > { %5129 = vmatprep.mubr.msk.bf16.mxu1 %vm3664_vm5, %v4147_v6 }
 0x4e4   : > { %5130 = vmatmul.mubr.msk.bf16.vlgmr.msra.gmra.mrb[80].mxu1 %vm3664_vm5, %v4152_v46 }
 0x4e5   : > { %5133 = vmatprep.mubr.msk.bf16.mxu1 %vm3664_vm5, %v4157_v9 }
 0x4ec   : > { %5134 = vmatmul.mubr.msk.bf16.gmra.mrb[84].mxu1 %vm3664_vm5, %v4162_v33  ;;  %vm4705_vm5 = vsmask.f32 256 }
 0x4ed   : > { %vm4706_vm11 = vmand %vm3675_vm2, %vm4705_vm5 }
 0x572   : > { %v5049_v34 = vpop.f32.mrb[48].mxu1 }
 0x573   : > { %v5050_v47 = vpop.f32.mrb[49].mxu1 }
 0x574   : > { %v5051_v59 = vadd.f32 %v5050_v47, %v5049_v34  ;;  %v5052_v35 = vpop.f32.mrb[50].mxu1 }
 0x575   : > { %v5053_v21 = vpop.f32.mrb[51].mxu1 }
 0x576   : > { %v5054_v2 = vadd.f32 %v5053_v21, %v5052_v35  ;;  %v4505_v17 = vadd.f32 %v5051_v59, %v4872_v28 }
 0x578   : > { %v4508_v39 = vadd.f32 %v5054_v2, %v4872_v28 }
 0x57c   : > { %v5055_v37 = vpop.f32.mrb[52].mxu1 }
 0x57d   : > { %v5056_v54 = vpop.f32.mrb[53].mxu1 }
 0x57e   : > { %v5057_v40 = vadd.f32 %v5056_v54, %v5055_v37  ;;  %v5058_v32 = vpop.f32.mrb[54].mxu1 }
 0x57f   : > { %v5059_v16 = vpop.f32.mrb[55].mxu1 }
 0x580   : > { %v5060_v57 = vadd.f32 %v5059_v16, %v5058_v32  ;;  %v4513_v11 = vadd.f32 %v5057_v40, %v4872_v28 }
 0x582   : > { %v4516_v7 = vadd.f32 %v5060_v57, %v4872_v28 }
 0x587   : > { %v5061_v48 = vpop.f32.mrb[56].mxu1 }
 0x588   : > { %v5062_v36 = vpop.f32.mrb[57].mxu1 }
 0x589   : > { %v5063_v12 = vadd.f32 %v5062_v36, %v5061_v48  ;;  %v5064_v29 = vpop.f32.mrb[58].mxu1 }
 0x58a   : > { %v5065_v41 = vpop.f32.mrb[59].mxu1 }
 0x58b   : > { %v5066_v3 = vadd.f32 %v5065_v41, %v5064_v29  ;;  %v4521_v0 = vadd.f32 %v5063_v12, %v4872_v28 }
 0x58d   : > { %v4524_v27 = vadd.f32 %v5066_v3, %v4872_v28 }
 0x58f   : > { %v5067_v18 = vpop.f32.mrb[60].mxu1 }
 0x590   : > { %v5068_v23 = vpop.f32.mrb[61].mxu1 }
 0x591   : > { %v5069_v61 = vadd.f32 %v5068_v23, %v5067_v18  ;;  %v5070_v30 = vpop.f32.mrb[62].mxu1 }
 0x592   : > { %v5071_v62 = vpop.f32.mrb[63].mxu1 }
 0x593   : > { %v4529_v53 = vadd.f32 %v5069_v61, %v4872_v28  ;;  %v4707_v61 = vld [vmem:[%s7176_s13 + $0x18] sm:$0x1] }
 0x597   : > { %v5089_v42 = vpop.f32.mrb[64].mxu1 }
 0x598   : > { %v5090_v5 = vpop.f32.mrb[65].mxu1 }
 0x599   : > { %v5091_v50 = vadd.f32 %v5090_v5, %v5089_v42  ;;  %v5092_v38 = vpop.f32.mrb[66].mxu1 }
 0x59a   : > { %v5093_v56 = vpop.f32.mrb[67].mxu1 }
 0x59b   : > { %v5094_v43 = vadd.f32 %v5093_v56, %v5092_v38  ;;  %v4569_v45 = vadd.f32 %v5091_v50, %v4505_v17 }
 0x59d   : > { %v4572_v63 = vadd.f32 %v5094_v43, %v4508_v39 }
 0x59f   : > { %v5095_v51 = vpop.f32.mrb[68].mxu1 }
 0x5a0   : > { %v5096_v58 = vpop.f32.mrb[69].mxu1 }
 0x5a1   : > { %v5097_v10 = vadd.f32 %v5096_v58, %v5095_v51  ;;  %v5098_v60 = vpop.f32.mrb[70].mxu1 }
 0x5a2   : > { %v5099_v22 = vpop.f32.mrb[71].mxu1 }
 0x5a3   : > { %v5100_v19 = vadd.f32 %v5099_v22, %v5098_v60  ;;  %v4577_v44 = vadd.f32 %v5097_v10, %v4513_v11 }
 0x5a5   : > { %v4580_v1 = vadd.f32 %v5100_v19, %v4516_v7 }
 0x5a7   : > { %v5101_v20 = vpop.f32.mrb[72].mxu1 }
 0x5a8   : > { %v5102_v55 = vpop.f32.mrb[73].mxu1 }
 0x5a9   : > { %v5103_v31 = vadd.f32 %v5102_v55, %v5101_v20  ;;  %v5104_v49 = vpop.f32.mrb[74].mxu1 }
 0x5aa   : > { %v5105_v25 = vpop.f32.mrb[75].mxu1 }
 0x5ab   : > { %v5106_v4 = vadd.f32 %v5105_v25, %v5104_v49  ;;  %v4585_v14 = vadd.f32 %v5103_v31, %v4521_v0 }
 0x5ad   : > { %v4588_v24 = vadd.f32 %v5106_v4, %v4524_v27 }
 0x5af   : > { %v5107_v13 = vpop.f32.mrb[76].mxu1 }
 0x5b0   : > { %v5108_v6 = vpop.f32.mrb[77].mxu1 }
 0x5b1   : > { %v5109_v52 = vadd.f32 %v5108_v6, %v5107_v13  ;;  %v5110_v26 = vpop.f32.mrb[78].mxu1 }
 0x5b2   : > { %v5111_v46 = vpop.f32.mrb[79].mxu1 }
 0x5b3   : > { %v4593_v8 = vadd.f32 %v5109_v52, %v4529_v53 }
 0x5b7   : > { %v5131_v9 = vpop.f32.mrb[80].mxu1 }
 0x5b8   : > { %v4641_v15 = vadd.f32 %v5131_v9, %v4577_v44  ;;  %v4632_v33 = vpop.f32.mrb[81].mxu1 }
 0x5b9   : > { %v4633_v34 = vadd.f32 %v4632_v33, %v4569_v45  ;;  %v5132_v47 = vpop.f32.mrb[82].mxu1 }
 0x5ba   : > { %v4664_v59 = vmax.f32 %v4641_v15, 0.0  ;;  %v4644_v35 = vadd.f32 %v5132_v47, %v4580_v1  ;;  %v4635_v21 = vpop.f32.mrb[83].mxu1 }
 0x5bb   : > { %v4662_v2 = vmax.f32 %v4633_v34, 0.0  ;;  %v4636_v37 = vadd.f32 %v4635_v21, %v4572_v63 }
 0x5bc   : > { %v4924_v54 = vpack.c.bf16 %v4664_v59, %v4664_v59  ;;  %v4665_v40 = vmax.f32 %v4644_v35, 0.0 }
 0x5bd   : > { %v4922_v32 = vpack.c.bf16 %v4662_v2, %v4662_v2  ;;  %v4663_v16 = vmax.f32 %v4636_v37, 0.0 }
 0x5be   : > { %4700 = vst.msk [vmem:[%s7176_s13 + $0x8] sm:$0xf] %vm3851_vm13, %v4924_v54  ;;  %v4925_v57 = vpack.c.bf16 %v4665_v40, %v4665_v40 }
 0x5bf   : > { %4698 = vst.msk [vmem:[%s7176_s13] sm:$0xf] %vm3851_vm13, %v4922_v32  ;;  %v4923_v48 = vpack.c.bf16 %v4663_v16, %v4663_v16  ;;  %v5135_v36 = vpop.f32.mrb[84].mxu1 }
 0x5c0   : > { %4701 = vst.msk [vmem:[%s7176_s13 + $0xc] sm:$0xf] %vm3851_vm13, %v4925_v57  ;;  %v4657_v12 = vadd.f32 %v5135_v36, %v4593_v8  ;;  %v4648_v29 = vpop.f32.mrb[85].mxu1 }
 0x5c1   : > { %4699 = vst.msk [vmem:[%s7176_s13 + $0x4] sm:$0xf] %vm3851_vm13, %v4923_v48  ;;  %v4649_v41 = vadd.f32 %v4648_v29, %v4585_v14  ;;  %v5136_v3 = vpop.f32.mrb[86].mxu1 }
 0x5c2   : > { %v4668_v18 = vmax.f32 %v4657_v12, 0.0  ;;  %v4651_v23 = vpop.f32.mrb[87].mxu1 }
 0x5c3   : > { %v4666_v30 = vmax.f32 %v4649_v41, 0.0  ;;  %v4652_v62 = vadd.f32 %v4651_v23, %v4588_v24 }
 0x5c4   : > { %v4928_v28 = vpack.c.bf16 %v4668_v18, %v4668_v18 }
 0x5c5   : > { %v4926_v42 = vpack.c.bf16 %v4666_v30, %v4666_v30  ;;  %v4667_v5 = vmax.f32 %v4652_v62, 0.0 }
 0x5c6   : > { %v4708_v17 = vsel %vm4706_vm11, %v4928_v28, %v4707_v61 }
 0x5c7   : > { %4709 = vst [vmem:[%s7176_s13 + $0x18] sm:$0x1] %v4708_v17  ;;  %4702 = vst.msk [vmem:[%s7176_s13 + $0x10] sm:$0xf] %vm3851_vm13, %v4926_v42  ;;  %v4927_v50 = vpack.c.bf16 %v4667_v5, %v4667_v5 }
 0x5c9   : > { %4703 = vst.msk [vmem:[%s7176_s13 + $0x14] sm:$0xf] %vm3851_vm13, %v4927_v50 }
 0x5ca PF: > { %s17_s24 = sadd.s32 1, %s5318_s24  }
 0x5cb   : > { %p14_p4 = scmp.ge.s32.totalorder %s17_s24, 4  }
 0x5cd   :  { %16 = sbr.rel (!%p14_p4) target bundleno = 1 (0x1), region = 237 }

// kernel: cnn_model_forward.3
= control target key start
LH: loop header
LB: loop body
LE: loop exit
PB: predicated region body
PF: predicated region fallthrough
CT: control target
= control target key end

     0   :  { %v812_v36 = vlaneseq  ;;  %v8582_v37 = vmov 1966171168   ;;  %s11224_s0 = inlined_call_operand.vmem [shape: bf16[2,3136], index: 0, kind: input, shape index: {}]   ;;  %s11225_s1 = inlined_call_operand.vmem [shape: bf16[3136,512], index: 1, kind: input, shape index: {}]   ;;  %s11226_s2 = inlined_call_operand.vmem [shape: f32[1,512], index: 2, kind: input, shape index: {}]   ;;  %s11227_s3 = inlined_call_operand.vmem [shape: bf16[512,3], index: 3, kind: input, shape index: {}]   ;;  %s11228_s4 = inlined_call_operand.vmem [shape: f32[1,3], index: 4, kind: input, shape index: {}]   ;;  %s11229_s5 = inlined_call_operand.hbm [shape: f32[2,3], index: 5, kind: output, shape index: {}]  }
   0x1   :  { %v7345_v0 = vld [vmem:[%s11225_s1 + $0x4] ss:$16 sps:$4 sm:$0xff]   ;;  %v7347_v1 = vld [vmem:[%s11225_s1 + $0xc] ss:$16 sps:$4 sm:$0xff]   ;;  %v7349_v2 = vld [vmem:[%s11225_s1] ss:$16 sps:$4 sm:$0xff]   ;;  %v838_v38 = vunpack.c.l.s4 %v8582_v37 }
   0x2   :  { %4945 = vmatprep.subr.bf16.mxu0 %v7345_v0  ;;  %v7350_v3 = vld [vmem:[%s11225_s1 + $0x8] ss:$16 sps:$4 sm:$0xff]   ;;  %5478 = vmatprep.subr.bf16.mxu1 %v7347_v1  ;;  %v7351_v4 = vld [vmem:[%s11225_s1 + $0x24] ss:$16 sps:$4 sm:$0xff]   ;;  %v7353_v5 = vld [vmem:[%s11225_s1 + $0x2c] ss:$16 sps:$4 sm:$0xff]  }
   0x3   :  { %4946 = vmatpush1.bf16.msra.mxu0 %v7349_v2  ;;  %5479 = vmatpush1.bf16.msra.mxu1 %v7350_v3  ;;  %v7355_v6 = vld [vmem:[%s11225_s1 + $0x20] ss:$16 sps:$4 sm:$0xff]   ;;  %v7356_v7 = vld [vmem:[%s11225_s1 + $0x28] ss:$16 sps:$4 sm:$0xff]   ;;  %v7357_v8 = vld [vmem:[%s11225_s1 + $0x44] ss:$16 sps:$4 sm:$0xff]   ;;  %v839_v43 = vunpack.c.0.s8 %v838_v38 }
   0x4   :  { %4947 = vmatprep.subr.bf16.mxu0 %v7351_v4  ;;  %5480 = vmatprep.subr.bf16.mxu1 %v7353_v5  ;;  %v7359_v9 = vld [vmem:[%s11225_s1 + $0x4c] ss:$16 sps:$4 sm:$0xff]   ;;  %v7361_v10 = vld [vmem:[%s11225_s1 + $0x40] ss:$16 sps:$4 sm:$0xff]   ;;  %v7362_v11 = vld [vmem:[%s11225_s1 + $0x48] ss:$16 sps:$4 sm:$0xff]  }
   0x5   :  { %v7363_v12 = vld [vmem:[%s11225_s1 + $0x64] ss:$16 sps:$4 sm:$0xff]   ;;  %v7365_v13 = vld [vmem:[%s11225_s1 + $0x6c] ss:$16 sps:$4 sm:$0xff]   ;;  %v7367_v14 = vld [vmem:[%s11225_s1 + $0x60] ss:$16 sps:$4 sm:$0xff]  }
   0x6   :  { %v7368_v15 = vld [vmem:[%s11225_s1 + $0x68] ss:$16 sps:$4 sm:$0xff]   ;;  %v7369_v16 = vld [vmem:[%s11225_s1 + $0x84] ss:$16 sps:$4 sm:$0xff]   ;;  %v7371_v17 = vld [vmem:[%s11225_s1 + $0x8c] ss:$16 sps:$4 sm:$0xff]  }
   0x7   :  { %4948 = vmatpush1.bf16.msra.mxu0 %v7355_v6  ;;  %5481 = vmatpush1.bf16.msra.mxu1 %v7356_v7  ;;  %v7373_v18 = vld [vmem:[%s11225_s1 + $0x80] ss:$16 sps:$4 sm:$0xff]   ;;  %v7374_v19 = vld [vmem:[%s11225_s1 + $0x88] ss:$16 sps:$4 sm:$0xff]   ;;  %v7375_v20 = vld [vmem:[%s11225_s1 + $0xa4] ss:$16 sps:$4 sm:$0xff]  }
   0x8   :  { %4949 = vmatprep.subr.bf16.mxu0 %v7357_v8  ;;  %5482 = vmatprep.subr.bf16.mxu1 %v7359_v9  ;;  %v7377_v21 = vld [vmem:[%s11225_s1 + $0xac] ss:$16 sps:$4 sm:$0xff]   ;;  %v7379_v22 = vld [vmem:[%s11225_s1 + $0xa0] ss:$16 sps:$4 sm:$0xff]   ;;  %v7380_v23 = vld [vmem:[%s11225_s1 + $0xa8] ss:$16 sps:$4 sm:$0xff]  }
   0x9   :  { %v7381_v24 = vld [vmem:[%s11225_s1 + $0xc4] ss:$16 sps:$4 sm:$0xff]   ;;  %v7383_v25 = vld [vmem:[%s11225_s1 + $0xcc] ss:$16 sps:$4 sm:$0xff]   ;;  %v7385_v26 = vld [vmem:[%s11225_s1 + $0xc0] ss:$16 sps:$4 sm:$0xff]  }
   0xa   :  { %v7386_v27 = vld [vmem:[%s11225_s1 + $0xc8] ss:$16 sps:$4 sm:$0xff]   ;;  %v7387_v28 = vld [vmem:[%s11225_s1 + $0xe4] ss:$16 sps:$4 sm:$0xff]   ;;  %v7389_v29 = vld [vmem:[%s11225_s1 + $0xec] ss:$16 sps:$4 sm:$0xff]  }
   0xb   :  { %4950 = vmatpush1.bf16.msra.mxu0 %v7361_v10  ;;  %5483 = vmatpush1.bf16.msra.mxu1 %v7362_v11  ;;  %v7391_v30 = vld [vmem:[%s11225_s1 + $0xe0] ss:$16 sps:$4 sm:$0xff]   ;;  %v7392_v31 = vld [vmem:[%s11225_s1 + $0xe8] ss:$16 sps:$4 sm:$0xff]   ;;  %v7393_v32 = vld [vmem:[%s11225_s1 + $0x104] ss:$16 sps:$4 sm:$0xff]  }
   0xc   :  { %4951 = vmatprep.subr.bf16.mxu0 %v7363_v12  ;;  %5484 = vmatprep.subr.bf16.mxu1 %v7365_v13  ;;  %v7395_v33 = vld [vmem:[%s11225_s1 + $0x10c] ss:$16 sps:$4 sm:$0xff]   ;;  %v7397_v34 = vld [vmem:[%s11225_s1 + $0x100] ss:$16 sps:$4 sm:$0xff]   ;;  %v7398_v35 = vld [vmem:[%s11225_s1 + $0x108] ss:$16 sps:$4 sm:$0xff]  }
   0xd   :  { %v7399_v39 = vld [vmem:[%s11225_s1 + $0x124] ss:$16 sps:$4 sm:$0xff]   ;;  %v7401_v40 = vld [vmem:[%s11225_s1 + $0x12c] ss:$16 sps:$4 sm:$0xff]   ;;  %v7403_v41 = vld [vmem:[%s11225_s1 + $0x120] ss:$16 sps:$4 sm:$0xff]  }
   0xe   :  { %v8732_v42 = vshrl.u32 %v812_v36, 7  ;;  %v7404_v44 = vld [vmem:[%s11225_s1 + $0x128] ss:$16 sps:$4 sm:$0xff]   ;;  %v7405_v45 = vld [vmem:[%s11225_s1 + $0x144] ss:$16 sps:$4 sm:$0xff]  }
   0xf   :  { %4952 = vmatpush1.bf16.msra.mxu0 %v7367_v14  ;;  %5485 = vmatpush1.bf16.msra.mxu1 %v7368_v15  ;;  %v7407_v46 = vld [vmem:[%s11225_s1 + $0x14c] ss:$16 sps:$4 sm:$0xff]   ;;  %v7409_v47 = vld [vmem:[%s11225_s1 + $0x140] ss:$16 sps:$4 sm:$0xff]   ;;  %v7410_v48 = vld [vmem:[%s11225_s1 + $0x148] ss:$16 sps:$4 sm:$0xff]  }
  0x10   :  { %4953 = vmatprep.subr.bf16.mxu0 %v7369_v16  ;;  %5486 = vmatprep.subr.bf16.mxu1 %v7371_v17  ;;  %v8750_v49 = vsub.s32 %v839_v43, %v8732_v42  ;;  %v7411_v50 = vld [vmem:[%s11225_s1 + $0x164] ss:$16 sps:$4 sm:$0xff]   ;;  %v7413_v51 = vld [vmem:[%s11225_s1 + $0x16c] ss:$16 sps:$4 sm:$0xff]   ;;  %v7415_v53 = vld [vmem:[%s11225_s1 + $0x160] ss:$16 sps:$4 sm:$0xff]  }
  0x11   :  { %v8761_v52 = vld [vmem:[%s11224_s0] sm:$0xff]  ;;  %v7416_v55 = vld [vmem:[%s11225_s1 + $0x168] ss:$16 sps:$4 sm:$0xff]   ;;  %v7419_v57 = vld [vmem:[%s11225_s1 + $0x18c] ss:$16 sps:$4 sm:$0xff]  }
  0x12   :  { %v843_v54 = vrot.slane %v8761_v52, %v8750_v49  ;;  %v7417_v56 = vld [vmem:[%s11225_s1 + $0x184] ss:$16 sps:$4 sm:$0xff]   ;;  %v7421_v59 = vld [vmem:[%s11225_s1 + $0x180] ss:$16 sps:$4 sm:$0xff]   ;;  %v7422_v61 = vld [vmem:[%s11225_s1 + $0x188] ss:$16 sps:$4 sm:$0xff]  }
  0x13   :  { %4954 = vmatpush1.bf16.msra.mxu0 %v7373_v18  ;;  %5487 = vmatpush1.bf16.msra.mxu1 %v7374_v19  ;;  %v7423_v62 = vld [vmem:[%s11225_s1 + $0x1a4] ss:$16 sps:$4 sm:$0xff]   ;;  %v7425_v63 = vld [vmem:[%s11225_s1 + $0x1ac] ss:$16 sps:$4 sm:$0xff]   ;;  %v7427_v0 = vld [vmem:[%s11225_s1 + $0x1a0] ss:$16 sps:$4 sm:$0xff]  }
  0x14   :  { %4955 = vmatprep.subr.bf16.mxu0 %v7375_v20  ;;  %5488 = vmatprep.subr.bf16.mxu1 %v7377_v21  ;;  %v851_v58 = vcombine.high %v843_v54, %v843_v54  ;;  %v7428_v1 = vld [vmem:[%s11225_s1 + $0x1a8] ss:$16 sps:$4 sm:$0xff]   ;;  %v7429_v2 = vld [vmem:[%s11225_s1 + $0x1c4] ss:$16 sps:$4 sm:$0xff]   ;;  %v7431_v3 = vld [vmem:[%s11225_s1 + $0x1cc] ss:$16 sps:$4 sm:$0xff]   ;;  %v8830_v13 = vrot.slane %v843_v54, %v8750_v49 }
  0x15   :  { %v7433_v4 = vld [vmem:[%s11225_s1 + $0x1c0] ss:$16 sps:$4 sm:$0xff]   ;;  %v7434_v5 = vld [vmem:[%s11225_s1 + $0x1c8] ss:$16 sps:$4 sm:$0xff]   ;;  %v7435_v6 = vld [vmem:[%s11225_s1 + $0x1e4] ss:$16 sps:$4 sm:$0xff]  }
  0x16   :  { %v873_v60 = vrot.slane %v851_v58, %v8750_v49  ;;  %v7437_v7 = vld [vmem:[%s11225_s1 + $0x1ec] ss:$16 sps:$4 sm:$0xff]   ;;  %v7439_v8 = vld [vmem:[%s11225_s1 + $0x1e0] ss:$16 sps:$4 sm:$0xff]   ;;  %v7440_v9 = vld [vmem:[%s11225_s1 + $0x1e8] ss:$16 sps:$4 sm:$0xff]  }
  0x17   :  { %4956 = vmatpush1.bf16.msra.mxu0 %v7379_v22  ;;  %5489 = vmatpush1.bf16.msra.mxu1 %v7380_v23  ;;  %v7443_v10 = vld [vmem:[%s11225_s1 + $0x204] ss:$16 sps:$4 sm:$0xff]   ;;  %v7446_v11 = vld [vmem:[%s11225_s1 + $0x20c] ss:$16 sps:$4 sm:$0xff]   ;;  %v7441_v12 = vld [vmem:[%s11225_s1 + $0x200] ss:$16 sps:$4 sm:$0xff]  }
  0x18   :  { %4957 = vmatprep.subr.bf16.mxu0 %v7381_v24  ;;  %5490 = vmatprep.subr.bf16.mxu1 %v7383_v25  ;;  %v7444_v14 = vld [vmem:[%s11225_s1 + $0x208] ss:$16 sps:$4 sm:$0xff]   ;;  %v7449_v15 = vld [vmem:[%s11225_s1 + $0x224] ss:$16 sps:$4 sm:$0xff]   ;;  %v7452_v16 = vld [vmem:[%s11225_s1 + $0x22c] ss:$16 sps:$4 sm:$0xff]   ;;  %v883_v17 = vcombine.high %v873_v60, %v873_v60 }
  0x19   :  { %4977 = vmatprep.mubr.bf16.mxu0 %v873_v60  ;;  %5510 = vmatprep.mubr.bf16.mxu1 %v873_v60  ;;  %v7447_v18 = vld [vmem:[%s11225_s1 + $0x220] ss:$16 sps:$4 sm:$0xff]   ;;  %v7450_v19 = vld [vmem:[%s11225_s1 + $0x228] ss:$16 sps:$4 sm:$0xff]   ;;  %v7455_v20 = vld [vmem:[%s11225_s1 + $0x244] ss:$16 sps:$4 sm:$0xff]  }
  0x1a   :  { %v7458_v21 = vld [vmem:[%s11225_s1 + $0x24c] ss:$16 sps:$4 sm:$0xff]   ;;  %v7453_v22 = vld [vmem:[%s11225_s1 + $0x240] ss:$16 sps:$4 sm:$0xff]   ;;  %v7456_v23 = vld [vmem:[%s11225_s1 + $0x248] ss:$16 sps:$4 sm:$0xff]  }
  0x1b   :  { %4958 = vmatpush1.bf16.msra.mxu0 %v7385_v26  ;;  %5491 = vmatpush1.bf16.msra.mxu1 %v7386_v27  ;;  %v7461_v24 = vld [vmem:[%s11225_s1 + $0x264] ss:$16 sps:$4 sm:$0xff]   ;;  %v7464_v25 = vld [vmem:[%s11225_s1 + $0x26c] ss:$16 sps:$4 sm:$0xff]   ;;  %v7459_v26 = vld [vmem:[%s11225_s1 + $0x260] ss:$16 sps:$4 sm:$0xff]  }
  0x1c   :  { %4959 = vmatprep.subr.bf16.mxu0 %v7387_v28  ;;  %5492 = vmatprep.subr.bf16.mxu1 %v7389_v29  ;;  %v7462_v27 = vld [vmem:[%s11225_s1 + $0x268] ss:$16 sps:$4 sm:$0xff]   ;;  %v7467_v28 = vld [vmem:[%s11225_s1 + $0x284] ss:$16 sps:$4 sm:$0xff]   ;;  %v7470_v29 = vld [vmem:[%s11225_s1 + $0x28c] ss:$16 sps:$4 sm:$0xff]  }
  0x1d   :  { %v7479_v36 = vld [vmem:[%s11225_s1 + $0x2c4] ss:$16 sps:$4 sm:$0xff]   ;;  %v7482_v37 = vld [vmem:[%s11225_s1 + $0x2cc] ss:$16 sps:$4 sm:$0xff]   ;;  %v7477_v38 = vld [vmem:[%s11225_s1 + $0x2c0] ss:$16 sps:$4 sm:$0xff]  }
  0x1e   :  { %v7483_v43 = vld [vmem:[%s11225_s1 + $0x2e0] ss:$16 sps:$4 sm:$0xff]   ;;  %v7498_v54 = vld [vmem:[%s11225_s1 + $0x328] ss:$16 sps:$4 sm:$0xff]   ;;  %v7512_v60 = vld [vmem:[%s11225_s1 + $0x36c] ss:$16 sps:$4 sm:$0xff]  }
  0x1f   :  { %4960 = vmatpush1.bf16.msra.mxu0 %v7391_v30  ;;  %5493 = vmatpush1.bf16.msra.mxu1 %v7392_v31  ;;  %v7465_v30 = vld [vmem:[%s11225_s1 + $0x280] ss:$16 sps:$4 sm:$0xff]   ;;  %v7468_v31 = vld [vmem:[%s11225_s1 + $0x288] ss:$16 sps:$4 sm:$0xff]  }
  0x20   :  { %4961 = vmatprep.subr.bf16.mxu0 %v7393_v32  ;;  %5494 = vmatprep.subr.bf16.mxu1 %v7395_v33  ;;  %v7473_v32 = vld [vmem:[%s11225_s1 + $0x2a4] ss:$16 sps:$4 sm:$0xff]   ;;  %v7476_v33 = vld [vmem:[%s11225_s1 + $0x2ac] ss:$16 sps:$4 sm:$0xff]   ;;  %v7504_v58 = vld [vmem:[%s11225_s1 + $0x348] ss:$16 sps:$4 sm:$0xff]  }
  0x23   :  { %4962 = vmatpush1.bf16.msra.mxu0 %v7397_v34  ;;  %5495 = vmatpush1.bf16.msra.mxu1 %v7398_v35  ;;  %v7471_v34 = vld [vmem:[%s11225_s1 + $0x2a0] ss:$16 sps:$4 sm:$0xff]   ;;  %v7474_v35 = vld [vmem:[%s11225_s1 + $0x2a8] ss:$16 sps:$4 sm:$0xff]  }
  0x24   :  { %4963 = vmatprep.subr.bf16.mxu0 %v7399_v39  ;;  %5496 = vmatprep.subr.bf16.mxu1 %v7401_v40  ;;  %v7480_v39 = vld [vmem:[%s11225_s1 + $0x2c8] ss:$16 sps:$4 sm:$0xff]   ;;  %v7485_v40 = vld [vmem:[%s11225_s1 + $0x2e4] ss:$16 sps:$4 sm:$0xff]  }
  0x27   :  { %4964 = vmatpush1.bf16.msra.mxu0 %v7403_v41  ;;  %5497 = vmatpush1.bf16.msra.mxu1 %v7404_v44  ;;  %v7488_v41 = vld [vmem:[%s11225_s1 + $0x2ec] ss:$16 sps:$4 sm:$0xff]   ;;  %v7486_v44 = vld [vmem:[%s11225_s1 + $0x2e8] ss:$16 sps:$4 sm:$0xff]  }
  0x28   :  { %4965 = vmatprep.subr.bf16.mxu0 %v7405_v45  ;;  %5498 = vmatprep.subr.bf16.mxu1 %v7407_v46  ;;  %v7491_v45 = vld [vmem:[%s11225_s1 + $0x304] ss:$16 sps:$4 sm:$0xff]   ;;  %v7494_v46 = vld [vmem:[%s11225_s1 + $0x30c] ss:$16 sps:$4 sm:$0xff]  }
  0x2b   :  { %4966 = vmatpush1.bf16.msra.mxu0 %v7409_v47  ;;  %5499 = vmatpush1.bf16.msra.mxu1 %v7410_v48  ;;  %v7489_v47 = vld [vmem:[%s11225_s1 + $0x300] ss:$16 sps:$4 sm:$0xff]   ;;  %v7492_v48 = vld [vmem:[%s11225_s1 + $0x308] ss:$16 sps:$4 sm:$0xff]  }
  0x2c   :  { %4967 = vmatprep.subr.bf16.mxu0 %v7411_v50  ;;  %5500 = vmatprep.subr.bf16.mxu1 %v7413_v51  ;;  %v7497_v50 = vld [vmem:[%s11225_s1 + $0x324] ss:$16 sps:$4 sm:$0xff]   ;;  %v7500_v51 = vld [vmem:[%s11225_s1 + $0x32c] ss:$16 sps:$4 sm:$0xff]  }
  0x2f   :  { %4968 = vmatpush1.bf16.msra.mxu0 %v7415_v53  ;;  %5501 = vmatpush1.bf16.msra.mxu1 %v7416_v55  ;;  %v7495_v53 = vld [vmem:[%s11225_s1 + $0x320] ss:$16 sps:$4 sm:$0xff]   ;;  %v7503_v55 = vld [vmem:[%s11225_s1 + $0x344] ss:$16 sps:$4 sm:$0xff]  }
  0x30   :  { %4969 = vmatprep.subr.bf16.mxu0 %v7417_v56  ;;  %5502 = vmatprep.subr.bf16.mxu1 %v7419_v57  ;;  %v7506_v56 = vld [vmem:[%s11225_s1 + $0x34c] ss:$16 sps:$4 sm:$0xff]   ;;  %v7501_v57 = vld [vmem:[%s11225_s1 + $0x340] ss:$16 sps:$4 sm:$0xff]  }
  0x33   :  { %4970 = vmatpush1.bf16.msra.mxu0 %v7421_v59  ;;  %5503 = vmatpush1.bf16.msra.mxu1 %v7422_v61  ;;  %v7509_v59 = vld [vmem:[%s11225_s1 + $0x364] ss:$16 sps:$4 sm:$0xff]   ;;  %v7507_v61 = vld [vmem:[%s11225_s1 + $0x360] ss:$16 sps:$4 sm:$0xff]  }
  0x34   :  { %4971 = vmatprep.subr.bf16.mxu0 %v7423_v62  ;;  %5504 = vmatprep.subr.bf16.mxu1 %v7425_v63  ;;  %v7510_v62 = vld [vmem:[%s11225_s1 + $0x368] ss:$16 sps:$4 sm:$0xff]   ;;  %v7515_v63 = vld [vmem:[%s11225_s1 + $0x384] ss:$16 sps:$4 sm:$0xff]  }
  0x37   :  { %4972 = vmatpush1.bf16.msra.mxu0 %v7427_v0  ;;  %5505 = vmatpush1.bf16.msra.mxu1 %v7428_v1  ;;  %v7518_v0 = vld [vmem:[%s11225_s1 + $0x38c] ss:$16 sps:$4 sm:$0xff]   ;;  %v7513_v1 = vld [vmem:[%s11225_s1 + $0x380] ss:$16 sps:$4 sm:$0xff]  }
  0x38   :  { %4973 = vmatprep.subr.bf16.mxu0 %v7429_v2  ;;  %5506 = vmatprep.subr.bf16.mxu1 %v7431_v3  ;;  %v7516_v2 = vld [vmem:[%s11225_s1 + $0x388] ss:$16 sps:$4 sm:$0xff]   ;;  %v7521_v3 = vld [vmem:[%s11225_s1 + $0x3a4] ss:$16 sps:$4 sm:$0xff]  }
  0x3b   :  { %4974 = vmatpush1.bf16.msra.mxu0 %v7433_v4  ;;  %5507 = vmatpush1.bf16.msra.mxu1 %v7434_v5  ;;  %v7524_v4 = vld [vmem:[%s11225_s1 + $0x3ac] ss:$16 sps:$4 sm:$0xff]   ;;  %v7519_v5 = vld [vmem:[%s11225_s1 + $0x3a0] ss:$16 sps:$4 sm:$0xff]  }
  0x3c   :  { %4975 = vmatprep.subr.bf16.mxu0 %v7435_v6  ;;  %5508 = vmatprep.subr.bf16.mxu1 %v7437_v7  ;;  %v7522_v6 = vld [vmem:[%s11225_s1 + $0x3a8] ss:$16 sps:$4 sm:$0xff]   ;;  %v7527_v7 = vld [vmem:[%s11225_s1 + $0x3c4] ss:$16 sps:$4 sm:$0xff]  }
  0x3f   :  { %4976 = vmatpush1.bf16.msra.mxu0 %v7439_v8  ;;  %5509 = vmatpush1.bf16.msra.mxu1 %v7440_v9  ;;  %v7530_v8 = vld [vmem:[%s11225_s1 + $0x3cc] ss:$16 sps:$4 sm:$0xff]   ;;  %v836_v9 = vcombine.high %v8761_v52, %v8761_v52 }
  0x40   :  { %4986 = vmatprep.subr.bf16.mxu0 %v7443_v10  ;;  %5519 = vmatprep.subr.bf16.mxu1 %v7446_v11  ;;  %v7525_v10 = vld [vmem:[%s11225_s1 + $0x3c0] ss:$16 sps:$4 sm:$0xff]   ;;  %v7528_v11 = vld [vmem:[%s11225_s1 + $0x3c8] ss:$16 sps:$4 sm:$0xff]   ;;  %v7536_v52 = vld [vmem:[%s11225_s1 + $0x3ec] ss:$16 sps:$4 sm:$0xff]  }
  0x42   :  { %4978 = vmatmul.mubr.bf16.vlgmr.msra.gmra.mrb[0].mxu0 %v8830_v13  ;;  %5511 = vmatmul.mubr.bf16.vlgmr.msra.gmra.mrb[0].mxu1 %v8830_v13 }
  0x43   :  { %4987 = vmatpush1.bf16.msra.mxu0 %v7441_v12  ;;  %5520 = vmatpush1.bf16.msra.mxu1 %v7444_v14  ;;  %v7533_v12 = vld [vmem:[%s11225_s1 + $0x3e4] ss:$16 sps:$4 sm:$0xff]   ;;  %v9014_v14 = vrot.slane %v836_v9, %v8750_v49  ;;  %v7612_v9 = vld [vmem:[%s11225_s1 + $0x588] ss:$16 sps:$4 sm:$0xff]  }
  0x44   :  { %4988 = vmatprep.subr.bf16.mxu0 %v7449_v15  ;;  %5521 = vmatprep.subr.bf16.mxu1 %v7452_v16  ;;  %v7531_v15 = vld [vmem:[%s11225_s1 + $0x3e0] ss:$16 sps:$4 sm:$0xff]   ;;  %v7534_v16 = vld [vmem:[%s11225_s1 + $0x3e8] ss:$16 sps:$4 sm:$0xff]  }
  0x45   :  { %5018 = vmatprep.mubr.bf16.mxu0 %v883_v17  ;;  %5551 = vmatprep.mubr.bf16.mxu1 %v883_v17  ;;  %v7539_v17 = vld [vmem:[%s11225_s1 + $0x404] ss:$16 sps:$4 sm:$0xff]  }
  0x47   :  { %4989 = vmatpush1.bf16.msra.mxu0 %v7447_v18  ;;  %5522 = vmatpush1.bf16.msra.mxu1 %v7450_v19  ;;  %v7542_v18 = vld [vmem:[%s11225_s1 + $0x40c] ss:$16 sps:$4 sm:$0xff]   ;;  %v852_v19 = vcombine.high %v9014_v14, %v9014_v14 }
  0x48   :  { %4990 = vmatprep.subr.bf16.mxu0 %v7455_v20  ;;  %5523 = vmatprep.subr.bf16.mxu1 %v7458_v21  ;;  %v7537_v20 = vld [vmem:[%s11225_s1 + $0x400] ss:$16 sps:$4 sm:$0xff]   ;;  %v881_v21 = vcombine.high %v8830_v13, %v8830_v13 }
  0x49   :  { %v7543_v13 = vld [vmem:[%s11225_s1 + $0x420] ss:$16 sps:$4 sm:$0xff]  }
  0x4b   :  { %4991 = vmatpush1.bf16.msra.mxu0 %v7453_v22  ;;  %5524 = vmatpush1.bf16.msra.mxu1 %v7456_v23  ;;  %v7540_v22 = vld [vmem:[%s11225_s1 + $0x408] ss:$16 sps:$4 sm:$0xff]   ;;  %v7545_v23 = vld [vmem:[%s11225_s1 + $0x424] ss:$16 sps:$4 sm:$0xff]  }
  0x4c   :  { %4992 = vmatprep.subr.bf16.mxu0 %v7461_v24  ;;  %5525 = vmatprep.subr.bf16.mxu1 %v7464_v25  ;;  %v7548_v24 = vld [vmem:[%s11225_s1 + $0x42c] ss:$16 sps:$4 sm:$0xff]   ;;  %v9045_v25 = vrot.slane %v852_v19, %v8750_v49  ;;  %v7629_v19 = vld [vmem:[%s11225_s1 + $0x5e4] ss:$16 sps:$4 sm:$0xff]  }
  0x4f   :  { %4993 = vmatpush1.bf16.msra.mxu0 %v7459_v26  ;;  %5526 = vmatpush1.bf16.msra.mxu1 %v7462_v27  ;;  %v7546_v26 = vld [vmem:[%s11225_s1 + $0x428] ss:$16 sps:$4 sm:$0xff]   ;;  %v7551_v27 = vld [vmem:[%s11225_s1 + $0x444] ss:$16 sps:$4 sm:$0xff]  }
  0x50   :  { %4994 = vmatprep.subr.bf16.mxu0 %v7467_v28  ;;  %5527 = vmatprep.subr.bf16.mxu1 %v7470_v29  ;;  %v7554_v28 = vld [vmem:[%s11225_s1 + $0x44c] ss:$16 sps:$4 sm:$0xff]   ;;  %v7549_v29 = vld [vmem:[%s11225_s1 + $0x440] ss:$16 sps:$4 sm:$0xff]  }
  0x53   :  { %4995 = vmatpush1.bf16.msra.mxu0 %v7465_v30  ;;  %5528 = vmatpush1.bf16.msra.mxu1 %v7468_v31  ;;  %v7552_v30 = vld [vmem:[%s11225_s1 + $0x448] ss:$16 sps:$4 sm:$0xff]   ;;  %v7557_v31 = vld [vmem:[%s11225_s1 + $0x464] ss:$16 sps:$4 sm:$0xff]  }
  0x54   :  { %4996 = vmatprep.subr.bf16.mxu0 %v7473_v32  ;;  %5529 = vmatprep.subr.bf16.mxu1 %v7476_v33  ;;  %v7560_v32 = vld [vmem:[%s11225_s1 + $0x46c] ss:$16 sps:$4 sm:$0xff]   ;;  %v7555_v33 = vld [vmem:[%s11225_s1 + $0x460] ss:$16 sps:$4 sm:$0xff]  }
  0x57   :  { %4997 = vmatpush1.bf16.msra.mxu0 %v7471_v34  ;;  %5530 = vmatpush1.bf16.msra.mxu1 %v7474_v35  ;;  %v7558_v34 = vld [vmem:[%s11225_s1 + $0x468] ss:$16 sps:$4 sm:$0xff]   ;;  %v7563_v35 = vld [vmem:[%s11225_s1 + $0x484] ss:$16 sps:$4 sm:$0xff]  }
  0x58   :  { %4998 = vmatprep.subr.bf16.mxu0 %v7479_v36  ;;  %5531 = vmatprep.subr.bf16.mxu1 %v7482_v37  ;;  %v7566_v36 = vld [vmem:[%s11225_s1 + $0x48c] ss:$16 sps:$4 sm:$0xff]   ;;  %v7561_v37 = vld [vmem:[%s11225_s1 + $0x480] ss:$16 sps:$4 sm:$0xff]  }
  0x5b   :  { %4999 = vmatpush1.bf16.msra.mxu0 %v7477_v38  ;;  %5532 = vmatpush1.bf16.msra.mxu1 %v7480_v39  ;;  %v7564_v38 = vld [vmem:[%s11225_s1 + $0x488] ss:$16 sps:$4 sm:$0xff]   ;;  %v7569_v39 = vld [vmem:[%s11225_s1 + $0x4a4] ss:$16 sps:$4 sm:$0xff]  }
  0x5c   :  { %5000 = vmatprep.subr.bf16.mxu0 %v7485_v40  ;;  %5533 = vmatprep.subr.bf16.mxu1 %v7488_v41  ;;  %v7572_v40 = vld [vmem:[%s11225_s1 + $0x4ac] ss:$16 sps:$4 sm:$0xff]   ;;  %v7567_v41 = vld [vmem:[%s11225_s1 + $0x4a0] ss:$16 sps:$4 sm:$0xff]  }
  0x5f   :  { %5001 = vmatpush1.bf16.msra.mxu0 %v7483_v43  ;;  %5534 = vmatpush1.bf16.msra.mxu1 %v7486_v44  ;;  %v7570_v43 = vld [vmem:[%s11225_s1 + $0x4a8] ss:$16 sps:$4 sm:$0xff]   ;;  %v7575_v44 = vld [vmem:[%s11225_s1 + $0x4c4] ss:$16 sps:$4 sm:$0xff]  }
  0x60   :  { %5002 = vmatprep.subr.bf16.mxu0 %v7491_v45  ;;  %5535 = vmatprep.subr.bf16.mxu1 %v7494_v46  ;;  %v7578_v45 = vld [vmem:[%s11225_s1 + $0x4cc] ss:$16 sps:$4 sm:$0xff]   ;;  %v7573_v46 = vld [vmem:[%s11225_s1 + $0x4c0] ss:$16 sps:$4 sm:$0xff]  }
  0x63   :  { %5003 = vmatpush1.bf16.msra.mxu0 %v7489_v47  ;;  %5536 = vmatpush1.bf16.msra.mxu1 %v7492_v48  ;;  %v7576_v47 = vld [vmem:[%s11225_s1 + $0x4c8] ss:$16 sps:$4 sm:$0xff]   ;;  %v7581_v48 = vld [vmem:[%s11225_s1 + $0x4e4] ss:$16 sps:$4 sm:$0xff]  }
  0x64   :  { %5004 = vmatprep.subr.bf16.mxu0 %v7497_v50  ;;  %5537 = vmatprep.subr.bf16.mxu1 %v7500_v51  ;;  %v7584_v50 = vld [vmem:[%s11225_s1 + $0x4ec] ss:$16 sps:$4 sm:$0xff]   ;;  %v7579_v51 = vld [vmem:[%s11225_s1 + $0x4e0] ss:$16 sps:$4 sm:$0xff]  }
  0x67   :  { %5005 = vmatpush1.bf16.msra.mxu0 %v7495_v53  ;;  %5538 = vmatpush1.bf16.msra.mxu1 %v7498_v54  ;;  %v7582_v53 = vld [vmem:[%s11225_s1 + $0x4e8] ss:$16 sps:$4 sm:$0xff]   ;;  %v7587_v54 = vld [vmem:[%s11225_s1 + $0x504] ss:$16 sps:$4 sm:$0xff]  }
  0x68   :  { %5006 = vmatprep.subr.bf16.mxu0 %v7503_v55  ;;  %5539 = vmatprep.subr.bf16.mxu1 %v7506_v56  ;;  %v7590_v55 = vld [vmem:[%s11225_s1 + $0x50c] ss:$16 sps:$4 sm:$0xff]   ;;  %v7585_v56 = vld [vmem:[%s11225_s1 + $0x500] ss:$16 sps:$4 sm:$0xff]  }
  0x6b   :  { %5007 = vmatpush1.bf16.msra.mxu0 %v7501_v57  ;;  %5540 = vmatpush1.bf16.msra.mxu1 %v7504_v58  ;;  %v7588_v57 = vld [vmem:[%s11225_s1 + $0x508] ss:$16 sps:$4 sm:$0xff]   ;;  %v7593_v58 = vld [vmem:[%s11225_s1 + $0x524] ss:$16 sps:$4 sm:$0xff]  }
  0x6c   :  { %5008 = vmatprep.subr.bf16.mxu0 %v7509_v59  ;;  %5541 = vmatprep.subr.bf16.mxu1 %v7512_v60  ;;  %v7596_v59 = vld [vmem:[%s11225_s1 + $0x52c] ss:$16 sps:$4 sm:$0xff]   ;;  %v7591_v60 = vld [vmem:[%s11225_s1 + $0x520] ss:$16 sps:$4 sm:$0xff]  }
  0x6f   :  { %5009 = vmatpush1.bf16.msra.mxu0 %v7507_v61  ;;  %5542 = vmatpush1.bf16.msra.mxu1 %v7510_v62  ;;  %v7594_v61 = vld [vmem:[%s11225_s1 + $0x528] ss:$16 sps:$4 sm:$0xff]   ;;  %v7599_v62 = vld [vmem:[%s11225_s1 + $0x544] ss:$16 sps:$4 sm:$0xff]  }
  0x70   :  { %5010 = vmatprep.subr.bf16.mxu0 %v7515_v63  ;;  %5543 = vmatprep.subr.bf16.mxu1 %v7518_v0  ;;  %v7602_v63 = vld [vmem:[%s11225_s1 + $0x54c] ss:$16 sps:$4 sm:$0xff]   ;;  %v7597_v0 = vld [vmem:[%s11225_s1 + $0x540] ss:$16 sps:$4 sm:$0xff]  }
  0x73   :  { %5011 = vmatpush1.bf16.msra.mxu0 %v7513_v1  ;;  %5544 = vmatpush1.bf16.msra.mxu1 %v7516_v2  ;;  %v7600_v1 = vld [vmem:[%s11225_s1 + $0x548] ss:$16 sps:$4 sm:$0xff]   ;;  %v7605_v2 = vld [vmem:[%s11225_s1 + $0x564] ss:$16 sps:$4 sm:$0xff]  }
  0x74   :  { %5012 = vmatprep.subr.bf16.mxu0 %v7521_v3  ;;  %5545 = vmatprep.subr.bf16.mxu1 %v7524_v4  ;;  %v7608_v3 = vld [vmem:[%s11225_s1 + $0x56c] ss:$16 sps:$4 sm:$0xff]   ;;  %v7603_v4 = vld [vmem:[%s11225_s1 + $0x560] ss:$16 sps:$4 sm:$0xff]  }
  0x77   :  { %5013 = vmatpush1.bf16.msra.mxu0 %v7519_v5  ;;  %5546 = vmatpush1.bf16.msra.mxu1 %v7522_v6  ;;  %v7606_v5 = vld [vmem:[%s11225_s1 + $0x568] ss:$16 sps:$4 sm:$0xff]   ;;  %v7611_v6 = vld [vmem:[%s11225_s1 + $0x584] ss:$16 sps:$4 sm:$0xff]  }
  0x78   :  { %5014 = vmatprep.subr.bf16.mxu0 %v7527_v7  ;;  %5547 = vmatprep.subr.bf16.mxu1 %v7530_v8  ;;  %v7614_v7 = vld [vmem:[%s11225_s1 + $0x58c] ss:$16 sps:$4 sm:$0xff]   ;;  %v7609_v8 = vld [vmem:[%s11225_s1 + $0x580] ss:$16 sps:$4 sm:$0xff]  }
  0x7b   :  { %5015 = vmatpush1.bf16.msra.mxu0 %v7525_v10  ;;  %5548 = vmatpush1.bf16.msra.mxu1 %v7528_v11  ;;  %v7617_v10 = vld [vmem:[%s11225_s1 + $0x5a4] ss:$16 sps:$4 sm:$0xff]   ;;  %v7620_v11 = vld [vmem:[%s11225_s1 + $0x5ac] ss:$16 sps:$4 sm:$0xff]  }
  0x7c   :  { %5016 = vmatprep.subr.bf16.mxu0 %v7533_v12  ;;  %5549 = vmatprep.subr.bf16.mxu1 %v7536_v52  ;;  %v7615_v12 = vld [vmem:[%s11225_s1 + $0x5a0] ss:$16 sps:$4 sm:$0xff]   ;;  %v7618_v52 = vld [vmem:[%s11225_s1 + $0x5a8] ss:$16 sps:$4 sm:$0xff]  }
  0x7f   :  { %5017 = vmatpush1.bf16.msra.mxu0 %v7531_v15  ;;  %5550 = vmatpush1.bf16.msra.mxu1 %v7534_v16  ;;  %v7623_v15 = vld [vmem:[%s11225_s1 + $0x5c4] ss:$16 sps:$4 sm:$0xff]   ;;  %v7626_v16 = vld [vmem:[%s11225_s1 + $0x5cc] ss:$16 sps:$4 sm:$0xff]  }
  0x80   :  { %5027 = vmatprep.subr.bf16.mxu0 %v7539_v17  ;;  %5560 = vmatprep.subr.bf16.mxu1 %v7542_v18  ;;  %v7621_v17 = vld [vmem:[%s11225_s1 + $0x5c0] ss:$16 sps:$4 sm:$0xff]   ;;  %v7624_v18 = vld [vmem:[%s11225_s1 + $0x5c8] ss:$16 sps:$4 sm:$0xff]  }
  0x82   :  { %5019 = vmatmul.mubr.bf16.vlgmr.msra.gmra.mrb[0].mxu0 %v881_v21  ;;  %5552 = vmatmul.mubr.bf16.vlgmr.msra.gmra.mrb[0].mxu1 %v881_v21  ;;  %v7627_v21 = vld [vmem:[%s11225_s1 + $0x5e0] ss:$16 sps:$4 sm:$0xff]  }
  0x83   :  { %5028 = vmatpush1.bf16.msra.mxu0 %v7537_v20  ;;  %5561 = vmatpush1.bf16.msra.mxu1 %v7540_v22  ;;  %v7632_v20 = vld [vmem:[%s11225_s1 + $0x5ec] ss:$16 sps:$4 sm:$0xff]   ;;  %v7630_v22 = vld [vmem:[%s11225_s1 + $0x5e8] ss:$16 sps:$4 sm:$0xff]  }
  0x84   :  { %5029 = vmatprep.subr.bf16.mxu0 %v7545_v23  ;;  %5562 = vmatprep.subr.bf16.mxu1 %v7548_v24  ;;  %v7636_v23 = vld [vmem:[%s11225_s1 + $0x604] ss:$16 sps:$4 sm:$0xff]   ;;  %v7639_v24 = vld [vmem:[%s11225_s1 + $0x60c] ss:$16 sps:$4 sm:$0xff]  }
  0x85   :  { %5059 = vmatprep.mubr.bf16.mxu0 %v9045_v25  ;;  %5592 = vmatprep.mubr.bf16.mxu1 %v9045_v25 }
  0x87   :  { %5030 = vmatpush1.bf16.msra.mxu0 %v7543_v13  ;;  %5563 = vmatpush1.bf16.msra.mxu1 %v7546_v26  ;;  %v7634_v13 = vld [vmem:[%s11225_s1 + $0x600] ss:$16 sps:$4 sm:$0xff]   ;;  %v9234_v26 = vrot.slane %v9014_v14, %v8750_v49  ;;  %v884_v14 = vcombine.high %v9045_v25, %v9045_v25  ;;  %v7648_v25 = vld [vmem:[%s11225_s1 + $0x644] ss:$16 sps:$4 sm:$0xff]  }
  0x88   :  { %5031 = vmatprep.subr.bf16.mxu0 %v7551_v27  ;;  %5564 = vmatprep.subr.bf16.mxu1 %v7554_v28  ;;  %v7637_v27 = vld [vmem:[%s11225_s1 + $0x608] ss:$16 sps:$4 sm:$0xff]   ;;  %v7642_v28 = vld [vmem:[%s11225_s1 + $0x624] ss:$16 sps:$4 sm:$0xff]  }
  0x8b   :  { %5032 = vmatpush1.bf16.msra.mxu0 %v7549_v29  ;;  %5565 = vmatpush1.bf16.msra.mxu1 %v7552_v30  ;;  %v7645_v29 = vld [vmem:[%s11225_s1 + $0x62c] ss:$16 sps:$4 sm:$0xff]   ;;  %v7640_v30 = vld [vmem:[%s11225_s1 + $0x620] ss:$16 sps:$4 sm:$0xff]  }
  0x8c   :  { %5033 = vmatprep.subr.bf16.mxu0 %v7557_v31  ;;  %5566 = vmatprep.subr.bf16.mxu1 %v7560_v32  ;;  %v7643_v31 = vld [vmem:[%s11225_s1 + $0x628] ss:$16 sps:$4 sm:$0xff]   ;;  %v7651_v32 = vld [vmem:[%s11225_s1 + $0x64c] ss:$16 sps:$4 sm:$0xff]  }
  0x8f   :  { %5034 = vmatpush1.bf16.msra.mxu0 %v7555_v33  ;;  %5567 = vmatpush1.bf16.msra.mxu1 %v7558_v34  ;;  %v7646_v33 = vld [vmem:[%s11225_s1 + $0x640] ss:$16 sps:$4 sm:$0xff]   ;;  %v7649_v34 = vld [vmem:[%s11225_s1 + $0x648] ss:$16 sps:$4 sm:$0xff]  }
  0x90   :  { %5035 = vmatprep.subr.bf16.mxu0 %v7563_v35  ;;  %5568 = vmatprep.subr.bf16.mxu1 %v7566_v36  ;;  %v7654_v35 = vld [vmem:[%s11225_s1 + $0x664] ss:$16 sps:$4 sm:$0xff]   ;;  %v7657_v36 = vld [vmem:[%s11225_s1 + $0x66c] ss:$16 sps:$4 sm:$0xff]  }
  0x93   :  { %5036 = vmatpush1.bf16.msra.mxu0 %v7561_v37  ;;  %5569 = vmatpush1.bf16.msra.mxu1 %v7564_v38  ;;  %v7652_v37 = vld [vmem:[%s11225_s1 + $0x660] ss:$16 sps:$4 sm:$0xff]   ;;  %v7655_v38 = vld [vmem:[%s11225_s1 + $0x668] ss:$16 sps:$4 sm:$0xff]  }
  0x94   :  { %5037 = vmatprep.subr.bf16.mxu0 %v7569_v39  ;;  %5570 = vmatprep.subr.bf16.mxu1 %v7572_v40  ;;  %v7660_v39 = vld [vmem:[%s11225_s1 + $0x684] ss:$16 sps:$4 sm:$0xff]   ;;  %v7663_v40 = vld [vmem:[%s11225_s1 + $0x68c] ss:$16 sps:$4 sm:$0xff]  }
  0x97   :  { %5038 = vmatpush1.bf16.msra.mxu0 %v7567_v41  ;;  %5571 = vmatpush1.bf16.msra.mxu1 %v7570_v43  ;;  %v7658_v41 = vld [vmem:[%s11225_s1 + $0x680] ss:$16 sps:$4 sm:$0xff]   ;;  %v7661_v43 = vld [vmem:[%s11225_s1 + $0x688] ss:$16 sps:$4 sm:$0xff]  }
  0x98   :  { %5039 = vmatprep.subr.bf16.mxu0 %v7575_v44  ;;  %5572 = vmatprep.subr.bf16.mxu1 %v7578_v45  ;;  %v7666_v44 = vld [vmem:[%s11225_s1 + $0x6a4] ss:$16 sps:$4 sm:$0xff]   ;;  %v7669_v45 = vld [vmem:[%s11225_s1 + $0x6ac] ss:$16 sps:$4 sm:$0xff]  }
  0x9b   :  { %5040 = vmatpush1.bf16.msra.mxu0 %v7573_v46  ;;  %5573 = vmatpush1.bf16.msra.mxu1 %v7576_v47  ;;  %v7664_v46 = vld [vmem:[%s11225_s1 + $0x6a0] ss:$16 sps:$4 sm:$0xff]   ;;  %v7667_v47 = vld [vmem:[%s11225_s1 + $0x6a8] ss:$16 sps:$4 sm:$0xff]  }
  0x9c   :  { %5041 = vmatprep.subr.bf16.mxu0 %v7581_v48  ;;  %5574 = vmatprep.subr.bf16.mxu1 %v7584_v50  ;;  %v7672_v48 = vld [vmem:[%s11225_s1 + $0x6c4] ss:$16 sps:$4 sm:$0xff]   ;;  %v7675_v50 = vld [vmem:[%s11225_s1 + $0x6cc] ss:$16 sps:$4 sm:$0xff]  }
  0x9f   :  { %5042 = vmatpush1.bf16.msra.mxu0 %v7579_v51  ;;  %5575 = vmatpush1.bf16.msra.mxu1 %v7582_v53  ;;  %v7670_v51 = vld [vmem:[%s11225_s1 + $0x6c0] ss:$16 sps:$4 sm:$0xff]   ;;  %v7673_v53 = vld [vmem:[%s11225_s1 + $0x6c8] ss:$16 sps:$4 sm:$0xff]  }
  0xa0   :  { %5043 = vmatprep.subr.bf16.mxu0 %v7587_v54  ;;  %5576 = vmatprep.subr.bf16.mxu1 %v7590_v55  ;;  %v7678_v54 = vld [vmem:[%s11225_s1 + $0x6e4] ss:$16 sps:$4 sm:$0xff]   ;;  %v7681_v55 = vld [vmem:[%s11225_s1 + $0x6ec] ss:$16 sps:$4 sm:$0xff]  }
  0xa3   :  { %5044 = vmatpush1.bf16.msra.mxu0 %v7585_v56  ;;  %5577 = vmatpush1.bf16.msra.mxu1 %v7588_v57  ;;  %v7676_v56 = vld [vmem:[%s11225_s1 + $0x6e0] ss:$16 sps:$4 sm:$0xff]   ;;  %v7679_v57 = vld [vmem:[%s11225_s1 + $0x6e8] ss:$16 sps:$4 sm:$0xff]  }
  0xa4   :  { %5045 = vmatprep.subr.bf16.mxu0 %v7593_v58  ;;  %5578 = vmatprep.subr.bf16.mxu1 %v7596_v59  ;;  %v7684_v58 = vld [vmem:[%s11225_s1 + $0x704] ss:$16 sps:$4 sm:$0xff]   ;;  %v7687_v59 = vld [vmem:[%s11225_s1 + $0x70c] ss:$16 sps:$4 sm:$0xff]  }
  0xa7   :  { %5046 = vmatpush1.bf16.msra.mxu0 %v7591_v60  ;;  %5579 = vmatpush1.bf16.msra.mxu1 %v7594_v61  ;;  %v7682_v60 = vld [vmem:[%s11225_s1 + $0x700] ss:$16 sps:$4 sm:$0xff]   ;;  %v7685_v61 = vld [vmem:[%s11225_s1 + $0x708] ss:$16 sps:$4 sm:$0xff]  }
  0xa8   :  { %5047 = vmatprep.subr.bf16.mxu0 %v7599_v62  ;;  %5580 = vmatprep.subr.bf16.mxu1 %v7602_v63  ;;  %v7690_v62 = vld [vmem:[%s11225_s1 + $0x724] ss:$16 sps:$4 sm:$0xff]   ;;  %v7693_v63 = vld [vmem:[%s11225_s1 + $0x72c] ss:$16 sps:$4 sm:$0xff]  }
  0xab   :  { %5048 = vmatpush1.bf16.msra.mxu0 %v7597_v0  ;;  %5581 = vmatpush1.bf16.msra.mxu1 %v7600_v1  ;;  %v7688_v0 = vld [vmem:[%s11225_s1 + $0x720] ss:$16 sps:$4 sm:$0xff]   ;;  %v7691_v1 = vld [vmem:[%s11225_s1 + $0x728] ss:$16 sps:$4 sm:$0xff]  }
  0xac   :  { %5049 = vmatprep.subr.bf16.mxu0 %v7605_v2  ;;  %5582 = vmatprep.subr.bf16.mxu1 %v7608_v3  ;;  %v7696_v2 = vld [vmem:[%s11225_s1 + $0x744] ss:$16 sps:$4 sm:$0xff]   ;;  %v7699_v3 = vld [vmem:[%s11225_s1 + $0x74c] ss:$16 sps:$4 sm:$0xff]  }
  0xaf   :  { %5050 = vmatpush1.bf16.msra.mxu0 %v7603_v4  ;;  %5583 = vmatpush1.bf16.msra.mxu1 %v7606_v5  ;;  %v7694_v4 = vld [vmem:[%s11225_s1 + $0x740] ss:$16 sps:$4 sm:$0xff]   ;;  %v7697_v5 = vld [vmem:[%s11225_s1 + $0x748] ss:$16 sps:$4 sm:$0xff]  }
  0xb0   :  { %5051 = vmatprep.subr.bf16.mxu0 %v7611_v6  ;;  %5584 = vmatprep.subr.bf16.mxu1 %v7614_v7  ;;  %v7702_v6 = vld [vmem:[%s11225_s1 + $0x764] ss:$16 sps:$4 sm:$0xff]   ;;  %v7705_v7 = vld [vmem:[%s11225_s1 + $0x76c] ss:$16 sps:$4 sm:$0xff]  }
  0xb3   :  { %5052 = vmatpush1.bf16.msra.mxu0 %v7609_v8  ;;  %5585 = vmatpush1.bf16.msra.mxu1 %v7612_v9  ;;  %v7700_v8 = vld [vmem:[%s11225_s1 + $0x760] ss:$16 sps:$4 sm:$0xff]   ;;  %v7703_v9 = vld [vmem:[%s11225_s1 + $0x768] ss:$16 sps:$4 sm:$0xff]  }
  0xb4   :  { %5053 = vmatprep.subr.bf16.mxu0 %v7617_v10  ;;  %5586 = vmatprep.subr.bf16.mxu1 %v7620_v11  ;;  %v7708_v10 = vld [vmem:[%s11225_s1 + $0x784] ss:$16 sps:$4 sm:$0xff]   ;;  %v7711_v11 = vld [vmem:[%s11225_s1 + $0x78c] ss:$16 sps:$4 sm:$0xff]  }
  0xb7   :  { %5054 = vmatpush1.bf16.msra.mxu0 %v7615_v12  ;;  %5587 = vmatpush1.bf16.msra.mxu1 %v7618_v52  ;;  %v7706_v12 = vld [vmem:[%s11225_s1 + $0x780] ss:$16 sps:$4 sm:$0xff]   ;;  %v7709_v52 = vld [vmem:[%s11225_s1 + $0x788] ss:$16 sps:$4 sm:$0xff]  }
  0xb8   :  { %5055 = vmatprep.subr.bf16.mxu0 %v7623_v15  ;;  %5588 = vmatprep.subr.bf16.mxu1 %v7626_v16  ;;  %v7714_v15 = vld [vmem:[%s11225_s1 + $0x7a4] ss:$16 sps:$4 sm:$0xff]   ;;  %v7717_v16 = vld [vmem:[%s11225_s1 + $0x7ac] ss:$16 sps:$4 sm:$0xff]  }
  0xbb   :  { %5056 = vmatpush1.bf16.msra.mxu0 %v7621_v17  ;;  %5589 = vmatpush1.bf16.msra.mxu1 %v7624_v18  ;;  %v7712_v17 = vld [vmem:[%s11225_s1 + $0x7a0] ss:$16 sps:$4 sm:$0xff]   ;;  %v7715_v18 = vld [vmem:[%s11225_s1 + $0x7a8] ss:$16 sps:$4 sm:$0xff]  }
  0xbc   :  { %5057 = vmatprep.subr.bf16.mxu0 %v7629_v19  ;;  %5590 = vmatprep.subr.bf16.mxu1 %v7632_v20  ;;  %v7720_v19 = vld [vmem:[%s11225_s1 + $0x7c4] ss:$16 sps:$4 sm:$0xff]   ;;  %v7723_v20 = vld [vmem:[%s11225_s1 + $0x7cc] ss:$16 sps:$4 sm:$0xff]  }
  0xbf   :  { %5058 = vmatpush1.bf16.msra.mxu0 %v7627_v21  ;;  %5591 = vmatpush1.bf16.msra.mxu1 %v7630_v22  ;;  %v9408_v21 = vld.sshfl [vmem:[%s11224_s0 + $0x8] sm:$0xff pattern:$0x75316420]  ;;  %v7718_v22 = vld [vmem:[%s11225_s1 + $0x7c0] ss:$16 sps:$4 sm:$0xff]  }
  0xc0   :  { %5068 = vmatprep.subr.bf16.mxu0 %v7636_v23  ;;  %5601 = vmatprep.subr.bf16.mxu1 %v7639_v24  ;;  %v7721_v23 = vld [vmem:[%s11225_s1 + $0x7c8] ss:$16 sps:$4 sm:$0xff]   ;;  %v7726_v24 = vld [vmem:[%s11225_s1 + $0x7e4] ss:$16 sps:$4 sm:$0xff]  }
  0xc2   :  { %5060 = vmatmul.mubr.bf16.vlgmr.msra.gmra.mrb[0].mxu0 %v9234_v26  ;;  %5593 = vmatmul.mubr.bf16.vlgmr.msra.gmra.mrb[0].mxu1 %v9234_v26 }
  0xc3   :  { %5069 = vmatpush1.bf16.msra.mxu0 %v7634_v13  ;;  %5602 = vmatpush1.bf16.msra.mxu1 %v7637_v27  ;;  %v7729_v13 = vld [vmem:[%s11225_s1 + $0x7ec] ss:$16 sps:$4 sm:$0xff]   ;;  %v7724_v27 = vld [vmem:[%s11225_s1 + $0x7e0] ss:$16 sps:$4 sm:$0xff]  }
  0xc4   :  { %5070 = vmatprep.subr.bf16.mxu0 %v7642_v28  ;;  %5603 = vmatprep.subr.bf16.mxu1 %v7645_v29  ;;  %v7727_v28 = vld [vmem:[%s11225_s1 + $0x7e8] ss:$16 sps:$4 sm:$0xff]   ;;  %v7732_v29 = vld [vmem:[%s11225_s1 + $0x804] ss:$16 sps:$4 sm:$0xff]  }
  0xc5   :  { %5100 = vmatprep.mubr.bf16.mxu0 %v884_v14  ;;  %5633 = vmatprep.mubr.bf16.mxu1 %v884_v14  ;;  %v7735_v14 = vld [vmem:[%s11225_s1 + $0x80c] ss:$16 sps:$4 sm:$0xff]  }
  0xc7   :  { %5071 = vmatpush1.bf16.msra.mxu0 %v7640_v30  ;;  %5604 = vmatpush1.bf16.msra.mxu1 %v7643_v31  ;;  %v900_v30 = vcombine.high %v9408_v21, %v9408_v21  ;;  %v882_v31 = vcombine.high %v9234_v26, %v9234_v26  ;;  %v7741_v26 = vld [vmem:[%s11225_s1 + $0x82c] ss:$16 sps:$4 sm:$0xff]  }
  0xc8   :  { %5072 = vmatprep.subr.bf16.mxu0 %v7648_v25  ;;  %5605 = vmatprep.subr.bf16.mxu1 %v7651_v32  ;;  %v7730_v25 = vld [vmem:[%s11225_s1 + $0x800] ss:$16 sps:$4 sm:$0xff]   ;;  %v7733_v32 = vld [vmem:[%s11225_s1 + $0x808] ss:$16 sps:$4 sm:$0xff]  }
  0xcb   :  { %5073 = vmatpush1.bf16.msra.mxu0 %v7646_v33  ;;  %5606 = vmatpush1.bf16.msra.mxu1 %v7649_v34  ;;  %v7738_v33 = vld [vmem:[%s11225_s1 + $0x824] ss:$16 sps:$4 sm:$0xff]   ;;  %v9451_v34 = vrot.slane %v900_v30, %v8750_v49 }
  0xcc   :  { %5074 = vmatprep.subr.bf16.mxu0 %v7654_v35  ;;  %5607 = vmatprep.subr.bf16.mxu1 %v7657_v36  ;;  %v7736_v35 = vld [vmem:[%s11225_s1 + $0x820] ss:$16 sps:$4 sm:$0xff]   ;;  %v7739_v36 = vld [vmem:[%s11225_s1 + $0x828] ss:$16 sps:$4 sm:$0xff]   ;;  %v7822_v30 = vld [vmem:[%s11225_s1 + $0x9e4] ss:$16 sps:$4 sm:$0xff]  }
  0xcf   :  { %5075 = vmatpush1.bf16.msra.mxu0 %v7652_v37  ;;  %5608 = vmatpush1.bf16.msra.mxu1 %v7655_v38  ;;  %v7744_v37 = vld [vmem:[%s11225_s1 + $0x844] ss:$16 sps:$4 sm:$0xff]   ;;  %v7747_v38 = vld [vmem:[%s11225_s1 + $0x84c] ss:$16 sps:$4 sm:$0xff]  }
  0xd0   :  { %5076 = vmatprep.subr.bf16.mxu0 %v7660_v39  ;;  %5609 = vmatprep.subr.bf16.mxu1 %v7663_v40  ;;  %v7742_v39 = vld [vmem:[%s11225_s1 + $0x840] ss:$16 sps:$4 sm:$0xff]   ;;  %v7745_v40 = vld [vmem:[%s11225_s1 + $0x848] ss:$16 sps:$4 sm:$0xff]  }
  0xd3   :  { %5077 = vmatpush1.bf16.msra.mxu0 %v7658_v41  ;;  %5610 = vmatpush1.bf16.msra.mxu1 %v7661_v43  ;;  %v7750_v41 = vld [vmem:[%s11225_s1 + $0x864] ss:$16 sps:$4 sm:$0xff]   ;;  %v7753_v43 = vld [vmem:[%s11225_s1 + $0x86c] ss:$16 sps:$4 sm:$0xff]  }
  0xd4   :  { %5078 = vmatprep.subr.bf16.mxu0 %v7666_v44  ;;  %5611 = vmatprep.subr.bf16.mxu1 %v7669_v45  ;;  %v7748_v44 = vld [vmem:[%s11225_s1 + $0x860] ss:$16 sps:$4 sm:$0xff]   ;;  %v7751_v45 = vld [vmem:[%s11225_s1 + $0x868] ss:$16 sps:$4 sm:$0xff]  }
  0xd7   :  { %5079 = vmatpush1.bf16.msra.mxu0 %v7664_v46  ;;  %5612 = vmatpush1.bf16.msra.mxu1 %v7667_v47  ;;  %v7756_v46 = vld [vmem:[%s11225_s1 + $0x884] ss:$16 sps:$4 sm:$0xff]   ;;  %v7759_v47 = vld [vmem:[%s11225_s1 + $0x88c] ss:$16 sps:$4 sm:$0xff]  }
  0xd8   :  { %5080 = vmatprep.subr.bf16.mxu0 %v7672_v48  ;;  %5613 = vmatprep.subr.bf16.mxu1 %v7675_v50  ;;  %v7754_v48 = vld [vmem:[%s11225_s1 + $0x880] ss:$16 sps:$4 sm:$0xff]   ;;  %v7757_v50 = vld [vmem:[%s11225_s1 + $0x888] ss:$16 sps:$4 sm:$0xff]  }
  0xdb   :  { %5081 = vmatpush1.bf16.msra.mxu0 %v7670_v51  ;;  %5614 = vmatpush1.bf16.msra.mxu1 %v7673_v53  ;;  %v7762_v51 = vld [vmem:[%s11225_s1 + $0x8a4] ss:$16 sps:$4 sm:$0xff]   ;;  %v7765_v53 = vld [vmem:[%s11225_s1 + $0x8ac] ss:$16 sps:$4 sm:$0xff]  }
  0xdc   :  { %5082 = vmatprep.subr.bf16.mxu0 %v7678_v54  ;;  %5615 = vmatprep.subr.bf16.mxu1 %v7681_v55  ;;  %v7760_v54 = vld [vmem:[%s11225_s1 + $0x8a0] ss:$16 sps:$4 sm:$0xff]   ;;  %v7763_v55 = vld [vmem:[%s11225_s1 + $0x8a8] ss:$16 sps:$4 sm:$0xff]  }
  0xdf   :  { %5083 = vmatpush1.bf16.msra.mxu0 %v7676_v56  ;;  %5616 = vmatpush1.bf16.msra.mxu1 %v7679_v57  ;;  %v7768_v56 = vld [vmem:[%s11225_s1 + $0x8c4] ss:$16 sps:$4 sm:$0xff]   ;;  %v7771_v57 = vld [vmem:[%s11225_s1 + $0x8cc] ss:$16 sps:$4 sm:$0xff]  }
  0xe0   :  { %5084 = vmatprep.subr.bf16.mxu0 %v7684_v58  ;;  %5617 = vmatprep.subr.bf16.mxu1 %v7687_v59  ;;  %v7766_v58 = vld [vmem:[%s11225_s1 + $0x8c0] ss:$16 sps:$4 sm:$0xff]   ;;  %v7769_v59 = vld [vmem:[%s11225_s1 + $0x8c8] ss:$16 sps:$4 sm:$0xff]  }
  0xe3   :  { %5085 = vmatpush1.bf16.msra.mxu0 %v7682_v60  ;;  %5618 = vmatpush1.bf16.msra.mxu1 %v7685_v61  ;;  %v7774_v60 = vld [vmem:[%s11225_s1 + $0x8e4] ss:$16 sps:$4 sm:$0xff]   ;;  %v7777_v61 = vld [vmem:[%s11225_s1 + $0x8ec] ss:$16 sps:$4 sm:$0xff]  }
  0xe4   :  { %5086 = vmatprep.subr.bf16.mxu0 %v7690_v62  ;;  %5619 = vmatprep.subr.bf16.mxu1 %v7693_v63  ;;  %v7772_v62 = vld [vmem:[%s11225_s1 + $0x8e0] ss:$16 sps:$4 sm:$0xff]   ;;  %v7775_v63 = vld [vmem:[%s11225_s1 + $0x8e8] ss:$16 sps:$4 sm:$0xff]  }
  0xe7   :  { %5087 = vmatpush1.bf16.msra.mxu0 %v7688_v0  ;;  %5620 = vmatpush1.bf16.msra.mxu1 %v7691_v1  ;;  %v7780_v0 = vld [vmem:[%s11225_s1 + $0x904] ss:$16 sps:$4 sm:$0xff]   ;;  %v7783_v1 = vld [vmem:[%s11225_s1 + $0x90c] ss:$16 sps:$4 sm:$0xff]  }
  0xe8   :  { %5088 = vmatprep.subr.bf16.mxu0 %v7696_v2  ;;  %5621 = vmatprep.subr.bf16.mxu1 %v7699_v3  ;;  %v7778_v2 = vld [vmem:[%s11225_s1 + $0x900] ss:$16 sps:$4 sm:$0xff]   ;;  %v7781_v3 = vld [vmem:[%s11225_s1 + $0x908] ss:$16 sps:$4 sm:$0xff]  }
  0xeb   :  { %5089 = vmatpush1.bf16.msra.mxu0 %v7694_v4  ;;  %5622 = vmatpush1.bf16.msra.mxu1 %v7697_v5  ;;  %v7786_v4 = vld [vmem:[%s11225_s1 + $0x924] ss:$16 sps:$4 sm:$0xff]   ;;  %v7789_v5 = vld [vmem:[%s11225_s1 + $0x92c] ss:$16 sps:$4 sm:$0xff]  }
  0xec   :  { %5090 = vmatprep.subr.bf16.mxu0 %v7702_v6  ;;  %5623 = vmatprep.subr.bf16.mxu1 %v7705_v7  ;;  %v7784_v6 = vld [vmem:[%s11225_s1 + $0x920] ss:$16 sps:$4 sm:$0xff]   ;;  %v7787_v7 = vld [vmem:[%s11225_s1 + $0x928] ss:$16 sps:$4 sm:$0xff]  }
  0xef   :  { %5091 = vmatpush1.bf16.msra.mxu0 %v7700_v8  ;;  %5624 = vmatpush1.bf16.msra.mxu1 %v7703_v9  ;;  %v7792_v8 = vld [vmem:[%s11225_s1 + $0x944] ss:$16 sps:$4 sm:$0xff]   ;;  %v7795_v9 = vld [vmem:[%s11225_s1 + $0x94c] ss:$16 sps:$4 sm:$0xff]  }
  0xf0   :  { %5092 = vmatprep.subr.bf16.mxu0 %v7708_v10  ;;  %5625 = vmatprep.subr.bf16.mxu1 %v7711_v11  ;;  %v7790_v10 = vld [vmem:[%s11225_s1 + $0x940] ss:$16 sps:$4 sm:$0xff]   ;;  %v7793_v11 = vld [vmem:[%s11225_s1 + $0x948] ss:$16 sps:$4 sm:$0xff]  }
  0xf3   :  { %5093 = vmatpush1.bf16.msra.mxu0 %v7706_v12  ;;  %5626 = vmatpush1.bf16.msra.mxu1 %v7709_v52  ;;  %v7798_v12 = vld [vmem:[%s11225_s1 + $0x964] ss:$16 sps:$4 sm:$0xff]   ;;  %v7801_v52 = vld [vmem:[%s11225_s1 + $0x96c] ss:$16 sps:$4 sm:$0xff]  }
  0xf4   :  { %5094 = vmatprep.subr.bf16.mxu0 %v7714_v15  ;;  %5627 = vmatprep.subr.bf16.mxu1 %v7717_v16  ;;  %v7796_v15 = vld [vmem:[%s11225_s1 + $0x960] ss:$16 sps:$4 sm:$0xff]   ;;  %v7799_v16 = vld [vmem:[%s11225_s1 + $0x968] ss:$16 sps:$4 sm:$0xff]  }
  0xf7   :  { %5095 = vmatpush1.bf16.msra.mxu0 %v7712_v17  ;;  %5628 = vmatpush1.bf16.msra.mxu1 %v7715_v18  ;;  %v7804_v17 = vld [vmem:[%s11225_s1 + $0x984] ss:$16 sps:$4 sm:$0xff]   ;;  %v7807_v18 = vld [vmem:[%s11225_s1 + $0x98c] ss:$16 sps:$4 sm:$0xff]  }
  0xf8   :  { %5096 = vmatprep.subr.bf16.mxu0 %v7720_v19  ;;  %5629 = vmatprep.subr.bf16.mxu1 %v7723_v20  ;;  %v7802_v19 = vld [vmem:[%s11225_s1 + $0x980] ss:$16 sps:$4 sm:$0xff]   ;;  %v7805_v20 = vld [vmem:[%s11225_s1 + $0x988] ss:$16 sps:$4 sm:$0xff]  }
  0xfb   :  { %5097 = vmatpush1.bf16.msra.mxu0 %v7718_v22  ;;  %5630 = vmatpush1.bf16.msra.mxu1 %v7721_v23  ;;  %v7810_v22 = vld [vmem:[%s11225_s1 + $0x9a4] ss:$16 sps:$4 sm:$0xff]   ;;  %v7813_v23 = vld [vmem:[%s11225_s1 + $0x9ac] ss:$16 sps:$4 sm:$0xff]  }
  0xfc   :  { %5098 = vmatprep.subr.bf16.mxu0 %v7726_v24  ;;  %5631 = vmatprep.subr.bf16.mxu1 %v7729_v13  ;;  %v7808_v24 = vld [vmem:[%s11225_s1 + $0x9a0] ss:$16 sps:$4 sm:$0xff]   ;;  %v7811_v13 = vld [vmem:[%s11225_s1 + $0x9a8] ss:$16 sps:$4 sm:$0xff]  }
  0xff   :  { %5099 = vmatpush1.bf16.msra.mxu0 %v7724_v27  ;;  %5632 = vmatpush1.bf16.msra.mxu1 %v7727_v28  ;;  %v7816_v27 = vld [vmem:[%s11225_s1 + $0x9c4] ss:$16 sps:$4 sm:$0xff]   ;;  %v7819_v28 = vld [vmem:[%s11225_s1 + $0x9cc] ss:$16 sps:$4 sm:$0xff]  }
 0x100   :  { %5109 = vmatprep.subr.bf16.mxu0 %v7732_v29  ;;  %5642 = vmatprep.subr.bf16.mxu1 %v7735_v14  ;;  %v7814_v29 = vld [vmem:[%s11225_s1 + $0x9c0] ss:$16 sps:$4 sm:$0xff]   ;;  %v7817_v14 = vld [vmem:[%s11225_s1 + $0x9c8] ss:$16 sps:$4 sm:$0xff]  }
 0x102   :  { %5101 = vmatmul.mubr.bf16.vlgmr.msra.gmra.mrb[0].mxu0 %v882_v31  ;;  %5634 = vmatmul.mubr.bf16.vlgmr.msra.gmra.mrb[0].mxu1 %v882_v31  ;;  %v7825_v31 = vld [vmem:[%s11225_s1 + $0x9ec] ss:$16 sps:$4 sm:$0xff]  }
 0x103   :  { %5110 = vmatpush1.bf16.msra.mxu0 %v7730_v25  ;;  %5643 = vmatpush1.bf16.msra.mxu1 %v7733_v32  ;;  %v7820_v25 = vld [vmem:[%s11225_s1 + $0x9e0] ss:$16 sps:$4 sm:$0xff]   ;;  %v7823_v32 = vld [vmem:[%s11225_s1 + $0x9e8] ss:$16 sps:$4 sm:$0xff]  }
 0x104   :  { %5111 = vmatprep.subr.bf16.mxu0 %v7738_v33  ;;  %5644 = vmatprep.subr.bf16.mxu1 %v7741_v26  ;;  %v7828_v33 = vld [vmem:[%s11225_s1 + $0xa04] ss:$16 sps:$4 sm:$0xff]   ;;  %v7831_v26 = vld [vmem:[%s11225_s1 + $0xa0c] ss:$16 sps:$4 sm:$0xff]  }
 0x105   :  { %5141 = vmatprep.mubr.bf16.mxu0 %v9451_v34  ;;  %5674 = vmatprep.mubr.bf16.mxu1 %v9451_v34 }
 0x107   :  { %5112 = vmatpush1.bf16.msra.mxu0 %v7736_v35  ;;  %5645 = vmatpush1.bf16.msra.mxu1 %v7739_v36  ;;  %v9637_v35 = vrot.slane %v9408_v21, %v8750_v49  ;;  %v7826_v36 = vld [vmem:[%s11225_s1 + $0xa00] ss:$16 sps:$4 sm:$0xff]   ;;  %v7837_v21 = vld [vmem:[%s11225_s1 + $0xa2c] ss:$16 sps:$4 sm:$0xff]  }
 0x108   :  { %5113 = vmatprep.subr.bf16.mxu0 %v7744_v37  ;;  %5646 = vmatprep.subr.bf16.mxu1 %v7747_v38  ;;  %v7829_v37 = vld [vmem:[%s11225_s1 + $0xa08] ss:$16 sps:$4 sm:$0xff]   ;;  %v7834_v38 = vld [vmem:[%s11225_s1 + $0xa24] ss:$16 sps:$4 sm:$0xff]  }
 0x10b   :  { %5114 = vmatpush1.bf16.msra.mxu0 %v7742_v39  ;;  %5647 = vmatpush1.bf16.msra.mxu1 %v7745_v40  ;;  %v932_v39 = vcombine.high %v9451_v34, %v9451_v34  ;;  %v7832_v40 = vld [vmem:[%s11225_s1 + $0xa20] ss:$16 sps:$4 sm:$0xff]   ;;  %v7840_v34 = vld [vmem:[%s11225_s1 + $0xa44] ss:$16 sps:$4 sm:$0xff]  }
 0x10c   :  { %5115 = vmatprep.subr.bf16.mxu0 %v7750_v41  ;;  %5648 = vmatprep.subr.bf16.mxu1 %v7753_v43  ;;  %v7835_v41 = vld [vmem:[%s11225_s1 + $0xa28] ss:$16 sps:$4 sm:$0xff]   ;;  %v7843_v43 = vld [vmem:[%s11225_s1 + $0xa4c] ss:$16 sps:$4 sm:$0xff]  }
 0x10f   :  { %5116 = vmatpush1.bf16.msra.mxu0 %v7748_v44  ;;  %5649 = vmatpush1.bf16.msra.mxu1 %v7751_v45  ;;  %v7838_v44 = vld [vmem:[%s11225_s1 + $0xa40] ss:$16 sps:$4 sm:$0xff]   ;;  %v7841_v45 = vld [vmem:[%s11225_s1 + $0xa48] ss:$16 sps:$4 sm:$0xff]  }
 0x110   :  { %5117 = vmatprep.subr.bf16.mxu0 %v7756_v46  ;;  %5650 = vmatprep.subr.bf16.mxu1 %v7759_v47  ;;  %v7846_v46 = vld [vmem:[%s11225_s1 + $0xa64] ss:$16 sps:$4 sm:$0xff]   ;;  %v7849_v47 = vld [vmem:[%s11225_s1 + $0xa6c] ss:$16 sps:$4 sm:$0xff]  }
 0x113   :  { %5118 = vmatpush1.bf16.msra.mxu0 %v7754_v48  ;;  %5651 = vmatpush1.bf16.msra.mxu1 %v7757_v50  ;;  %v7844_v48 = vld [vmem:[%s11225_s1 + $0xa60] ss:$16 sps:$4 sm:$0xff]   ;;  %v7847_v50 = vld [vmem:[%s11225_s1 + $0xa68] ss:$16 sps:$4 sm:$0xff]  }
 0x114   :  { %5119 = vmatprep.subr.bf16.mxu0 %v7762_v51  ;;  %5652 = vmatprep.subr.bf16.mxu1 %v7765_v53  ;;  %v7852_v51 = vld [vmem:[%s11225_s1 + $0xa84] ss:$16 sps:$4 sm:$0xff]   ;;  %v7855_v53 = vld [vmem:[%s11225_s1 + $0xa8c] ss:$16 sps:$4 sm:$0xff]  }
 0x117   :  { %5120 = vmatpush1.bf16.msra.mxu0 %v7760_v54  ;;  %5653 = vmatpush1.bf16.msra.mxu1 %v7763_v55  ;;  %v7850_v54 = vld [vmem:[%s11225_s1 + $0xa80] ss:$16 sps:$4 sm:$0xff]   ;;  %v7853_v55 = vld [vmem:[%s11225_s1 + $0xa88] ss:$16 sps:$4 sm:$0xff]  }
 0x118   :  { %5121 = vmatprep.subr.bf16.mxu0 %v7768_v56  ;;  %5654 = vmatprep.subr.bf16.mxu1 %v7771_v57  ;;  %v7858_v56 = vld [vmem:[%s11225_s1 + $0xaa4] ss:$16 sps:$4 sm:$0xff]   ;;  %v7861_v57 = vld [vmem:[%s11225_s1 + $0xaac] ss:$16 sps:$4 sm:$0xff]  }
 0x11b   :  { %5122 = vmatpush1.bf16.msra.mxu0 %v7766_v58  ;;  %5655 = vmatpush1.bf16.msra.mxu1 %v7769_v59  ;;  %v7856_v58 = vld [vmem:[%s11225_s1 + $0xaa0] ss:$16 sps:$4 sm:$0xff]   ;;  %v7859_v59 = vld [vmem:[%s11225_s1 + $0xaa8] ss:$16 sps:$4 sm:$0xff]  }
 0x11c   :  { %5123 = vmatprep.subr.bf16.mxu0 %v7774_v60  ;;  %5656 = vmatprep.subr.bf16.mxu1 %v7777_v61  ;;  %v7864_v60 = vld [vmem:[%s11225_s1 + $0xac4] ss:$16 sps:$4 sm:$0xff]   ;;  %v7867_v61 = vld [vmem:[%s11225_s1 + $0xacc] ss:$16 sps:$4 sm:$0xff]  }
 0x11f   :  { %5124 = vmatpush1.bf16.msra.mxu0 %v7772_v62  ;;  %5657 = vmatpush1.bf16.msra.mxu1 %v7775_v63  ;;  %v7862_v62 = vld [vmem:[%s11225_s1 + $0xac0] ss:$16 sps:$4 sm:$0xff]   ;;  %v7865_v63 = vld [vmem:[%s11225_s1 + $0xac8] ss:$16 sps:$4 sm:$0xff]  }
 0x120   :  { %5125 = vmatprep.subr.bf16.mxu0 %v7780_v0  ;;  %5658 = vmatprep.subr.bf16.mxu1 %v7783_v1  ;;  %v7870_v0 = vld [vmem:[%s11225_s1 + $0xae4] ss:$16 sps:$4 sm:$0xff]   ;;  %v7873_v1 = vld [vmem:[%s11225_s1 + $0xaec] ss:$16 sps:$4 sm:$0xff]  }
 0x123   :  { %5126 = vmatpush1.bf16.msra.mxu0 %v7778_v2  ;;  %5659 = vmatpush1.bf16.msra.mxu1 %v7781_v3  ;;  %v7868_v2 = vld [vmem:[%s11225_s1 + $0xae0] ss:$16 sps:$4 sm:$0xff]   ;;  %v7871_v3 = vld [vmem:[%s11225_s1 + $0xae8] ss:$16 sps:$4 sm:$0xff]  }
 0x124   :  { %5127 = vmatprep.subr.bf16.mxu0 %v7786_v4  ;;  %5660 = vmatprep.subr.bf16.mxu1 %v7789_v5  ;;  %v7876_v4 = vld [vmem:[%s11225_s1 + $0xb04] ss:$16 sps:$4 sm:$0xff]   ;;  %v7879_v5 = vld [vmem:[%s11225_s1 + $0xb0c] ss:$16 sps:$4 sm:$0xff]  }
 0x127   :  { %5128 = vmatpush1.bf16.msra.mxu0 %v7784_v6  ;;  %5661 = vmatpush1.bf16.msra.mxu1 %v7787_v7  ;;  %v7874_v6 = vld [vmem:[%s11225_s1 + $0xb00] ss:$16 sps:$4 sm:$0xff]   ;;  %v7877_v7 = vld [vmem:[%s11225_s1 + $0xb08] ss:$16 sps:$4 sm:$0xff]  }
 0x128   :  { %5129 = vmatprep.subr.bf16.mxu0 %v7792_v8  ;;  %5662 = vmatprep.subr.bf16.mxu1 %v7795_v9  ;;  %v7882_v8 = vld [vmem:[%s11225_s1 + $0xb24] ss:$16 sps:$4 sm:$0xff]   ;;  %v7885_v9 = vld [vmem:[%s11225_s1 + $0xb2c] ss:$16 sps:$4 sm:$0xff]  }
 0x12b   :  { %5130 = vmatpush1.bf16.msra.mxu0 %v7790_v10  ;;  %5663 = vmatpush1.bf16.msra.mxu1 %v7793_v11  ;;  %v7880_v10 = vld [vmem:[%s11225_s1 + $0xb20] ss:$16 sps:$4 sm:$0xff]   ;;  %v7883_v11 = vld [vmem:[%s11225_s1 + $0xb28] ss:$16 sps:$4 sm:$0xff]  }
 0x12c   :  { %5131 = vmatprep.subr.bf16.mxu0 %v7798_v12  ;;  %5664 = vmatprep.subr.bf16.mxu1 %v7801_v52  ;;  %v7888_v12 = vld [vmem:[%s11225_s1 + $0xb44] ss:$16 sps:$4 sm:$0xff]   ;;  %v7891_v52 = vld [vmem:[%s11225_s1 + $0xb4c] ss:$16 sps:$4 sm:$0xff]  }
 0x12f   :  { %5132 = vmatpush1.bf16.msra.mxu0 %v7796_v15  ;;  %5665 = vmatpush1.bf16.msra.mxu1 %v7799_v16  ;;  %v7886_v15 = vld [vmem:[%s11225_s1 + $0xb40] ss:$16 sps:$4 sm:$0xff]   ;;  %v7889_v16 = vld [vmem:[%s11225_s1 + $0xb48] ss:$16 sps:$4 sm:$0xff]  }
 0x130   :  { %5133 = vmatprep.subr.bf16.mxu0 %v7804_v17  ;;  %5666 = vmatprep.subr.bf16.mxu1 %v7807_v18  ;;  %v7894_v17 = vld [vmem:[%s11225_s1 + $0xb64] ss:$16 sps:$4 sm:$0xff]   ;;  %v7897_v18 = vld [vmem:[%s11225_s1 + $0xb6c] ss:$16 sps:$4 sm:$0xff]  }
 0x133   :  { %5134 = vmatpush1.bf16.msra.mxu0 %v7802_v19  ;;  %5667 = vmatpush1.bf16.msra.mxu1 %v7805_v20  ;;  %v7892_v19 = vld [vmem:[%s11225_s1 + $0xb60] ss:$16 sps:$4 sm:$0xff]   ;;  %v7895_v20 = vld [vmem:[%s11225_s1 + $0xb68] ss:$16 sps:$4 sm:$0xff]  }
 0x134   :  { %5135 = vmatprep.subr.bf16.mxu0 %v7810_v22  ;;  %5668 = vmatprep.subr.bf16.mxu1 %v7813_v23  ;;  %v7900_v22 = vld [vmem:[%s11225_s1 + $0xb84] ss:$16 sps:$4 sm:$0xff]   ;;  %v7903_v23 = vld [vmem:[%s11225_s1 + $0xb8c] ss:$16 sps:$4 sm:$0xff]  }
 0x137   :  { %5136 = vmatpush1.bf16.msra.mxu0 %v7808_v24  ;;  %5669 = vmatpush1.bf16.msra.mxu1 %v7811_v13  ;;  %v7898_v24 = vld [vmem:[%s11225_s1 + $0xb80] ss:$16 sps:$4 sm:$0xff]   ;;  %v7901_v13 = vld [vmem:[%s11225_s1 + $0xb88] ss:$16 sps:$4 sm:$0xff]  }
 0x138   :  { %5137 = vmatprep.subr.bf16.mxu0 %v7816_v27  ;;  %5670 = vmatprep.subr.bf16.mxu1 %v7819_v28  ;;  %v7906_v27 = vld [vmem:[%s11225_s1 + $0xba4] ss:$16 sps:$4 sm:$0xff]   ;;  %v7909_v28 = vld [vmem:[%s11225_s1 + $0xbac] ss:$16 sps:$4 sm:$0xff]  }
 0x13b   :  { %5138 = vmatpush1.bf16.msra.mxu0 %v7814_v29  ;;  %5671 = vmatpush1.bf16.msra.mxu1 %v7817_v14  ;;  %v7904_v29 = vld [vmem:[%s11225_s1 + $0xba0] ss:$16 sps:$4 sm:$0xff]   ;;  %v7907_v14 = vld [vmem:[%s11225_s1 + $0xba8] ss:$16 sps:$4 sm:$0xff]  }
 0x13c   :  { %5139 = vmatprep.subr.bf16.mxu0 %v7822_v30  ;;  %5672 = vmatprep.subr.bf16.mxu1 %v7825_v31  ;;  %v7912_v30 = vld [vmem:[%s11225_s1 + $0xbc4] ss:$16 sps:$4 sm:$0xff]   ;;  %v7915_v31 = vld [vmem:[%s11225_s1 + $0xbcc] ss:$16 sps:$4 sm:$0xff]  }
 0x13f   :  { %5140 = vmatpush1.bf16.msra.mxu0 %v7820_v25  ;;  %5673 = vmatpush1.bf16.msra.mxu1 %v7823_v32  ;;  %v8556_v25 = vld [vmem:[%s11224_s0 + $0x8] sm:$0xff] }
 0x140   :  { %5150 = vmatprep.subr.bf16.mxu0 %v7828_v33  ;;  %5683 = vmatprep.subr.bf16.mxu1 %v7831_v26  ;;  %v885_v32 = vcombine.high %v8556_v25, %v8556_v25  ;;  %v7910_v33 = vld [vmem:[%s11225_s1 + $0xbc0] ss:$16 sps:$4 sm:$0xff]   ;;  %v7913_v26 = vld [vmem:[%s11225_s1 + $0xbc8] ss:$16 sps:$4 sm:$0xff]  }
 0x141   :  { %v7994_v25 = vld [vmem:[%s11225_s1 + $0xd80] ss:$16 sps:$4 sm:$0xff]  }
 0x142   :  { %5142 = vmatmul.mubr.bf16.vlgmr.msra.gmra.mrb[0].mxu0 %v9637_v35  ;;  %5675 = vmatmul.mubr.bf16.vlgmr.msra.gmra.mrb[0].mxu1 %v9637_v35 }
 0x143   :  { %5151 = vmatpush1.bf16.msra.mxu0 %v7826_v36  ;;  %5684 = vmatpush1.bf16.msra.mxu1 %v7829_v37  ;;  %v7918_v36 = vld [vmem:[%s11225_s1 + $0xbe4] ss:$16 sps:$4 sm:$0xff]   ;;  %v7921_v37 = vld [vmem:[%s11225_s1 + $0xbec] ss:$16 sps:$4 sm:$0xff]  }
 0x144   :  { %5152 = vmatprep.subr.bf16.mxu0 %v7834_v38  ;;  %5685 = vmatprep.subr.bf16.mxu1 %v7837_v21  ;;  %v9827_v38 = vrot.slane %v885_v32, %v8750_v49  ;;  %v7916_v21 = vld [vmem:[%s11225_s1 + $0xbe0] ss:$16 sps:$4 sm:$0xff]   ;;  %v7997_v32 = vld [vmem:[%s11225_s1 + $0xd88] ss:$16 sps:$4 sm:$0xff]  }
 0x145   :  { %5182 = vmatprep.mubr.bf16.mxu0 %v932_v39  ;;  %5715 = vmatprep.mubr.bf16.mxu1 %v932_v39  ;;  %v7919_v39 = vld [vmem:[%s11225_s1 + $0xbe8] ss:$16 sps:$4 sm:$0xff]  }
 0x147   :  { %5153 = vmatpush1.bf16.msra.mxu0 %v7832_v40  ;;  %5686 = vmatpush1.bf16.msra.mxu1 %v7835_v41  ;;  %v7924_v40 = vld [vmem:[%s11225_s1 + $0xc04] ss:$16 sps:$4 sm:$0xff]   ;;  %v7927_v41 = vld [vmem:[%s11225_s1 + $0xc0c] ss:$16 sps:$4 sm:$0xff]  }
 0x148   :  { %5154 = vmatprep.subr.bf16.mxu0 %v7840_v34  ;;  %5687 = vmatprep.subr.bf16.mxu1 %v7843_v43  ;;  %v901_v34 = vcombine.high %v9827_v38, %v9827_v38  ;;  %v930_v43 = vcombine.high %v9637_v35, %v9637_v35  ;;  %v7933_v35 = vld [vmem:[%s11225_s1 + $0xc2c] ss:$16 sps:$4 sm:$0xff]  }
 0x14b   :  { %5155 = vmatpush1.bf16.msra.mxu0 %v7838_v44  ;;  %5688 = vmatpush1.bf16.msra.mxu1 %v7841_v45  ;;  %v7922_v44 = vld [vmem:[%s11225_s1 + $0xc00] ss:$16 sps:$4 sm:$0xff]   ;;  %v7925_v45 = vld [vmem:[%s11225_s1 + $0xc08] ss:$16 sps:$4 sm:$0xff]  }
 0x14c   :  { %5156 = vmatprep.subr.bf16.mxu0 %v7846_v46  ;;  %5689 = vmatprep.subr.bf16.mxu1 %v7849_v47  ;;  %v7930_v46 = vld [vmem:[%s11225_s1 + $0xc24] ss:$16 sps:$4 sm:$0xff]   ;;  %v9858_v47 = vrot.slane %v901_v34, %v8750_v49 }
 0x14d   :  { %v8014_v34 = vld [vmem:[%s11225_s1 + $0xde4] ss:$16 sps:$4 sm:$0xff]  }
 0x14f   :  { %5157 = vmatpush1.bf16.msra.mxu0 %v7844_v48  ;;  %5690 = vmatpush1.bf16.msra.mxu1 %v7847_v50  ;;  %v7928_v48 = vld [vmem:[%s11225_s1 + $0xc20] ss:$16 sps:$4 sm:$0xff]   ;;  %v7931_v50 = vld [vmem:[%s11225_s1 + $0xc28] ss:$16 sps:$4 sm:$0xff]  }
 0x150   :  { %5158 = vmatprep.subr.bf16.mxu0 %v7852_v51  ;;  %5691 = vmatprep.subr.bf16.mxu1 %v7855_v53  ;;  %v7936_v51 = vld [vmem:[%s11225_s1 + $0xc44] ss:$16 sps:$4 sm:$0xff]   ;;  %v7939_v53 = vld [vmem:[%s11225_s1 + $0xc4c] ss:$16 sps:$4 sm:$0xff]  }
 0x153   :  { %5159 = vmatpush1.bf16.msra.mxu0 %v7850_v54  ;;  %5692 = vmatpush1.bf16.msra.mxu1 %v7853_v55  ;;  %v7934_v54 = vld [vmem:[%s11225_s1 + $0xc40] ss:$16 sps:$4 sm:$0xff]   ;;  %v7937_v55 = vld [vmem:[%s11225_s1 + $0xc48] ss:$16 sps:$4 sm:$0xff]  }
 0x154   :  { %5160 = vmatprep.subr.bf16.mxu0 %v7858_v56  ;;  %5693 = vmatprep.subr.bf16.mxu1 %v7861_v57  ;;  %v7942_v56 = vld [vmem:[%s11225_s1 + $0xc64] ss:$16 sps:$4 sm:$0xff]   ;;  %v7945_v57 = vld [vmem:[%s11225_s1 + $0xc6c] ss:$16 sps:$4 sm:$0xff]  }
 0x157   :  { %5161 = vmatpush1.bf16.msra.mxu0 %v7856_v58  ;;  %5694 = vmatpush1.bf16.msra.mxu1 %v7859_v59  ;;  %v7940_v58 = vld [vmem:[%s11225_s1 + $0xc60] ss:$16 sps:$4 sm:$0xff]   ;;  %v7943_v59 = vld [vmem:[%s11225_s1 + $0xc68] ss:$16 sps:$4 sm:$0xff]  }
 0x158   :  { %5162 = vmatprep.subr.bf16.mxu0 %v7864_v60  ;;  %5695 = vmatprep.subr.bf16.mxu1 %v7867_v61  ;;  %v7948_v60 = vld [vmem:[%s11225_s1 + $0xc84] ss:$16 sps:$4 sm:$0xff]   ;;  %v7951_v61 = vld [vmem:[%s11225_s1 + $0xc8c] ss:$16 sps:$4 sm:$0xff]  }
 0x15b   :  { %5163 = vmatpush1.bf16.msra.mxu0 %v7862_v62  ;;  %5696 = vmatpush1.bf16.msra.mxu1 %v7865_v63  ;;  %v7946_v62 = vld [vmem:[%s11225_s1 + $0xc80] ss:$16 sps:$4 sm:$0xff]   ;;  %v7949_v63 = vld [vmem:[%s11225_s1 + $0xc88] ss:$16 sps:$4 sm:$0xff]  }
 0x15c   :  { %5164 = vmatprep.subr.bf16.mxu0 %v7870_v0  ;;  %5697 = vmatprep.subr.bf16.mxu1 %v7873_v1  ;;  %v7954_v0 = vld [vmem:[%s11225_s1 + $0xca4] ss:$16 sps:$4 sm:$0xff]   ;;  %v7957_v1 = vld [vmem:[%s11225_s1 + $0xcac] ss:$16 sps:$4 sm:$0xff]  }
 0x15f   :  { %5165 = vmatpush1.bf16.msra.mxu0 %v7868_v2  ;;  %5698 = vmatpush1.bf16.msra.mxu1 %v7871_v3  ;;  %v7952_v2 = vld [vmem:[%s11225_s1 + $0xca0] ss:$16 sps:$4 sm:$0xff]   ;;  %v7955_v3 = vld [vmem:[%s11225_s1 + $0xca8] ss:$16 sps:$4 sm:$0xff]  }
 0x160   :  { %5166 = vmatprep.subr.bf16.mxu0 %v7876_v4  ;;  %5699 = vmatprep.subr.bf16.mxu1 %v7879_v5  ;;  %v7960_v4 = vld [vmem:[%s11225_s1 + $0xcc4] ss:$16 sps:$4 sm:$0xff]   ;;  %v7963_v5 = vld [vmem:[%s11225_s1 + $0xccc] ss:$16 sps:$4 sm:$0xff]  }
 0x163   :  { %5167 = vmatpush1.bf16.msra.mxu0 %v7874_v6  ;;  %5700 = vmatpush1.bf16.msra.mxu1 %v7877_v7  ;;  %v7958_v6 = vld [vmem:[%s11225_s1 + $0xcc0] ss:$16 sps:$4 sm:$0xff]   ;;  %v7961_v7 = vld [vmem:[%s11225_s1 + $0xcc8] ss:$16 sps:$4 sm:$0xff]  }
 0x164   :  { %5168 = vmatprep.subr.bf16.mxu0 %v7882_v8  ;;  %5701 = vmatprep.subr.bf16.mxu1 %v7885_v9  ;;  %v7966_v8 = vld [vmem:[%s11225_s1 + $0xce4] ss:$16 sps:$4 sm:$0xff]   ;;  %v7969_v9 = vld [vmem:[%s11225_s1 + $0xcec] ss:$16 sps:$4 sm:$0xff]  }
 0x167   :  { %5169 = vmatpush1.bf16.msra.mxu0 %v7880_v10  ;;  %5702 = vmatpush1.bf16.msra.mxu1 %v7883_v11  ;;  %v7964_v10 = vld [vmem:[%s11225_s1 + $0xce0] ss:$16 sps:$4 sm:$0xff]   ;;  %v7967_v11 = vld [vmem:[%s11225_s1 + $0xce8] ss:$16 sps:$4 sm:$0xff]  }
 0x168   :  { %5170 = vmatprep.subr.bf16.mxu0 %v7888_v12  ;;  %5703 = vmatprep.subr.bf16.mxu1 %v7891_v52  ;;  %v7972_v12 = vld [vmem:[%s11225_s1 + $0xd04] ss:$16 sps:$4 sm:$0xff]   ;;  %v7975_v52 = vld [vmem:[%s11225_s1 + $0xd0c] ss:$16 sps:$4 sm:$0xff]  }
 0x16b   :  { %5171 = vmatpush1.bf16.msra.mxu0 %v7886_v15  ;;  %5704 = vmatpush1.bf16.msra.mxu1 %v7889_v16  ;;  %v7970_v15 = vld [vmem:[%s11225_s1 + $0xd00] ss:$16 sps:$4 sm:$0xff]   ;;  %v7973_v16 = vld [vmem:[%s11225_s1 + $0xd08] ss:$16 sps:$4 sm:$0xff]  }
 0x16c   :  { %5172 = vmatprep.subr.bf16.mxu0 %v7894_v17  ;;  %5705 = vmatprep.subr.bf16.mxu1 %v7897_v18  ;;  %v7978_v17 = vld [vmem:[%s11225_s1 + $0xd24] ss:$16 sps:$4 sm:$0xff]   ;;  %v7981_v18 = vld [vmem:[%s11225_s1 + $0xd2c] ss:$16 sps:$4 sm:$0xff]  }
 0x16f   :  { %5173 = vmatpush1.bf16.msra.mxu0 %v7892_v19  ;;  %5706 = vmatpush1.bf16.msra.mxu1 %v7895_v20  ;;  %v7976_v19 = vld [vmem:[%s11225_s1 + $0xd20] ss:$16 sps:$4 sm:$0xff]   ;;  %v7979_v20 = vld [vmem:[%s11225_s1 + $0xd28] ss:$16 sps:$4 sm:$0xff]  }
 0x170   :  { %5174 = vmatprep.subr.bf16.mxu0 %v7900_v22  ;;  %5707 = vmatprep.subr.bf16.mxu1 %v7903_v23  ;;  %v7984_v22 = vld [vmem:[%s11225_s1 + $0xd44] ss:$16 sps:$4 sm:$0xff]   ;;  %v7987_v23 = vld [vmem:[%s11225_s1 + $0xd4c] ss:$16 sps:$4 sm:$0xff]  }
 0x173   :  { %5175 = vmatpush1.bf16.msra.mxu0 %v7898_v24  ;;  %5708 = vmatpush1.bf16.msra.mxu1 %v7901_v13  ;;  %v7982_v24 = vld [vmem:[%s11225_s1 + $0xd40] ss:$16 sps:$4 sm:$0xff]   ;;  %v7985_v13 = vld [vmem:[%s11225_s1 + $0xd48] ss:$16 sps:$4 sm:$0xff]  }
 0x174   :  { %5176 = vmatprep.subr.bf16.mxu0 %v7906_v27  ;;  %5709 = vmatprep.subr.bf16.mxu1 %v7909_v28  ;;  %v7990_v27 = vld [vmem:[%s11225_s1 + $0xd64] ss:$16 sps:$4 sm:$0xff]   ;;  %v7993_v28 = vld [vmem:[%s11225_s1 + $0xd6c] ss:$16 sps:$4 sm:$0xff]  }
 0x177   :  { %5177 = vmatpush1.bf16.msra.mxu0 %v7904_v29  ;;  %5710 = vmatpush1.bf16.msra.mxu1 %v7907_v14  ;;  %v7988_v29 = vld [vmem:[%s11225_s1 + $0xd60] ss:$16 sps:$4 sm:$0xff]   ;;  %v7991_v14 = vld [vmem:[%s11225_s1 + $0xd68] ss:$16 sps:$4 sm:$0xff]  }
 0x178   :  { %5178 = vmatprep.subr.bf16.mxu0 %v7912_v30  ;;  %5711 = vmatprep.subr.bf16.mxu1 %v7915_v31  ;;  %v7996_v30 = vld [vmem:[%s11225_s1 + $0xd84] ss:$16 sps:$4 sm:$0xff]   ;;  %v7999_v31 = vld [vmem:[%s11225_s1 + $0xd8c] ss:$16 sps:$4 sm:$0xff]  }
 0x17b   :  { %5179 = vmatpush1.bf16.msra.mxu0 %v7910_v33  ;;  %5712 = vmatpush1.bf16.msra.mxu1 %v7913_v26  ;;  %v8002_v33 = vld [vmem:[%s11225_s1 + $0xda4] ss:$16 sps:$4 sm:$0xff]   ;;  %v8005_v26 = vld [vmem:[%s11225_s1 + $0xdac] ss:$16 sps:$4 sm:$0xff]  }
 0x17c   :  { %5180 = vmatprep.subr.bf16.mxu0 %v7918_v36  ;;  %5713 = vmatprep.subr.bf16.mxu1 %v7921_v37  ;;  %v8000_v36 = vld [vmem:[%s11225_s1 + $0xda0] ss:$16 sps:$4 sm:$0xff]   ;;  %v8003_v37 = vld [vmem:[%s11225_s1 + $0xda8] ss:$16 sps:$4 sm:$0xff]  }
 0x17f   :  { %5181 = vmatpush1.bf16.msra.mxu0 %v7916_v21  ;;  %5714 = vmatpush1.bf16.msra.mxu1 %v7919_v39  ;;  %v8008_v21 = vld [vmem:[%s11225_s1 + $0xdc4] ss:$16 sps:$4 sm:$0xff]   ;;  %v8011_v39 = vld [vmem:[%s11225_s1 + $0xdcc] ss:$16 sps:$4 sm:$0xff]  }
 0x180   :  { %5191 = vmatprep.subr.bf16.mxu0 %v7924_v40  ;;  %5724 = vmatprep.subr.bf16.mxu1 %v7927_v41  ;;  %v8006_v40 = vld [vmem:[%s11225_s1 + $0xdc0] ss:$16 sps:$4 sm:$0xff]   ;;  %v8009_v41 = vld [vmem:[%s11225_s1 + $0xdc8] ss:$16 sps:$4 sm:$0xff]  }
 0x182   :  { %5183 = vmatmul.mubr.bf16.vlgmr.msra.gmra.mrb[0].mxu0 %v930_v43  ;;  %5716 = vmatmul.mubr.bf16.vlgmr.msra.gmra.mrb[0].mxu1 %v930_v43  ;;  %v8017_v43 = vld [vmem:[%s11225_s1 + $0xdec] ss:$16 sps:$4 sm:$0xff]  }
 0x183   :  { %5192 = vmatpush1.bf16.msra.mxu0 %v7922_v44  ;;  %5725 = vmatpush1.bf16.msra.mxu1 %v7925_v45  ;;  %v8012_v44 = vld [vmem:[%s11225_s1 + $0xde0] ss:$16 sps:$4 sm:$0xff]   ;;  %v8015_v45 = vld [vmem:[%s11225_s1 + $0xde8] ss:$16 sps:$4 sm:$0xff]  }
 0x184   :  { %5193 = vmatprep.subr.bf16.mxu0 %v7930_v46  ;;  %5726 = vmatprep.subr.bf16.mxu1 %v7933_v35  ;;  %v8021_v46 = vld [vmem:[%s11225_s1 + $0xe04] ss:$16 sps:$4 sm:$0xff]   ;;  %v8024_v35 = vld [vmem:[%s11225_s1 + $0xe0c] ss:$16 sps:$4 sm:$0xff]  }
 0x185   :  { %5223 = vmatprep.mubr.bf16.mxu0 %v9858_v47  ;;  %5756 = vmatprep.mubr.bf16.mxu1 %v9858_v47 }
 0x187   :  { %5194 = vmatpush1.bf16.msra.mxu0 %v7928_v48  ;;  %5727 = vmatpush1.bf16.msra.mxu1 %v7931_v50  ;;  %v10044_v48 = vrot.slane %v9827_v38, %v8750_v49  ;;  %v8019_v50 = vld [vmem:[%s11225_s1 + $0xe00] ss:$16 sps:$4 sm:$0xff]   ;;  %v8030_v38 = vld [vmem:[%s11225_s1 + $0xe2c] ss:$16 sps:$4 sm:$0xff]  }
 0x188   :  { %5195 = vmatprep.subr.bf16.mxu0 %v7936_v51  ;;  %5728 = vmatprep.subr.bf16.mxu1 %v7939_v53  ;;  %v8022_v51 = vld [vmem:[%s11225_s1 + $0xe08] ss:$16 sps:$4 sm:$0xff]   ;;  %v8027_v53 = vld [vmem:[%s11225_s1 + $0xe24] ss:$16 sps:$4 sm:$0xff]  }
 0x18b   :  { %5196 = vmatpush1.bf16.msra.mxu0 %v7934_v54  ;;  %5729 = vmatpush1.bf16.msra.mxu1 %v7937_v55  ;;  %v933_v54 = vcombine.high %v9858_v47, %v9858_v47  ;;  %v8025_v55 = vld [vmem:[%s11225_s1 + $0xe20] ss:$16 sps:$4 sm:$0xff]   ;;  %v8033_v47 = vld [vmem:[%s11225_s1 + $0xe44] ss:$16 sps:$4 sm:$0xff]  }
 0x18c   :  { %5197 = vmatprep.subr.bf16.mxu0 %v7942_v56  ;;  %5730 = vmatprep.subr.bf16.mxu1 %v7945_v57  ;;  %v8028_v56 = vld [vmem:[%s11225_s1 + $0xe28] ss:$16 sps:$4 sm:$0xff]   ;;  %v8036_v57 = vld [vmem:[%s11225_s1 + $0xe4c] ss:$16 sps:$4 sm:$0xff]  }
 0x18f   :  { %5198 = vmatpush1.bf16.msra.mxu0 %v7940_v58  ;;  %5731 = vmatpush1.bf16.msra.mxu1 %v7943_v59  ;;  %v8031_v58 = vld [vmem:[%s11225_s1 + $0xe40] ss:$16 sps:$4 sm:$0xff]   ;;  %v8034_v59 = vld [vmem:[%s11225_s1 + $0xe48] ss:$16 sps:$4 sm:$0xff]  }
 0x190   :  { %5199 = vmatprep.subr.bf16.mxu0 %v7948_v60  ;;  %5732 = vmatprep.subr.bf16.mxu1 %v7951_v61  ;;  %v8039_v60 = vld [vmem:[%s11225_s1 + $0xe64] ss:$16 sps:$4 sm:$0xff]   ;;  %v8042_v61 = vld [vmem:[%s11225_s1 + $0xe6c] ss:$16 sps:$4 sm:$0xff]  }
 0x193   :  { %5200 = vmatpush1.bf16.msra.mxu0 %v7946_v62  ;;  %5733 = vmatpush1.bf16.msra.mxu1 %v7949_v63  ;;  %v8037_v62 = vld [vmem:[%s11225_s1 + $0xe60] ss:$16 sps:$4 sm:$0xff]   ;;  %v8040_v63 = vld [vmem:[%s11225_s1 + $0xe68] ss:$16 sps:$4 sm:$0xff]  }
 0x194   :  { %5201 = vmatprep.subr.bf16.mxu0 %v7954_v0  ;;  %5734 = vmatprep.subr.bf16.mxu1 %v7957_v1  ;;  %v8045_v0 = vld [vmem:[%s11225_s1 + $0xe84] ss:$16 sps:$4 sm:$0xff]   ;;  %v8048_v1 = vld [vmem:[%s11225_s1 + $0xe8c] ss:$16 sps:$4 sm:$0xff]  }
 0x197   :  { %5202 = vmatpush1.bf16.msra.mxu0 %v7952_v2  ;;  %5735 = vmatpush1.bf16.msra.mxu1 %v7955_v3  ;;  %v8043_v2 = vld [vmem:[%s11225_s1 + $0xe80] ss:$16 sps:$4 sm:$0xff]   ;;  %v8046_v3 = vld [vmem:[%s11225_s1 + $0xe88] ss:$16 sps:$4 sm:$0xff]  }
 0x198   :  { %5203 = vmatprep.subr.bf16.mxu0 %v7960_v4  ;;  %5736 = vmatprep.subr.bf16.mxu1 %v7963_v5  ;;  %v8051_v4 = vld [vmem:[%s11225_s1 + $0xea4] ss:$16 sps:$4 sm:$0xff]   ;;  %v8054_v5 = vld [vmem:[%s11225_s1 + $0xeac] ss:$16 sps:$4 sm:$0xff]  }
 0x19b   :  { %5204 = vmatpush1.bf16.msra.mxu0 %v7958_v6  ;;  %5737 = vmatpush1.bf16.msra.mxu1 %v7961_v7  ;;  %v8049_v6 = vld [vmem:[%s11225_s1 + $0xea0] ss:$16 sps:$4 sm:$0xff]   ;;  %v8052_v7 = vld [vmem:[%s11225_s1 + $0xea8] ss:$16 sps:$4 sm:$0xff]  }
 0x19c   :  { %5205 = vmatprep.subr.bf16.mxu0 %v7966_v8  ;;  %5738 = vmatprep.subr.bf16.mxu1 %v7969_v9  ;;  %v8057_v8 = vld [vmem:[%s11225_s1 + $0xec4] ss:$16 sps:$4 sm:$0xff]   ;;  %v8060_v9 = vld [vmem:[%s11225_s1 + $0xecc] ss:$16 sps:$4 sm:$0xff]  }
 0x19f   :  { %5206 = vmatpush1.bf16.msra.mxu0 %v7964_v10  ;;  %5739 = vmatpush1.bf16.msra.mxu1 %v7967_v11  ;;  %v8055_v10 = vld [vmem:[%s11225_s1 + $0xec0] ss:$16 sps:$4 sm:$0xff]   ;;  %v8058_v11 = vld [vmem:[%s11225_s1 + $0xec8] ss:$16 sps:$4 sm:$0xff]  }
 0x1a0   :  { %5207 = vmatprep.subr.bf16.mxu0 %v7972_v12  ;;  %5740 = vmatprep.subr.bf16.mxu1 %v7975_v52  ;;  %v8063_v12 = vld [vmem:[%s11225_s1 + $0xee4] ss:$16 sps:$4 sm:$0xff]   ;;  %v8066_v52 = vld [vmem:[%s11225_s1 + $0xeec] ss:$16 sps:$4 sm:$0xff]  }
 0x1a3   :  { %5208 = vmatpush1.bf16.msra.mxu0 %v7970_v15  ;;  %5741 = vmatpush1.bf16.msra.mxu1 %v7973_v16  ;;  %v8061_v15 = vld [vmem:[%s11225_s1 + $0xee0] ss:$16 sps:$4 sm:$0xff]   ;;  %v8064_v16 = vld [vmem:[%s11225_s1 + $0xee8] ss:$16 sps:$4 sm:$0xff]  }
 0x1a4   :  { %5209 = vmatprep.subr.bf16.mxu0 %v7978_v17  ;;  %5742 = vmatprep.subr.bf16.mxu1 %v7981_v18  ;;  %v8069_v17 = vld [vmem:[%s11225_s1 + $0xf04] ss:$16 sps:$4 sm:$0xff]   ;;  %v8072_v18 = vld [vmem:[%s11225_s1 + $0xf0c] ss:$16 sps:$4 sm:$0xff]  }
 0x1a7   :  { %5210 = vmatpush1.bf16.msra.mxu0 %v7976_v19  ;;  %5743 = vmatpush1.bf16.msra.mxu1 %v7979_v20  ;;  %v8067_v19 = vld [vmem:[%s11225_s1 + $0xf00] ss:$16 sps:$4 sm:$0xff]   ;;  %v8070_v20 = vld [vmem:[%s11225_s1 + $0xf08] ss:$16 sps:$4 sm:$0xff]  }
 0x1a8   :  { %5211 = vmatprep.subr.bf16.mxu0 %v7984_v22  ;;  %5744 = vmatprep.subr.bf16.mxu1 %v7987_v23  ;;  %v8075_v22 = vld [vmem:[%s11225_s1 + $0xf24] ss:$16 sps:$4 sm:$0xff]   ;;  %v8078_v23 = vld [vmem:[%s11225_s1 + $0xf2c] ss:$16 sps:$4 sm:$0xff]  }
 0x1ab   :  { %5212 = vmatpush1.bf16.msra.mxu0 %v7982_v24  ;;  %5745 = vmatpush1.bf16.msra.mxu1 %v7985_v13  ;;  %v8073_v24 = vld [vmem:[%s11225_s1 + $0xf20] ss:$16 sps:$4 sm:$0xff]   ;;  %v8076_v13 = vld [vmem:[%s11225_s1 + $0xf28] ss:$16 sps:$4 sm:$0xff]  }
 0x1ac   :  { %5213 = vmatprep.subr.bf16.mxu0 %v7990_v27  ;;  %5746 = vmatprep.subr.bf16.mxu1 %v7993_v28  ;;  %v8081_v27 = vld [vmem:[%s11225_s1 + $0xf44] ss:$16 sps:$4 sm:$0xff]   ;;  %v8084_v28 = vld [vmem:[%s11225_s1 + $0xf4c] ss:$16 sps:$4 sm:$0xff]  }
 0x1af   :  { %5214 = vmatpush1.bf16.msra.mxu0 %v7988_v29  ;;  %5747 = vmatpush1.bf16.msra.mxu1 %v7991_v14  ;;  %v8079_v29 = vld [vmem:[%s11225_s1 + $0xf40] ss:$16 sps:$4 sm:$0xff]   ;;  %v8082_v14 = vld [vmem:[%s11225_s1 + $0xf48] ss:$16 sps:$4 sm:$0xff]  }
 0x1b0   :  { %5215 = vmatprep.subr.bf16.mxu0 %v7996_v30  ;;  %5748 = vmatprep.subr.bf16.mxu1 %v7999_v31  ;;  %v8087_v30 = vld [vmem:[%s11225_s1 + $0xf64] ss:$16 sps:$4 sm:$0xff]   ;;  %v8090_v31 = vld [vmem:[%s11225_s1 + $0xf6c] ss:$16 sps:$4 sm:$0xff]  }
 0x1b3   :  { %5216 = vmatpush1.bf16.msra.mxu0 %v7994_v25  ;;  %5749 = vmatpush1.bf16.msra.mxu1 %v7997_v32 }
 0x1b4   :  { %5217 = vmatprep.subr.bf16.mxu0 %v8002_v33  ;;  %5750 = vmatprep.subr.bf16.mxu1 %v8005_v26 }
 0x1b7   :  { %5218 = vmatpush1.bf16.msra.mxu0 %v8000_v36  ;;  %5751 = vmatpush1.bf16.msra.mxu1 %v8003_v37 }
 0x1b8   :  { %5219 = vmatprep.subr.bf16.mxu0 %v8008_v21  ;;  %5752 = vmatprep.subr.bf16.mxu1 %v8011_v39 }
 0x1bb   :  { %5220 = vmatpush1.bf16.msra.mxu0 %v8006_v40  ;;  %5753 = vmatpush1.bf16.msra.mxu1 %v8009_v41 }
 0x1bc   :  { %5221 = vmatprep.subr.bf16.mxu0 %v8014_v34  ;;  %5754 = vmatprep.subr.bf16.mxu1 %v8017_v43 }
 0x1bf   :  { %5222 = vmatpush1.bf16.msra.mxu0 %v8012_v44  ;;  %5755 = vmatpush1.bf16.msra.mxu1 %v8015_v45 }
 0x1c0   :  { %5232 = vmatprep.subr.bf16.mxu0 %v8021_v46  ;;  %5765 = vmatprep.subr.bf16.mxu1 %v8024_v35 }
 0x1c2   :  { %5224 = vmatmul.mubr.bf16.vlgmr.msra.gmra.mrb[0].mxu0 %v10044_v48  ;;  %5757 = vmatmul.mubr.bf16.vlgmr.msra.gmra.mrb[0].mxu1 %v10044_v48 }
 0x1c3   :  { %5233 = vmatpush1.bf16.msra.mxu0 %v8019_v50  ;;  %5766 = vmatpush1.bf16.msra.mxu1 %v8022_v51 }
 0x1c4   :  { %5234 = vmatprep.subr.bf16.mxu0 %v8027_v53  ;;  %5767 = vmatprep.subr.bf16.mxu1 %v8030_v38 }
 0x1c5   :  { %5264 = vmatprep.mubr.bf16.mxu0 %v933_v54  ;;  %5797 = vmatprep.mubr.bf16.mxu1 %v933_v54 }
 0x1c7   :  { %5235 = vmatpush1.bf16.msra.mxu0 %v8025_v55  ;;  %5768 = vmatpush1.bf16.msra.mxu1 %v8028_v56 }
 0x1c8   :  { %5236 = vmatprep.subr.bf16.mxu0 %v8033_v47  ;;  %5769 = vmatprep.subr.bf16.mxu1 %v8036_v57 }
 0x1cb   :  { %5237 = vmatpush1.bf16.msra.mxu0 %v8031_v58  ;;  %5770 = vmatpush1.bf16.msra.mxu1 %v8034_v59 }
 0x1cc   :  { %5238 = vmatprep.subr.bf16.mxu0 %v8039_v60  ;;  %5771 = vmatprep.subr.bf16.mxu1 %v8042_v61 }
 0x1cf   :  { %5239 = vmatpush1.bf16.msra.mxu0 %v8037_v62  ;;  %5772 = vmatpush1.bf16.msra.mxu1 %v8040_v63 }
 0x1d0   :  { %5240 = vmatprep.subr.bf16.mxu0 %v8045_v0  ;;  %5773 = vmatprep.subr.bf16.mxu1 %v8048_v1 }
 0x1d3   :  { %5241 = vmatpush1.bf16.msra.mxu0 %v8043_v2  ;;  %5774 = vmatpush1.bf16.msra.mxu1 %v8046_v3 }
 0x1d4   :  { %5242 = vmatprep.subr.bf16.mxu0 %v8051_v4  ;;  %5775 = vmatprep.subr.bf16.mxu1 %v8054_v5 }
 0x1d7   :  { %5243 = vmatpush1.bf16.msra.mxu0 %v8049_v6  ;;  %5776 = vmatpush1.bf16.msra.mxu1 %v8052_v7 }
 0x1d8   :  { %5244 = vmatprep.subr.bf16.mxu0 %v8057_v8  ;;  %5777 = vmatprep.subr.bf16.mxu1 %v8060_v9 }
 0x1db   :  { %5245 = vmatpush1.bf16.msra.mxu0 %v8055_v10  ;;  %5778 = vmatpush1.bf16.msra.mxu1 %v8058_v11 }
 0x1dc   :  { %5246 = vmatprep.subr.bf16.mxu0 %v8063_v12  ;;  %5779 = vmatprep.subr.bf16.mxu1 %v8066_v52 }
 0x1df   :  { %5247 = vmatpush1.bf16.msra.mxu0 %v8061_v15  ;;  %5780 = vmatpush1.bf16.msra.mxu1 %v8064_v16 }
 0x1e0   :  { %5248 = vmatprep.subr.bf16.mxu0 %v8069_v17  ;;  %5781 = vmatprep.subr.bf16.mxu1 %v8072_v18 }
 0x1e3   :  { %5249 = vmatpush1.bf16.msra.mxu0 %v8067_v19  ;;  %5782 = vmatpush1.bf16.msra.mxu1 %v8070_v20 }
 0x1e4   :  { %5250 = vmatprep.subr.bf16.mxu0 %v8075_v22  ;;  %5783 = vmatprep.subr.bf16.mxu1 %v8078_v23 }
 0x1e7   :  { %5251 = vmatpush1.bf16.msra.mxu0 %v8073_v24  ;;  %5784 = vmatpush1.bf16.msra.mxu1 %v8076_v13 }
 0x1e8   :  { %5252 = vmatprep.subr.bf16.mxu0 %v8081_v27  ;;  %5785 = vmatprep.subr.bf16.mxu1 %v8084_v28 }
 0x1e9   :  { %10 = vsyncpa [#allocation3], 0  ;;  %v8085_v25 = vld [vmem:[%s11225_s1 + $0xf60] ss:$16 sps:$4 sm:$0xff]   ;;  %v8088_v32 = vld [vmem:[%s11225_s1 + $0xf68] ss:$16 sps:$4 sm:$0xff]   ;;  %v931_v47 = vcombine.high %v10044_v48, %v10044_v48 }
 0x1ea   :  { %v8093_v33 = vld [vmem:[%s11225_s1 + $0xf84] ss:$16 sps:$4 sm:$0xff]   ;;  %v8096_v26 = vld [vmem:[%s11225_s1 + $0xf8c] ss:$16 sps:$4 sm:$0xff]   ;;  %v8091_v36 = vld [vmem:[%s11225_s1 + $0xf80] ss:$16 sps:$4 sm:$0xff]  }
 0x1eb   :  { %5253 = vmatpush1.bf16.msra.mxu0 %v8079_v29  ;;  %5786 = vmatpush1.bf16.msra.mxu1 %v8082_v14  ;;  %v8094_v37 = vld [vmem:[%s11225_s1 + $0xf88] ss:$16 sps:$4 sm:$0xff]   ;;  %v8099_v21 = vld [vmem:[%s11225_s1 + $0xfa4] ss:$16 sps:$4 sm:$0xff]   ;;  %v8102_v39 = vld [vmem:[%s11225_s1 + $0xfac] ss:$16 sps:$4 sm:$0xff]  }
 0x1ec   :  { %5254 = vmatprep.subr.bf16.mxu0 %v8087_v30  ;;  %5787 = vmatprep.subr.bf16.mxu1 %v8090_v31  ;;  %v8097_v40 = vld [vmem:[%s11225_s1 + $0xfa0] ss:$16 sps:$4 sm:$0xff]   ;;  %v8100_v41 = vld [vmem:[%s11225_s1 + $0xfa8] ss:$16 sps:$4 sm:$0xff]   ;;  %v8105_v34 = vld [vmem:[%s11225_s1 + $0xfc4] ss:$16 sps:$4 sm:$0xff]  }
 0x1ed   :  { %v8108_v43 = vld [vmem:[%s11225_s1 + $0xfcc] ss:$16 sps:$4 sm:$0xff]   ;;  %v10221_v44 = vld [vmem:[%s11224_s0 + $0x10] sm:$0xff]  ;;  %v8106_v46 = vld [vmem:[%s11225_s1 + $0xfc8] ss:$16 sps:$4 sm:$0xff]   ;;  %vm4941_vm0 = vcmask 523264  }
 0x1ee   :  { %v8103_v45 = vld [vmem:[%s11225_s1 + $0xfc0] ss:$16 sps:$4 sm:$0xff]   ;;  %v8111_v35 = vld [vmem:[%s11225_s1 + $0xfe4] ss:$16 sps:$4 sm:$0xff]   ;;  %v8114_v50 = vld [vmem:[%s11225_s1 + $0xfec] ss:$16 sps:$4 sm:$0xff]   ;;  %v10237_v51 = vrot.slane %v10221_v44, %v8750_v49 }
 0x1ef   :  { %5255 = vmatpush1.bf16.msra.mxu0 %v8085_v25  ;;  %5788 = vmatpush1.bf16.msra.mxu1 %v8088_v32  ;;  %v8109_v53 = vld [vmem:[%s11225_s1 + $0xfe0] ss:$16 sps:$4 sm:$0xff]   ;;  %v8112_v38 = vld [vmem:[%s11225_s1 + $0xfe8] ss:$16 sps:$4 sm:$0xff]   ;;  %v8117_v54 = vld [vmem:[%s11225_s1 + $0x1004] ss:$16 sps:$4 sm:$0xff]  }
 0x1f0   :  { %5256 = vmatprep.subr.bf16.mxu0 %v8093_v33  ;;  %5789 = vmatprep.subr.bf16.mxu1 %v8096_v26  ;;  %v8120_v55 = vld [vmem:[%s11225_s1 + $0x100c] ss:$16 sps:$4 sm:$0xff]   ;;  %v949_v56 = vcombine.high %v10237_v51, %v10237_v51  ;;  %v8115_v57 = vld [vmem:[%s11225_s1 + $0x1000] ss:$16 sps:$4 sm:$0xff]   ;;  %v8118_v58 = vld [vmem:[%s11225_s1 + $0x1008] ss:$16 sps:$4 sm:$0xff]  }
 0x1f1   :  { %v8123_v59 = vld [vmem:[%s11225_s1 + $0x1024] ss:$16 sps:$4 sm:$0xff]   ;;  %v8126_v48 = vld [vmem:[%s11225_s1 + $0x102c] ss:$16 sps:$4 sm:$0xff]   ;;  %v8121_v61 = vld [vmem:[%s11225_s1 + $0x1020] ss:$16 sps:$4 sm:$0xff]  }
 0x1f2   :  { %v10268_v60 = vrot.slane %v949_v56, %v8750_v49  ;;  %v8124_v62 = vld [vmem:[%s11225_s1 + $0x1028] ss:$16 sps:$4 sm:$0xff]   ;;  %v8129_v63 = vld [vmem:[%s11225_s1 + $0x1044] ss:$16 sps:$4 sm:$0xff]   ;;  %v8132_v0 = vld [vmem:[%s11225_s1 + $0x104c] ss:$16 sps:$4 sm:$0xff]  }
 0x1f3   :  { %5257 = vmatpush1.bf16.msra.mxu0 %v8091_v36  ;;  %5790 = vmatpush1.bf16.msra.mxu1 %v8094_v37  ;;  %v8127_v1 = vld [vmem:[%s11225_s1 + $0x1040] ss:$16 sps:$4 sm:$0xff]   ;;  %v8130_v2 = vld [vmem:[%s11225_s1 + $0x1048] ss:$16 sps:$4 sm:$0xff]   ;;  %v8135_v3 = vld [vmem:[%s11225_s1 + $0x1064] ss:$16 sps:$4 sm:$0xff]  }
 0x1f4   :  { %5258 = vmatprep.subr.bf16.mxu0 %v8099_v21  ;;  %5791 = vmatprep.subr.bf16.mxu1 %v8102_v39  ;;  %v8138_v4 = vld [vmem:[%s11225_s1 + $0x106c] ss:$16 sps:$4 sm:$0xff]   ;;  %v8133_v5 = vld [vmem:[%s11225_s1 + $0x1060] ss:$16 sps:$4 sm:$0xff]   ;;  %v8136_v6 = vld [vmem:[%s11225_s1 + $0x1068] ss:$16 sps:$4 sm:$0xff]  }
 0x1f5   :  { %v8141_v7 = vld [vmem:[%s11225_s1 + $0x1084] ss:$16 sps:$4 sm:$0xff]   ;;  %v8144_v8 = vld [vmem:[%s11225_s1 + $0x108c] ss:$16 sps:$4 sm:$0xff]   ;;  %v8139_v9 = vld [vmem:[%s11225_s1 + $0x1080] ss:$16 sps:$4 sm:$0xff]  }
 0x1f6   :  { %v8142_v10 = vld [vmem:[%s11225_s1 + $0x1088] ss:$16 sps:$4 sm:$0xff]   ;;  %v8147_v11 = vld [vmem:[%s11225_s1 + $0x10a4] ss:$16 sps:$4 sm:$0xff]   ;;  %v8150_v12 = vld [vmem:[%s11225_s1 + $0x10ac] ss:$16 sps:$4 sm:$0xff]  }
 0x1f7   :  { %5259 = vmatpush1.bf16.msra.mxu0 %v8097_v40  ;;  %5792 = vmatpush1.bf16.msra.mxu1 %v8100_v41  ;;  %v8145_v52 = vld [vmem:[%s11225_s1 + $0x10a0] ss:$16 sps:$4 sm:$0xff]   ;;  %v8148_v15 = vld [vmem:[%s11225_s1 + $0x10a8] ss:$16 sps:$4 sm:$0xff]   ;;  %v8153_v16 = vld [vmem:[%s11225_s1 + $0x10c4] ss:$16 sps:$4 sm:$0xff]  }
 0x1f8   :  { %5260 = vmatprep.subr.bf16.mxu0 %v8105_v34  ;;  %5793 = vmatprep.subr.bf16.mxu1 %v8108_v43  ;;  %v8156_v17 = vld [vmem:[%s11225_s1 + $0x10cc] ss:$16 sps:$4 sm:$0xff]   ;;  %v8151_v18 = vld [vmem:[%s11225_s1 + $0x10c0] ss:$16 sps:$4 sm:$0xff]   ;;  %v8154_v19 = vld [vmem:[%s11225_s1 + $0x10c8] ss:$16 sps:$4 sm:$0xff]  }
 0x1f9   :  { %v8159_v20 = vld [vmem:[%s11225_s1 + $0x10e4] ss:$16 sps:$4 sm:$0xff]   ;;  %v8162_v22 = vld [vmem:[%s11225_s1 + $0x10ec] ss:$16 sps:$4 sm:$0xff]   ;;  %v8157_v23 = vld [vmem:[%s11225_s1 + $0x10e0] ss:$16 sps:$4 sm:$0xff]  }
 0x1fa   :  { %v8160_v24 = vld [vmem:[%s11225_s1 + $0x10e8] ss:$16 sps:$4 sm:$0xff]   ;;  %v8165_v13 = vld [vmem:[%s11225_s1 + $0x1104] ss:$16 sps:$4 sm:$0xff]   ;;  %v8168_v27 = vld [vmem:[%s11225_s1 + $0x110c] ss:$16 sps:$4 sm:$0xff]  }
 0x1fb   :  { %5261 = vmatpush1.bf16.msra.mxu0 %v8103_v45  ;;  %5794 = vmatpush1.bf16.msra.mxu1 %v8106_v46  ;;  %v8163_v28 = vld [vmem:[%s11225_s1 + $0x1100] ss:$16 sps:$4 sm:$0xff]   ;;  %v8166_v29 = vld [vmem:[%s11225_s1 + $0x1108] ss:$16 sps:$4 sm:$0xff]   ;;  %v8171_v14 = vld [vmem:[%s11225_s1 + $0x1124] ss:$16 sps:$4 sm:$0xff]  }
 0x1fc   :  { %5262 = vmatprep.subr.bf16.mxu0 %v8111_v35  ;;  %5795 = vmatprep.subr.bf16.mxu1 %v8114_v50  ;;  %v8174_v30 = vld [vmem:[%s11225_s1 + $0x112c] ss:$16 sps:$4 sm:$0xff]   ;;  %v8169_v31 = vld [vmem:[%s11225_s1 + $0x1120] ss:$16 sps:$4 sm:$0xff]   ;;  %v8172_v25 = vld [vmem:[%s11225_s1 + $0x1128] ss:$16 sps:$4 sm:$0xff]  }
 0x1fd   :  { %v8177_v32 = vld [vmem:[%s11225_s1 + $0x1144] ss:$16 sps:$4 sm:$0xff]   ;;  %v8180_v33 = vld [vmem:[%s11225_s1 + $0x114c] ss:$16 sps:$4 sm:$0xff]   ;;  %v8175_v26 = vld [vmem:[%s11225_s1 + $0x1140] ss:$16 sps:$4 sm:$0xff]  }
 0x1fe   :  { %v8178_v36 = vld [vmem:[%s11225_s1 + $0x1148] ss:$16 sps:$4 sm:$0xff]   ;;  %v8183_v37 = vld [vmem:[%s11225_s1 + $0x1164] ss:$16 sps:$4 sm:$0xff]   ;;  %v8186_v21 = vld [vmem:[%s11225_s1 + $0x116c] ss:$16 sps:$4 sm:$0xff]  }
 0x1ff   :  { %5263 = vmatpush1.bf16.msra.mxu0 %v8109_v53  ;;  %5796 = vmatpush1.bf16.msra.mxu1 %v8112_v38  ;;  %v8181_v39 = vld [vmem:[%s11225_s1 + $0x1160] ss:$16 sps:$4 sm:$0xff]   ;;  %v8184_v40 = vld [vmem:[%s11225_s1 + $0x1168] ss:$16 sps:$4 sm:$0xff]   ;;  %v8189_v41 = vld [vmem:[%s11225_s1 + $0x1184] ss:$16 sps:$4 sm:$0xff]  }
 0x200   :  { %5273 = vmatprep.subr.bf16.mxu0 %v8117_v54  ;;  %5806 = vmatprep.subr.bf16.mxu1 %v8120_v55  ;;  %v8192_v34 = vld [vmem:[%s11225_s1 + $0x118c] ss:$16 sps:$4 sm:$0xff]   ;;  %v8187_v43 = vld [vmem:[%s11225_s1 + $0x1180] ss:$16 sps:$4 sm:$0xff]   ;;  %v8190_v45 = vld [vmem:[%s11225_s1 + $0x1188] ss:$16 sps:$4 sm:$0xff]  }
 0x201   :  { %v8195_v46 = vld [vmem:[%s11225_s1 + $0x11a4] ss:$16 sps:$4 sm:$0xff]   ;;  %v8198_v35 = vld [vmem:[%s11225_s1 + $0x11ac] ss:$16 sps:$4 sm:$0xff]   ;;  %v8193_v50 = vld [vmem:[%s11225_s1 + $0x11a0] ss:$16 sps:$4 sm:$0xff]  }
 0x202   :  { %5265 = vmatmul.mubr.bf16.vlgmr.msra.gmra.mrb[0].mxu0 %v931_v47  ;;  %5798 = vmatmul.mubr.bf16.vlgmr.msra.gmra.mrb[0].mxu1 %v931_v47  ;;  %v8196_v53 = vld [vmem:[%s11225_s1 + $0x11a8] ss:$16 sps:$4 sm:$0xff]   ;;  %v8201_v38 = vld [vmem:[%s11225_s1 + $0x11c4] ss:$16 sps:$4 sm:$0xff]   ;;  %v8204_v54 = vld [vmem:[%s11225_s1 + $0x11cc] ss:$16 sps:$4 sm:$0xff]  }
 0x203   :  { %5274 = vmatpush1.bf16.msra.mxu0 %v8115_v57  ;;  %5807 = vmatpush1.bf16.msra.mxu1 %v8118_v58  ;;  %v8199_v55 = vld [vmem:[%s11225_s1 + $0x11c0] ss:$16 sps:$4 sm:$0xff]   ;;  %v8202_v56 = vld [vmem:[%s11225_s1 + $0x11c8] ss:$16 sps:$4 sm:$0xff]   ;;  %v8207_v47 = vld [vmem:[%s11225_s1 + $0x11e4] ss:$16 sps:$4 sm:$0xff]  }
 0x204   :  { %5275 = vmatprep.subr.bf16.mxu0 %v8123_v59  ;;  %5808 = vmatprep.subr.bf16.mxu1 %v8126_v48  ;;  %v8210_v57 = vld [vmem:[%s11225_s1 + $0x11ec] ss:$16 sps:$4 sm:$0xff]   ;;  %v8205_v58 = vld [vmem:[%s11225_s1 + $0x11e0] ss:$16 sps:$4 sm:$0xff]   ;;  %v8208_v59 = vld [vmem:[%s11225_s1 + $0x11e8] ss:$16 sps:$4 sm:$0xff]  }
 0x205   :  { %5305 = vmatprep.mubr.bf16.mxu0 %v10268_v60  ;;  %5838 = vmatprep.mubr.bf16.mxu1 %v10268_v60  ;;  %v8213_v48 = vld [vmem:[%s11225_s1 + $0x1204] ss:$16 sps:$4 sm:$0xff]   ;;  %s8584_s6 = smov [#allocation2]   ;;  %vm6362_vm1 = vcmask 17408  }
 0x206   :  { %s6370_s7 = sshll.u32 %s8584_s6, 4  ;;  %s6371_s7 = int_to_ptr.vmem [resolvable:$true] %s6370_s7 }
 0x207   :  { %5276 = vmatpush1.bf16.msra.mxu0 %v8121_v61  ;;  %5809 = vmatpush1.bf16.msra.mxu1 %v8124_v62  ;;  %v8216_v61 = vld [vmem:[%s11225_s1 + $0x120c] ss:$16 sps:$4 sm:$0xff]   ;;  %v10454_v62 = vrot.slane %v10237_v51, %v8750_v49  ;;  %s8558_s8 = scalar_lea.vmem %s6371_s7, 32  ;;  %p8563_p1 = scmp.lt.s32.totalorder %s6371_s7, %s6371_s7 }
 0x208   :  { %5277 = vmatprep.subr.bf16.mxu0 %v8129_v63  ;;  %5810 = vmatprep.subr.bf16.mxu1 %v8132_v0  ;;  %v8211_v63 = vld [vmem:[%s11225_s1 + $0x1200] ss:$16 sps:$4 sm:$0xff]   ;;  %v8214_v0 = vld [vmem:[%s11225_s1 + $0x1208] ss:$16 sps:$4 sm:$0xff]   ;;  %v8222_v51 = vld [vmem:[%s11225_s1 + $0x122c] ss:$16 sps:$4 sm:$0xff]   ;;  %p8559_p0 = scmp.ne.s32.totalorder %s6371_s7, %s8558_s8  ;;  %p8564_p2 = scmp.lt.s32.totalorder %s8558_s8, %s8558_s8 }
 0x20a   :  { %p8565_p3 = por %p8564_p2, %p8563_p1 }
 0x20b   :  { %5278 = vmatpush1.bf16.msra.mxu0 %v8127_v1  ;;  %5811 = vmatpush1.bf16.msra.mxu1 %v8130_v2  ;;  %v8219_v1 = vld [vmem:[%s11225_s1 + $0x1224] ss:$16 sps:$4 sm:$0xff]   ;;  %v981_v2 = vcombine.high %v10268_v60, %v10268_v60 }
 0x20c   :  { %5279 = vmatprep.subr.bf16.mxu0 %v8135_v3  ;;  %5812 = vmatprep.subr.bf16.mxu1 %v8138_v4  ;;  %v8217_v3 = vld [vmem:[%s11225_s1 + $0x1220] ss:$16 sps:$4 sm:$0xff]   ;;  %v8220_v4 = vld [vmem:[%s11225_s1 + $0x1228] ss:$16 sps:$4 sm:$0xff]   ;;  %v8225_v60 = vld [vmem:[%s11225_s1 + $0x1244] ss:$16 sps:$4 sm:$0xff]   ;;  %p8566_p4 = pnand %p8565_p3, %p8559_p0 }
 0x20f   :  { %5280 = vmatpush1.bf16.msra.mxu0 %v8133_v5  ;;  %5813 = vmatpush1.bf16.msra.mxu1 %v8136_v6  ;;  %v8228_v5 = vld [vmem:[%s11225_s1 + $0x124c] ss:$16 sps:$4 sm:$0xff]   ;;  %v8223_v6 = vld [vmem:[%s11225_s1 + $0x1240] ss:$16 sps:$4 sm:$0xff]  }
 0x210   :  { %5281 = vmatprep.subr.bf16.mxu0 %v8141_v7  ;;  %5814 = vmatprep.subr.bf16.mxu1 %v8144_v8  ;;  %v8226_v7 = vld [vmem:[%s11225_s1 + $0x1248] ss:$16 sps:$4 sm:$0xff]   ;;  %v8231_v8 = vld [vmem:[%s11225_s1 + $0x1264] ss:$16 sps:$4 sm:$0xff]  }
 0x213   :  { %5282 = vmatpush1.bf16.msra.mxu0 %v8139_v9  ;;  %5815 = vmatpush1.bf16.msra.mxu1 %v8142_v10  ;;  %v8234_v9 = vld [vmem:[%s11225_s1 + $0x126c] ss:$16 sps:$4 sm:$0xff]   ;;  %v8229_v10 = vld [vmem:[%s11225_s1 + $0x1260] ss:$16 sps:$4 sm:$0xff]  }
 0x214   :  { %5283 = vmatprep.subr.bf16.mxu0 %v8147_v11  ;;  %5816 = vmatprep.subr.bf16.mxu1 %v8150_v12  ;;  %v8232_v11 = vld [vmem:[%s11225_s1 + $0x1268] ss:$16 sps:$4 sm:$0xff]   ;;  %v8237_v12 = vld [vmem:[%s11225_s1 + $0x1284] ss:$16 sps:$4 sm:$0xff]  }
 0x217   :  { %5284 = vmatpush1.bf16.msra.mxu0 %v8145_v52  ;;  %5817 = vmatpush1.bf16.msra.mxu1 %v8148_v15  ;;  %v8240_v52 = vld [vmem:[%s11225_s1 + $0x128c] ss:$16 sps:$4 sm:$0xff]   ;;  %v8235_v15 = vld [vmem:[%s11225_s1 + $0x1280] ss:$16 sps:$4 sm:$0xff]  }
 0x218   :  { %5285 = vmatprep.subr.bf16.mxu0 %v8153_v16  ;;  %5818 = vmatprep.subr.bf16.mxu1 %v8156_v17  ;;  %v8238_v16 = vld [vmem:[%s11225_s1 + $0x1288] ss:$16 sps:$4 sm:$0xff]   ;;  %v8243_v17 = vld [vmem:[%s11225_s1 + $0x12a4] ss:$16 sps:$4 sm:$0xff]  }
 0x21b   :  { %5286 = vmatpush1.bf16.msra.mxu0 %v8151_v18  ;;  %5819 = vmatpush1.bf16.msra.mxu1 %v8154_v19  ;;  %v8246_v18 = vld [vmem:[%s11225_s1 + $0x12ac] ss:$16 sps:$4 sm:$0xff]   ;;  %v8241_v19 = vld [vmem:[%s11225_s1 + $0x12a0] ss:$16 sps:$4 sm:$0xff]  }
 0x21c   :  { %5287 = vmatprep.subr.bf16.mxu0 %v8159_v20  ;;  %5820 = vmatprep.subr.bf16.mxu1 %v8162_v22  ;;  %v8244_v20 = vld [vmem:[%s11225_s1 + $0x12a8] ss:$16 sps:$4 sm:$0xff]   ;;  %v8249_v22 = vld [vmem:[%s11225_s1 + $0x12c4] ss:$16 sps:$4 sm:$0xff]  }
 0x21f   :  { %5288 = vmatpush1.bf16.msra.mxu0 %v8157_v23  ;;  %5821 = vmatpush1.bf16.msra.mxu1 %v8160_v24  ;;  %v8252_v23 = vld [vmem:[%s11225_s1 + $0x12cc] ss:$16 sps:$4 sm:$0xff]   ;;  %v8247_v24 = vld [vmem:[%s11225_s1 + $0x12c0] ss:$16 sps:$4 sm:$0xff]  }
 0x220   :  { %5289 = vmatprep.subr.bf16.mxu0 %v8165_v13  ;;  %5822 = vmatprep.subr.bf16.mxu1 %v8168_v27  ;;  %v8250_v13 = vld [vmem:[%s11225_s1 + $0x12c8] ss:$16 sps:$4 sm:$0xff]   ;;  %v8255_v27 = vld [vmem:[%s11225_s1 + $0x12e4] ss:$16 sps:$4 sm:$0xff]  }
 0x223   :  { %5290 = vmatpush1.bf16.msra.mxu0 %v8163_v28  ;;  %5823 = vmatpush1.bf16.msra.mxu1 %v8166_v29  ;;  %v8258_v28 = vld [vmem:[%s11225_s1 + $0x12ec] ss:$16 sps:$4 sm:$0xff]   ;;  %v8253_v29 = vld [vmem:[%s11225_s1 + $0x12e0] ss:$16 sps:$4 sm:$0xff]  }
 0x224   :  { %5291 = vmatprep.subr.bf16.mxu0 %v8171_v14  ;;  %5824 = vmatprep.subr.bf16.mxu1 %v8174_v30  ;;  %v8256_v14 = vld [vmem:[%s11225_s1 + $0x12e8] ss:$16 sps:$4 sm:$0xff]   ;;  %v8261_v30 = vld [vmem:[%s11225_s1 + $0x1304] ss:$16 sps:$4 sm:$0xff]  }
 0x227   :  { %5292 = vmatpush1.bf16.msra.mxu0 %v8169_v31  ;;  %5825 = vmatpush1.bf16.msra.mxu1 %v8172_v25  ;;  %v8264_v31 = vld [vmem:[%s11225_s1 + $0x130c] ss:$16 sps:$4 sm:$0xff]   ;;  %v8259_v25 = vld [vmem:[%s11225_s1 + $0x1300] ss:$16 sps:$4 sm:$0xff]  }
 0x228   :  { %5293 = vmatprep.subr.bf16.mxu0 %v8177_v32  ;;  %5826 = vmatprep.subr.bf16.mxu1 %v8180_v33  ;;  %v8262_v32 = vld [vmem:[%s11225_s1 + $0x1308] ss:$16 sps:$4 sm:$0xff]   ;;  %v8267_v33 = vld [vmem:[%s11225_s1 + $0x1324] ss:$16 sps:$4 sm:$0xff]  }
 0x22b   :  { %5294 = vmatpush1.bf16.msra.mxu0 %v8175_v26  ;;  %5827 = vmatpush1.bf16.msra.mxu1 %v8178_v36  ;;  %v8270_v26 = vld [vmem:[%s11225_s1 + $0x132c] ss:$16 sps:$4 sm:$0xff]   ;;  %v8265_v36 = vld [vmem:[%s11225_s1 + $0x1320] ss:$16 sps:$4 sm:$0xff]  }
 0x22c   :  { %5295 = vmatprep.subr.bf16.mxu0 %v8183_v37  ;;  %5828 = vmatprep.subr.bf16.mxu1 %v8186_v21  ;;  %v8268_v37 = vld [vmem:[%s11225_s1 + $0x1328] ss:$16 sps:$4 sm:$0xff]   ;;  %v8273_v21 = vld [vmem:[%s11225_s1 + $0x1344] ss:$16 sps:$4 sm:$0xff]  }
 0x22f   :  { %5296 = vmatpush1.bf16.msra.mxu0 %v8181_v39  ;;  %5829 = vmatpush1.bf16.msra.mxu1 %v8184_v40  ;;  %v8276_v39 = vld [vmem:[%s11225_s1 + $0x134c] ss:$16 sps:$4 sm:$0xff]   ;;  %v8271_v40 = vld [vmem:[%s11225_s1 + $0x1340] ss:$16 sps:$4 sm:$0xff]  }
 0x230   :  { %5297 = vmatprep.subr.bf16.mxu0 %v8189_v41  ;;  %5830 = vmatprep.subr.bf16.mxu1 %v8192_v34  ;;  %v8274_v41 = vld [vmem:[%s11225_s1 + $0x1348] ss:$16 sps:$4 sm:$0xff]   ;;  %v8279_v34 = vld [vmem:[%s11225_s1 + $0x1364] ss:$16 sps:$4 sm:$0xff]  }
 0x233   :  { %5298 = vmatpush1.bf16.msra.mxu0 %v8187_v43  ;;  %5831 = vmatpush1.bf16.msra.mxu1 %v8190_v45  ;;  %v8282_v43 = vld [vmem:[%s11225_s1 + $0x136c] ss:$16 sps:$4 sm:$0xff]   ;;  %v8277_v45 = vld [vmem:[%s11225_s1 + $0x1360] ss:$16 sps:$4 sm:$0xff]  }
 0x234   :  { %5299 = vmatprep.subr.bf16.mxu0 %v8195_v46  ;;  %5832 = vmatprep.subr.bf16.mxu1 %v8198_v35  ;;  %v8280_v46 = vld [vmem:[%s11225_s1 + $0x1368] ss:$16 sps:$4 sm:$0xff]   ;;  %v8285_v35 = vld [vmem:[%s11225_s1 + $0x1384] ss:$16 sps:$4 sm:$0xff]  }
 0x237   :  { %5300 = vmatpush1.bf16.msra.mxu0 %v8193_v50  ;;  %5833 = vmatpush1.bf16.msra.mxu1 %v8196_v53  ;;  %v8288_v50 = vld [vmem:[%s11225_s1 + $0x138c] ss:$16 sps:$4 sm:$0xff]   ;;  %v8283_v53 = vld [vmem:[%s11225_s1 + $0x1380] ss:$16 sps:$4 sm:$0xff]  }
 0x238   :  { %5301 = vmatprep.subr.bf16.mxu0 %v8201_v38  ;;  %5834 = vmatprep.subr.bf16.mxu1 %v8204_v54  ;;  %v8286_v38 = vld [vmem:[%s11225_s1 + $0x1388] ss:$16 sps:$4 sm:$0xff]   ;;  %v8291_v54 = vld [vmem:[%s11225_s1 + $0x13a4] ss:$16 sps:$4 sm:$0xff]  }
 0x23b   :  { %5302 = vmatpush1.bf16.msra.mxu0 %v8199_v55  ;;  %5835 = vmatpush1.bf16.msra.mxu1 %v8202_v56  ;;  %v8294_v55 = vld [vmem:[%s11225_s1 + $0x13ac] ss:$16 sps:$4 sm:$0xff]   ;;  %v8289_v56 = vld [vmem:[%s11225_s1 + $0x13a0] ss:$16 sps:$4 sm:$0xff]  }
 0x23c   :  { %5303 = vmatprep.subr.bf16.mxu0 %v8207_v47  ;;  %5836 = vmatprep.subr.bf16.mxu1 %v8210_v57  ;;  %v8292_v47 = vld [vmem:[%s11225_s1 + $0x13a8] ss:$16 sps:$4 sm:$0xff]   ;;  %v8297_v57 = vld [vmem:[%s11225_s1 + $0x13c4] ss:$16 sps:$4 sm:$0xff]  }
 0x23f   :  { %5304 = vmatpush1.bf16.msra.mxu0 %v8205_v58  ;;  %5837 = vmatpush1.bf16.msra.mxu1 %v8208_v59  ;;  %v8300_v58 = vld [vmem:[%s11225_s1 + $0x13cc] ss:$16 sps:$4 sm:$0xff]   ;;  %v934_v59 = vcombine.high %v10221_v44, %v10221_v44 }
 0x240   :  { %5314 = vmatprep.subr.bf16.mxu0 %v8213_v48  ;;  %5847 = vmatprep.subr.bf16.mxu1 %v8216_v61  ;;  %v8295_v48 = vld [vmem:[%s11225_s1 + $0x13c0] ss:$16 sps:$4 sm:$0xff]   ;;  %v8298_v61 = vld [vmem:[%s11225_s1 + $0x13c8] ss:$16 sps:$4 sm:$0xff]   ;;  %v8306_v44 = vld [vmem:[%s11225_s1 + $0x13ec] ss:$16 sps:$4 sm:$0xff]  }
 0x242   :  { %5306 = vmatmul.mubr.bf16.vlgmr.msra.gmra.mrb[0].mxu0 %v10454_v62  ;;  %5839 = vmatmul.mubr.bf16.vlgmr.msra.gmra.mrb[0].mxu1 %v10454_v62 }
 0x243   :  { %5315 = vmatpush1.bf16.msra.mxu0 %v8211_v63  ;;  %5848 = vmatpush1.bf16.msra.mxu1 %v8214_v0  ;;  %v8303_v63 = vld [vmem:[%s11225_s1 + $0x13e4] ss:$16 sps:$4 sm:$0xff]   ;;  %v10643_v0 = vrot.slane %v934_v59, %v8750_v49  ;;  %v8382_v59 = vld [vmem:[%s11225_s1 + $0x1588] ss:$16 sps:$4 sm:$0xff]  }
 0x244   :  { %5316 = vmatprep.subr.bf16.mxu0 %v8219_v1  ;;  %5849 = vmatprep.subr.bf16.mxu1 %v8222_v51  ;;  %v8301_v1 = vld [vmem:[%s11225_s1 + $0x13e0] ss:$16 sps:$4 sm:$0xff]   ;;  %v8304_v51 = vld [vmem:[%s11225_s1 + $0x13e8] ss:$16 sps:$4 sm:$0xff]  }
 0x245   :  { %5346 = vmatprep.mubr.bf16.mxu0 %v981_v2  ;;  %5879 = vmatprep.mubr.bf16.mxu1 %v981_v2  ;;  %v8309_v2 = vld [vmem:[%s11225_s1 + $0x1404] ss:$16 sps:$4 sm:$0xff]  }
 0x247   :  { %5317 = vmatpush1.bf16.msra.mxu0 %v8217_v3  ;;  %5850 = vmatpush1.bf16.msra.mxu1 %v8220_v4  ;;  %v8312_v3 = vld [vmem:[%s11225_s1 + $0x140c] ss:$16 sps:$4 sm:$0xff]   ;;  %v950_v4 = vcombine.high %v10643_v0, %v10643_v0 }
 0x248   :  { %5318 = vmatprep.subr.bf16.mxu0 %v8225_v60  ;;  %5851 = vmatprep.subr.bf16.mxu1 %v8228_v5  ;;  %v979_v60 = vcombine.high %v10454_v62, %v10454_v62  ;;  %v8307_v5 = vld [vmem:[%s11225_s1 + $0x1400] ss:$16 sps:$4 sm:$0xff]   ;;  %v8318_v62 = vld [vmem:[%s11225_s1 + $0x142c] ss:$16 sps:$4 sm:$0xff]  }
 0x24b   :  { %5319 = vmatpush1.bf16.msra.mxu0 %v8223_v6  ;;  %5852 = vmatpush1.bf16.msra.mxu1 %v8226_v7  ;;  %v8310_v6 = vld [vmem:[%s11225_s1 + $0x1408] ss:$16 sps:$4 sm:$0xff]   ;;  %v8315_v7 = vld [vmem:[%s11225_s1 + $0x1424] ss:$16 sps:$4 sm:$0xff]  }
 0x24c   :  { %5320 = vmatprep.subr.bf16.mxu0 %v8231_v8  ;;  %5853 = vmatprep.subr.bf16.mxu1 %v8234_v9  ;;  %v10674_v8 = vrot.slane %v950_v4, %v8750_v49  ;;  %v8313_v9 = vld [vmem:[%s11225_s1 + $0x1420] ss:$16 sps:$4 sm:$0xff]   ;;  %v8399_v4 = vld [vmem:[%s11225_s1 + $0x15e4] ss:$16 sps:$4 sm:$0xff]  }
 0x24f   :  { %5321 = vmatpush1.bf16.msra.mxu0 %v8229_v10  ;;  %5854 = vmatpush1.bf16.msra.mxu1 %v8232_v11  ;;  %v8316_v10 = vld [vmem:[%s11225_s1 + $0x1428] ss:$16 sps:$4 sm:$0xff]   ;;  %v8321_v11 = vld [vmem:[%s11225_s1 + $0x1444] ss:$16 sps:$4 sm:$0xff]  }
 0x250   :  { %5322 = vmatprep.subr.bf16.mxu0 %v8237_v12  ;;  %5855 = vmatprep.subr.bf16.mxu1 %v8240_v52  ;;  %v8324_v12 = vld [vmem:[%s11225_s1 + $0x144c] ss:$16 sps:$4 sm:$0xff]   ;;  %v8319_v52 = vld [vmem:[%s11225_s1 + $0x1440] ss:$16 sps:$4 sm:$0xff]  }
 0x253   :  { %5323 = vmatpush1.bf16.msra.mxu0 %v8235_v15  ;;  %5856 = vmatpush1.bf16.msra.mxu1 %v8238_v16  ;;  %v8322_v15 = vld [vmem:[%s11225_s1 + $0x1448] ss:$16 sps:$4 sm:$0xff]   ;;  %v8327_v16 = vld [vmem:[%s11225_s1 + $0x1464] ss:$16 sps:$4 sm:$0xff]  }
 0x254   :  { %5324 = vmatprep.subr.bf16.mxu0 %v8243_v17  ;;  %5857 = vmatprep.subr.bf16.mxu1 %v8246_v18  ;;  %v8330_v17 = vld [vmem:[%s11225_s1 + $0x146c] ss:$16 sps:$4 sm:$0xff]   ;;  %v8325_v18 = vld [vmem:[%s11225_s1 + $0x1460] ss:$16 sps:$4 sm:$0xff]  }
 0x257   :  { %5325 = vmatpush1.bf16.msra.mxu0 %v8241_v19  ;;  %5858 = vmatpush1.bf16.msra.mxu1 %v8244_v20  ;;  %v8328_v19 = vld [vmem:[%s11225_s1 + $0x1468] ss:$16 sps:$4 sm:$0xff]   ;;  %v8333_v20 = vld [vmem:[%s11225_s1 + $0x1484] ss:$16 sps:$4 sm:$0xff]  }
 0x258   :  { %5326 = vmatprep.subr.bf16.mxu0 %v8249_v22  ;;  %5859 = vmatprep.subr.bf16.mxu1 %v8252_v23  ;;  %v8336_v22 = vld [vmem:[%s11225_s1 + $0x148c] ss:$16 sps:$4 sm:$0xff]   ;;  %v8331_v23 = vld [vmem:[%s11225_s1 + $0x1480] ss:$16 sps:$4 sm:$0xff]  }
 0x25b   :  { %5327 = vmatpush1.bf16.msra.mxu0 %v8247_v24  ;;  %5860 = vmatpush1.bf16.msra.mxu1 %v8250_v13  ;;  %v8334_v24 = vld [vmem:[%s11225_s1 + $0x1488] ss:$16 sps:$4 sm:$0xff]   ;;  %v8339_v13 = vld [vmem:[%s11225_s1 + $0x14a4] ss:$16 sps:$4 sm:$0xff]  }
 0x25c   :  { %5328 = vmatprep.subr.bf16.mxu0 %v8255_v27  ;;  %5861 = vmatprep.subr.bf16.mxu1 %v8258_v28  ;;  %v8342_v27 = vld [vmem:[%s11225_s1 + $0x14ac] ss:$16 sps:$4 sm:$0xff]   ;;  %v8337_v28 = vld [vmem:[%s11225_s1 + $0x14a0] ss:$16 sps:$4 sm:$0xff]  }
 0x25f   :  { %5329 = vmatpush1.bf16.msra.mxu0 %v8253_v29  ;;  %5862 = vmatpush1.bf16.msra.mxu1 %v8256_v14  ;;  %v8340_v29 = vld [vmem:[%s11225_s1 + $0x14a8] ss:$16 sps:$4 sm:$0xff]   ;;  %v8345_v14 = vld [vmem:[%s11225_s1 + $0x14c4] ss:$16 sps:$4 sm:$0xff]  }
 0x260   :  { %5330 = vmatprep.subr.bf16.mxu0 %v8261_v30  ;;  %5863 = vmatprep.subr.bf16.mxu1 %v8264_v31  ;;  %v8348_v30 = vld [vmem:[%s11225_s1 + $0x14cc] ss:$16 sps:$4 sm:$0xff]   ;;  %v8343_v31 = vld [vmem:[%s11225_s1 + $0x14c0] ss:$16 sps:$4 sm:$0xff]  }
 0x263   :  { %5331 = vmatpush1.bf16.msra.mxu0 %v8259_v25  ;;  %5864 = vmatpush1.bf16.msra.mxu1 %v8262_v32  ;;  %v8346_v25 = vld [vmem:[%s11225_s1 + $0x14c8] ss:$16 sps:$4 sm:$0xff]   ;;  %v8351_v32 = vld [vmem:[%s11225_s1 + $0x14e4] ss:$16 sps:$4 sm:$0xff]  }
 0x264   :  { %5332 = vmatprep.subr.bf16.mxu0 %v8267_v33  ;;  %5865 = vmatprep.subr.bf16.mxu1 %v8270_v26  ;;  %v8354_v33 = vld [vmem:[%s11225_s1 + $0x14ec] ss:$16 sps:$4 sm:$0xff]   ;;  %v8349_v26 = vld [vmem:[%s11225_s1 + $0x14e0] ss:$16 sps:$4 sm:$0xff]  }
 0x267   :  { %5333 = vmatpush1.bf16.msra.mxu0 %v8265_v36  ;;  %5866 = vmatpush1.bf16.msra.mxu1 %v8268_v37  ;;  %v8352_v36 = vld [vmem:[%s11225_s1 + $0x14e8] ss:$16 sps:$4 sm:$0xff]   ;;  %v8357_v37 = vld [vmem:[%s11225_s1 + $0x1504] ss:$16 sps:$4 sm:$0xff]  }
 0x268   :  { %5334 = vmatprep.subr.bf16.mxu0 %v8273_v21  ;;  %5867 = vmatprep.subr.bf16.mxu1 %v8276_v39  ;;  %v8360_v21 = vld [vmem:[%s11225_s1 + $0x150c] ss:$16 sps:$4 sm:$0xff]   ;;  %v8355_v39 = vld [vmem:[%s11225_s1 + $0x1500] ss:$16 sps:$4 sm:$0xff]  }
 0x26b   :  { %5335 = vmatpush1.bf16.msra.mxu0 %v8271_v40  ;;  %5868 = vmatpush1.bf16.msra.mxu1 %v8274_v41  ;;  %v8358_v40 = vld [vmem:[%s11225_s1 + $0x1508] ss:$16 sps:$4 sm:$0xff]   ;;  %v8363_v41 = vld [vmem:[%s11225_s1 + $0x1524] ss:$16 sps:$4 sm:$0xff]  }
 0x26c   :  { %5336 = vmatprep.subr.bf16.mxu0 %v8279_v34  ;;  %5869 = vmatprep.subr.bf16.mxu1 %v8282_v43  ;;  %v8366_v34 = vld [vmem:[%s11225_s1 + $0x152c] ss:$16 sps:$4 sm:$0xff]   ;;  %v8361_v43 = vld [vmem:[%s11225_s1 + $0x1520] ss:$16 sps:$4 sm:$0xff]  }
 0x26f   :  { %5337 = vmatpush1.bf16.msra.mxu0 %v8277_v45  ;;  %5870 = vmatpush1.bf16.msra.mxu1 %v8280_v46  ;;  %v8364_v45 = vld [vmem:[%s11225_s1 + $0x1528] ss:$16 sps:$4 sm:$0xff]   ;;  %v8369_v46 = vld [vmem:[%s11225_s1 + $0x1544] ss:$16 sps:$4 sm:$0xff]  }
 0x270   :  { %5338 = vmatprep.subr.bf16.mxu0 %v8285_v35  ;;  %5871 = vmatprep.subr.bf16.mxu1 %v8288_v50  ;;  %v8372_v35 = vld [vmem:[%s11225_s1 + $0x154c] ss:$16 sps:$4 sm:$0xff]   ;;  %v8367_v50 = vld [vmem:[%s11225_s1 + $0x1540] ss:$16 sps:$4 sm:$0xff]  }
 0x273   :  { %5339 = vmatpush1.bf16.msra.mxu0 %v8283_v53  ;;  %5872 = vmatpush1.bf16.msra.mxu1 %v8286_v38  ;;  %v8370_v53 = vld [vmem:[%s11225_s1 + $0x1548] ss:$16 sps:$4 sm:$0xff]   ;;  %v8375_v38 = vld [vmem:[%s11225_s1 + $0x1564] ss:$16 sps:$4 sm:$0xff]  }
 0x274   :  { %5340 = vmatprep.subr.bf16.mxu0 %v8291_v54  ;;  %5873 = vmatprep.subr.bf16.mxu1 %v8294_v55  ;;  %v8378_v54 = vld [vmem:[%s11225_s1 + $0x156c] ss:$16 sps:$4 sm:$0xff]   ;;  %v8373_v55 = vld [vmem:[%s11225_s1 + $0x1560] ss:$16 sps:$4 sm:$0xff]  }
 0x277   :  { %5341 = vmatpush1.bf16.msra.mxu0 %v8289_v56  ;;  %5874 = vmatpush1.bf16.msra.mxu1 %v8292_v47  ;;  %v8376_v56 = vld [vmem:[%s11225_s1 + $0x1568] ss:$16 sps:$4 sm:$0xff]   ;;  %v8381_v47 = vld [vmem:[%s11225_s1 + $0x1584] ss:$16 sps:$4 sm:$0xff]  }
 0x278   :  { %5342 = vmatprep.subr.bf16.mxu0 %v8297_v57  ;;  %5875 = vmatprep.subr.bf16.mxu1 %v8300_v58  ;;  %v8384_v57 = vld [vmem:[%s11225_s1 + $0x158c] ss:$16 sps:$4 sm:$0xff]   ;;  %v8379_v58 = vld [vmem:[%s11225_s1 + $0x1580] ss:$16 sps:$4 sm:$0xff]  }
 0x27b   :  { %5343 = vmatpush1.bf16.msra.mxu0 %v8295_v48  ;;  %5876 = vmatpush1.bf16.msra.mxu1 %v8298_v61  ;;  %v8387_v48 = vld [vmem:[%s11225_s1 + $0x15a4] ss:$16 sps:$4 sm:$0xff]   ;;  %v8390_v61 = vld [vmem:[%s11225_s1 + $0x15ac] ss:$16 sps:$4 sm:$0xff]  }
 0x27c   :  { %5344 = vmatprep.subr.bf16.mxu0 %v8303_v63  ;;  %5877 = vmatprep.subr.bf16.mxu1 %v8306_v44  ;;  %v8385_v63 = vld [vmem:[%s11225_s1 + $0x15a0] ss:$16 sps:$4 sm:$0xff]   ;;  %v8388_v44 = vld [vmem:[%s11225_s1 + $0x15a8] ss:$16 sps:$4 sm:$0xff]  }
 0x27f   :  { %5345 = vmatpush1.bf16.msra.mxu0 %v8301_v1  ;;  %5878 = vmatpush1.bf16.msra.mxu1 %v8304_v51  ;;  %v8393_v1 = vld [vmem:[%s11225_s1 + $0x15c4] ss:$16 sps:$4 sm:$0xff]   ;;  %v8396_v51 = vld [vmem:[%s11225_s1 + $0x15cc] ss:$16 sps:$4 sm:$0xff]  }
 0x280   :  { %5355 = vmatprep.subr.bf16.mxu0 %v8309_v2  ;;  %5888 = vmatprep.subr.bf16.mxu1 %v8312_v3  ;;  %v8391_v2 = vld [vmem:[%s11225_s1 + $0x15c0] ss:$16 sps:$4 sm:$0xff]   ;;  %v8394_v3 = vld [vmem:[%s11225_s1 + $0x15c8] ss:$16 sps:$4 sm:$0xff]  }
 0x282   :  { %5347 = vmatmul.mubr.bf16.vlgmr.msra.gmra.mrb[0].mxu0 %v979_v60  ;;  %5880 = vmatmul.mubr.bf16.vlgmr.msra.gmra.mrb[0].mxu1 %v979_v60  ;;  %v8402_v60 = vld [vmem:[%s11225_s1 + $0x15ec] ss:$16 sps:$4 sm:$0xff]  }
 0x283   :  { %5356 = vmatpush1.bf16.msra.mxu0 %v8307_v5  ;;  %5889 = vmatpush1.bf16.msra.mxu1 %v8310_v6  ;;  %v8397_v5 = vld [vmem:[%s11225_s1 + $0x15e0] ss:$16 sps:$4 sm:$0xff]   ;;  %v8400_v6 = vld [vmem:[%s11225_s1 + $0x15e8] ss:$16 sps:$4 sm:$0xff]  }
 0x284   :  { %5357 = vmatprep.subr.bf16.mxu0 %v8315_v7  ;;  %5890 = vmatprep.subr.bf16.mxu1 %v8318_v62  ;;  %v8406_v7 = vld [vmem:[%s11225_s1 + $0x1604] ss:$16 sps:$4 sm:$0xff]   ;;  %v8409_v62 = vld [vmem:[%s11225_s1 + $0x160c] ss:$16 sps:$4 sm:$0xff]  }
 0x285   :  { %5387 = vmatprep.mubr.bf16.mxu0 %v10674_v8  ;;  %5920 = vmatprep.mubr.bf16.mxu1 %v10674_v8 }
 0x287   :  { %5358 = vmatpush1.bf16.msra.mxu0 %v8313_v9  ;;  %5891 = vmatpush1.bf16.msra.mxu1 %v8316_v10  ;;  %v10860_v9 = vrot.slane %v10643_v0, %v8750_v49  ;;  %v8404_v10 = vld [vmem:[%s11225_s1 + $0x1600] ss:$16 sps:$4 sm:$0xff]   ;;  %v8415_v0 = vld [vmem:[%s11225_s1 + $0x162c] ss:$16 sps:$4 sm:$0xff]  }
 0x288   :  { %5359 = vmatprep.subr.bf16.mxu0 %v8321_v11  ;;  %5892 = vmatprep.subr.bf16.mxu1 %v8324_v12  ;;  %v8407_v11 = vld [vmem:[%s11225_s1 + $0x1608] ss:$16 sps:$4 sm:$0xff]   ;;  %v8412_v12 = vld [vmem:[%s11225_s1 + $0x1624] ss:$16 sps:$4 sm:$0xff]  }
 0x28b   :  { %5360 = vmatpush1.bf16.msra.mxu0 %v8319_v52  ;;  %5893 = vmatpush1.bf16.msra.mxu1 %v8322_v15  ;;  %v982_v52 = vcombine.high %v10674_v8, %v10674_v8  ;;  %v8410_v15 = vld [vmem:[%s11225_s1 + $0x1620] ss:$16 sps:$4 sm:$0xff]   ;;  %v8418_v8 = vld [vmem:[%s11225_s1 + $0x1644] ss:$16 sps:$4 sm:$0xff]  }
 0x28c   :  { %5361 = vmatprep.subr.bf16.mxu0 %v8327_v16  ;;  %5894 = vmatprep.subr.bf16.mxu1 %v8330_v17  ;;  %v8413_v16 = vld [vmem:[%s11225_s1 + $0x1628] ss:$16 sps:$4 sm:$0xff]   ;;  %v8421_v17 = vld [vmem:[%s11225_s1 + $0x164c] ss:$16 sps:$4 sm:$0xff]  }
 0x28f   :  { %5362 = vmatpush1.bf16.msra.mxu0 %v8325_v18  ;;  %5895 = vmatpush1.bf16.msra.mxu1 %v8328_v19  ;;  %v8416_v18 = vld [vmem:[%s11225_s1 + $0x1640] ss:$16 sps:$4 sm:$0xff]   ;;  %v8419_v19 = vld [vmem:[%s11225_s1 + $0x1648] ss:$16 sps:$4 sm:$0xff]  }
 0x290   :  { %5363 = vmatprep.subr.bf16.mxu0 %v8333_v20  ;;  %5896 = vmatprep.subr.bf16.mxu1 %v8336_v22  ;;  %v8424_v20 = vld [vmem:[%s11225_s1 + $0x1664] ss:$16 sps:$4 sm:$0xff]   ;;  %v8427_v22 = vld [vmem:[%s11225_s1 + $0x166c] ss:$16 sps:$4 sm:$0xff]  }
 0x293   :  { %5364 = vmatpush1.bf16.msra.mxu0 %v8331_v23  ;;  %5897 = vmatpush1.bf16.msra.mxu1 %v8334_v24  ;;  %v8422_v23 = vld [vmem:[%s11225_s1 + $0x1660] ss:$16 sps:$4 sm:$0xff]   ;;  %v8425_v24 = vld [vmem:[%s11225_s1 + $0x1668] ss:$16 sps:$4 sm:$0xff]  }
 0x294   :  { %5365 = vmatprep.subr.bf16.mxu0 %v8339_v13  ;;  %5898 = vmatprep.subr.bf16.mxu1 %v8342_v27  ;;  %v8430_v13 = vld [vmem:[%s11225_s1 + $0x1684] ss:$16 sps:$4 sm:$0xff]   ;;  %v8433_v27 = vld [vmem:[%s11225_s1 + $0x168c] ss:$16 sps:$4 sm:$0xff]  }
 0x297   :  { %5366 = vmatpush1.bf16.msra.mxu0 %v8337_v28  ;;  %5899 = vmatpush1.bf16.msra.mxu1 %v8340_v29  ;;  %v8428_v28 = vld [vmem:[%s11225_s1 + $0x1680] ss:$16 sps:$4 sm:$0xff]   ;;  %v8431_v29 = vld [vmem:[%s11225_s1 + $0x1688] ss:$16 sps:$4 sm:$0xff]  }
 0x298   :  { %5367 = vmatprep.subr.bf16.mxu0 %v8345_v14  ;;  %5900 = vmatprep.subr.bf16.mxu1 %v8348_v30  ;;  %v8436_v14 = vld [vmem:[%s11225_s1 + $0x16a4] ss:$16 sps:$4 sm:$0xff]   ;;  %v8439_v30 = vld [vmem:[%s11225_s1 + $0x16ac] ss:$16 sps:$4 sm:$0xff]  }
 0x29b   :  { %5368 = vmatpush1.bf16.msra.mxu0 %v8343_v31  ;;  %5901 = vmatpush1.bf16.msra.mxu1 %v8346_v25  ;;  %v8434_v31 = vld [vmem:[%s11225_s1 + $0x16a0] ss:$16 sps:$4 sm:$0xff]   ;;  %v8437_v25 = vld [vmem:[%s11225_s1 + $0x16a8] ss:$16 sps:$4 sm:$0xff]  }
 0x29c   :  { %5369 = vmatprep.subr.bf16.mxu0 %v8351_v32  ;;  %5902 = vmatprep.subr.bf16.mxu1 %v8354_v33  ;;  %v8442_v32 = vld [vmem:[%s11225_s1 + $0x16c4] ss:$16 sps:$4 sm:$0xff]   ;;  %v8445_v33 = vld [vmem:[%s11225_s1 + $0x16cc] ss:$16 sps:$4 sm:$0xff]  }
 0x29f   :  { %5370 = vmatpush1.bf16.msra.mxu0 %v8349_v26  ;;  %5903 = vmatpush1.bf16.msra.mxu1 %v8352_v36  ;;  %v8440_v26 = vld [vmem:[%s11225_s1 + $0x16c0] ss:$16 sps:$4 sm:$0xff]   ;;  %v8443_v36 = vld [vmem:[%s11225_s1 + $0x16c8] ss:$16 sps:$4 sm:$0xff]  }
 0x2a0   :  { %5371 = vmatprep.subr.bf16.mxu0 %v8357_v37  ;;  %5904 = vmatprep.subr.bf16.mxu1 %v8360_v21  ;;  %v8448_v37 = vld [vmem:[%s11225_s1 + $0x16e4] ss:$16 sps:$4 sm:$0xff]   ;;  %v8451_v21 = vld [vmem:[%s11225_s1 + $0x16ec] ss:$16 sps:$4 sm:$0xff]  }
 0x2a3   :  { %5372 = vmatpush1.bf16.msra.mxu0 %v8355_v39  ;;  %5905 = vmatpush1.bf16.msra.mxu1 %v8358_v40  ;;  %v8446_v39 = vld [vmem:[%s11225_s1 + $0x16e0] ss:$16 sps:$4 sm:$0xff]   ;;  %v8449_v40 = vld [vmem:[%s11225_s1 + $0x16e8] ss:$16 sps:$4 sm:$0xff]  }
 0x2a4   :  { %5373 = vmatprep.subr.bf16.mxu0 %v8363_v41  ;;  %5906 = vmatprep.subr.bf16.mxu1 %v8366_v34  ;;  %v8454_v41 = vld [vmem:[%s11225_s1 + $0x1704] ss:$16 sps:$4 sm:$0xff]   ;;  %v8457_v34 = vld [vmem:[%s11225_s1 + $0x170c] ss:$16 sps:$4 sm:$0xff]  }
 0x2a7   :  { %5374 = vmatpush1.bf16.msra.mxu0 %v8361_v43  ;;  %5907 = vmatpush1.bf16.msra.mxu1 %v8364_v45  ;;  %v8452_v43 = vld [vmem:[%s11225_s1 + $0x1700] ss:$16 sps:$4 sm:$0xff]   ;;  %v8455_v45 = vld [vmem:[%s11225_s1 + $0x1708] ss:$16 sps:$4 sm:$0xff]  }
 0x2a8   :  { %5375 = vmatprep.subr.bf16.mxu0 %v8369_v46  ;;  %5908 = vmatprep.subr.bf16.mxu1 %v8372_v35  ;;  %v8460_v46 = vld [vmem:[%s11225_s1 + $0x1724] ss:$16 sps:$4 sm:$0xff]   ;;  %v8463_v35 = vld [vmem:[%s11225_s1 + $0x172c] ss:$16 sps:$4 sm:$0xff]  }
 0x2ab   :  { %5376 = vmatpush1.bf16.msra.mxu0 %v8367_v50  ;;  %5909 = vmatpush1.bf16.msra.mxu1 %v8370_v53  ;;  %v8458_v50 = vld [vmem:[%s11225_s1 + $0x1720] ss:$16 sps:$4 sm:$0xff]   ;;  %v8461_v53 = vld [vmem:[%s11225_s1 + $0x1728] ss:$16 sps:$4 sm:$0xff]  }
 0x2ac   :  { %5377 = vmatprep.subr.bf16.mxu0 %v8375_v38  ;;  %5910 = vmatprep.subr.bf16.mxu1 %v8378_v54  ;;  %v8466_v38 = vld [vmem:[%s11225_s1 + $0x1744] ss:$16 sps:$4 sm:$0xff]   ;;  %v8469_v54 = vld [vmem:[%s11225_s1 + $0x174c] ss:$16 sps:$4 sm:$0xff]  }
 0x2af   :  { %5378 = vmatpush1.bf16.msra.mxu0 %v8373_v55  ;;  %5911 = vmatpush1.bf16.msra.mxu1 %v8376_v56  ;;  %v8464_v55 = vld [vmem:[%s11225_s1 + $0x1740] ss:$16 sps:$4 sm:$0xff]   ;;  %v8467_v56 = vld [vmem:[%s11225_s1 + $0x1748] ss:$16 sps:$4 sm:$0xff]  }
 0x2b0   :  { %5379 = vmatprep.subr.bf16.mxu0 %v8381_v47  ;;  %5912 = vmatprep.subr.bf16.mxu1 %v8384_v57  ;;  %v8472_v47 = vld [vmem:[%s11225_s1 + $0x1764] ss:$16 sps:$4 sm:$0xff]   ;;  %v8475_v57 = vld [vmem:[%s11225_s1 + $0x176c] ss:$16 sps:$4 sm:$0xff]  }
 0x2b3   :  { %5380 = vmatpush1.bf16.msra.mxu0 %v8379_v58  ;;  %5913 = vmatpush1.bf16.msra.mxu1 %v8382_v59  ;;  %v8470_v58 = vld [vmem:[%s11225_s1 + $0x1760] ss:$16 sps:$4 sm:$0xff]   ;;  %v8473_v59 = vld [vmem:[%s11225_s1 + $0x1768] ss:$16 sps:$4 sm:$0xff]  }
 0x2b4   :  { %5381 = vmatprep.subr.bf16.mxu0 %v8387_v48  ;;  %5914 = vmatprep.subr.bf16.mxu1 %v8390_v61  ;;  %v8478_v48 = vld [vmem:[%s11225_s1 + $0x1784] ss:$16 sps:$4 sm:$0xff]   ;;  %v8481_v61 = vld [vmem:[%s11225_s1 + $0x178c] ss:$16 sps:$4 sm:$0xff]  }
 0x2b7   :  { %5382 = vmatpush1.bf16.msra.mxu0 %v8385_v63  ;;  %5915 = vmatpush1.bf16.msra.mxu1 %v8388_v44  ;;  %v8476_v63 = vld [vmem:[%s11225_s1 + $0x1780] ss:$16 sps:$4 sm:$0xff]   ;;  %v8479_v44 = vld [vmem:[%s11225_s1 + $0x1788] ss:$16 sps:$4 sm:$0xff]  }
 0x2b8   :  { %5383 = vmatprep.subr.bf16.mxu0 %v8393_v1  ;;  %5916 = vmatprep.subr.bf16.mxu1 %v8396_v51  ;;  %v8484_v1 = vld [vmem:[%s11225_s1 + $0x17a4] ss:$16 sps:$4 sm:$0xff]   ;;  %v8487_v51 = vld [vmem:[%s11225_s1 + $0x17ac] ss:$16 sps:$4 sm:$0xff]  }
 0x2bb   :  { %5384 = vmatpush1.bf16.msra.mxu0 %v8391_v2  ;;  %5917 = vmatpush1.bf16.msra.mxu1 %v8394_v3  ;;  %v8482_v2 = vld [vmem:[%s11225_s1 + $0x17a0] ss:$16 sps:$4 sm:$0xff]   ;;  %v8485_v3 = vld [vmem:[%s11225_s1 + $0x17a8] ss:$16 sps:$4 sm:$0xff]  }
 0x2bc   :  { %5385 = vmatprep.subr.bf16.mxu0 %v8399_v4  ;;  %5918 = vmatprep.subr.bf16.mxu1 %v8402_v60  ;;  %v8490_v4 = vld [vmem:[%s11225_s1 + $0x17c4] ss:$16 sps:$4 sm:$0xff]   ;;  %v8493_v60 = vld [vmem:[%s11225_s1 + $0x17cc] ss:$16 sps:$4 sm:$0xff]  }
 0x2bf   :  { %5386 = vmatpush1.bf16.msra.mxu0 %v8397_v5  ;;  %5919 = vmatpush1.bf16.msra.mxu1 %v8400_v6  ;;  %v8488_v5 = vld [vmem:[%s11225_s1 + $0x17c0] ss:$16 sps:$4 sm:$0xff]   ;;  %v8491_v6 = vld [vmem:[%s11225_s1 + $0x17c8] ss:$16 sps:$4 sm:$0xff]  }
 0x2c0   :  { %5396 = vmatprep.subr.bf16.mxu0 %v8406_v7  ;;  %5929 = vmatprep.subr.bf16.mxu1 %v8409_v62  ;;  %v8496_v7 = vld [vmem:[%s11225_s1 + $0x17e4] ss:$16 sps:$4 sm:$0xff]   ;;  %v8499_v62 = vld [vmem:[%s11225_s1 + $0x17ec] ss:$16 sps:$4 sm:$0xff]  }
 0x2c2   :  { %5388 = vmatmul.mubr.bf16.vlgmr.msra.gmra.mrb[0].mxu0 %v10860_v9  ;;  %5921 = vmatmul.mubr.bf16.vlgmr.msra.gmra.mrb[0].mxu1 %v10860_v9 }
 0x2c3   :  { %5397 = vmatpush1.bf16.msra.mxu0 %v8404_v10  ;;  %5930 = vmatpush1.bf16.msra.mxu1 %v8407_v11  ;;  %v8494_v10 = vld [vmem:[%s11225_s1 + $0x17e0] ss:$16 sps:$4 sm:$0xff]   ;;  %v8497_v11 = vld [vmem:[%s11225_s1 + $0x17e8] ss:$16 sps:$4 sm:$0xff]  }
 0x2c4   :  { %5398 = vmatprep.subr.bf16.mxu0 %v8412_v12  ;;  %5931 = vmatprep.subr.bf16.mxu1 %v8415_v0  ;;  %v8502_v12 = vld [vmem:[%s11225_s1 + $0x1804] ss:$16 sps:$4 sm:$0xff]   ;;  %v8505_v0 = vld [vmem:[%s11225_s1 + $0x180c] ss:$16 sps:$4 sm:$0xff]  }
 0x2c5   :  { %5428 = vmatprep.mubr.bf16.mxu0 %v982_v52  ;;  %5961 = vmatprep.mubr.bf16.mxu1 %v982_v52  ;;  %v980_v52 = vcombine.high %v10860_v9, %v10860_v9  ;;  %v8511_v9 = vld [vmem:[%s11225_s1 + $0x182c] ss:$16 sps:$4 sm:$0xff]  }
 0x2c7   :  { %5399 = vmatpush1.bf16.msra.mxu0 %v8410_v15  ;;  %5932 = vmatpush1.bf16.msra.mxu1 %v8413_v16  ;;  %v8500_v15 = vld [vmem:[%s11225_s1 + $0x1800] ss:$16 sps:$4 sm:$0xff]   ;;  %v8503_v16 = vld [vmem:[%s11225_s1 + $0x1808] ss:$16 sps:$4 sm:$0xff]  }
 0x2c8   :  { %5400 = vmatprep.subr.bf16.mxu0 %v8418_v8  ;;  %5933 = vmatprep.subr.bf16.mxu1 %v8421_v17  ;;  %v8508_v8 = vld [vmem:[%s11225_s1 + $0x1824] ss:$16 sps:$4 sm:$0xff]   ;;  %v8506_v17 = vld [vmem:[%s11225_s1 + $0x1820] ss:$16 sps:$4 sm:$0xff]  }
 0x2cb   :  { %5401 = vmatpush1.bf16.msra.mxu0 %v8416_v18  ;;  %5934 = vmatpush1.bf16.msra.mxu1 %v8419_v19  ;;  %v8509_v18 = vld [vmem:[%s11225_s1 + $0x1828] ss:$16 sps:$4 sm:$0xff]   ;;  %v8514_v19 = vld [vmem:[%s11225_s1 + $0x1844] ss:$16 sps:$4 sm:$0xff]  }
 0x2cc   :  { %5402 = vmatprep.subr.bf16.mxu0 %v8424_v20  ;;  %5935 = vmatprep.subr.bf16.mxu1 %v8427_v22  ;;  %v8517_v20 = vld [vmem:[%s11225_s1 + $0x184c] ss:$16 sps:$4 sm:$0xff]   ;;  %v8583_v22 = vmov 0  }
 0x2cf   :  { %5403 = vmatpush1.bf16.msra.mxu0 %v8422_v23  ;;  %5936 = vmatpush1.bf16.msra.mxu1 %v8425_v24  ;;  %v8512_v23 = vld [vmem:[%s11225_s1 + $0x1840] ss:$16 sps:$4 sm:$0xff]   ;;  %v8515_v24 = vld [vmem:[%s11225_s1 + $0x1848] ss:$16 sps:$4 sm:$0xff]  }
 0x2d0   :  { %5404 = vmatprep.subr.bf16.mxu0 %v8430_v13  ;;  %5937 = vmatprep.subr.bf16.mxu1 %v8433_v27  ;;  %v8520_v13 = vld [vmem:[%s11225_s1 + $0x1864] ss:$16 sps:$4 sm:$0xff]   ;;  %v8523_v27 = vld [vmem:[%s11225_s1 + $0x186c] ss:$16 sps:$4 sm:$0xff]  }
 0x2d3   :  { %5405 = vmatpush1.bf16.msra.mxu0 %v8428_v28  ;;  %5938 = vmatpush1.bf16.msra.mxu1 %v8431_v29  ;;  %v8518_v28 = vld [vmem:[%s11225_s1 + $0x1860] ss:$16 sps:$4 sm:$0xff]   ;;  %v8521_v29 = vld [vmem:[%s11225_s1 + $0x1868] ss:$16 sps:$4 sm:$0xff]  }
 0x2d4   :  { %5406 = vmatprep.subr.bf16.mxu0 %v8436_v14  ;;  %5939 = vmatprep.subr.bf16.mxu1 %v8439_v30  ;;  %v6378_v14 = vld.sshfl [vmem:[%s11224_s0 + $0x18] sm:$0x1 pattern:$0x75316420]  ;;  %v8524_v30 = vld [vmem:[%s11227_s3 + $0x40] sm:$0xff]  }
 0x2d7   :  { %5407 = vmatpush1.bf16.msra.mxu0 %v8434_v31  ;;  %5940 = vmatpush1.bf16.msra.mxu1 %v8437_v25  ;;  %v8525_v31 = vld [vmem:[%s11227_s3 + $0xc0] sm:$0xff]   ;;  %v996_v25 = vrot.slane %v6378_v14, %v8750_v49  ;;  %v8529_v49 = vld [vmem:[%s11227_s3 + $0xc8] sm:$0xff]  }
 0x2d8   :  { %5408 = vmatprep.subr.bf16.mxu0 %v8442_v32  ;;  %5941 = vmatprep.subr.bf16.mxu1 %v8445_v33  ;;  %v8526_v32 = vld [vmem:[%s11227_s3] sm:$0xff]  }
 0x2d9   :  { %v8527_v33 = vld [vmem:[%s11227_s3 + $0x80] sm:$0xff]  }
 0x2db   :  { %5409 = vmatpush1.bf16.msra.mxu0 %v8440_v26  ;;  %5942 = vmatpush1.bf16.msra.mxu1 %v8443_v36  ;;  %v8528_v26 = vld [vmem:[%s11227_s3 + $0x48] sm:$0xff]  }
 0x2dc   :  { %5410 = vmatprep.subr.bf16.mxu0 %v8448_v37  ;;  %5943 = vmatprep.subr.bf16.mxu1 %v8451_v21  ;;  %v8530_v36 = vld [vmem:[%s11227_s3 + $0x8] sm:$0xff]   ;;  %v8532_v21 = vld [vmem:[%s11227_s3 + $0x50] sm:$0xff]  }
 0x2dd   :  { %v8531_v37 = vld [vmem:[%s11227_s3 + $0x88] sm:$0xff]  }
 0x2df   :  { %5411 = vmatpush1.bf16.msra.mxu0 %v8446_v39  ;;  %5944 = vmatpush1.bf16.msra.mxu1 %v8449_v40  ;;  %v8533_v39 = vld [vmem:[%s11227_s3 + $0xd0] sm:$0xff]  }
 0x2e0   :  { %5412 = vmatprep.subr.bf16.mxu0 %v8454_v41  ;;  %5945 = vmatprep.subr.bf16.mxu1 %v8457_v34  ;;  %v8534_v40 = vld [vmem:[%s11227_s3 + $0x10] sm:$0xff]   ;;  %v8536_v34 = vld [vmem:[%s11227_s3 + $0x58] sm:$0xff]  }
 0x2e1   :  { %v8535_v41 = vld [vmem:[%s11227_s3 + $0x90] sm:$0xff]  }
 0x2e3   :  { %5413 = vmatpush1.bf16.msra.mxu0 %v8452_v43  ;;  %5946 = vmatpush1.bf16.msra.mxu1 %v8455_v45  ;;  %v8537_v43 = vld [vmem:[%s11227_s3 + $0xd8] sm:$0xff]  }
 0x2e4   :  { %5414 = vmatprep.subr.bf16.mxu0 %v8460_v46  ;;  %5947 = vmatprep.subr.bf16.mxu1 %v8463_v35  ;;  %v8538_v45 = vld [vmem:[%s11227_s3 + $0x18] sm:$0xff]   ;;  %v8540_v35 = vld [vmem:[%s11227_s3 + $0x60] sm:$0xff]  }
 0x2e5   :  { %v8539_v46 = vld [vmem:[%s11227_s3 + $0x98] sm:$0xff]  }
 0x2e7   :  { %5415 = vmatpush1.bf16.msra.mxu0 %v8458_v50  ;;  %5948 = vmatpush1.bf16.msra.mxu1 %v8461_v53  ;;  %v8541_v50 = vld [vmem:[%s11227_s3 + $0xe0] sm:$0xff]  }
 0x2e8   :  { %5416 = vmatprep.subr.bf16.mxu0 %v8466_v38  ;;  %5949 = vmatprep.subr.bf16.mxu1 %v8469_v54  ;;  %v8542_v53 = vld [vmem:[%s11227_s3 + $0x20] sm:$0xff]   ;;  %v8544_v54 = vld [vmem:[%s11227_s3 + $0x68] sm:$0xff]  }
 0x2e9   :  { %v8543_v38 = vld [vmem:[%s11227_s3 + $0xa0] sm:$0xff]  }
 0x2eb   :  { %5417 = vmatpush1.bf16.msra.mxu0 %v8464_v55  ;;  %5950 = vmatpush1.bf16.msra.mxu1 %v8467_v56  ;;  %v8545_v55 = vld [vmem:[%s11227_s3 + $0xe8] sm:$0xff]  }
 0x2ec   :  { %5418 = vmatprep.subr.bf16.mxu0 %v8472_v47  ;;  %5951 = vmatprep.subr.bf16.mxu1 %v8475_v57  ;;  %v8546_v56 = vld [vmem:[%s11227_s3 + $0x28] sm:$0xff]   ;;  %v8548_v57 = vld [vmem:[%s11227_s3 + $0x70] sm:$0xff]  }
 0x2ed   :  { %v8547_v47 = vld [vmem:[%s11227_s3 + $0xa8] sm:$0xff]  }
 0x2ef   :  { %5419 = vmatpush1.bf16.msra.mxu0 %v8470_v58  ;;  %5952 = vmatpush1.bf16.msra.mxu1 %v8473_v59  ;;  %v8549_v58 = vld [vmem:[%s11227_s3 + $0xf0] sm:$0xff]  }
 0x2f0   :  { %5420 = vmatprep.subr.bf16.mxu0 %v8478_v48  ;;  %5953 = vmatprep.subr.bf16.mxu1 %v8481_v61  ;;  %v8550_v59 = vld [vmem:[%s11227_s3 + $0x30] sm:$0xff]   ;;  %v8552_v61 = vld [vmem:[%s11227_s3 + $0x78] sm:$0xff]  }
 0x2f1   :  { %v8551_v48 = vld [vmem:[%s11227_s3 + $0xb0] sm:$0xff]  }
 0x2f3   :  { %5421 = vmatpush1.bf16.msra.mxu0 %v8476_v63  ;;  %5954 = vmatpush1.bf16.msra.mxu1 %v8479_v44  ;;  %v8553_v63 = vld [vmem:[%s11227_s3 + $0xf8] sm:$0xff]  }
 0x2f4   :  { %5422 = vmatprep.subr.bf16.mxu0 %v8484_v1  ;;  %5955 = vmatprep.subr.bf16.mxu1 %v8487_v51  ;;  %v8554_v44 = vld [vmem:[%s11227_s3 + $0x38] sm:$0xff]   ;;  %v814_v51 = vsub.s32 0, %v8732_v42 }
 0x2f5   :  { %v8555_v1 = vld [vmem:[%s11227_s3 + $0xb8] sm:$0xff]  }
 0x2f7   :  { %5423 = vmatpush1.bf16.msra.mxu0 %v8482_v2  ;;  %5956 = vmatpush1.bf16.msra.mxu1 %v8485_v3  ;;  %v822_v2 = vsub.s32 2, %v8732_v42  ;;  %v810_v3 = vld [vmem:[%s11226_s2] sm:$0xf] }
 0x2f8   :  { %5424 = vmatprep.subr.bf16.mxu0 %v8490_v4  ;;  %5957 = vmatprep.subr.bf16.mxu1 %v8493_v60  ;;  %v818_v4 = vsub.s32 1, %v8732_v42  ;;  %v826_v60 = vsub.s32 3, %v8732_v42 }
 0x2fb   :  { %5425 = vmatpush1.bf16.msra.mxu0 %v8488_v5  ;;  %5958 = vmatpush1.bf16.msra.mxu1 %v8491_v6  ;;  %v815_v5 = vrot.slane %v810_v3, %v814_v51  ;;  %v823_v6 = vrot.slane %v810_v3, %v822_v2 }
 0x2fc   :  { %5426 = vmatprep.subr.bf16.mxu0 %v8496_v7  ;;  %5959 = vmatprep.subr.bf16.mxu1 %v8499_v62  ;;  %v819_v7 = vrot.slane %v810_v3, %v818_v4  ;;  %v827_v62 = vrot.slane %v810_v3, %v826_v60 }
 0x2ff   :  { %5427 = vmatpush1.bf16.msra.mxu0 %v8494_v10  ;;  %5960 = vmatpush1.bf16.msra.mxu1 %v8497_v11 }
 0x300   :  { %5437 = vmatprep.subr.bf16.mxu0 %v8502_v12  ;;  %5970 = vmatprep.subr.bf16.mxu1 %v8505_v0 }
 0x302   :  { %5429 = vmatmul.mubr.bf16.vlgmr.msra.gmra.mrb[0].mxu0 %v980_v52  ;;  %5962 = vmatmul.mubr.bf16.vlgmr.msra.gmra.mrb[0].mxu1 %v980_v52 }
 0x303   :  { %5438 = vmatpush1.bf16.msra.mxu0 %v8500_v15  ;;  %5971 = vmatpush1.bf16.msra.mxu1 %v8503_v16 }
 0x304   :  { %5439 = vmatprep.subr.bf16.mxu0 %v8508_v8  ;;  %5972 = vmatprep.subr.bf16.mxu1 %v8511_v9 }
 0x305   :  { %5469 = vmatprep.mubr.bf16.mxu0 %v8583_v22  ;;  %6002 = vmatprep.mubr.bf16.mxu1 %v8583_v22 }
 0x307   :  { %5440 = vmatpush1.bf16.msra.mxu0 %v8506_v17  ;;  %5973 = vmatpush1.bf16.msra.mxu1 %v8509_v18 }
 0x308   :  { %5441 = vmatprep.subr.bf16.mxu0 %v8514_v19  ;;  %5974 = vmatprep.subr.bf16.mxu1 %v8517_v20 }
 0x30b   :  { %5442 = vmatpush1.bf16.msra.mxu0 %v8512_v23  ;;  %5975 = vmatpush1.bf16.msra.mxu1 %v8515_v24 }
 0x30c   :  { %5443 = vmatprep.subr.bf16.mxu0 %v8520_v13  ;;  %5976 = vmatprep.subr.bf16.mxu1 %v8523_v27 }
 0x30f   :  { %5444 = vmatpush1.bf16.msra.mxu0 %v8518_v28  ;;  %5977 = vmatpush1.bf16.msra.mxu1 %v8521_v29 }
 0x310   :  { %7198 = vmatprep.subr.bf16.mxu0 %v8524_v30  ;;  %7220 = vmatprep.subr.bf16.mxu1 %v8525_v31  ;;  %v7165_v30 = vld [vmem:[%s11228_s4] ss:$0 sm:$0xff] }
 0x312   :  { %7163 = vmatmul.mubr.msk.bf16.vlgmr.msra.gmra.mrb[0].mxu0 %vm4941_vm0, %v996_v25  ;;  %7164 = vmatmul.mubr.msk.bf16.vlgmr.msra.gmra.mrb[0].mxu1 %vm4941_vm0, %v996_v25 }
 0x313   :  { %7199 = vmatpush3.bf16.msra.mxu0 %v8526_v32  ;;  %7221 = vmatpush3.bf16.msra.mxu1 %v8527_v33 }
 0x314   :  { %7200 = vmatprep.subr.bf16.mxu0 %v8528_v26  ;;  %7222 = vmatprep.subr.bf16.mxu1 %v8529_v49 }
 0x317   :  { %7201 = vmatpush3.bf16.msra.mxu0 %v8530_v36  ;;  %7223 = vmatpush3.bf16.msra.mxu1 %v8531_v37 }
 0x318   :  { %7202 = vmatprep.subr.bf16.mxu0 %v8532_v21  ;;  %7224 = vmatprep.subr.bf16.mxu1 %v8533_v39 }
 0x31b   :  { %7203 = vmatpush3.bf16.msra.mxu0 %v8534_v40  ;;  %7225 = vmatpush3.bf16.msra.mxu1 %v8535_v41 }
 0x31c   :  { %7204 = vmatprep.subr.bf16.mxu0 %v8536_v34  ;;  %7226 = vmatprep.subr.bf16.mxu1 %v8537_v43 }
 0x31f   :  { %7205 = vmatpush3.bf16.msra.mxu0 %v8538_v45  ;;  %7227 = vmatpush3.bf16.msra.mxu1 %v8539_v46 }
 0x320   :  { %7206 = vmatprep.subr.bf16.mxu0 %v8540_v35  ;;  %7228 = vmatprep.subr.bf16.mxu1 %v8541_v50 }
 0x323   :  { %7207 = vmatpush3.bf16.msra.mxu0 %v8542_v53  ;;  %7229 = vmatpush3.bf16.msra.mxu1 %v8543_v38 }
 0x324   :  { %7208 = vmatprep.subr.bf16.mxu0 %v8544_v54  ;;  %7230 = vmatprep.subr.bf16.mxu1 %v8545_v55 }
 0x327   :  { %7209 = vmatpush3.bf16.msra.mxu0 %v8546_v56  ;;  %7231 = vmatpush3.bf16.msra.mxu1 %v8547_v47 }
 0x328   :  { %7210 = vmatprep.subr.bf16.mxu0 %v8548_v57  ;;  %7232 = vmatprep.subr.bf16.mxu1 %v8549_v58 }
 0x32b   :  { %7211 = vmatpush3.bf16.msra.mxu0 %v8550_v59  ;;  %7233 = vmatpush3.bf16.msra.mxu1 %v8551_v48 }
 0x32c   :  { %7212 = vmatprep.subr.bf16.mxu0 %v8552_v61  ;;  %7234 = vmatprep.subr.bf16.mxu1 %v8553_v63 }
 0x32f   :  { %7213 = vmatpush3.bf16.msra.mxu0 %v8554_v44  ;;  %7235 = vmatpush3.bf16.msra.mxu1 %v8555_v1 }
 0x3e5   :  { %v5471_v10 = vpop.f32.mrb[0].mxu0  ;;  %v6004_v11 = vpop.f32.mrb[0].mxu1 }
 0x3e6   :  { %v7242_v12 = vadd.f32 %v5471_v10, %v815_v5  ;;  %v7244_v0 = vadd.f32 %v6004_v11, %v823_v6  ;;  %v5473_v52 = vpop.f32.mrb[1].mxu0  ;;  %v6006_v15 = vpop.f32.mrb[1].mxu1 }
 0x3e7   :  { %v7243_v16 = vadd.f32 %v5473_v52, %v819_v7  ;;  %v7245_v8 = vadd.f32 %v6006_v15, %v827_v62  ;;  %v5475_v9 = vpop.f32.mrb[2].mxu0  ;;  %v6008_v17 = vpop.f32.mrb[2].mxu1 }
 0x3e8   :  { %v6011_v18 = vmax.f32 %v7242_v12, 0.0  ;;  %v6013_v19 = vmax.f32 %v7244_v0, 0.0  ;;  %v5476_v20 = vpop.f32.mrb[3].mxu0  ;;  %v6009_v22 = vpop.f32.mrb[3].mxu1 }
 0x3e9   :  { %v6012_v23 = vmax.f32 %v7243_v16, 0.0  ;;  %v6014_v42 = vmax.f32 %v7245_v8, 0.0 }
 0x3ea   :  { %v6015_v27 = vpack.c.bf16 %v6011_v18, %v6011_v18  ;;  %v6017_v28 = vpack.c.bf16 %v6013_v19, %v6013_v19 }
 0x3eb   :  { %v6016_v24 = vpack.c.bf16 %v6012_v23, %v6012_v23  ;;  %v6018_v13 = vpack.c.bf16 %v6014_v42, %v6014_v42 }
 0x3ed   :  { %6314 = vmatprep.mubr.bf16.mxu0 %v6016_v24  ;;  %6354 = vmatprep.mubr.bf16.mxu1 %v6018_v13 }
 0x3ee   :  { %6315 = vmatmul.mubr.bf16.vlgmr.msra.gmra.mrb[4].mxu0 %v6015_v27  ;;  %6355 = vmatmul.mubr.bf16.vlgmr.msra.gmra.mrb[4].mxu1 %v6017_v28 }
 0x4c1   :  { %v7214_v29 = vpop.f32.mrb[4].mxu0  ;;  %v7236_v14 = vpop.f32.mrb[4].mxu1 }
 0x4c2   :  { %v7215_v31 = vpop.f32.mrb[5].mxu0  ;;  %v7237_v25 = vpop.f32.mrb[5].mxu1 }
 0x4c3   :  { %v7216_v32 = vadd.f32 %v7215_v31, %v7214_v29  ;;  %v7238_v33 = vadd.f32 %v7237_v25, %v7236_v14  ;;  %v7217_v26 = vpop.f32.mrb[6].mxu0  ;;  %v7239_v49 = vpop.f32.mrb[6].mxu1 }
 0x4c4   :  { %v7218_v36 = vpop.f32.mrb[7].mxu0  ;;  %v7240_v37 = vpop.f32.mrb[7].mxu1 }
 0x4c5   :  { %v6317_v21 = vadd.f32 %v7216_v32, %v7165_v30 }
 0x4c7   :  { %v6357_v39 = vadd.f32 %v7238_v33, %v6317_v21 }
 0x4c9   :  { %6363 = vst.msk [vmem:[#allocation2] sm:$0x3] %vm6362_vm1, %v6357_v39 }
 0x4ca   :  { %8569 = shalt.err (!%p8566_p4)
}
 0x4cb   :  { %s8570_s10 = scalar_lea.hbm %s11229_s5, 32 }
 0x4cc   :  { %p8571_p5 = scmp.ne.s32.totalorder %s11229_s5, %s8570_s10  ;;  %p8574_p6 = scmp.lt.u32.totalorder %s8570_s10, %s11229_s5 }
 0x4ce   :  { %p8576_p7 = pnand %p8574_p6, %p8571_p5 }
 0x4d0   :  { %8579 = shalt.err (!%p8576_p7)
}
 0x4d1   :  { %6373 = dma.vmem_to_hbm [thread:$0]  %s6371_s7, 32, %s11229_s5, [#allocation3]  }
 0x4d2   :  { %8580 = dma.done.wait [#allocation3], 32  }
 0x4d3   :  { %8581 = vsyncadd [#allocation3], 4294967264 }
 0x4d4   :  { %6377 = vsyncpa [#allocation3], 1 }

</bundles_post_ra>
